<compile_context>
chip_gen: v7x
topology: tpu7x:2x2x1
jax: 0.10.0
libtpu: 0.0.40
codegen_flags: <defaults>
</compile_context>

<pallas_src>
import functools

import jax
import jax.numpy as jnp
import numpy as np
from jax import lax
from jax.experimental import pallas as pl
from jax.experimental.pallas import tpu as pltpu

LN_EPS = 1e-5  # torch.nn.LayerNorm default


# ----------------------------- Kernel 1: LN + fused projections/gates + stats ---------------
def _ln_proj_kernel(z_ref, *refs, c, has_mask):
    if has_mask:
        m_ref, refs = refs[0], refs[1:]
    (lnw_ref, lnb_ref, w_ref, b_ref,
     at_ref, bt_ref, g_ref, stats_ref) = refs

    z = z_ref[...].astype(jnp.float32)                           # (tm, c)
    mu = jnp.mean(z, axis=-1, keepdims=True)
    var = jnp.mean((z - mu) ** 2, axis=-1, keepdims=True)
    zn = (z - mu) * lax.rsqrt(var + LN_EPS)
    zn = zn * lnw_ref[...] + lnb_ref[...]

    # one MXU matmul for all five heads (fused (c, 5c) projection)
    h = jnp.dot(zn, w_ref[...], preferred_element_type=jnp.float32) + b_ref[...]   # (tm, 5c)
    pa = h[:, 0 * c:1 * c]
    ga = h[:, 1 * c:2 * c]
    pb = h[:, 2 * c:3 * c]
    gb = h[:, 3 * c:4 * c]
    gg = h[:, 4 * c:5 * c]

    a = pa * jax.nn.sigmoid(ga)                                   # (tm, c) f32
    b = pb * jax.nn.sigmoid(gb)
    g_ref[...] = jax.nn.sigmoid(gg).astype(g_ref.dtype)

    at = a.T                                                      # (c, tm) f32 (2D transpose)
    bt = b.T

    if has_mask:
        m_row = m_ref[...].astype(jnp.float32)                    # (1, tm), lane-dense load
        m2_row = m_row * m_row
        # masked partial sums via (1,tm)x(tm,c) dots -> no mask transpose needed
        sa = jnp.dot(m_row, a, preferred_element_type=jnp.float32)
        saa = jnp.dot(m2_row, a * a, preferred_element_type=jnp.float32)
        sb = jnp.dot(m_row, b, preferred_element_type=jnp.float32)
        sbb = jnp.dot(m2_row, b * b, preferred_element_type=jnp.float32)
        at = at * m_row                                           # lane-aligned broadcast
        bt = bt * m_row
    else:
        sa = jnp.sum(a, axis=0, keepdims=True)                    # (1, c)
        saa = jnp.sum(a * a, axis=0, keepdims=True)
        sb = jnp.sum(b, axis=0, keepdims=True)
        sbb = jnp.sum(b * b, axis=0, keepdims=True)

    at_ref[...] = at.astype(at_ref.dtype)
    bt_ref[...] = bt.astype(bt_ref.dtype)
    stats_ref[0:1, :] = sa
    stats_ref[1:2, :] = saa
    stats_ref[2:3, :] = sb
    stats_ref[3:4, :] = sbb


# ----------------------------- Kernel 2: tiled triangle contraction over k ------------------
def _triangle_kernel(a_ref, b_ref, x_ref, acc_ref):
    # a_ref: (c, tk, ti) = a[ch, k, i];  b_ref: (c, tk, tj) = b[ch, k, j]
    @pl.when(pl.program_id(3) == 0)
    def _():
        acc_ref[...] = jnp.zeros_like(acc_ref)

    a_t = a_ref[...]
    # batched minor-dims transpose (k,i)->(i,k); f32 round-trip keeps the relayout on the
    # 32-bit path, result is cast back so the MXU still sees bf16 operands in bf16 mode.
    a_sw = jnp.swapaxes(a_t.astype(jnp.float32), 1, 2).astype(a_t.dtype)   # (c, ti, tk)
    acc_ref[...] += jnp.einsum('cik,ckj->cij', a_sw, b_ref[...],
                               preferred_element_type=jnp.float32)

    @pl.when(pl.program_id(3) == pl.num_programs(3) - 1)
    def _():
        x_ref[...] = acc_ref[...].astype(x_ref.dtype)


# ----------------------------- Kernel 3: scale + out-LayerNorm + proj_o + gate --------------
def _out_kernel(scale_ref, xt_ref, g_ref, lnw_ref, lnb_ref, wo_ref, bo_ref, o_ref):
    x = xt_ref[...].astype(jnp.float32).T * scale_ref[0]          # (tm, c)
    mu = jnp.mean(x, axis=-1, keepdims=True)
    var = jnp.mean((x - mu) ** 2, axis=-1, keepdims=True)
    xn = (x - mu) * lax.rsqrt(var + LN_EPS)
    xn = xn * lnw_ref[...] + lnb_ref[...]
    y = jnp.dot(xn, wo_ref[...], preferred_element_type=jnp.float32) + bo_ref[...]
    o_ref[...] = (g_ref[...].astype(jnp.float32) * y).astype(o_ref.dtype)


# ----------------------------- Wrapper -----------------------------
def _fit_tile(full, want, align):
    """Largest divisor of `full` that is <= want and a multiple of `align` (or `full` itself)."""
    t = min(want, full)
    while t > align:
        if full % t == 0 and t % align == 0:
            return t
        t -= align
    if full % align == 0 and align <= full:
        return align if full % align == 0 and (full // align) >= 1 and full % align == 0 else full
    return full


def triangle_multiplication_incoming(z, params, pair_mask=None, *,
                                     work_dtype=jnp.float32,
                                     row_tile=512, spatial_tile=128, k_tile=128):
    B, N1, N2, c = z.shape
    assert N1 == N2, "triangle update expects a square pair representation"
    N = N1
    R = B * N * N

    tm = _fit_tile(R, row_tile, 128)           # row tile for K1 / K3 (lane dim of a^T/b^T)
    ti = _fit_tile(N, spatial_tile, 128)       # i / j tiles for K2
    tj = ti
    tk = _fit_tile(N, k_tile, 8)               # k (contraction) tile for K2
    assert R % tm == 0
    assert N % ti == 0 and N % tk == 0
    assert tk % 8 == 0 or tk == N

    has_mask = pair_mask is not None
    wsz = np.dtype(work_dtype).itemsize
    zsz = np.dtype(z.dtype).itemsize

    # fused projection weights: (c, 5c) / (1, 5c)
    w_cat = jnp.concatenate([params['w_proj_a'], params['w_gate_a'],
                             params['w_proj_b'], params['w_gate_b'],
                             params['w_gate']], axis=1)
    b_cat = jnp.concatenate([params['b_proj_a'], params['b_gate_a'],
                             params['b_proj_b'], params['b_gate_b'],
                             params['b_gate']])[None, :]

    z_flat = z.reshape(R, c)
    n_row_tiles = R // tm

    # --- stage 1: LN + fused projections, gating, masking, std partial sums ---
    k1_in_specs = [pl.BlockSpec((tm, c), lambda r: (r, 0))]
    k1_args = [z_flat]
    if has_mask:
        k1_in_specs.append(pl.BlockSpec((1, tm), lambda r: (0, r)))   # lane-dense mask tile
        k1_args.append(pair_mask.reshape(1, R).astype(jnp.float32))
    k1_in_specs += [pl.BlockSpec((1, c), lambda r: (0, 0)),
                    pl.BlockSpec((1, c), lambda r: (0, 0)),
                    pl.BlockSpec((c, 5 * c), lambda r: (0, 0)),
                    pl.BlockSpec((1, 5 * c), lambda r: (0, 0))]
    k1_args += [params['ln_w'][None, :], params['ln_b'][None, :], w_cat, b_cat]

    k1_cost = pl.CostEstimate(
        flops=2 * R * c * 5 * c + 16 * R * c,
        transcendentals=3 * R * c,
        bytes_accessed=R * c * zsz + 3 * R * c * wsz + 4 * n_row_tiles * c * 4)

    at_flat, bt_flat, g_flat, stats = pl.pallas_call(
        functools.partial(_ln_proj_kernel, c=c, has_mask=has_mask),
        out_shape=[jax.ShapeDtypeStruct((c, R), work_dtype),          # a^T  (channel-first)
                   jax.ShapeDtypeStruct((c, R), work_dtype),          # b^T  (channel-first)
                   jax.ShapeDtypeStruct((R, c), work_dtype),          # sigmoid(gate)
                   jax.ShapeDtypeStruct((n_row_tiles, 4, c), jnp.float32)],
        grid=(n_row_tiles,),
        in_specs=k1_in_specs,
        out_specs=[pl.BlockSpec((c, tm), lambda r: (0, r)),
                   pl.BlockSpec((c, tm), lambda r: (0, r)),
                   pl.BlockSpec((tm, c), lambda r: (r, 0)),
                   pl.BlockSpec((None, 4, c), lambda r: (r, 0, 0))],
        compiler_params=pltpu.CompilerParams(dimension_semantics=("parallel",)),
        cost_estimate=k1_cost,
    )(*k1_args)

    # --- global std (ddof=1) from the tiny per-tile partial sums; fold into one scalar ---
    n_el = R * c
    tot = stats.sum(axis=(0, 2))                                    # (4,)
    s1a, s2a, s1b, s2b = tot[0], tot[1], tot[2], tot[3]
    var_a = jnp.maximum(s2a - s1a * s1a / n_el, 0.0) / (n_el - 1)
    var_b = jnp.maximum(s2b - s1b * s1b / n_el, 0.0) / (n_el - 1)
    a_std = jnp.sqrt(var_a)
    b_std = jnp.sqrt(var_b)
    scale = jnp.where((a_std != 0.0) & (b_std != 0.0),
                      1.0 / (a_std * b_std), 1.0).astype(jnp.float32).reshape(1)

    # --- stage 2: tiled x[c, b, i, j] = sum_k a[c, b, k, i] * b[c, b, k, j] ---
    # free reshapes: (c, R) -> (c, B*N, N); no squeezed block dims needed.
    aT = at_flat.reshape(c, B * N, N)      # [ch, (b, k), i]
    bT = bt_flat.reshape(c, B * N, N)      # [ch, (b, k), j]
    n_i, n_j, n_k = N // ti, N // tj, N // tk

    acc_bytes = c * ti * tj * 4
    blk_bytes = (2 * wsz * (c * tk * ti + c * tk * tj)      # double-buffered inputs
                 + 2 * wsz * c * ti * tj                    # double-buffered output
                 + acc_bytes)
    vmem_lim = int(min(max(32 * 1024 * 1024, blk_bytes * 1.25), 120 * 1024 * 1024))

    k2_cost = pl.CostEstimate(
        flops=2 * B * c * N ** 3,
        transcendentals=0,
        bytes_accessed=wsz * c * B * N * N * (n_j + n_i + 1))

    xT = pl.pallas_call(
        _triangle_kernel,
        out_shape=jax.ShapeDtypeStruct((c, B * N, N), work_dtype),   # [ch, (b, i), j]
        grid=(B, n_i, n_j, n_k),
        in_specs=[pl.BlockSpec((c, tk, ti), lambda b, i, j, k: (0, b * (N // tk) + k, i)),
                  pl.BlockSpec((c, tk, tj), lambda b, i, j, k: (0, b * (N // tk) + k, j))],
        out_specs=pl.BlockSpec((c, ti, tj), lambda b, i, j, k: (0, b * (N // ti) + i, j)),
        scratch_shapes=[pltpu.VMEM((c, ti, tj), jnp.float32)],
        compiler_params=pltpu.CompilerParams(
            dimension_semantics=("parallel", "parallel", "parallel", "arbitrary"),
            vmem_limit_bytes=vmem_lim),
        cost_estimate=k2_cost,
    )(aT, bT)

    # --- stage 3: scale, layer_norm_out, proj_o, gate (consumes channel-first x) ---
    xt_flat = xT.reshape(c, R)
    k3_cost = pl.CostEstimate(
        flops=2 * R * c * c + 12 * R * c,
        transcendentals=0,
        bytes_accessed=2 * R * c * wsz + R * c * zsz)

    out_flat = pl.pallas_call(
        _out_kernel,
        out_shape=jax.ShapeDtypeStruct((R, c), z.dtype),
        grid=(n_row_tiles,),
        in_specs=[pl.BlockSpec(memory_space=pltpu.MemorySpace.SMEM),
                  pl.BlockSpec((c, tm), lambda r: (0, r)),
                  pl.BlockSpec((tm, c), lambda r: (r, 0)),
                  pl.BlockSpec((1, c), lambda r: (0, 0)),
                  pl.BlockSpec((1, c), lambda r: (0, 0)),
                  pl.BlockSpec((c, c), lambda r: (0, 0)),
                  pl.BlockSpec((1, c), lambda r: (0, 0))],
        out_specs=pl.BlockSpec((tm, c), lambda r: (r, 0)),
        compiler_params=pltpu.CompilerParams(dimension_semantics=("parallel",)),
        cost_estimate=k3_cost,
    )(scale, xt_flat, g_flat,
      params['ln_out_w'][None, :], params['ln_out_b'][None, :],
      params['w_proj_o'], params['b_proj_o'][None, :])

    return out_flat.reshape(B, N, N, c)


# ----------------------------- Pure-JAX reference (for correctness check) -------------------
def reference(z, params, pair_mask=None):
    if pair_mask is None:
        pair_mask = jnp.ones(z.shape[:-1], z.dtype)
    pm = pair_mask[..., None]

    def ln(x, w, b):
        mu = jnp.mean(x, -1, keepdims=True)
        var = jnp.mean((x - mu) ** 2, -1, keepdims=True)
        return (x - mu) / jnp.sqrt(var + LN_EPS) * w + b

    def lin(x, w, b):
        return jnp.dot(x, w, precision=lax.Precision.HIGHEST) + b

    zn = ln(z, params['ln_w'], params['ln_b'])
    a = lin(zn, params['w_proj_a'], params['b_proj_a']) * \
        jax.nn.sigmoid(lin(zn, params['w_gate_a'], params['b_gate_a'])) * pm
    b_ = lin(zn, params['w_proj_b'], params['b_proj_b']) * \
        jax.nn.sigmoid(lin(zn, params['w_gate_b'], params['b_gate_b'])) * pm
    a_std = jnp.std(a, ddof=1)
    b_std = jnp.std(b_, ddof=1)
    cond = (a_std != 0.0) & (b_std != 0.0)
    a = jnp.where(cond, a / a_std, a)
    b_ = jnp.where(cond, b_ / b_std, b_)
    gate = jax.nn.sigmoid(lin(zn, params['w_gate'], params['b_gate']))
    x = jnp.einsum('bkic,bkjc->bijc', a, b_, precision=lax.Precision.HIGHEST)
    o = gate * lin(ln(x, params['ln_out_w'], params['ln_out_b']),
                   params['w_proj_o'], params['b_proj_o'])
    return o


# ----------------------------- Deterministic parameter init -----------------------------
def init_params(key, c):
    names = ['proj_a', 'gate_a', 'proj_b', 'gate_b', 'gate', 'proj_o']
    keys = jax.random.split(key, 2 * len(names))
    p = {}
    for i, name in enumerate(names):
        p[f'w_{name}'] = jax.random.normal(keys[2 * i], (c, c), jnp.float32) / jnp.sqrt(c)
        p[f'b_{name}'] = jax.random.normal(keys[2 * i + 1], (c,), jnp.float32) * 0.1
    p['ln_w'] = jnp.ones((c,), jnp.float32)
    p['ln_b'] = jnp.zeros((c,), jnp.float32)
    p['ln_out_w'] = jnp.ones((c,), jnp.float32)
    p['ln_out_b'] = jnp.zeros((c,), jnp.float32)
    return p


if __name__ == "__main__":
    key = jax.random.PRNGKey(0)
    kz, kp, km = jax.random.split(key, 3)
    B, N, c = 2, 16, 32
    z = jax.random.normal(kz, (B, N, N, c), jnp.float32)
    params = init_params(kp, c)

    run_f32 = jax.jit(functools.partial(triangle_multiplication_incoming,
                                        work_dtype=jnp.float32))
    run_bf16 = jax.jit(functools.partial(triangle_multiplication_incoming,
                                         work_dtype=jnp.bfloat16))

    # f32 intermediates, no mask
    out = jax.block_until_ready(run_f32(z, params))
    ref = reference(z, params)
    np.testing.assert_allclose(np.asarray(out), np.asarray(ref), rtol=2e-2, atol=2e-2)

    # f32 intermediates, with a pair mask
    mask = (jax.random.uniform(km, (B, N, N)) > 0.3).astype(jnp.float32)
    out_m = jax.block_until_ready(run_f32(z, params, mask))
    ref_m = reference(z, params, mask)
    np.testing.assert_allclose(np.asarray(out_m), np.asarray(ref_m), rtol=2e-2, atol=2e-2)

    # bf16 intermediates (halved inter-stage HBM traffic, bf16 MXU operands)
    out_h = jax.block_until_ready(run_bf16(z, params))
    np.testing.assert_allclose(np.asarray(out_h), np.asarray(ref), rtol=1e-1, atol=1e-1)

    print("KERNEL_OK")
</pallas_src>

<mosaic_0001>
module attributes {stable_mosaic.version = 11 : i64} {
  func.func @_ln_proj_kernel(%arg0: i32, %arg1: memref<512x32xf32, #tpu.memory_space<vmem>>, %arg2: memref<1x32xf32, #tpu.memory_space<vmem>>, %arg3: memref<1x32xf32, #tpu.memory_space<vmem>>, %arg4: memref<32x160xf32, #tpu.memory_space<vmem>>, %arg5: memref<1x160xf32, #tpu.memory_space<vmem>>, %arg6: memref<32x512xf32, #tpu.memory_space<vmem>>, %arg7: memref<32x512xf32, #tpu.memory_space<vmem>>, %arg8: memref<512x32xf32, #tpu.memory_space<vmem>>, %arg9: memref<1x4x32xf32, #tpu.memory_space<vmem>>) attributes {dimension_semantics = [#tpu.dimension_semantics<parallel>], iteration_bounds = array<i64: 1>, scalar_prefetch = 0 : i64, scratch_operands = 0 : i64, tpu.core_type = #tpu.core_type<tc>, window_params = [{transform_indices = @transform_0, window_bounds = array<i64: 512, 32>}, {pipeline_mode = #tpu.pipeline_mode<synchronous>, transform_indices = @transform_1, window_bounds = array<i64: 1, 32>}, {pipeline_mode = #tpu.pipeline_mode<synchronous>, transform_indices = @transform_2, window_bounds = array<i64: 1, 32>}, {pipeline_mode = #tpu.pipeline_mode<synchronous>, transform_indices = @transform_3, window_bounds = array<i64: 32, 160>}, {pipeline_mode = #tpu.pipeline_mode<synchronous>, transform_indices = @transform_4, window_bounds = array<i64: 1, 160>}, {transform_indices = @transform_5, window_bounds = array<i64: 32, 512>}, {transform_indices = @transform_6, window_bounds = array<i64: 32, 512>}, {transform_indices = @transform_7, window_bounds = array<i64: 512, 32>}, {transform_indices = @transform_8, window_bounds = array<i64: 1, 4, 32>}]} {
    %c0 = arith.constant 0 : index
    %c0_0 = arith.constant 0 : index
    %0 = vector.load %arg1[%c0, %c0_0] : memref<512x32xf32, #tpu.memory_space<vmem>>, vector<512x32xf32>
    %cst = arith.constant dense<0.000000e+00> : vector<512xf32>
    %1 = vector.multi_reduction <add>, %0, %cst [1] : vector<512x32xf32> to vector<512xf32>
    %2 = vector.shape_cast %1 : vector<512xf32> to vector<512x1xf32>
    %cst_1 = arith.constant 3.200000e+01 : f32
    %3 = vector.broadcast %cst_1 : f32 to vector<512x1xf32>
    %4 = arith.divf %2, %3 : vector<512x1xf32>
    %5 = vector.broadcast %4 : vector<512x1xf32> to vector<512x32xf32>
    %6 = arith.subf %0, %5 : vector<512x32xf32>
    %7 = arith.mulf %6, %6 : vector<512x32xf32>
    %cst_2 = arith.constant dense<0.000000e+00> : vector<512xf32>
    %8 = vector.multi_reduction <add>, %7, %cst_2 [1] : vector<512x32xf32> to vector<512xf32>
    %9 = vector.shape_cast %8 : vector<512xf32> to vector<512x1xf32>
    %cst_3 = arith.constant 3.200000e+01 : f32
    %10 = vector.broadcast %cst_3 : f32 to vector<512x1xf32>
    %11 = arith.divf %9, %10 : vector<512x1xf32>
    %12 = vector.broadcast %4 : vector<512x1xf32> to vector<512x32xf32>
    %13 = arith.subf %0, %12 : vector<512x32xf32>
    %cst_4 = arith.constant 9.99999974E-6 : f32
    %14 = vector.broadcast %cst_4 : f32 to vector<512x1xf32>
    %15 = arith.addf %11, %14 : vector<512x1xf32>
    %16 = math.rsqrt %15 : vector<512x1xf32>
    %17 = vector.broadcast %16 : vector<512x1xf32> to vector<512x32xf32>
    %18 = arith.mulf %13, %17 : vector<512x32xf32>
    %c0_5 = arith.constant 0 : index
    %c0_6 = arith.constant 0 : index
    %19 = vector.load %arg2[%c0_5, %c0_6] : memref<1x32xf32, #tpu.memory_space<vmem>>, vector<1x32xf32>
    %20 = vector.broadcast %19 : vector<1x32xf32> to vector<512x32xf32>
    %21 = arith.mulf %18, %20 : vector<512x32xf32>
    %c0_7 = arith.constant 0 : index
    %c0_8 = arith.constant 0 : index
    %22 = vector.load %arg3[%c0_7, %c0_8] : memref<1x32xf32, #tpu.memory_space<vmem>>, vector<1x32xf32>
    %23 = vector.broadcast %22 : vector<1x32xf32> to vector<512x32xf32>
    %24 = arith.addf %21, %23 : vector<512x32xf32>
    %c0_9 = arith.constant 0 : index
    %c0_10 = arith.constant 0 : index
    %25 = vector.load %arg4[%c0_9, %c0_10] : memref<32x160xf32, #tpu.memory_space<vmem>>, vector<32x160xf32>
    %cst_11 = arith.constant dense<0.000000e+00> : vector<512x160xf32>
    %26 = tpu.matmul %24, %25, %cst_11 {dimension_numbers = #tpu.dot_dimension_numbers<[1], [0], [0], [1], [0, 0, 1, 1], [], []>} : vector<512x32xf32>, vector<32x160xf32>, vector<512x160xf32> -> vector<512x160xf32>
    %c0_12 = arith.constant 0 : index
    %c0_13 = arith.constant 0 : index
    %27 = vector.load %arg5[%c0_12, %c0_13] : memref<1x160xf32, #tpu.memory_space<vmem>>, vector<1x160xf32>
    %28 = vector.broadcast %27 : vector<1x160xf32> to vector<512x160xf32>
    %29 = arith.addf %26, %28 : vector<512x160xf32>
    %30 = vector.extract_strided_slice %29 {offsets = [0, 0], sizes = [512, 32], strides = [1, 1]} : vector<512x160xf32> to vector<512x32xf32>
    %31 = vector.extract_strided_slice %29 {offsets = [0, 32], sizes = [512, 32], strides = [1, 1]} : vector<512x160xf32> to vector<512x32xf32>
    %32 = vector.extract_strided_slice %29 {offsets = [0, 64], sizes = [512, 32], strides = [1, 1]} : vector<512x160xf32> to vector<512x32xf32>
    %33 = vector.extract_strided_slice %29 {offsets = [0, 96], sizes = [512, 32], strides = [1, 1]} : vector<512x160xf32> to vector<512x32xf32>
    %34 = vector.extract_strided_slice %29 {offsets = [0, 128], sizes = [512, 32], strides = [1, 1]} : vector<512x160xf32> to vector<512x32xf32>
    %35 = arith.negf %31 : vector<512x32xf32>
    %36 = math.exp %35 : vector<512x32xf32>
    %cst_14 = arith.constant 1.000000e+00 : f32
    %37 = vector.broadcast %cst_14 : f32 to vector<512x32xf32>
    %38 = arith.addf %37, %36 : vector<512x32xf32>
    %39 = arith.divf %37, %38 : vector<512x32xf32>
    %40 = arith.mulf %30, %39 : vector<512x32xf32>
    %41 = arith.negf %33 : vector<512x32xf32>
    %42 = math.exp %41 : vector<512x32xf32>
    %cst_15 = arith.constant 1.000000e+00 : f32
    %43 = vector.broadcast %cst_15 : f32 to vector<512x32xf32>
    %44 = arith.addf %43, %42 : vector<512x32xf32>
    %45 = arith.divf %43, %44 : vector<512x32xf32>
    %46 = arith.mulf %32, %45 : vector<512x32xf32>
    %47 = arith.negf %34 : vector<512x32xf32>
    %48 = math.exp %47 : vector<512x32xf32>
    %cst_16 = arith.constant 1.000000e+00 : f32
    %49 = vector.broadcast %cst_16 : f32 to vector<512x32xf32>
    %50 = arith.addf %49, %48 : vector<512x32xf32>
    %51 = arith.divf %49, %50 : vector<512x32xf32>
    %c0_17 = arith.constant 0 : index
    %c0_18 = arith.constant 0 : index
    %52 = vector.load %arg8[%c0_17, %c0_18] : memref<512x32xf32, #tpu.memory_space<vmem>>, vector<512x32xf32>
    tpu.vector_store %arg8[%c0_17, %c0_18], %51 {strides = array<i32>} : memref<512x32xf32, #tpu.memory_space<vmem>>, vector<512x32xf32>,
    %53 = tpu.transpose %40, [1, 0] : vector<512x32xf32> -> vector<32x512xf32>
    %54 = tpu.transpose %46, [1, 0] : vector<512x32xf32> -> vector<32x512xf32>
    %cst_19 = arith.constant dense<0.000000e+00> : vector<32xf32>
    %55 = vector.multi_reduction <add>, %40, %cst_19 [0] : vector<512x32xf32> to vector<32xf32>
    %56 = vector.shape_cast %55 : vector<32xf32> to vector<1x32xf32>
    %57 = arith.mulf %40, %40 : vector<512x32xf32>
    %cst_20 = arith.constant dense<0.000000e+00> : vector<32xf32>
    %58 = vector.multi_reduction <add>, %57, %cst_20 [0] : vector<512x32xf32> to vector<32xf32>
    %59 = vector.shape_cast %58 : vector<32xf32> to vector<1x32xf32>
    %cst_21 = arith.constant dense<0.000000e+00> : vector<32xf32>
    %60 = vector.multi_reduction <add>, %46, %cst_21 [0] : vector<512x32xf32> to vector<32xf32>
    %61 = vector.shape_cast %60 : vector<32xf32> to vector<1x32xf32>
    %62 = arith.mulf %46, %46 : vector<512x32xf32>
    %cst_22 = arith.constant dense<0.000000e+00> : vector<32xf32>
    %63 = vector.multi_reduction <add>, %62, %cst_22 [0] : vector<512x32xf32> to vector<32xf32>
    %64 = vector.shape_cast %63 : vector<32xf32> to vector<1x32xf32>
    %c0_23 = arith.constant 0 : index
    %c0_24 = arith.constant 0 : index
    %65 = vector.load %arg6[%c0_23, %c0_24] : memref<32x512xf32, #tpu.memory_space<vmem>>, vector<32x512xf32>
    tpu.vector_store %arg6[%c0_23, %c0_24], %53 {strides = array<i32>} : memref<32x512xf32, #tpu.memory_space<vmem>>, vector<32x512xf32>,
    %c0_25 = arith.constant 0 : index
    %c0_26 = arith.constant 0 : index
    %66 = vector.load %arg7[%c0_25, %c0_26] : memref<32x512xf32, #tpu.memory_space<vmem>>, vector<32x512xf32>
    tpu.vector_store %arg7[%c0_25, %c0_26], %54 {strides = array<i32>} : memref<32x512xf32, #tpu.memory_space<vmem>>, vector<32x512xf32>,
    %c0_27 = arith.constant 0 : index
    %c0_28 = arith.constant 0 : index
    %c0_29 = arith.constant 0 : index
    %67 = vector.load %arg9[%c0_27, %c0_28, %c0_29] : memref<1x4x32xf32, #tpu.memory_space<vmem>>, vector<1x1x32xf32>
    %68 = vector.shape_cast %67 : vector<1x1x32xf32> to vector<1x32xf32>
    %69 = vector.shape_cast %56 : vector<1x32xf32> to vector<1x1x32xf32>
    tpu.vector_store %arg9[%c0_27, %c0_28, %c0_29], %69 {strides = array<i32>} : memref<1x4x32xf32, #tpu.memory_space<vmem>>, vector<1x1x32xf32>,
    %c0_30 = arith.constant 0 : index
    %c1 = arith.constant 1 : index
    %c0_31 = arith.constant 0 : index
    %70 = vector.load %arg9[%c0_30, %c1, %c0_31] : memref<1x4x32xf32, #tpu.memory_space<vmem>>, vector<1x1x32xf32>
    %71 = vector.shape_cast %70 : vector<1x1x32xf32> to vector<1x32xf32>
    %72 = vector.shape_cast %59 : vector<1x32xf32> to vector<1x1x32xf32>
    tpu.vector_store %arg9[%c0_30, %c1, %c0_31], %72 {strides = array<i32>} : memref<1x4x32xf32, #tpu.memory_space<vmem>>, vector<1x1x32xf32>,
    %c0_32 = arith.constant 0 : index
    %c2 = arith.constant 2 : index
    %c0_33 = arith.constant 0 : index
    %73 = vector.load %arg9[%c0_32, %c2, %c0_33] : memref<1x4x32xf32, #tpu.memory_space<vmem>>, vector<1x1x32xf32>
    %74 = vector.shape_cast %73 : vector<1x1x32xf32> to vector<1x32xf32>
    %75 = vector.shape_cast %61 : vector<1x32xf32> to vector<1x1x32xf32>
    tpu.vector_store %arg9[%c0_32, %c2, %c0_33], %75 {strides = array<i32>} : memref<1x4x32xf32, #tpu.memory_space<vmem>>, vector<1x1x32xf32>,
    %c0_34 = arith.constant 0 : index
    %c3 = arith.constant 3 : index
    %c0_35 = arith.constant 0 : index
    %76 = vector.load %arg9[%c0_34, %c3, %c0_35] : memref<1x4x32xf32, #tpu.memory_space<vmem>>, vector<1x1x32xf32>
    %77 = vector.shape_cast %76 : vector<1x1x32xf32> to vector<1x32xf32>
    %78 = vector.shape_cast %64 : vector<1x32xf32> to vector<1x1x32xf32>
    tpu.vector_store %arg9[%c0_34, %c3, %c0_35], %78 {strides = array<i32>} : memref<1x4x32xf32, #tpu.memory_space<vmem>>, vector<1x1x32xf32>,
    return
  }
  func.func @transform_0(%arg0: i32) -> (i32, i32) {
    %c0_i32 = arith.constant 0 : i32
    %c0_i32_0 = arith.constant 0 : i32
    return %arg0, %c0_i32 : i32, i32
  }
  func.func @transform_1(%arg0: i32) -> (i32, i32) {
    %c0_i32 = arith.constant 0 : i32
    %c0_i32_0 = arith.constant 0 : i32
    %c0_i32_1 = arith.constant 0 : i32
    return %c0_i32, %c0_i32_0 : i32, i32
  }
  func.func @transform_2(%arg0: i32) -> (i32, i32) {
    %c0_i32 = arith.constant 0 : i32
    %c0_i32_0 = arith.constant 0 : i32
    %c0_i32_1 = arith.constant 0 : i32
    return %c0_i32, %c0_i32_0 : i32, i32
  }
  func.func @transform_3(%arg0: i32) -> (i32, i32) {
    %c0_i32 = arith.constant 0 : i32
    %c0_i32_0 = arith.constant 0 : i32
    %c0_i32_1 = arith.constant 0 : i32
    return %c0_i32, %c0_i32_0 : i32, i32
  }
  func.func @transform_4(%arg0: i32) -> (i32, i32) {
    %c0_i32 = arith.constant 0 : i32
    %c0_i32_0 = arith.constant 0 : i32
    %c0_i32_1 = arith.constant 0 : i32
    return %c0_i32, %c0_i32_0 : i32, i32
  }
  func.func @transform_5(%arg0: i32) -> (i32, i32) {
    %c0_i32 = arith.constant 0 : i32
    %c0_i32_0 = arith.constant 0 : i32
    return %c0_i32, %arg0 : i32, i32
  }
  func.func @transform_6(%arg0: i32) -> (i32, i32) {
    %c0_i32 = arith.constant 0 : i32
    %c0_i32_0 = arith.constant 0 : i32
    return %c0_i32, %arg0 : i32, i32
  }
  func.func @transform_7(%arg0: i32) -> (i32, i32) {
    %c0_i32 = arith.constant 0 : i32
    %c0_i32_0 = arith.constant 0 : i32
    return %arg0, %c0_i32 : i32, i32
  }
  func.func @transform_8(%arg0: i32) -> (i32, i32, i32) {
    %c0_i32 = arith.constant 0 : i32
    %c0_i32_0 = arith.constant 0 : i32
    %c0_i32_1 = arith.constant 0 : i32
    return %arg0, %c0_i32, %c0_i32_0 : i32, i32, i32
  }
}

module attributes {stable_mosaic.version = 11 : i64} {
  func.func @_triangle_kernel(%arg0: i32, %arg1: i32, %arg2: i32, %arg3: i32, %arg4: memref<32x16x16xf32, #tpu.memory_space<vmem>>, %arg5: memref<32x16x16xf32, #tpu.memory_space<vmem>>, %arg6: memref<32x16x16xf32, #tpu.memory_space<vmem>>, %arg7: memref<32x16x16xf32, #tpu.memory_space<vmem>>) attributes {dimension_semantics = [#tpu.dimension_semantics<parallel>, #tpu.dimension_semantics<parallel>, #tpu.dimension_semantics<parallel>, #tpu.dimension_semantics<arbitrary>], iteration_bounds = array<i64: 2, 1, 1, 1>, scalar_prefetch = 0 : i64, scratch_operands = 1 : i64, tpu.core_type = #tpu.core_type<tc>, window_params = [{transform_indices = @transform_0, window_bounds = array<i64: 32, 16, 16>}, {transform_indices = @transform_1, window_bounds = array<i64: 32, 16, 16>}, {transform_indices = @transform_2, window_bounds = array<i64: 32, 16, 16>}]} {
    %c0_i32 = arith.constant 0 : i32
    %0 = arith.cmpi eq, %arg3, %c0_i32 : i32
    %1 = arith.extui %0 : i1 to i32
    %c0_i32_0 = arith.constant 0 : i32
    %2 = arith.cmpi ne, %1, %c0_i32_0 : i32
    scf.if %2 {
      %cst_14 = arith.constant 0.000000e+00 : f32
      %13 = vector.broadcast %cst_14 : f32 to vector<32x16x16xf32>
      %c0_15 = arith.constant 0 : index
      %c0_16 = arith.constant 0 : index
      %c0_17 = arith.constant 0 : index
      %14 = vector.load %arg7[%c0_15, %c0_16, %c0_17] : memref<32x16x16xf32, #tpu.memory_space<vmem>>, vector<32x16x16xf32>
      tpu.vector_store %arg7[%c0_15, %c0_16, %c0_17], %13 {strides = array<i32>} : memref<32x16x16xf32, #tpu.memory_space<vmem>>, vector<32x16x16xf32>,
    } else {
    }
    %c0 = arith.constant 0 : index
    %c0_1 = arith.constant 0 : index
    %c0_2 = arith.constant 0 : index
    %3 = vector.load %arg4[%c0, %c0_1, %c0_2] : memref<32x16x16xf32, #tpu.memory_space<vmem>>, vector<32x16x16xf32>
    %4 = tpu.transpose %3, [0, 2, 1] : vector<32x16x16xf32> -> vector<32x16x16xf32>
    %c0_3 = arith.constant 0 : index
    %c0_4 = arith.constant 0 : index
    %c0_5 = arith.constant 0 : index
    %5 = vector.load %arg7[%c0_3, %c0_4, %c0_5] : memref<32x16x16xf32, #tpu.memory_space<vmem>>, vector<32x16x16xf32>
    %c0_6 = arith.constant 0 : index
    %c0_7 = arith.constant 0 : index
    %c0_8 = arith.constant 0 : index
    %6 = vector.load %arg5[%c0_6, %c0_7, %c0_8] : memref<32x16x16xf32, #tpu.memory_space<vmem>>, vector<32x16x16xf32>
    "tpu.trace_start"() <{level = 10 : i32, message = "cik,ckj->cij"}> : () -> ()
    %cst = arith.constant dense<0.000000e+00> : vector<32x16x16xf32>
    %7 = tpu.matmul %4, %6, %cst {dimension_numbers = #tpu.dot_dimension_numbers<[2], [1], [1], [2], [0, 0, 0, 1, 1, 2], [0], [0]>} : vector<32x16x16xf32>, vector<32x16x16xf32>, vector<32x16x16xf32> -> vector<32x16x16xf32>
    "tpu.trace_stop"() : () -> ()
    %8 = arith.addf %5, %7 : vector<32x16x16xf32>
    %c0_9 = arith.constant 0 : index
    %c0_10 = arith.constant 0 : index
    %c0_11 = arith.constant 0 : index
    %9 = vector.load %arg7[%c0_9, %c0_10, %c0_11] : memref<32x16x16xf32, #tpu.memory_space<vmem>>, vector<32x16x16xf32>
    tpu.vector_store %arg7[%c0_9, %c0_10, %c0_11], %8 {strides = array<i32>} : memref<32x16x16xf32, #tpu.memory_space<vmem>>, vector<32x16x16xf32>,
    %c0_i32_12 = arith.constant 0 : i32
    %10 = arith.cmpi eq, %arg3, %c0_i32_12 : i32
    %11 = arith.extui %10 : i1 to i32
    %c0_i32_13 = arith.constant 0 : i32
    %12 = arith.cmpi ne, %11, %c0_i32_13 : i32
    scf.if %12 {
      %c0_14 = arith.constant 0 : index
      %c0_15 = arith.constant 0 : index
      %c0_16 = arith.constant 0 : index
      %13 = vector.load %arg7[%c0_14, %c0_15, %c0_16] : memref<32x16x16xf32, #tpu.memory_space<vmem>>, vector<32x16x16xf32>
      %c0_17 = arith.constant 0 : index
      %c0_18 = arith.constant 0 : index
      %c0_19 = arith.constant 0 : index
      %14 = vector.load %arg6[%c0_17, %c0_18, %c0_19] : memref<32x16x16xf32, #tpu.memory_space<vmem>>, vector<32x16x16xf32>
      tpu.vector_store %arg6[%c0_17, %c0_18, %c0_19], %13 {strides = array<i32>} : memref<32x16x16xf32, #tpu.memory_space<vmem>>, vector<32x16x16xf32>,
    } else {
    }
    return
  }
  func.func @transform_0(%arg0: i32, %arg1: i32, %arg2: i32, %arg3: i32) -> (i32, i32, i32) {
    %c1_i32 = arith.constant 1 : i32
    %0 = arith.muli %arg0, %c1_i32 : i32
    %1 = arith.addi %0, %arg3 : i32
    %c0_i32 = arith.constant 0 : i32
    %c0_i32_0 = arith.constant 0 : i32
    return %c0_i32, %1, %arg1 : i32, i32, i32
  }
  func.func @transform_1(%arg0: i32, %arg1: i32, %arg2: i32, %arg3: i32) -> (i32, i32, i32) {
    %c1_i32 = arith.constant 1 : i32
    %0 = arith.muli %arg0, %c1_i32 : i32
    %1 = arith.addi %0, %arg3 : i32
    %c0_i32 = arith.constant 0 : i32
    %c0_i32_0 = arith.constant 0 : i32
    return %c0_i32, %1, %arg2 : i32, i32, i32
  }
  func.func @transform_2(%arg0: i32, %arg1: i32, %arg2: i32, %arg3: i32) -> (i32, i32, i32) {
    %c1_i32 = arith.constant 1 : i32
    %0 = arith.muli %arg0, %c1_i32 : i32
    %1 = arith.addi %0, %arg1 : i32
    %c0_i32 = arith.constant 0 : i32
    %c0_i32_0 = arith.constant 0 : i32
    return %c0_i32, %1, %arg2 : i32, i32, i32
  }
}

module attributes {stable_mosaic.version = 11 : i64} {
  func.func @_out_kernel(%arg0: i32, %arg1: memref<1xf32, #tpu.memory_space<smem>>, %arg2: memref<32x512xf32, #tpu.memory_space<vmem>>, %arg3: memref<512x32xf32, #tpu.memory_space<vmem>>, %arg4: memref<1x32xf32, #tpu.memory_space<vmem>>, %arg5: memref<1x32xf32, #tpu.memory_space<vmem>>, %arg6: memref<32x32xf32, #tpu.memory_space<vmem>>, %arg7: memref<1x32xf32, #tpu.memory_space<vmem>>, %arg8: memref<512x32xf32, #tpu.memory_space<vmem>>) attributes {dimension_semantics = [#tpu.dimension_semantics<parallel>], iteration_bounds = array<i64: 1>, scalar_prefetch = 0 : i64, scratch_operands = 0 : i64, tpu.core_type = #tpu.core_type<tc>, window_params = [{transform_indices = @transform_0, window_bounds = array<i64: 1>}, {transform_indices = @transform_1, window_bounds = array<i64: 32, 512>}, {transform_indices = @transform_2, window_bounds = array<i64: 512, 32>}, {pipeline_mode = #tpu.pipeline_mode<synchronous>, transform_indices = @transform_3, window_bounds = array<i64: 1, 32>}, {pipeline_mode = #tpu.pipeline_mode<synchronous>, transform_indices = @transform_4, window_bounds = array<i64: 1, 32>}, {pipeline_mode = #tpu.pipeline_mode<synchronous>, transform_indices = @transform_5, window_bounds = array<i64: 32, 32>}, {pipeline_mode = #tpu.pipeline_mode<synchronous>, transform_indices = @transform_6, window_bounds = array<i64: 1, 32>}, {transform_indices = @transform_7, window_bounds = array<i64: 512, 32>}]} {
    %c0 = arith.constant 0 : index
    %c0_0 = arith.constant 0 : index
    %0 = vector.load %arg2[%c0, %c0_0] : memref<32x512xf32, #tpu.memory_space<vmem>>, vector<32x512xf32>
    %1 = tpu.transpose %0, [1, 0] : vector<32x512xf32> -> vector<512x32xf32>
    %c0_1 = arith.constant 0 : index
    %2 = memref.load %arg1[%c0_1] : memref<1xf32, #tpu.memory_space<smem>>
    %3 = vector.broadcast %2 : f32 to vector<512x32xf32>
    %4 = arith.mulf %1, %3 : vector<512x32xf32>
    %cst = arith.constant dense<0.000000e+00> : vector<512xf32>
    %5 = vector.multi_reduction <add>, %4, %cst [1] : vector<512x32xf32> to vector<512xf32>
    %6 = vector.shape_cast %5 : vector<512xf32> to vector<512x1xf32>
    %cst_2 = arith.constant 3.200000e+01 : f32
    %7 = vector.broadcast %cst_2 : f32 to vector<512x1xf32>
    %8 = arith.divf %6, %7 : vector<512x1xf32>
    %9 = vector.broadcast %8 : vector<512x1xf32> to vector<512x32xf32>
    %10 = arith.subf %4, %9 : vector<512x32xf32>
    %11 = arith.mulf %10, %10 : vector<512x32xf32>
    %cst_3 = arith.constant dense<0.000000e+00> : vector<512xf32>
    %12 = vector.multi_reduction <add>, %11, %cst_3 [1] : vector<512x32xf32> to vector<512xf32>
    %13 = vector.shape_cast %12 : vector<512xf32> to vector<512x1xf32>
    %cst_4 = arith.constant 3.200000e+01 : f32
    %14 = vector.broadcast %cst_4 : f32 to vector<512x1xf32>
    %15 = arith.divf %13, %14 : vector<512x1xf32>
    %16 = vector.broadcast %8 : vector<512x1xf32> to vector<512x32xf32>
    %17 = arith.subf %4, %16 : vector<512x32xf32>
    %cst_5 = arith.constant 9.99999974E-6 : f32
    %18 = vector.broadcast %cst_5 : f32 to vector<512x1xf32>
    %19 = arith.addf %15, %18 : vector<512x1xf32>
    %20 = math.rsqrt %19 : vector<512x1xf32>
    %21 = vector.broadcast %20 : vector<512x1xf32> to vector<512x32xf32>
    %22 = arith.mulf %17, %21 : vector<512x32xf32>
    %c0_6 = arith.constant 0 : index
    %c0_7 = arith.constant 0 : index
    %23 = vector.load %arg4[%c0_6, %c0_7] : memref<1x32xf32, #tpu.memory_space<vmem>>, vector<1x32xf32>
    %24 = vector.broadcast %23 : vector<1x32xf32> to vector<512x32xf32>
    %25 = arith.mulf %22, %24 : vector<512x32xf32>
    %c0_8 = arith.constant 0 : index
    %c0_9 = arith.constant 0 : index
    %26 = vector.load %arg5[%c0_8, %c0_9] : memref<1x32xf32, #tpu.memory_space<vmem>>, vector<1x32xf32>
    %27 = vector.broadcast %26 : vector<1x32xf32> to vector<512x32xf32>
    %28 = arith.addf %25, %27 : vector<512x32xf32>
    %c0_10 = arith.constant 0 : index
    %c0_11 = arith.constant 0 : index
    %29 = vector.load %arg6[%c0_10, %c0_11] : memref<32x32xf32, #tpu.memory_space<vmem>>, vector<32x32xf32>
    %cst_12 = arith.constant dense<0.000000e+00> : vector<512x32xf32>
    %30 = tpu.matmul %28, %29, %cst_12 {dimension_numbers = #tpu.dot_dimension_numbers<[1], [0], [0], [1], [0, 0, 1, 1], [], []>} : vector<512x32xf32>, vector<32x32xf32>, vector<512x32xf32> -> vector<512x32xf32>
    %c0_13 = arith.constant 0 : index
    %c0_14 = arith.constant 0 : index
    %31 = vector.load %arg7[%c0_13, %c0_14] : memref<1x32xf32, #tpu.memory_space<vmem>>, vector<1x32xf32>
    %32 = vector.broadcast %31 : vector<1x32xf32> to vector<512x32xf32>
    %33 = arith.addf %30, %32 : vector<512x32xf32>
    %c0_15 = arith.constant 0 : index
    %c0_16 = arith.constant 0 : index
    %34 = vector.load %arg3[%c0_15, %c0_16] : memref<512x32xf32, #tpu.memory_space<vmem>>, vector<512x32xf32>
    %35 = arith.mulf %34, %33 : vector<512x32xf32>
    %c0_17 = arith.constant 0 : index
    %c0_18 = arith.constant 0 : index
    %36 = vector.load %arg8[%c0_17, %c0_18] : memref<512x32xf32, #tpu.memory_space<vmem>>, vector<512x32xf32>
    tpu.vector_store %arg8[%c0_17, %c0_18], %35 {strides = array<i32>} : memref<512x32xf32, #tpu.memory_space<vmem>>, vector<512x32xf32>,
    return
  }
  func.func @transform_0(%arg0: i32) -> i32 {
    %c0_i32 = arith.constant 0 : i32
    %c0_i32_0 = arith.constant 0 : i32
    return %c0_i32 : i32
  }
  func.func @transform_1(%arg0: i32) -> (i32, i32) {
    %c0_i32 = arith.constant 0 : i32
    %c0_i32_0 = arith.constant 0 : i32
    return %c0_i32, %arg0 : i32, i32
  }
  func.func @transform_2(%arg0: i32) -> (i32, i32) {
    %c0_i32 = arith.constant 0 : i32
    %c0_i32_0 = arith.constant 0 : i32
    return %arg0, %c0_i32 : i32, i32
  }
  func.func @transform_3(%arg0: i32) -> (i32, i32) {
    %c0_i32 = arith.constant 0 : i32
    %c0_i32_0 = arith.constant 0 : i32
    %c0_i32_1 = arith.constant 0 : i32
    return %c0_i32, %c0_i32_0 : i32, i32
  }
  func.func @transform_4(%arg0: i32) -> (i32, i32) {
    %c0_i32 = arith.constant 0 : i32
    %c0_i32_0 = arith.constant 0 : i32
    %c0_i32_1 = arith.constant 0 : i32
    return %c0_i32, %c0_i32_0 : i32, i32
  }
  func.func @transform_5(%arg0: i32) -> (i32, i32) {
    %c0_i32 = arith.constant 0 : i32
    %c0_i32_0 = arith.constant 0 : i32
    %c0_i32_1 = arith.constant 0 : i32
    return %c0_i32, %c0_i32_0 : i32, i32
  }
  func.func @transform_6(%arg0: i32) -> (i32, i32) {
    %c0_i32 = arith.constant 0 : i32
    %c0_i32_0 = arith.constant 0 : i32
    %c0_i32_1 = arith.constant 0 : i32
    return %c0_i32, %c0_i32_0 : i32, i32
  }
  func.func @transform_7(%arg0: i32) -> (i32, i32) {
    %c0_i32 = arith.constant 0 : i32
    %c0_i32_0 = arith.constant 0 : i32
    return %arg0, %c0_i32 : i32, i32
  }
}

</mosaic_0001>

<bundles_post_ra>
// kernel: triangle_multiplication_incoming.3
= control target key start
LH: loop header
LB: loop body
LE: loop exit
PB: predicated region body
PF: predicated region fallthrough
CT: control target
= control target key end

     0   :  { %14 = vsyncpa [#allocation3], 0  ;;  %s4940_s27 = smov [#allocation2]   ;;  %s8391_s0 = inlined_call_operand.hbm [shape: f32[512,32], index: 0, kind: input, shape index: {}]   ;;  %s8392_s1 = inlined_call_operand.vmem [shape: f32[1,32], index: 1, kind: input, shape index: {}]   ;;  %s8393_s2 = inlined_call_operand.vmem [shape: f32[1,32], index: 2, kind: input, shape index: {}]   ;;  %s8394_s3 = inlined_call_operand.vmem [shape: f32[32,160], index: 3, kind: input, shape index: {}]   ;;  %s8395_s4 = inlined_call_operand.vmem [shape: f32[1,160], index: 4, kind: input, shape index: {}]   ;;  %s8396_s5 = inlined_call_operand.vmem [shape: f32[32,512], index: 5, kind: output, shape index: {0}]   ;;  %s8397_s6 = inlined_call_operand.vmem [shape: f32[32,512], index: 6, kind: output, shape index: {1}]   ;;  %s8398_s7 = inlined_call_operand.vmem [shape: f32[512,32], index: 7, kind: output, shape index: {2}]   ;;  %s8399_s8 = inlined_call_operand.vmem [shape: f32[1,4,32], index: 8, kind: output, shape index: {3}]  }
   0x1   :  { %s20_s28 = sshll.u32 %s4940_s27, 4  ;;  %s4916_s9 = scalar_lea.hbm %s8391_s0, 8192  ;;  %s21_s28 = int_to_ptr.vmem [resolvable:$true] %s20_s28 }
   0x2   :  { %p4917_p0 = scmp.ne.s32.totalorder %s8391_s0, %s4916_s9  ;;  %p4920_p1 = scmp.lt.u32.totalorder %s4916_s9, %s8391_s0 }
   0x4   :  { %p4922_p2 = pnand %p4920_p1, %p4917_p0 }
   0x6   :  { %4925 = shalt.err (!%p4922_p2)
}
   0x7   :  { %s4926_s14 = scalar_lea.vmem %s21_s28, 8192  ;;  %p4931_p4 = scmp.lt.s32.totalorder %s21_s28, %s21_s28 }
   0x8   :  { %p4927_p3 = scmp.ne.s32.totalorder %s21_s28, %s4926_s14  ;;  %p4932_p5 = scmp.lt.s32.totalorder %s4926_s14, %s4926_s14 }
   0xa   :  { %p4933_p6 = por %p4932_p5, %p4931_p4 }
   0xc   :  { %p4934_p7 = pnand %p4933_p6, %p4927_p3 }
   0xe   :  { %4937 = shalt.err (!%p4934_p7)
}
   0xf   :  { %s4941_s15 = smov 128   ;;  %s4942_s16 = smov 8  }
  0x10   :  { %26 = dma.hbm_to_vmem [thread:$0]  %s8391_s0, 8192, %s21_s28, [#allocation3], %s4941_s15, %s4941_s15, %s4942_s16  }
  0x11   :  { %4938 = dma.done.wait [#allocation3], 8192  }
  0x12   :  { %4939 = vsyncadd [#allocation3], 4294959104  ;;  %vm102_vm0 = vcmask 261120   ;;  %v5003_v0 = vld [vmem:[#allocation2] sm:$0xff]  ;;  %v5005_v1 = vld [vmem:[#allocation2 + $0x10] sm:$0xff]  ;;  %vm3733_vm1 = vcmask 785920  }
  0x13   :  { %v5007_v2 = vld [vmem:[#allocation2 + $0x8] sm:$0xff]  ;;  %v103_v3 = vsel %vm102_vm0, %v5003_v0, 0.0  ;;  %v109_v4 = vsel %vm102_vm0, %v5005_v1, 0.0  ;;  %v5013_v5 = vld [vmem:[#allocation2 + $0x18] sm:$0xff]  ;;  %v5019_v8 = vld [vmem:[#allocation2 + $0x20] sm:$0xff]  ;;  %s4945_s13 = smov 64  }
  0x14   :  { %104 = vadd.xlane.f32.xlu0 %v103_v3  ;;  %110 = vadd.xlane.f32.xlu1 %v109_v4  ;;  %v106_v6 = vsel %vm102_vm0, %v5007_v2, 0.0  ;;  %v112_v7 = vsel %vm102_vm0, %v5013_v5, 0.0  ;;  %v5021_v9 = vld [vmem:[#allocation2 + $0x28] sm:$0xff]  ;;  %v115_v10 = vsel %vm102_vm0, %v5019_v8, 0.0  ;;  %v5027_v12 = vld [vmem:[#allocation2 + $0x30] sm:$0xff]  ;;  %v5029_v13 = vld [vmem:[#allocation2 + $0x38] sm:$0xff] }
  0x15   :  { %v118_v11 = vsel %vm102_vm0, %v5021_v9, 0.0  ;;  %v121_v14 = vsel %vm102_vm0, %v5027_v12, 0.0  ;;  %v124_v15 = vsel %vm102_vm0, %v5029_v13, 0.0  ;;  %v5035_v16 = vld [vmem:[#allocation2 + $0x40] sm:$0xff]  ;;  %v5037_v17 = vld [vmem:[#allocation2 + $0x48] sm:$0xff]  ;;  %v5043_v20 = vld [vmem:[#allocation2 + $0x50] sm:$0xff] }
  0x16   :  { %v127_v18 = vsel %vm102_vm0, %v5035_v16, 0.0  ;;  %v130_v19 = vsel %vm102_vm0, %v5037_v17, 0.0  ;;  %v5045_v21 = vld [vmem:[#allocation2 + $0x58] sm:$0xff]  ;;  %v133_v22 = vsel %vm102_vm0, %v5043_v20, 0.0  ;;  %v5051_v24 = vld [vmem:[#allocation2 + $0x60] sm:$0xff]  ;;  %v5053_v25 = vld [vmem:[#allocation2 + $0x68] sm:$0xff] }
  0x17   :  { %v136_v23 = vsel %vm102_vm0, %v5045_v21, 0.0  ;;  %v139_v26 = vsel %vm102_vm0, %v5051_v24, 0.0  ;;  %v142_v27 = vsel %vm102_vm0, %v5053_v25, 0.0  ;;  %v5059_v28 = vld [vmem:[#allocation2 + $0x70] sm:$0xff]  ;;  %v5061_v29 = vld [vmem:[#allocation2 + $0x78] sm:$0xff]  ;;  %v5067_v32 = vld [vmem:[#allocation2 + $0x80] sm:$0xff] }
  0x18   :  { %107 = vadd.xlane.f32.xlu0 %v106_v6  ;;  %113 = vadd.xlane.f32.xlu1 %v112_v7  ;;  %v145_v30 = vsel %vm102_vm0, %v5059_v28, 0.0  ;;  %v148_v31 = vsel %vm102_vm0, %v5061_v29, 0.0  ;;  %v5069_v33 = vld [vmem:[#allocation2 + $0x88] sm:$0xff]  ;;  %v151_v34 = vsel %vm102_vm0, %v5067_v32, 0.0  ;;  %v5075_v36 = vld [vmem:[#allocation2 + $0x90] sm:$0xff]  ;;  %v5077_v37 = vld [vmem:[#allocation2 + $0x98] sm:$0xff] }
  0x19   :  { %v154_v35 = vsel %vm102_vm0, %v5069_v33, 0.0  ;;  %v157_v38 = vsel %vm102_vm0, %v5075_v36, 0.0  ;;  %v160_v39 = vsel %vm102_vm0, %v5077_v37, 0.0  ;;  %v5083_v40 = vld [vmem:[#allocation2 + $0xa0] sm:$0xff]  ;;  %v5085_v41 = vld [vmem:[#allocation2 + $0xa8] sm:$0xff]  ;;  %v5091_v44 = vld [vmem:[#allocation2 + $0xb0] sm:$0xff] }
  0x1a   :  { %v163_v42 = vsel %vm102_vm0, %v5083_v40, 0.0  ;;  %v166_v43 = vsel %vm102_vm0, %v5085_v41, 0.0  ;;  %v5093_v45 = vld [vmem:[#allocation2 + $0xb8] sm:$0xff]  ;;  %v169_v46 = vsel %vm102_vm0, %v5091_v44, 0.0  ;;  %v5099_v48 = vld [vmem:[#allocation2 + $0xc0] sm:$0xff]  ;;  %v5101_v49 = vld [vmem:[#allocation2 + $0xc8] sm:$0xff] }
  0x1b   :  { %v172_v47 = vsel %vm102_vm0, %v5093_v45, 0.0  ;;  %v175_v50 = vsel %vm102_vm0, %v5099_v48, 0.0  ;;  %v178_v51 = vsel %vm102_vm0, %v5101_v49, 0.0  ;;  %v5107_v52 = vld [vmem:[#allocation2 + $0xd0] sm:$0xff]  ;;  %v5109_v53 = vld [vmem:[#allocation2 + $0xd8] sm:$0xff]  ;;  %v5115_v56 = vld [vmem:[#allocation2 + $0xe0] sm:$0xff] }
  0x1c   :  { %116 = vadd.xlane.f32.xlu0 %v115_v10  ;;  %119 = vadd.xlane.f32.xlu1 %v118_v11  ;;  %v181_v54 = vsel %vm102_vm0, %v5107_v52, 0.0  ;;  %v184_v55 = vsel %vm102_vm0, %v5109_v53, 0.0  ;;  %v5117_v57 = vld [vmem:[#allocation2 + $0xe8] sm:$0xff]  ;;  %v187_v58 = vsel %vm102_vm0, %v5115_v56, 0.0  ;;  %v5123_v60 = vld [vmem:[#allocation2 + $0xf0] sm:$0xff]  ;;  %v5125_v61 = vld [vmem:[#allocation2 + $0xf8] sm:$0xff] }
  0x1d   :  { %v190_v59 = vsel %vm102_vm0, %v5117_v57, 0.0  ;;  %v193_v62 = vsel %vm102_vm0, %v5123_v60, 0.0  ;;  %v196_v63 = vsel %vm102_vm0, %v5125_v61, 0.0  ;;  %v5131_v3 = vld [vmem:[#allocation2 + $0x100] sm:$0xff]  ;;  %v5133_v4 = vld [vmem:[#allocation2 + $0x108] sm:$0xff]  ;;  %v5139_v10 = vld [vmem:[#allocation2 + $0x110] sm:$0xff] }
  0x1e   :  { %v199_v6 = vsel %vm102_vm0, %v5131_v3, 0.0  ;;  %v202_v7 = vsel %vm102_vm0, %v5133_v4, 0.0  ;;  %v5141_v11 = vld [vmem:[#allocation2 + $0x118] sm:$0xff]  ;;  %vm4032_vm2 = vcmask 253952  }
  0x20   :  { %122 = vadd.xlane.f32.xlu0 %v121_v14  ;;  %125 = vadd.xlane.f32.xlu1 %v124_v15  ;;  %v205_v14 = vsel %vm102_vm0, %v5139_v10, 0.0  ;;  %v208_v15 = vsel %vm102_vm0, %v5141_v11, 0.0 }
  0x24   :  { %128 = vadd.xlane.f32.xlu0 %v127_v18  ;;  %131 = vadd.xlane.f32.xlu1 %v130_v19  ;;  %v5147_v18 = vld [vmem:[#allocation2 + $0x120] sm:$0xff]  ;;  %v5149_v19 = vld [vmem:[#allocation2 + $0x128] sm:$0xff] }
  0x28   :  { %134 = vadd.xlane.f32.xlu0 %v133_v22  ;;  %137 = vadd.xlane.f32.xlu1 %v136_v23  ;;  %v211_v22 = vsel %vm102_vm0, %v5147_v18, 0.0  ;;  %v214_v23 = vsel %vm102_vm0, %v5149_v19, 0.0 }
  0x2c   :  { %140 = vadd.xlane.f32.xlu0 %v139_v26  ;;  %143 = vadd.xlane.f32.xlu1 %v142_v27  ;;  %v5155_v26 = vld [vmem:[#allocation2 + $0x130] sm:$0xff]  ;;  %v5157_v27 = vld [vmem:[#allocation2 + $0x138] sm:$0xff] }
  0x30   :  { %146 = vadd.xlane.f32.xlu0 %v145_v30  ;;  %149 = vadd.xlane.f32.xlu1 %v148_v31  ;;  %v217_v30 = vsel %vm102_vm0, %v5155_v26, 0.0  ;;  %v220_v31 = vsel %vm102_vm0, %v5157_v27, 0.0 }
  0x34   :  { %152 = vadd.xlane.f32.xlu0 %v151_v34  ;;  %155 = vadd.xlane.f32.xlu1 %v154_v35  ;;  %v5163_v34 = vld [vmem:[#allocation2 + $0x140] sm:$0xff]  ;;  %v5165_v35 = vld [vmem:[#allocation2 + $0x148] sm:$0xff] }
  0x38   :  { %158 = vadd.xlane.f32.xlu0 %v157_v38  ;;  %161 = vadd.xlane.f32.xlu1 %v160_v39  ;;  %v223_v38 = vsel %vm102_vm0, %v5163_v34, 0.0  ;;  %v226_v39 = vsel %vm102_vm0, %v5165_v35, 0.0 }
  0x3c   :  { %164 = vadd.xlane.f32.xlu0 %v163_v42  ;;  %167 = vadd.xlane.f32.xlu1 %v166_v43  ;;  %v5171_v42 = vld [vmem:[#allocation2 + $0x150] sm:$0xff]  ;;  %v5173_v43 = vld [vmem:[#allocation2 + $0x158] sm:$0xff] }
  0x40   :  { %170 = vadd.xlane.f32.xlu0 %v169_v46  ;;  %173 = vadd.xlane.f32.xlu1 %v172_v47  ;;  %v229_v46 = vsel %vm102_vm0, %v5171_v42, 0.0  ;;  %v232_v47 = vsel %vm102_vm0, %v5173_v43, 0.0 }
  0x44   :  { %176 = vadd.xlane.f32.xlu0 %v175_v50  ;;  %179 = vadd.xlane.f32.xlu1 %v178_v51  ;;  %v5179_v50 = vld [vmem:[#allocation2 + $0x160] sm:$0xff]  ;;  %v5181_v51 = vld [vmem:[#allocation2 + $0x168] sm:$0xff] }
  0x48   :  { %182 = vadd.xlane.f32.xlu0 %v181_v54  ;;  %185 = vadd.xlane.f32.xlu1 %v184_v55  ;;  %v235_v54 = vsel %vm102_vm0, %v5179_v50, 0.0  ;;  %v238_v55 = vsel %vm102_vm0, %v5181_v51, 0.0 }
  0x4c   :  { %188 = vadd.xlane.f32.xlu0 %v187_v58  ;;  %191 = vadd.xlane.f32.xlu1 %v190_v59  ;;  %v5187_v58 = vld [vmem:[#allocation2 + $0x170] sm:$0xff]  ;;  %v5189_v59 = vld [vmem:[#allocation2 + $0x178] sm:$0xff] }
  0x50   :  { %194 = vadd.xlane.f32.xlu0 %v193_v62  ;;  %197 = vadd.xlane.f32.xlu1 %v196_v63  ;;  %v241_v62 = vsel %vm102_vm0, %v5187_v58, 0.0  ;;  %v244_v63 = vsel %vm102_vm0, %v5189_v59, 0.0 }
  0x54   :  { %200 = vadd.xlane.f32.xlu0 %v199_v6  ;;  %203 = vadd.xlane.f32.xlu1 %v202_v7  ;;  %v5195_v6 = vld [vmem:[#allocation2 + $0x180] sm:$0xff]  ;;  %v5197_v7 = vld [vmem:[#allocation2 + $0x188] sm:$0xff] }
  0x58   :  { %206 = vadd.xlane.f32.xlu0 %v205_v14  ;;  %209 = vadd.xlane.f32.xlu1 %v208_v15  ;;  %v247_v14 = vsel %vm102_vm0, %v5195_v6, 0.0  ;;  %v250_v15 = vsel %vm102_vm0, %v5197_v7, 0.0 }
  0x5c   :  { %212 = vadd.xlane.f32.xlu0 %v211_v22  ;;  %215 = vadd.xlane.f32.xlu1 %v214_v23  ;;  %v5203_v22 = vld [vmem:[#allocation2 + $0x190] sm:$0xff]  ;;  %v5205_v23 = vld [vmem:[#allocation2 + $0x198] sm:$0xff] }
  0x5d   :  { %8530 = vst [vmem:[#allocation5_spill] sm:$0xff] %v5203_v22  ;;  %8531 = vst [vmem:[#allocation6_spill] sm:$0xff] %v5205_v23 }
  0x60   :  { %218 = vadd.xlane.f32.xlu0 %v217_v30  ;;  %221 = vadd.xlane.f32.xlu1 %v220_v31  ;;  %v253_v30 = vsel %vm102_vm0, %v5203_v22, 0.0  ;;  %v256_v31 = vsel %vm102_vm0, %v5205_v23, 0.0 }
  0x64   :  { %224 = vadd.xlane.f32.xlu0 %v223_v38  ;;  %227 = vadd.xlane.f32.xlu1 %v226_v39  ;;  %v5211_v38 = vld [vmem:[#allocation2 + $0x1a0] sm:$0xff]  ;;  %v5213_v39 = vld [vmem:[#allocation2 + $0x1a8] sm:$0xff] }
  0x65   :  { %8532 = vst [vmem:[#allocation7_spill] sm:$0xff] %v5211_v38  ;;  %8533 = vst [vmem:[#allocation8_spill] sm:$0xff] %v5213_v39 }
  0x68   :  { %230 = vadd.xlane.f32.xlu0 %v229_v46  ;;  %233 = vadd.xlane.f32.xlu1 %v232_v47  ;;  %v259_v46 = vsel %vm102_vm0, %v5211_v38, 0.0  ;;  %v262_v47 = vsel %vm102_vm0, %v5213_v39, 0.0 }
  0x6c   :  { %236 = vadd.xlane.f32.xlu0 %v235_v54  ;;  %239 = vadd.xlane.f32.xlu1 %v238_v55  ;;  %v5219_v54 = vld [vmem:[#allocation2 + $0x1b0] sm:$0xff]  ;;  %v5221_v55 = vld [vmem:[#allocation2 + $0x1b8] sm:$0xff] }
  0x6d   :  { %8534 = vst [vmem:[#allocation9_spill] sm:$0xff] %v5219_v54  ;;  %8535 = vst [vmem:[#allocation10_spill] sm:$0xff] %v5221_v55 }
  0x70   :  { %242 = vadd.xlane.f32.xlu0 %v241_v62  ;;  %245 = vadd.xlane.f32.xlu1 %v244_v63  ;;  %v265_v62 = vsel %vm102_vm0, %v5219_v54, 0.0  ;;  %v268_v63 = vsel %vm102_vm0, %v5221_v55, 0.0 }
  0x74   :  { %248 = vadd.xlane.f32.xlu0 %v247_v14  ;;  %251 = vadd.xlane.f32.xlu1 %v250_v15  ;;  %v5227_v14 = vld [vmem:[#allocation2 + $0x1c0] sm:$0xff]  ;;  %v5229_v15 = vld [vmem:[#allocation2 + $0x1c8] sm:$0xff] }
  0x75   :  { %8536 = vst [vmem:[#allocation11_spill] sm:$0xff] %v5227_v14  ;;  %8537 = vst [vmem:[#allocation12_spill] sm:$0xff] %v5229_v15 }
  0x78   :  { %254 = vadd.xlane.f32.xlu0 %v253_v30  ;;  %257 = vadd.xlane.f32.xlu1 %v256_v31  ;;  %v271_v30 = vsel %vm102_vm0, %v5227_v14, 0.0  ;;  %v274_v31 = vsel %vm102_vm0, %v5229_v15, 0.0 }
  0x7c   :  { %260 = vadd.xlane.f32.xlu0 %v259_v46  ;;  %263 = vadd.xlane.f32.xlu1 %v262_v47  ;;  %v5235_v46 = vld [vmem:[#allocation2 + $0x1d0] sm:$0xff]  ;;  %v5237_v47 = vld [vmem:[#allocation2 + $0x1d8] sm:$0xff] }
  0x7d   :  { %8538 = vst [vmem:[#allocation13_spill] sm:$0xff] %v5235_v46  ;;  %8539 = vst [vmem:[#allocation14_spill] sm:$0xff] %v5237_v47  ;;  %v277_v55 = vsel %vm102_vm0, %v5235_v46, 0.0  ;;  %v280_v54 = vsel %vm102_vm0, %v5237_v47, 0.0 }
  0x80   :  { %266 = vadd.xlane.f32.xlu0 %v265_v62  ;;  %269 = vadd.xlane.f32.xlu1 %v268_v63  ;;  %v5243_v62 = vld [vmem:[#allocation2 + $0x1e0] sm:$0xff]  ;;  %v5245_v63 = vld [vmem:[#allocation2 + $0x1e8] sm:$0xff] }
  0x81   :  { %8540 = vst [vmem:[#allocation15_spill] sm:$0xff] %v5243_v62  ;;  %8541 = vst [vmem:[#allocation16_spill] sm:$0xff] %v5245_v63  ;;  %v283_v15 = vsel %vm102_vm0, %v5243_v62, 0.0  ;;  %v286_v14 = vsel %vm102_vm0, %v5245_v63, 0.0 }
  0x84   :  { %272 = vadd.xlane.f32.xlu0 %v271_v30  ;;  %275 = vadd.xlane.f32.xlu1 %v274_v31  ;;  %v5251_v30 = vld [vmem:[#allocation2 + $0x1f0] sm:$0xff]  ;;  %v5253_v31 = vld [vmem:[#allocation2 + $0x1f8] sm:$0xff] }
  0x85   :  { %8542 = vst [vmem:[#allocation17_spill] sm:$0xff] %v5251_v30  ;;  %v289_v47 = vsel %vm102_vm0, %v5251_v30, 0.0  ;;  %v292_v46 = vsel %vm102_vm0, %v5253_v31, 0.0 }
  0x88   :  { %278 = vadd.xlane.f32.xlu0 %v277_v55  ;;  %281 = vadd.xlane.f32.xlu1 %v280_v54 }
  0x8c   :  { %284 = vadd.xlane.f32.xlu0 %v283_v15  ;;  %287 = vadd.xlane.f32.xlu1 %v286_v14 }
  0x90   :  { %290 = vadd.xlane.f32.xlu0 %v289_v47  ;;  %293 = vadd.xlane.f32.xlu1 %v292_v46 }
  0xa1   :  { %v105_v54 = vpop.xlane.xlu0 %104  ;;  %v111_v55 = vpop.xlane.xlu1 %110 }
  0xa2   :  { %v296_v62 = vmul.f32 0.03125, %v105_v54  ;;  %v298_v39 = vmul.f32 0.03125, %v111_v55 }
  0xa4   :  { %v5260_v63 = vsub.f32 %v5003_v0, %v296_v62  ;;  %v5263_v38 = vsub.f32 %v5005_v1, %v298_v39 }
  0xa5   :  { %v108_v15 = vpop.xlane.xlu0 %107  ;;  %v114_v14 = vpop.xlane.xlu1 %113 }
  0xa6   :  { %8543 = vst [vmem:[#allocation18_spill] sm:$0xff] %v5263_v38  ;;  %v297_v23 = vmul.f32 0.03125, %v108_v15  ;;  %v299_v22 = vmul.f32 0.03125, %v114_v14  ;;  %v424_v30 = vmul.f32 %v5260_v63, %v5260_v63  ;;  %v426_v46 = vmul.f32 %v5263_v38, %v5263_v38 }
  0xa8   :  { %v5270_v47 = vsub.f32 %v5007_v2, %v297_v23  ;;  %v5273_v54 = vsub.f32 %v5013_v5, %v299_v22  ;;  %v488_v0 = vsel %vm102_vm0, %v424_v30, 0.0  ;;  %v494_v62 = vsel %vm102_vm0, %v426_v46, 0.0 }
  0xa9   :  { %489 = vadd.xlane.f32.xlu0 %v488_v0  ;;  %v117_v1 = vpop.xlane.xlu0 %116  ;;  %v120_v39 = vpop.xlane.xlu1 %119 }
  0xaa   :  { %v300_v55 = vmul.f32 0.03125, %v117_v1  ;;  %v301_v15 = vmul.f32 0.03125, %v120_v39  ;;  %v425_v14 = vmul.f32 %v5270_v47, %v5270_v47  ;;  %v427_v38 = vmul.f32 %v5273_v54, %v5273_v54 }
  0xac   :  { %v5282_v2 = vsub.f32 %v5019_v8, %v300_v55  ;;  %v5285_v5 = vsub.f32 %v5021_v9, %v301_v15  ;;  %v491_v22 = vsel %vm102_vm0, %v425_v14, 0.0  ;;  %v497_v46 = vsel %vm102_vm0, %v427_v38, 0.0 }
  0xad   :  { %495 = vadd.xlane.f32.xlu0 %v494_v62  ;;  %492 = vadd.xlane.f32.xlu1 %v491_v22  ;;  %v123_v23 = vpop.xlane.xlu0 %122  ;;  %v126_v30 = vpop.xlane.xlu1 %125 }
  0xae   :  { %v302_v0 = vmul.f32 0.03125, %v123_v23  ;;  %v303_v1 = vmul.f32 0.03125, %v126_v30  ;;  %v428_v39 = vmul.f32 %v5282_v2, %v5282_v2  ;;  %v429_v8 = vmul.f32 %v5285_v5, %v5285_v5 }
  0xb0   :  { %v5294_v55 = vsub.f32 %v5027_v12, %v302_v0  ;;  %v5297_v9 = vsub.f32 %v5029_v13, %v303_v1  ;;  %v500_v62 = vsel %vm102_vm0, %v428_v39, 0.0  ;;  %v503_v14 = vsel %vm102_vm0, %v429_v8, 0.0 }
  0xb1   :  { %498 = vadd.xlane.f32.xlu1 %v497_v46  ;;  %501 = vadd.xlane.f32.xlu0 %v500_v62  ;;  %v129_v15 = vpop.xlane.xlu0 %128  ;;  %v132_v38 = vpop.xlane.xlu1 %131 }
  0xb2   :  { %v304_v22 = vmul.f32 0.03125, %v129_v15  ;;  %v305_v23 = vmul.f32 0.03125, %v132_v38  ;;  %v430_v30 = vmul.f32 %v5294_v55, %v5294_v55  ;;  %v431_v12 = vmul.f32 %v5297_v9, %v5297_v9 }
  0xb4   :  { %v5306_v0 = vsub.f32 %v5035_v16, %v304_v22  ;;  %v5309_v13 = vsub.f32 %v5037_v17, %v305_v23  ;;  %v506_v46 = vsel %vm102_vm0, %v430_v30, 0.0  ;;  %v509_v8 = vsel %vm102_vm0, %v431_v12, 0.0 }
  0xb5   :  { %504 = vadd.xlane.f32.xlu1 %v503_v14  ;;  %507 = vadd.xlane.f32.xlu0 %v506_v46  ;;  %v135_v1 = vpop.xlane.xlu0 %134  ;;  %v138_v39 = vpop.xlane.xlu1 %137 }
  0xb6   :  { %v306_v62 = vmul.f32 0.03125, %v135_v1  ;;  %v307_v15 = vmul.f32 0.03125, %v138_v39  ;;  %v432_v38 = vmul.f32 %v5306_v0, %v5306_v0  ;;  %v433_v16 = vmul.f32 %v5309_v13, %v5309_v13 }
  0xb8   :  { %v5318_v22 = vsub.f32 %v5043_v20, %v306_v62  ;;  %v5321_v17 = vsub.f32 %v5045_v21, %v307_v15  ;;  %v512_v14 = vsel %vm102_vm0, %v432_v38, 0.0  ;;  %v515_v12 = vsel %vm102_vm0, %v433_v16, 0.0 }
  0xb9   :  { %510 = vadd.xlane.f32.xlu1 %v509_v8  ;;  %513 = vadd.xlane.f32.xlu0 %v512_v14  ;;  %v141_v23 = vpop.xlane.xlu0 %140  ;;  %v144_v30 = vpop.xlane.xlu1 %143 }
  0xba   :  { %v308_v46 = vmul.f32 0.03125, %v141_v23  ;;  %v309_v1 = vmul.f32 0.03125, %v144_v30  ;;  %v434_v39 = vmul.f32 %v5318_v22, %v5318_v22  ;;  %v435_v20 = vmul.f32 %v5321_v17, %v5321_v17 }
  0xbc   :  { %v5330_v62 = vsub.f32 %v5051_v24, %v308_v46  ;;  %v5333_v21 = vsub.f32 %v5053_v25, %v309_v1  ;;  %v518_v8 = vsel %vm102_vm0, %v434_v39, 0.0  ;;  %v521_v16 = vsel %vm102_vm0, %v435_v20, 0.0 }
  0xbd   :  { %516 = vadd.xlane.f32.xlu1 %v515_v12  ;;  %519 = vadd.xlane.f32.xlu0 %v518_v8  ;;  %v147_v15 = vpop.xlane.xlu0 %146  ;;  %v150_v38 = vpop.xlane.xlu1 %149 }
  0xbe   :  { %8544 = vst [vmem:[#allocation19_spill] sm:$0xff] %v5330_v62  ;;  %8545 = vst [vmem:[#allocation20_spill] sm:$0xff] %v5333_v21  ;;  %v310_v14 = vmul.f32 0.03125, %v147_v15  ;;  %v311_v23 = vmul.f32 0.03125, %v150_v38  ;;  %v436_v30 = vmul.f32 %v5330_v62, %v5330_v62  ;;  %v437_v24 = vmul.f32 %v5333_v21, %v5333_v21 }
  0xc0   :  { %v5342_v46 = vsub.f32 %v5059_v28, %v310_v14  ;;  %v5345_v25 = vsub.f32 %v5061_v29, %v311_v23  ;;  %v524_v12 = vsel %vm102_vm0, %v436_v30, 0.0  ;;  %v527_v20 = vsel %vm102_vm0, %v437_v24, 0.0  ;;  %v1079_v29 = vld [vmem:[%s8394_s3 + $0x8] sm:$0xff]  ;;  %v1078_v23 = vld [vmem:[%s8394_s3] sm:$0xff]  ;;  %v1080_v30 = vld [vmem:[%s8394_s3 + $0x10] sm:$0xff] }
  0xc1   :  { %522 = vadd.xlane.f32.xlu1 %v521_v16  ;;  %525 = vadd.xlane.f32.xlu0 %v524_v12  ;;  %v153_v1 = vpop.xlane.xlu0 %152  ;;  %v156_v39 = vpop.xlane.xlu1 %155  ;;  %v1081_v16 = vld [vmem:[%s8394_s3 + $0x18] sm:$0xff] }
  0xc2   :  { %8546 = vst [vmem:[#allocation21_spill] sm:$0xff] %v5342_v46  ;;  %8547 = vst [vmem:[#allocation22_spill] sm:$0xff] %v5345_v25  ;;  %v312_v8 = vmul.f32 0.03125, %v153_v1  ;;  %v313_v15 = vmul.f32 0.03125, %v156_v39  ;;  %v438_v38 = vmul.f32 %v5342_v46, %v5342_v46  ;;  %v439_v28 = vmul.f32 %v5345_v25, %v5345_v25 }
  0xc3   :  { %v4256_v14 = vpack.c.bf16 %v1081_v16, %v1079_v29  ;;  %v4258_v25 = vpack.c.bf16 %v1080_v30, %v1078_v23 }
  0xc4   :  { %v5366_v24 = vsub.f32 %v5067_v32, %v312_v8  ;;  %v5369_v12 = vsub.f32 %v5069_v33, %v313_v15  ;;  %v530_v1 = vsel %vm102_vm0, %v438_v38, 0.0  ;;  %v533_v16 = vsel %vm102_vm0, %v439_v28, 0.0  ;;  %v1083_v33 = vld [vmem:[%s8394_s3 + $0x28] sm:$0xff]  ;;  %v1082_v15 = vld [vmem:[%s8394_s3 + $0x20] sm:$0xff]  ;;  %v1084_v38 = vld [vmem:[%s8394_s3 + $0x30] sm:$0xff] }
  0xc5   :  { %528 = vadd.xlane.f32.xlu1 %v527_v20  ;;  %531 = vadd.xlane.f32.xlu0 %v530_v1  ;;  %v159_v39 = vpop.xlane.xlu0 %158  ;;  %v162_v29 = vpop.xlane.xlu1 %161  ;;  %v1085_v20 = vld [vmem:[%s8394_s3 + $0x38] sm:$0xff] }
  0xc6   :  { %v314_v46 = vmul.f32 0.03125, %v159_v39  ;;  %v315_v21 = vmul.f32 0.03125, %v162_v29  ;;  %v440_v62 = vmul.f32 %v5366_v24, %v5366_v24  ;;  %v441_v32 = vmul.f32 %v5369_v12, %v5369_v12  ;;  %4257 = vmatprep.subr.bf16.mxu0 %v4256_v14  ;;  %4264 = vmatprep.subr.bf16.mxu1 %v4256_v14 }
  0xc7   :  { %4259 = vmatpush1.bf16.msra.mxu0 %v4258_v25  ;;  %v4260_v8 = vpack.c.bf16 %v1085_v20, %v1083_v33  ;;  %4266 = vmatpush1.bf16.msra.mxu1 %v4258_v25  ;;  %v4262_v29 = vpack.c.bf16 %v1084_v38, %v1082_v15 }
  0xc8   :  { %v5390_v28 = vsub.f32 %v5075_v36, %v314_v46  ;;  %v5393_v23 = vsub.f32 %v5077_v37, %v315_v21  ;;  %v536_v30 = vsel %vm102_vm0, %v440_v62, 0.0  ;;  %v539_v39 = vsel %vm102_vm0, %v441_v32, 0.0 }
  0xc9   :  { %534 = vadd.xlane.f32.xlu1 %v533_v16  ;;  %537 = vadd.xlane.f32.xlu0 %v536_v30  ;;  %v165_v14 = vpop.xlane.xlu0 %164  ;;  %v168_v1 = vpop.xlane.xlu1 %167  ;;  %v8418_v46 = vmov 0.0  }
  0xca   :  { %v316_v33 = vmul.f32 0.03125, %v165_v14  ;;  %v317_v20 = vmul.f32 0.03125, %v168_v1  ;;  %v442_v25 = vmul.f32 %v5390_v28, %v5390_v28  ;;  %v443_v36 = vmul.f32 %v5393_v23, %v5393_v23  ;;  %4261 = vmatprep.subr.bf16.mxu0 %v4260_v8  ;;  %4265 = vmatprep.subr.bf16.mxu1 %v4260_v8 }
  0xcb   :  { %4263 = vmatpush1.bf16.msra.mxu0 %v4262_v29  ;;  %4267 = vmatpush1.bf16.msra.mxu1 %v4262_v29 }
  0xcc   :  { %v5402_v37 = vsub.f32 %v5083_v40, %v316_v33  ;;  %v5405_v62 = vsub.f32 %v5085_v41, %v317_v20  ;;  %v542_v21 = vsel %vm102_vm0, %v442_v25, 0.0  ;;  %1354 = vmatprep.mubr.f32.mxu0 %v8418_v46  ;;  %1546 = vmatprep.mubr.f32.mxu1 %v8418_v46  ;;  %v545_v8 = vsel %vm102_vm0, %v443_v36, 0.0 }
  0xcd   :  { %540 = vadd.xlane.f32.xlu1 %v539_v39  ;;  %543 = vadd.xlane.f32.xlu0 %v542_v21  ;;  %v171_v16 = vpop.xlane.xlu0 %170  ;;  %v174_v32 = vpop.xlane.xlu1 %173 }
  0xce   :  { %v318_v15 = vmul.f32 0.03125, %v171_v16  ;;  %v319_v38 = vmul.f32 0.03125, %v174_v32  ;;  %v444_v40 = vmul.f32 %v5402_v37, %v5402_v37  ;;  %v445_v41 = vmul.f32 %v5405_v62, %v5405_v62 }
  0xd0   :  { %v5416_v30 = vsub.f32 %v5091_v44, %v318_v15  ;;  %v5419_v14 = vsub.f32 %v5093_v45, %v319_v38  ;;  %v548_v1 = vsel %vm102_vm0, %v444_v40, 0.0  ;;  %v551_v33 = vsel %vm102_vm0, %v445_v41, 0.0 }
  0xd1   :  { %546 = vadd.xlane.f32.xlu1 %v545_v8  ;;  %549 = vadd.xlane.f32.xlu0 %v548_v1  ;;  %v177_v39 = vpop.xlane.xlu0 %176  ;;  %v180_v29 = vpop.xlane.xlu1 %179 }
  0xd2   :  { %v320_v20 = vmul.f32 0.03125, %v177_v39  ;;  %v321_v25 = vmul.f32 0.03125, %v180_v29  ;;  %v446_v36 = vmul.f32 %v5416_v30, %v5416_v30  ;;  %v447_v44 = vmul.f32 %v5419_v14, %v5419_v14 }
  0xd4   :  { %v5428_v21 = vsub.f32 %v5099_v48, %v320_v20  ;;  %v5431_v45 = vsub.f32 %v5101_v49, %v321_v25  ;;  %v554_v16 = vsel %vm102_vm0, %v446_v36, 0.0  ;;  %v557_v15 = vsel %vm102_vm0, %v447_v44, 0.0 }
  0xd5   :  { %552 = vadd.xlane.f32.xlu1 %v551_v33  ;;  %555 = vadd.xlane.f32.xlu0 %v554_v16  ;;  %v183_v32 = vpop.xlane.xlu0 %182  ;;  %v186_v8 = vpop.xlane.xlu1 %185 }
  0xd6   :  { %v322_v38 = vmul.f32 0.03125, %v183_v32  ;;  %v323_v40 = vmul.f32 0.03125, %v186_v8  ;;  %v448_v41 = vmul.f32 %v5428_v21, %v5428_v21  ;;  %v449_v48 = vmul.f32 %v5431_v45, %v5431_v45 }
  0xd8   :  { %v5440_v1 = vsub.f32 %v5107_v52, %v322_v38  ;;  %v5443_v49 = vsub.f32 %v5109_v53, %v323_v40  ;;  %v560_v39 = vsel %vm102_vm0, %v448_v41, 0.0  ;;  %v563_v20 = vsel %vm102_vm0, %v449_v48, 0.0 }
  0xd9   :  { %558 = vadd.xlane.f32.xlu1 %v557_v15  ;;  %561 = vadd.xlane.f32.xlu0 %v560_v39  ;;  %v189_v29 = vpop.xlane.xlu0 %188  ;;  %v192_v33 = vpop.xlane.xlu1 %191 }
  0xda   :  { %v324_v25 = vmul.f32 0.03125, %v189_v29  ;;  %v325_v36 = vmul.f32 0.03125, %v192_v33  ;;  %v450_v44 = vmul.f32 %v5440_v1, %v5440_v1  ;;  %v451_v52 = vmul.f32 %v5443_v49, %v5443_v49 }
  0xdc   :  { %v5452_v16 = vsub.f32 %v5115_v56, %v324_v25  ;;  %v5455_v53 = vsub.f32 %v5117_v57, %v325_v36  ;;  %v566_v32 = vsel %vm102_vm0, %v450_v44, 0.0  ;;  %v569_v38 = vsel %vm102_vm0, %v451_v52, 0.0 }
  0xdd   :  { %564 = vadd.xlane.f32.xlu1 %v563_v20  ;;  %567 = vadd.xlane.f32.xlu0 %v566_v32  ;;  %v195_v8 = vpop.xlane.xlu0 %194  ;;  %v198_v15 = vpop.xlane.xlu1 %197 }
  0xde   :  { %v326_v40 = vmul.f32 0.03125, %v195_v8  ;;  %v327_v41 = vmul.f32 0.03125, %v198_v15  ;;  %v452_v48 = vmul.f32 %v5452_v16, %v5452_v16  ;;  %v453_v56 = vmul.f32 %v5455_v53, %v5455_v53 }
  0xe0   :  { %v5464_v39 = vsub.f32 %v5123_v60, %v326_v40  ;;  %v5467_v57 = vsub.f32 %v5125_v61, %v327_v41  ;;  %v572_v29 = vsel %vm102_vm0, %v452_v48, 0.0  ;;  %v575_v25 = vsel %vm102_vm0, %v453_v56, 0.0 }
  0xe1   :  { %570 = vadd.xlane.f32.xlu1 %v569_v38  ;;  %573 = vadd.xlane.f32.xlu0 %v572_v29  ;;  %v201_v33 = vpop.xlane.xlu0 %200  ;;  %v204_v20 = vpop.xlane.xlu1 %203 }
  0xe2   :  { %8548 = vst [vmem:[#allocation23_spill] sm:$0xff] %v5464_v39  ;;  %8549 = vst [vmem:[#allocation24_spill] sm:$0xff] %v5467_v57  ;;  %v328_v36 = vmul.f32 0.03125, %v201_v33  ;;  %v329_v44 = vmul.f32 0.03125, %v204_v20  ;;  %v454_v52 = vmul.f32 %v5464_v39, %v5464_v39  ;;  %v455_v60 = vmul.f32 %v5467_v57, %v5467_v57 }
  0xe4   :  { %v5476_v32 = vsub.f32 %v5131_v3, %v328_v36  ;;  %v5479_v61 = vsub.f32 %v5133_v4, %v329_v44  ;;  %v578_v8 = vsel %vm102_vm0, %v454_v52, 0.0  ;;  %v581_v40 = vsel %vm102_vm0, %v455_v60, 0.0 }
  0xe5   :  { %576 = vadd.xlane.f32.xlu1 %v575_v25  ;;  %579 = vadd.xlane.f32.xlu0 %v578_v8  ;;  %v207_v15 = vpop.xlane.xlu0 %206  ;;  %v210_v38 = vpop.xlane.xlu1 %209 }
  0xe6   :  { %v330_v41 = vmul.f32 0.03125, %v207_v15  ;;  %v331_v48 = vmul.f32 0.03125, %v210_v38  ;;  %v456_v56 = vmul.f32 %v5476_v32, %v5476_v32  ;;  %v457_v3 = vmul.f32 %v5479_v61, %v5479_v61 }
  0xe8   :  { %v5488_v29 = vsub.f32 %v5139_v10, %v330_v41  ;;  %v5491_v4 = vsub.f32 %v5141_v11, %v331_v48  ;;  %v584_v33 = vsel %vm102_vm0, %v456_v56, 0.0  ;;  %v587_v36 = vsel %vm102_vm0, %v457_v3, 0.0 }
  0xe9   :  { %582 = vadd.xlane.f32.xlu1 %v581_v40  ;;  %585 = vadd.xlane.f32.xlu0 %v584_v33  ;;  %v213_v20 = vpop.xlane.xlu0 %212  ;;  %v216_v25 = vpop.xlane.xlu1 %215 }
  0xea   :  { %v332_v44 = vmul.f32 0.03125, %v213_v20  ;;  %v333_v52 = vmul.f32 0.03125, %v216_v25  ;;  %v458_v60 = vmul.f32 %v5488_v29, %v5488_v29  ;;  %v459_v10 = vmul.f32 %v5491_v4, %v5491_v4 }
  0xec   :  { %v5500_v8 = vsub.f32 %v5147_v18, %v332_v44  ;;  %v5503_v11 = vsub.f32 %v5149_v19, %v333_v52  ;;  %v590_v15 = vsel %vm102_vm0, %v458_v60, 0.0  ;;  %v593_v41 = vsel %vm102_vm0, %v459_v10, 0.0 }
  0xed   :  { %588 = vadd.xlane.f32.xlu1 %v587_v36  ;;  %591 = vadd.xlane.f32.xlu0 %v590_v15  ;;  %v219_v38 = vpop.xlane.xlu0 %218  ;;  %v222_v40 = vpop.xlane.xlu1 %221 }
  0xee   :  { %v334_v48 = vmul.f32 0.03125, %v219_v38  ;;  %v335_v56 = vmul.f32 0.03125, %v222_v40  ;;  %v460_v3 = vmul.f32 %v5500_v8, %v5500_v8  ;;  %v461_v18 = vmul.f32 %v5503_v11, %v5503_v11 }
  0xf0   :  { %v5512_v33 = vsub.f32 %v5155_v26, %v334_v48  ;;  %v5515_v19 = vsub.f32 %v5157_v27, %v335_v56  ;;  %v596_v20 = vsel %vm102_vm0, %v460_v3, 0.0  ;;  %v599_v44 = vsel %vm102_vm0, %v461_v18, 0.0 }
  0xf1   :  { %594 = vadd.xlane.f32.xlu1 %v593_v41  ;;  %597 = vadd.xlane.f32.xlu0 %v596_v20  ;;  %v225_v25 = vpop.xlane.xlu0 %224  ;;  %v228_v36 = vpop.xlane.xlu1 %227 }
  0xf2   :  { %v336_v52 = vmul.f32 0.03125, %v225_v25  ;;  %v337_v60 = vmul.f32 0.03125, %v228_v36  ;;  %v462_v10 = vmul.f32 %v5512_v33, %v5512_v33  ;;  %v463_v26 = vmul.f32 %v5515_v19, %v5515_v19 }
  0xf4   :  { %v5524_v15 = vsub.f32 %v5163_v34, %v336_v52  ;;  %v5527_v27 = vsub.f32 %v5165_v35, %v337_v60  ;;  %v602_v38 = vsel %vm102_vm0, %v462_v10, 0.0  ;;  %v605_v48 = vsel %vm102_vm0, %v463_v26, 0.0 }
  0xf5   :  { %600 = vadd.xlane.f32.xlu1 %v599_v44  ;;  %603 = vadd.xlane.f32.xlu0 %v602_v38  ;;  %v231_v40 = vpop.xlane.xlu0 %230  ;;  %v234_v41 = vpop.xlane.xlu1 %233 }
  0xf6   :  { %v338_v56 = vmul.f32 0.03125, %v231_v40  ;;  %v339_v3 = vmul.f32 0.03125, %v234_v41  ;;  %v464_v18 = vmul.f32 %v5524_v15, %v5524_v15  ;;  %v465_v34 = vmul.f32 %v5527_v27, %v5527_v27 }
  0xf8   :  { %v5536_v20 = vsub.f32 %v5171_v42, %v338_v56  ;;  %v5539_v35 = vsub.f32 %v5173_v43, %v339_v3  ;;  %v608_v25 = vsel %vm102_vm0, %v464_v18, 0.0  ;;  %v611_v52 = vsel %vm102_vm0, %v465_v34, 0.0 }
  0xf9   :  { %606 = vadd.xlane.f32.xlu1 %v605_v48  ;;  %609 = vadd.xlane.f32.xlu0 %v608_v25  ;;  %v237_v36 = vpop.xlane.xlu0 %236  ;;  %v240_v44 = vpop.xlane.xlu1 %239 }
  0xfa   :  { %v340_v60 = vmul.f32 0.03125, %v237_v36  ;;  %v341_v10 = vmul.f32 0.03125, %v240_v44  ;;  %v466_v26 = vmul.f32 %v5536_v20, %v5536_v20  ;;  %v467_v42 = vmul.f32 %v5539_v35, %v5539_v35 }
  0xfc   :  { %v5548_v38 = vsub.f32 %v5179_v50, %v340_v60  ;;  %v5551_v43 = vsub.f32 %v5181_v51, %v341_v10  ;;  %v614_v40 = vsel %vm102_vm0, %v466_v26, 0.0  ;;  %v617_v56 = vsel %vm102_vm0, %v467_v42, 0.0 }
  0xfd   :  { %612 = vadd.xlane.f32.xlu1 %v611_v52  ;;  %615 = vadd.xlane.f32.xlu0 %v614_v40  ;;  %v243_v41 = vpop.xlane.xlu0 %242  ;;  %v246_v48 = vpop.xlane.xlu1 %245 }
  0xfe   :  { %v342_v3 = vmul.f32 0.03125, %v243_v41  ;;  %v343_v18 = vmul.f32 0.03125, %v246_v48  ;;  %v468_v34 = vmul.f32 %v5548_v38, %v5548_v38  ;;  %v469_v50 = vmul.f32 %v5551_v43, %v5551_v43 }
 0x100   :  { %v5560_v25 = vsub.f32 %v5187_v58, %v342_v3  ;;  %v5563_v51 = vsub.f32 %v5189_v59, %v343_v18  ;;  %v620_v36 = vsel %vm102_vm0, %v468_v34, 0.0  ;;  %v623_v60 = vsel %vm102_vm0, %v469_v50, 0.0 }
 0x101   :  { %618 = vadd.xlane.f32.xlu1 %v617_v56  ;;  %621 = vadd.xlane.f32.xlu0 %v620_v36  ;;  %v249_v44 = vpop.xlane.xlu0 %248  ;;  %v252_v52 = vpop.xlane.xlu1 %251  ;;  %v8554_v36 = vld [vmem:[#allocation5_spill] sm:$0xff] }
 0x102   :  { %8550 = vst [vmem:[#allocation25_spill] sm:$0xff] %v5560_v25  ;;  %8551 = vst [vmem:[#allocation26_spill] sm:$0xff] %v5563_v51  ;;  %v344_v10 = vmul.f32 0.03125, %v249_v44  ;;  %v345_v26 = vmul.f32 0.03125, %v252_v52  ;;  %v470_v42 = vmul.f32 %v5560_v25, %v5560_v25  ;;  %v471_v58 = vmul.f32 %v5563_v51, %v5563_v51  ;;  %v8585_v25 = vld [vmem:[#allocation21_spill] sm:$0xff] }
 0x104   :  { %v5572_v40 = vsub.f32 %v5195_v6, %v344_v10  ;;  %v5575_v59 = vsub.f32 %v5197_v7, %v345_v26  ;;  %v626_v41 = vsel %vm102_vm0, %v470_v42, 0.0  ;;  %v629_v3 = vsel %vm102_vm0, %v471_v58, 0.0  ;;  %v8556_v7 = vld [vmem:[#allocation6_spill] sm:$0xff] }
 0x105   :  { %624 = vadd.xlane.f32.xlu1 %v623_v60  ;;  %627 = vadd.xlane.f32.xlu0 %v626_v41  ;;  %v255_v48 = vpop.xlane.xlu0 %254  ;;  %v258_v56 = vpop.xlane.xlu1 %257 }
 0x106   :  { %8552 = vst [vmem:[#allocation27_spill] sm:$0xff] %v5572_v40  ;;  %8553 = vst [vmem:[#allocation28_spill] sm:$0xff] %v5575_v59  ;;  %v346_v18 = vmul.f32 0.03125, %v255_v48  ;;  %v347_v34 = vmul.f32 0.03125, %v258_v56  ;;  %v472_v50 = vmul.f32 %v5572_v40, %v5572_v40  ;;  %v473_v6 = vmul.f32 %v5575_v59, %v5575_v59 }
 0x108   :  { %v5584_v44 = vsub.f32 %v8554_v36, %v346_v18  ;;  %v5587_v52 = vsub.f32 %v8556_v7, %v347_v34  ;;  %v632_v60 = vsel %vm102_vm0, %v472_v50, 0.0  ;;  %v635_v42 = vsel %vm102_vm0, %v473_v6, 0.0  ;;  %v8558_v18 = vld [vmem:[#allocation7_spill] sm:$0xff]  ;;  %v8560_v34 = vld [vmem:[#allocation8_spill] sm:$0xff] }
 0x109   :  { %630 = vadd.xlane.f32.xlu1 %v629_v3  ;;  %633 = vadd.xlane.f32.xlu0 %v632_v60  ;;  %v261_v10 = vpop.xlane.xlu0 %260  ;;  %v264_v26 = vpop.xlane.xlu1 %263 }
 0x10a   :  { %8555 = vst [vmem:[#allocation5_spill] sm:$0xff] %v5584_v44  ;;  %8557 = vst [vmem:[#allocation6_spill] sm:$0xff] %v5587_v52  ;;  %v348_v58 = vmul.f32 0.03125, %v261_v10  ;;  %v349_v41 = vmul.f32 0.03125, %v264_v26  ;;  %v474_v48 = vmul.f32 %v5584_v44, %v5584_v44  ;;  %v475_v56 = vmul.f32 %v5587_v52, %v5587_v52 }
 0x10c   :  { %v5596_v36 = vsub.f32 %v8558_v18, %v348_v58  ;;  %v5599_v7 = vsub.f32 %v8560_v34, %v349_v41  ;;  %v638_v3 = vsel %vm102_vm0, %v474_v48, 0.0  ;;  %v641_v60 = vsel %vm102_vm0, %v475_v56, 0.0  ;;  %v8562_v18 = vld [vmem:[#allocation9_spill] sm:$0xff]  ;;  %v8564_v41 = vld [vmem:[#allocation10_spill] sm:$0xff] }
 0x10d   :  { %636 = vadd.xlane.f32.xlu1 %v635_v42  ;;  %639 = vadd.xlane.f32.xlu0 %v638_v3  ;;  %v267_v50 = vpop.xlane.xlu0 %266  ;;  %v270_v6 = vpop.xlane.xlu1 %269 }
 0x10e   :  { %8559 = vst [vmem:[#allocation7_spill] sm:$0xff] %v5596_v36  ;;  %8561 = vst [vmem:[#allocation8_spill] sm:$0xff] %v5599_v7  ;;  %v350_v10 = vmul.f32 0.03125, %v267_v50  ;;  %v351_v26 = vmul.f32 0.03125, %v270_v6  ;;  %v476_v46 = vmul.f32 %v5596_v36, %v5596_v36  ;;  %v477_v58 = vmul.f32 %v5599_v7, %v5599_v7 }
 0x110   :  { %v5608_v52 = vsub.f32 %v8562_v18, %v350_v10  ;;  %v5611_v34 = vsub.f32 %v8564_v41, %v351_v26  ;;  %v644_v42 = vsel %vm102_vm0, %v476_v46, 0.0  ;;  %v647_v3 = vsel %vm102_vm0, %v477_v58, 0.0  ;;  %v8566_v18 = vld [vmem:[#allocation11_spill] sm:$0xff]  ;;  %v8568_v26 = vld [vmem:[#allocation12_spill] sm:$0xff] }
 0x111   :  { %642 = vadd.xlane.f32.xlu1 %v641_v60  ;;  %645 = vadd.xlane.f32.xlu0 %v644_v42  ;;  %v273_v48 = vpop.xlane.xlu0 %272  ;;  %v276_v56 = vpop.xlane.xlu1 %275 }
 0x112   :  { %8563 = vst [vmem:[#allocation9_spill] sm:$0xff] %v5608_v52  ;;  %8565 = vst [vmem:[#allocation10_spill] sm:$0xff] %v5611_v34  ;;  %v352_v50 = vmul.f32 0.03125, %v273_v48  ;;  %v353_v6 = vmul.f32 0.03125, %v276_v56  ;;  %v478_v36 = vmul.f32 %v5608_v52, %v5608_v52  ;;  %v479_v10 = vmul.f32 %v5611_v34, %v5611_v34 }
 0x114   :  { %v5620_v7 = vsub.f32 %v8566_v18, %v352_v50  ;;  %v5623_v41 = vsub.f32 %v8568_v26, %v353_v6  ;;  %v650_v46 = vsel %vm102_vm0, %v478_v36, 0.0  ;;  %v653_v42 = vsel %vm102_vm0, %v479_v10, 0.0  ;;  %v8570_v18 = vld [vmem:[#allocation13_spill] sm:$0xff]  ;;  %v8572_v6 = vld [vmem:[#allocation14_spill] sm:$0xff] }
 0x115   :  { %648 = vadd.xlane.f32.xlu1 %v647_v3  ;;  %651 = vadd.xlane.f32.xlu0 %v650_v46  ;;  %v279_v60 = vpop.xlane.xlu0 %278  ;;  %v282_v58 = vpop.xlane.xlu1 %281 }
 0x116   :  { %8567 = vst [vmem:[#allocation11_spill] sm:$0xff] %v5620_v7  ;;  %8569 = vst [vmem:[#allocation12_spill] sm:$0xff] %v5623_v41  ;;  %v354_v48 = vmul.f32 0.03125, %v279_v60  ;;  %v355_v56 = vmul.f32 0.03125, %v282_v58  ;;  %v480_v52 = vmul.f32 %v5620_v7, %v5620_v7  ;;  %v481_v50 = vmul.f32 %v5623_v41, %v5623_v41 }
 0x118   :  { %v5632_v34 = vsub.f32 %v8570_v18, %v354_v48  ;;  %v5635_v26 = vsub.f32 %v8572_v6, %v355_v56  ;;  %v656_v36 = vsel %vm102_vm0, %v480_v52, 0.0  ;;  %v659_v46 = vsel %vm102_vm0, %v481_v50, 0.0  ;;  %v8574_v18 = vld [vmem:[#allocation15_spill] sm:$0xff]  ;;  %v8576_v56 = vld [vmem:[#allocation16_spill] sm:$0xff] }
 0x119   :  { %654 = vadd.xlane.f32.xlu1 %v653_v42  ;;  %657 = vadd.xlane.f32.xlu0 %v656_v36  ;;  %v285_v3 = vpop.xlane.xlu0 %284  ;;  %v288_v10 = vpop.xlane.xlu1 %287 }
 0x11a   :  { %8571 = vst [vmem:[#allocation13_spill] sm:$0xff] %v5632_v34  ;;  %8573 = vst [vmem:[#allocation14_spill] sm:$0xff] %v5635_v26  ;;  %v356_v60 = vmul.f32 0.03125, %v285_v3  ;;  %v357_v58 = vmul.f32 0.03125, %v288_v10  ;;  %v482_v7 = vmul.f32 %v5632_v34, %v5632_v34  ;;  %v483_v48 = vmul.f32 %v5635_v26, %v5635_v26 }
 0x11c   :  { %v5644_v41 = vsub.f32 %v8574_v18, %v356_v60  ;;  %v5647_v6 = vsub.f32 %v8576_v56, %v357_v58  ;;  %v662_v52 = vsel %vm102_vm0, %v482_v7, 0.0  ;;  %v665_v36 = vsel %vm102_vm0, %v483_v48, 0.0  ;;  %v8578_v18 = vld [vmem:[#allocation17_spill] sm:$0xff] }
 0x11d   :  { %660 = vadd.xlane.f32.xlu1 %v659_v46  ;;  %663 = vadd.xlane.f32.xlu0 %v662_v52  ;;  %v291_v42 = vpop.xlane.xlu0 %290  ;;  %v294_v50 = vpop.xlane.xlu1 %293 }
 0x11e   :  { %8575 = vst [vmem:[#allocation15_spill] sm:$0xff] %v5644_v41  ;;  %8577 = vst [vmem:[#allocation16_spill] sm:$0xff] %v5647_v6  ;;  %v358_v3 = vmul.f32 0.03125, %v291_v42  ;;  %v359_v10 = vmul.f32 0.03125, %v294_v50  ;;  %v484_v34 = vmul.f32 %v5644_v41, %v5644_v41  ;;  %v485_v60 = vmul.f32 %v5647_v6, %v5647_v6 }
 0x120   :  { %v5656_v26 = vsub.f32 %v8578_v18, %v358_v3  ;;  %v5659_v58 = vsub.f32 %v5253_v31, %v359_v10  ;;  %v668_v7 = vsel %vm102_vm0, %v484_v34, 0.0  ;;  %v671_v46 = vsel %vm102_vm0, %v485_v60, 0.0 }
 0x121   :  { %666 = vadd.xlane.f32.xlu1 %v665_v36  ;;  %669 = vadd.xlane.f32.xlu0 %v668_v7 }
 0x122   :  { %8579 = vst [vmem:[#allocation17_spill] sm:$0xff] %v5656_v26  ;;  %8580 = vst [vmem:[#allocation29_spill] sm:$0xff] %v5659_v58  ;;  %v486_v48 = vmul.f32 %v5656_v26, %v5656_v26  ;;  %v487_v56 = vmul.f32 %v5659_v58, %v5659_v58 }
 0x124   :  { %v674_v52 = vsel %vm102_vm0, %v486_v48, 0.0  ;;  %v677_v42 = vsel %vm102_vm0, %v487_v56, 0.0 }
 0x125   :  { %672 = vadd.xlane.f32.xlu1 %v671_v46  ;;  %675 = vadd.xlane.f32.xlu0 %v674_v52 }
 0x129   :  { %678 = vadd.xlane.f32.xlu1 %v677_v42 }
 0x136   :  { %v490_v31 = vpop.xlane.xlu0 %489 }
 0x137   :  { %v680_v50 = vmul.f32 0.03125, %v490_v31 }
 0x139   :  { %v744_v34 = vadd.f32 1e-05, %v680_v50 }
 0x13a   :  { %v493_v36 = vpop.xlane.xlu1 %492  ;;  %v496_v3 = vpop.xlane.xlu0 %495 }
 0x13b   :  { %4274 = vrsqrt.f32 %v744_v34  ;;  %v681_v10 = vmul.f32 0.03125, %v493_v36  ;;  %v682_v60 = vmul.f32 0.03125, %v496_v3  ;;  %v5672_v36 = vld [vmem:[%s8392_s1] ss:$0 sm:$0xff] }
 0x13d   :  { %v745_v18 = vadd.f32 1e-05, %v681_v10  ;;  %v746_v7 = vadd.f32 1e-05, %v682_v60 }
 0x13e   :  { %v499_v26 = vpop.xlane.xlu1 %498  ;;  %v502_v6 = vpop.xlane.xlu0 %501 }
 0x13f   :  { %4276 = vrsqrt.f32 %v745_v18  ;;  %v683_v58 = vmul.f32 0.03125, %v499_v26  ;;  %v684_v48 = vmul.f32 0.03125, %v502_v6  ;;  %v5678_v6 = vld [vmem:[%s8393_s2] ss:$0 sm:$0xff] }
 0x140   :  { %4278 = vrsqrt.f32 %v746_v7 }
 0x141   :  { %v747_v46 = vadd.f32 1e-05, %v683_v58  ;;  %v748_v52 = vadd.f32 1e-05, %v684_v48 }
 0x142   :  { %v505_v56 = vpop.xlane.xlu1 %504  ;;  %v508_v42 = vpop.xlane.xlu0 %507 }
 0x143   :  { %4280 = vrsqrt.f32 %v747_v46  ;;  %v685_v31 = vmul.f32 0.03125, %v505_v56  ;;  %v686_v34 = vmul.f32 0.03125, %v508_v42 }
 0x144   :  { %4282 = vrsqrt.f32 %v748_v52 }
 0x145   :  { %v4275_v50 = vpop.eup %4274  ;;  %v749_v41 = vadd.f32 1e-05, %v685_v31  ;;  %v750_v18 = vadd.f32 1e-05, %v686_v34  ;;  %v8581_v31 = vld [vmem:[#allocation18_spill] sm:$0xff] }
 0x146   :  { %v511_v3 = vpop.xlane.xlu1 %510  ;;  %v514_v10 = vpop.xlane.xlu0 %513  ;;  %v872_v26 = vmul.f32 %v4275_v50, %v5260_v63 }
 0x147   :  { %4284 = vrsqrt.f32 %v749_v41  ;;  %v687_v7 = vmul.f32 0.03125, %v511_v3  ;;  %v688_v59 = vmul.f32 0.03125, %v514_v10  ;;  %v8582_v41 = vmov 0.0  }
 0x148   :  { %v943_v58 = vmul.f32 %v5672_v36, %v872_v26  ;;  %4286 = vrsqrt.f32 %v750_v18 }
 0x149   :  { %v4277_v60 = vpop.eup %4276  ;;  %v751_v26 = vadd.f32 1e-05, %v687_v7 }
 0x14a   :  { %v4279_v48 = vpop.eup %4278  ;;  %v517_v46 = vpop.xlane.xlu1 %516  ;;  %v1014_v56 = vadd.f32 %v5678_v6, %v943_v58  ;;  %v873_v42 = vmul.f32 %v4277_v60, %v5270_v47 }
 0x14b   :  { %v520_v52 = vpop.xlane.xlu0 %519  ;;  %v874_v63 = vmul.f32 %v4279_v48, %v8581_v31  ;;  %4288 = vrsqrt.f32 %v751_v26  ;;  %v752_v48 = vadd.f32 1e-05, %v688_v59 }
 0x14c   :  { %4064 = vmatmul.mubr.msk.f32.vlgmr.msra.gmra.mrb[0].mxu0 %vm102_vm0, %v1014_v56  ;;  %v944_v50 = vmul.f32 %v5672_v36, %v873_v42  ;;  %v689_v56 = vmul.f32 0.03125, %v517_v46 }
 0x14d   :  { %v4281_v44 = vpop.eup %4280  ;;  %1360 = vmatprep.mubr.f32.mxu0 %v8582_v41  ;;  %v945_v58 = vmul.f32 %v5672_v36, %v874_v63  ;;  %4290 = vrsqrt.f32 %v752_v48 }
 0x14e   :  { %v523_v34 = vpop.xlane.xlu1 %522  ;;  %v1015_v40 = vadd.f32 %v5678_v6, %v944_v50  ;;  %v875_v47 = vmul.f32 %v4281_v44, %v5273_v54  ;;  %v4283_v60 = vpop.eup %4282  ;;  %v753_v54 = vadd.f32 1e-05, %v689_v56  ;;  %v690_v44 = vmul.f32 0.03125, %v520_v52 }
 0x14f   :  { %v526_v3 = vpop.xlane.xlu0 %525  ;;  %v1016_v7 = vadd.f32 %v5678_v6, %v945_v58  ;;  %v876_v31 = vmul.f32 %v4283_v60, %v5282_v2 }
 0x150   :  { %4065 = vmatmul.mubr.msk.f32.gmra.mrb[2].mxu0 %vm102_vm0, %v1015_v40  ;;  %v946_v42 = vmul.f32 %v5672_v36, %v875_v47  ;;  %4292 = vrsqrt.f32 %v753_v54  ;;  %v754_v2 = vadd.f32 1e-05, %v690_v44  ;;  %v691_v47 = vmul.f32 0.03125, %v523_v34 }
 0x151   :  { %1366 = vmatprep.mubr.f32.mxu0 %v8582_v41  ;;  %v4285_v50 = vpop.eup %4284  ;;  %v947_v63 = vmul.f32 %v5672_v36, %v876_v31  ;;  %v692_v31 = vmul.f32 0.03125, %v526_v3 }
 0x152   :  { %v529_v18 = vpop.xlane.xlu1 %528  ;;  %v1017_v46 = vadd.f32 %v5678_v6, %v946_v42  ;;  %v877_v26 = vmul.f32 %v4285_v50, %v5285_v5  ;;  %v4287_v58 = vpop.eup %4286  ;;  %4294 = vrsqrt.f32 %v754_v2  ;;  %v755_v5 = vadd.f32 1e-05, %v691_v47 }
 0x153   :  { %v532_v10 = vpop.xlane.xlu0 %531  ;;  %v1018_v48 = vadd.f32 %v5678_v6, %v947_v63 }
 0x154   :  { %4066 = vmatmul.mubr.msk.f32.gmra.mrb[4].mxu0 %vm102_vm0, %v1016_v7  ;;  %v948_v56 = vmul.f32 %v5672_v36, %v877_v26  ;;  %v878_v7 = vmul.f32 %v4287_v58, %v5294_v55  ;;  %4296 = vrsqrt.f32 %v755_v5  ;;  %v756_v55 = vadd.f32 1e-05, %v692_v31 }
 0x155   :  { %1372 = vmatprep.mubr.f32.mxu0 %v8582_v41  ;;  %v4289_v42 = vpop.eup %4288  ;;  %v693_v26 = vmul.f32 0.03125, %v529_v18 }
 0x156   :  { %v535_v40 = vpop.xlane.xlu1 %534  ;;  %v1019_v54 = vadd.f32 %v5678_v6, %v948_v56  ;;  %v949_v44 = vmul.f32 %v5672_v36, %v878_v7  ;;  %4298 = vrsqrt.f32 %v756_v55  ;;  %v694_v7 = vmul.f32 0.03125, %v532_v10 }
 0x157   :  { %v538_v59 = vpop.xlane.xlu0 %537  ;;  %v4291_v63 = vpop.eup %4290 }
 0x158   :  { %4067 = vmatmul.mubr.msk.f32.gmra.mrb[6].mxu0 %vm102_vm0, %v1017_v46  ;;  %v879_v46 = vmul.f32 %v4289_v42, %v5297_v9  ;;  %v1020_v2 = vadd.f32 %v5678_v6, %v949_v44  ;;  %v757_v9 = vadd.f32 1e-05, %v693_v26 }
 0x159   :  { %1378 = vmatprep.mubr.f32.mxu0 %v8582_v41 }
 0x15a   :  { %v541_v60 = vpop.xlane.xlu1 %540  ;;  %v950_v47 = vmul.f32 %v5672_v36, %v879_v46  ;;  %v4293_v56 = vpop.eup %4292  ;;  %4300 = vrsqrt.f32 %v757_v9  ;;  %v695_v46 = vmul.f32 0.03125, %v535_v40 }
 0x15b   :  { %v5702_v52 = vpop.xlane.xlu0 %543 }
 0x15c   :  { %4068 = vmatmul.mubr.msk.f32.gmra.mrb[8].mxu0 %vm102_vm0, %v1018_v48  ;;  %v880_v48 = vmul.f32 %v4291_v63, %v5306_v0  ;;  %v1021_v5 = vadd.f32 %v5678_v6, %v950_v47  ;;  %v4295_v44 = vpop.eup %4294  ;;  %v758_v0 = vadd.f32 1e-05, %v694_v7 }
 0x15d   :  { %1384 = vmatprep.mubr.f32.mxu0 %v8582_v41 }
 0x15e   :  { %v5709_v34 = vpop.xlane.xlu1 %546  ;;  %v951_v31 = vmul.f32 %v5672_v36, %v880_v48  ;;  %v4297_v47 = vpop.eup %4296  ;;  %4302 = vrsqrt.f32 %v758_v0  ;;  %v759_v48 = vadd.f32 1e-05, %v695_v46 }
 0x15f   :  { %v5711_v50 = vpop.xlane.xlu0 %549 }
 0x160   :  { %4069 = vmatmul.mubr.msk.f32.gmra.mrb[10].mxu0 %vm102_vm0, %v1019_v54  ;;  %v881_v54 = vmul.f32 %v4293_v56, %v5309_v13  ;;  %v1022_v55 = vadd.f32 %v5678_v6, %v951_v31  ;;  %v696_v13 = vmul.f32 0.03125, %v538_v59  ;;  %v4299_v31 = vpop.eup %4298  ;;  %4304 = vrsqrt.f32 %v759_v48 }
 0x161   :  { %1390 = vmatprep.mubr.f32.mxu0 %v8582_v41 }
 0x162   :  { %v5718_v3 = vpop.xlane.xlu1 %552  ;;  %v952_v26 = vmul.f32 %v5672_v36, %v881_v54  ;;  %v697_v54 = vmul.f32 0.03125, %v541_v60 }
 0x163   :  { %v5720_v58 = vpop.xlane.xlu0 %555 }
 0x164   :  { %4070 = vmatmul.mubr.msk.f32.gmra.mrb[12].mxu0 %vm102_vm0, %v1020_v2  ;;  %v882_v2 = vmul.f32 %v4295_v44, %v5318_v22  ;;  %v1023_v9 = vadd.f32 %v5678_v6, %v952_v26  ;;  %v760_v22 = vadd.f32 1e-05, %v696_v13  ;;  %v761_v60 = vadd.f32 1e-05, %v697_v54 }
 0x165   :  { %1396 = vmatprep.mubr.f32.mxu0 %v8582_v41 }
 0x166   :  { %v5727_v18 = vpop.xlane.xlu1 %558  ;;  %v953_v7 = vmul.f32 %v5672_v36, %v882_v2  ;;  %v4301_v2 = vpop.eup %4300  ;;  %4306 = vrsqrt.f32 %v760_v22 }
 0x167   :  { %v5729_v42 = vpop.xlane.xlu0 %561  ;;  %4308 = vrsqrt.f32 %v761_v60  ;;  %v700_v60 = vmul.f32 0.03125, %v5711_v50 }
 0x168   :  { %4071 = vmatmul.mubr.msk.f32.gmra.mrb[14].mxu0 %vm102_vm0, %v1021_v5  ;;  %v883_v5 = vmul.f32 %v4297_v47, %v5321_v17  ;;  %v1024_v0 = vadd.f32 %v5678_v6, %v953_v7  ;;  %v698_v17 = vmul.f32 0.03125, %v5702_v52  ;;  %v699_v47 = vmul.f32 0.03125, %v5709_v34 }
 0x169   :  { %1402 = vmatprep.mubr.f32.mxu0 %v8582_v41 }
 0x16a   :  { %v5736_v10 = vpop.xlane.xlu1 %564  ;;  %v954_v46 = vmul.f32 %v5672_v36, %v883_v5  ;;  %v8584_v5 = vld [vmem:[#allocation20_spill] sm:$0xff]  ;;  %v762_v51 = vadd.f32 1e-05, %v698_v17  ;;  %v763_v54 = vadd.f32 1e-05, %v699_v47 }
 0x16b   :  { %v5738_v63 = vpop.xlane.xlu0 %567 }
 0x16c   :  { %4072 = vmatmul.mubr.msk.f32.gmra.mrb[16].mxu0 %vm102_vm0, %v1022_v55  ;;  %v8583_v55 = vld [vmem:[#allocation19_spill] sm:$0xff]  ;;  %4310 = vrsqrt.f32 %v762_v51  ;;  %v8586_v51 = vld [vmem:[#allocation22_spill] sm:$0xff] }
 0x16d   :  { %1408 = vmatprep.mubr.f32.mxu0 %v8582_v41  ;;  %v884_v26 = vmul.f32 %v4299_v31, %v8583_v55  ;;  %v885_v31 = vmul.f32 %v4301_v2, %v8584_v5  ;;  %v4303_v55 = vpop.eup %4302 }
 0x16e   :  { %v5745_v40 = vpop.xlane.xlu1 %570  ;;  %v4305_v39 = vpop.eup %4304 }
 0x16f   :  { %v5747_v56 = vpop.xlane.xlu0 %573  ;;  %v955_v7 = vmul.f32 %v5672_v36, %v884_v26  ;;  %v886_v26 = vmul.f32 %v4303_v55, %v8585_v25  ;;  %v887_v55 = vmul.f32 %v4305_v39, %v8586_v51 }
 0x170   :  { %4073 = vmatmul.mubr.msk.f32.gmra.mrb[18].mxu0 %vm102_vm0, %v1023_v9  ;;  %v1025_v9 = vadd.f32 %v5678_v6, %v954_v46  ;;  %v956_v46 = vmul.f32 %v5672_v36, %v885_v31  ;;  %v4307_v47 = vpop.eup %4306 }
 0x171   :  { %1414 = vmatprep.mubr.f32.mxu0 %v8582_v41  ;;  %v1026_v57 = vadd.f32 %v5678_v6, %v955_v7  ;;  %v957_v25 = vmul.f32 %v5672_v36, %v886_v26  ;;  %v958_v39 = vmul.f32 %v5672_v36, %v887_v55 }
 0x172   :  { %v5754_v59 = vpop.xlane.xlu1 %576  ;;  %v1027_v31 = vadd.f32 %v5678_v6, %v956_v46 }
 0x173   :  { %v5756_v44 = vpop.xlane.xlu0 %579  ;;  %v1028_v26 = vadd.f32 %v5678_v6, %v957_v25  ;;  %v1029_v25 = vadd.f32 %v5678_v6, %v958_v39 }
 0x174   :  { %4074 = vmatmul.mubr.msk.f32.gmra.mrb[20].mxu0 %vm102_vm0, %v1024_v0 }
 0x175   :  { %1420 = vmatprep.mubr.f32.mxu0 %v8582_v41 }
 0x176   :  { %v5765_v13 = vpop.xlane.xlu1 %582 }
 0x177   :  { %v586_v48 = vpop.xlane.xlu0 %585 }
 0x178   :  { %v712_v52 = vmul.f32 0.03125, %v586_v48  ;;  %4075 = vmatmul.mubr.msk.f32.gmra.mrb[22].mxu0 %vm102_vm0, %v1025_v9 }
 0x179   :  { %1426 = vmatprep.mubr.f32.mxu0 %v8582_v41 }
 0x17a   :  { %v776_v22 = vadd.f32 1e-05, %v712_v52  ;;  %v589_v34 = vpop.xlane.xlu1 %588 }
 0x17b   :  { %v592_v0 = vpop.xlane.xlu0 %591  ;;  %v713_v2 = vmul.f32 0.03125, %v589_v34 }
 0x17c   :  { %v714_v17 = vmul.f32 0.03125, %v592_v0  ;;  %4312 = vrsqrt.f32 %v776_v22  ;;  %4076 = vmatmul.mubr.msk.f32.gmra.mrb[24].mxu0 %vm102_vm0, %v1026_v57  ;;  %v764_v22 = vadd.f32 1e-05, %v700_v60  ;;  %v701_v57 = vmul.f32 0.03125, %v5718_v3  ;;  %v4309_v0 = vpop.eup %4308 }
 0x17d   :  { %v777_v48 = vadd.f32 1e-05, %v713_v2  ;;  %1432 = vmatprep.mubr.f32.mxu0 %v8582_v41  ;;  %4314 = vrsqrt.f32 %v763_v54  ;;  %v888_v54 = vmul.f32 %v4307_v47, %v5366_v24  ;;  %v889_v47 = vmul.f32 %v4309_v0, %v5369_v12 }
 0x17e   :  { %v778_v9 = vadd.f32 1e-05, %v714_v17  ;;  %v595_v7 = vpop.xlane.xlu1 %594  ;;  %v765_v3 = vadd.f32 1e-05, %v701_v57 }
 0x17f   :  { %v598_v5 = vpop.xlane.xlu0 %597  ;;  %4316 = vrsqrt.f32 %v777_v48  ;;  %v715_v52 = vmul.f32 0.03125, %v595_v7  ;;  %v702_v48 = vmul.f32 0.03125, %v5720_v58  ;;  %v959_v24 = vmul.f32 %v5672_v36, %v888_v54 }
 0x180   :  { %v716_v50 = vmul.f32 0.03125, %v598_v5  ;;  %4318 = vrsqrt.f32 %v778_v9  ;;  %4077 = vmatmul.mubr.msk.f32.gmra.mrb[26].mxu0 %vm102_vm0, %v1027_v31  ;;  %v4311_v9 = vpop.eup %4310 }
 0x181   :  { %v779_v34 = vadd.f32 1e-05, %v715_v52  ;;  %1438 = vmatprep.mubr.f32.mxu0 %v8582_v41  ;;  %v766_v58 = vadd.f32 1e-05, %v702_v48  ;;  %v1030_v12 = vadd.f32 %v5678_v6, %v959_v24  ;;  %v890_v54 = vmul.f32 %v4311_v9, %v5390_v28 }
 0x182   :  { %v780_v46 = vadd.f32 1e-05, %v716_v50  ;;  %v601_v2 = vpop.xlane.xlu1 %600  ;;  %v703_v50 = vmul.f32 0.03125, %v5727_v18  ;;  %v704_v18 = vmul.f32 0.03125, %v5729_v42 }
 0x183   :  { %4320 = vrsqrt.f32 %v779_v34  ;;  %v717_v17 = vmul.f32 0.03125, %v601_v2  ;;  %v604_v60 = vpop.xlane.xlu0 %603  ;;  %v960_v34 = vmul.f32 %v5672_v36, %v889_v47  ;;  %v961_v42 = vmul.f32 %v5672_v36, %v890_v54 }
 0x184   :  { %4322 = vrsqrt.f32 %v764_v22  ;;  %4078 = vmatmul.mubr.msk.f32.gmra.mrb[28].mxu0 %vm102_vm0, %v1028_v26  ;;  %v718_v31 = vmul.f32 0.03125, %v604_v60 }
 0x185   :  { %1444 = vmatprep.mubr.f32.mxu0 %v8582_v41  ;;  %4324 = vrsqrt.f32 %v780_v46  ;;  %v781_v5 = vadd.f32 1e-05, %v717_v17  ;;  %v767_v17 = vadd.f32 1e-05, %v703_v50 }
 0x186   :  { %v4313_v7 = vpop.eup %4312  ;;  %v607_v51 = vpop.xlane.xlu1 %606  ;;  %4326 = vrsqrt.f32 %v765_v3 }
 0x187   :  { %v904_v55 = vmul.f32 %v4313_v7, %v5476_v32  ;;  %v4315_v52 = vpop.eup %4314  ;;  %4328 = vrsqrt.f32 %v781_v5  ;;  %v782_v32 = vadd.f32 1e-05, %v718_v31  ;;  %v719_v46 = vmul.f32 0.03125, %v607_v51  ;;  %v610_v26 = vpop.xlane.xlu0 %609 }
 0x188   :  { %4079 = vmatmul.mubr.msk.f32.gmra.mrb[30].mxu0 %vm102_vm0, %v1029_v25  ;;  %4330 = vrsqrt.f32 %v766_v58  ;;  %v891_v48 = vmul.f32 %v4315_v52, %v5393_v23  ;;  %v720_v47 = vmul.f32 0.03125, %v610_v26  ;;  %v768_v51 = vadd.f32 1e-05, %v704_v18 }
 0x189   :  { %v4317_v22 = vpop.eup %4316  ;;  %1450 = vmatprep.mubr.f32.mxu0 %v8582_v41  ;;  %v975_v57 = vmul.f32 %v5672_v36, %v904_v55  ;;  %4332 = vrsqrt.f32 %v782_v32  ;;  %v783_v24 = vadd.f32 1e-05, %v719_v46  ;;  %v705_v23 = vmul.f32 0.03125, %v5736_v10 }
 0x18a   :  { %v4319_v0 = vpop.eup %4318  ;;  %v905_v2 = vmul.f32 %v4317_v22, %v5479_v61  ;;  %v1031_v61 = vadd.f32 %v5678_v6, %v960_v34  ;;  %4334 = vrsqrt.f32 %v767_v17  ;;  %v962_v55 = vmul.f32 %v5672_v36, %v891_v48 }
 0x18b   :  { %v1046_v39 = vadd.f32 %v5678_v6, %v975_v57  ;;  %v906_v3 = vmul.f32 %v4319_v0, %v5488_v29  ;;  %v613_v29 = vpop.xlane.xlu1 %612  ;;  %4336 = vrsqrt.f32 %v783_v24  ;;  %v784_v50 = vadd.f32 1e-05, %v720_v47 }
 0x18c   :  { %4080 = vmatmul.mubr.msk.f32.gmra.mrb[32].mxu0 %vm102_vm0, %v1030_v12  ;;  %v976_v60 = vmul.f32 %v5672_v36, %v905_v2  ;;  %v721_v22 = vmul.f32 0.03125, %v613_v29  ;;  %v616_v12 = vpop.xlane.xlu0 %615  ;;  %4338 = vrsqrt.f32 %v768_v51  ;;  %v706_v0 = vmul.f32 0.03125, %v5738_v63 }
 0x18d   :  { %v4321_v28 = vpop.eup %4320  ;;  %4096 = vmatmul.mubr.msk.f32.vlgmr.msra.gmra.mrb[0].mxu1 %vm102_vm0, %v1046_v39  ;;  %1456 = vmatprep.mubr.f32.mxu0 %v8582_v41  ;;  %v977_v5 = vmul.f32 %v5672_v36, %v906_v3  ;;  %v1033_v32 = vadd.f32 %v5678_v6, %v962_v55  ;;  %4340 = vrsqrt.f32 %v784_v50  ;;  %v722_v26 = vmul.f32 0.03125, %v616_v12 }
 0x18e   :  { %v4323_v9 = vpop.eup %4322  ;;  %1552 = vmatprep.mubr.f32.mxu1 %v8582_v41  ;;  %v1047_v7 = vadd.f32 %v5678_v6, %v976_v60  ;;  %v907_v31 = vmul.f32 %v4321_v28, %v5491_v4  ;;  %v1032_v4 = vadd.f32 %v5678_v6, %v961_v42  ;;  %v785_v18 = vadd.f32 1e-05, %v721_v22 }
 0x18f   :  { %v4325_v25 = vpop.eup %4324  ;;  %v892_v52 = vmul.f32 %v4323_v9, %v5402_v37  ;;  %v1048_v57 = vadd.f32 %v5678_v6, %v977_v5  ;;  %v769_v37 = vadd.f32 1e-05, %v705_v23  ;;  %v619_v63 = vpop.xlane.xlu1 %618  ;;  %v770_v28 = vadd.f32 1e-05, %v706_v0 }
 0x190   :  { %4081 = vmatmul.mubr.msk.f32.gmra.mrb[34].mxu0 %vm102_vm0, %v1031_v61  ;;  %v4327_v58 = vpop.eup %4326  ;;  %v978_v10 = vmul.f32 %v5672_v36, %v907_v31  ;;  %v908_v34 = vmul.f32 %v4325_v25, %v5500_v8  ;;  %v707_v61 = vmul.f32 0.03125, %v5745_v40  ;;  %v786_v9 = vadd.f32 1e-05, %v722_v26  ;;  %v622_v40 = vpop.xlane.xlu0 %621 }
 0x191   :  { %4097 = vmatmul.mubr.msk.f32.gmra.mrb[2].mxu1 %vm102_vm0, %v1047_v7  ;;  %1462 = vmatprep.mubr.f32.mxu0 %v8582_v41  ;;  %v4329_v54 = vpop.eup %4328  ;;  %v963_v46 = vmul.f32 %v5672_v36, %v892_v52  ;;  %v893_v8 = vmul.f32 %v4327_v58, %v5405_v62  ;;  %4342 = vrsqrt.f32 %v769_v37  ;;  %v723_v24 = vmul.f32 0.03125, %v619_v63 }
 0x192   :  { %1558 = vmatprep.mubr.f32.mxu1 %v8582_v41  ;;  %v4331_v2 = vpop.eup %4330  ;;  %v1049_v39 = vadd.f32 %v5678_v6, %v978_v10  ;;  %v979_v17 = vmul.f32 %v5672_v36, %v908_v34  ;;  %v909_v60 = vmul.f32 %v4329_v54, %v5503_v11  ;;  %4344 = vrsqrt.f32 %v785_v18 }
 0x193   :  { %v4333_v3 = vpop.eup %4332  ;;  %v1034_v62 = vadd.f32 %v5678_v6, %v963_v46  ;;  %v894_v42 = vmul.f32 %v4331_v2, %v5416_v30  ;;  %v964_v11 = vmul.f32 %v5672_v36, %v893_v8  ;;  %4346 = vrsqrt.f32 %v770_v28  ;;  %v625_v58 = vpop.xlane.xlu1 %624 }
 0x194   :  { %4082 = vmatmul.mubr.msk.f32.gmra.mrb[36].mxu0 %vm102_vm0, %v1032_v4  ;;  %v4335_v48 = vpop.eup %4334  ;;  %v1050_v47 = vadd.f32 %v5678_v6, %v979_v17  ;;  %v980_v7 = vmul.f32 %v5672_v36, %v909_v60  ;;  %v910_v29 = vmul.f32 %v4333_v3, %v5512_v33  ;;  %v771_v31 = vadd.f32 1e-05, %v707_v61 }
 0x195   :  { %4098 = vmatmul.mubr.msk.f32.gmra.mrb[4].mxu1 %vm102_vm0, %v1048_v57  ;;  %1468 = vmatprep.mubr.f32.mxu0 %v8582_v41  ;;  %v4337_v5 = vpop.eup %4336  ;;  %v708_v30 = vmul.f32 0.03125, %v5747_v56  ;;  %v965_v25 = vmul.f32 %v5672_v36, %v894_v42  ;;  %v895_v51 = vmul.f32 %v4335_v48, %v5419_v14  ;;  %4348 = vrsqrt.f32 %v786_v9 }
 0x196   :  { %1564 = vmatprep.mubr.f32.mxu1 %v8582_v41  ;;  %v4339_v23 = vpop.eup %4338  ;;  %v787_v55 = vadd.f32 1e-05, %v723_v24  ;;  %v724_v52 = vmul.f32 0.03125, %v622_v40  ;;  %v1035_v33 = vadd.f32 %v5678_v6, %v964_v11  ;;  %v1051_v50 = vadd.f32 %v5678_v6, %v980_v7 }
 0x197   :  { %v981_v56 = vmul.f32 %v5672_v36, %v910_v29  ;;  %v911_v22 = vmul.f32 %v4337_v5, %v5515_v19  ;;  %v4341_v4 = vpop.eup %4340  ;;  %4350 = vrsqrt.f32 %v771_v31  ;;  %v709_v12 = vmul.f32 0.03125, %v5754_v59  ;;  %v628_v59 = vpop.xlane.xlu0 %627 }
 0x198   :  { %4083 = vmatmul.mubr.msk.f32.gmra.mrb[38].mxu0 %vm102_vm0, %v1033_v32  ;;  %v772_v14 = vadd.f32 1e-05, %v708_v30  ;;  %v966_v57 = vmul.f32 %v5672_v36, %v895_v51  ;;  %v896_v10 = vmul.f32 %v4339_v23, %v5428_v21  ;;  %4352 = vrsqrt.f32 %v787_v55 }
 0x199   :  { %4099 = vmatmul.mubr.msk.f32.gmra.mrb[6].mxu1 %vm102_vm0, %v1049_v39  ;;  %1474 = vmatprep.mubr.f32.mxu0 %v8582_v41  ;;  %v788_v34 = vadd.f32 1e-05, %v724_v52  ;;  %v725_v54 = vmul.f32 0.03125, %v625_v58  ;;  %v1036_v19 = vadd.f32 %v5678_v6, %v965_v25  ;;  %v1052_v37 = vadd.f32 %v5678_v6, %v981_v56 }
 0x19a   :  { %1570 = vmatprep.mubr.f32.mxu1 %v8582_v41  ;;  %v982_v32 = vmul.f32 %v5672_v36, %v911_v22  ;;  %v912_v46 = vmul.f32 %v4341_v4, %v5524_v15  ;;  %v773_v18 = vadd.f32 1e-05, %v709_v12  ;;  %v710_v26 = vmul.f32 0.03125, %v5756_v44  ;;  %v631_v44 = vpop.xlane.xlu1 %630 }
 0x19b   :  { %v4343_v0 = vpop.eup %4342  ;;  %4354 = vrsqrt.f32 %v772_v14  ;;  %v1037_v21 = vadd.f32 %v5678_v6, %v966_v57  ;;  %v967_v8 = vmul.f32 %v5672_v36, %v896_v10  ;;  %v789_v39 = vadd.f32 1e-05, %v725_v54  ;;  %v634_v40 = vpop.xlane.xlu0 %633 }
 0x19c   :  { %4084 = vmatmul.mubr.msk.f32.gmra.mrb[40].mxu0 %vm102_vm0, %v1034_v62  ;;  %v4345_v2 = vpop.eup %4344  ;;  %4356 = vrsqrt.f32 %v788_v34  ;;  %v726_v17 = vmul.f32 0.03125, %v628_v59  ;;  %v897_v15 = vmul.f32 %v4343_v0, %v5431_v45  ;;  %v1053_v60 = vadd.f32 %v5678_v6, %v982_v32 }
 0x19d   :  { %4100 = vmatmul.mubr.msk.f32.gmra.mrb[8].mxu1 %vm102_vm0, %v1050_v47  ;;  %1480 = vmatprep.mubr.f32.mxu0 %v8582_v41  ;;  %v4347_v63 = vpop.eup %4346  ;;  %v983_v3 = vmul.f32 %v5672_v36, %v912_v46  ;;  %v913_v28 = vmul.f32 %v4345_v2, %v5527_v27  ;;  %4358 = vrsqrt.f32 %v773_v18  ;;  %v774_v62 = vadd.f32 1e-05, %v710_v26  ;;  %v8587_v26 = vld [vmem:[#allocation23_spill] sm:$0xff] }
 0x19e   :  { %1576 = vmatprep.mubr.f32.mxu1 %v8582_v41  ;;  %v711_v42 = vmul.f32 0.03125, %v5765_v13  ;;  %v1038_v45 = vadd.f32 %v5678_v6, %v967_v8  ;;  %v898_v48 = vmul.f32 %v4347_v63, %v5440_v1  ;;  %4360 = vrsqrt.f32 %v789_v39  ;;  %v637_v23 = vpop.xlane.xlu1 %636 }
 0x19f   :  { %v4349_v61 = vpop.eup %4348  ;;  %v790_v24 = vadd.f32 1e-05, %v726_v17  ;;  %v727_v11 = vmul.f32 0.03125, %v631_v44  ;;  %v968_v27 = vmul.f32 %v5672_v36, %v897_v15  ;;  %v1054_v47 = vadd.f32 %v5678_v6, %v983_v3  ;;  %v640_v12 = vpop.xlane.xlu0 %639 }
 0x1a0   :  { %4085 = vmatmul.mubr.msk.f32.gmra.mrb[42].mxu0 %vm102_vm0, %v1035_v33  ;;  %v984_v13 = vmul.f32 %v5672_v36, %v913_v28  ;;  %v914_v7 = vmul.f32 %v4349_v61, %v5536_v20  ;;  %4362 = vrsqrt.f32 %v774_v62  ;;  %v775_v1 = vadd.f32 1e-05, %v711_v42 }
 0x1a1   :  { %4101 = vmatmul.mubr.msk.f32.gmra.mrb[10].mxu1 %vm102_vm0, %v1051_v50  ;;  %1486 = vmatprep.mubr.f32.mxu0 %v8582_v41  ;;  %v4351_v9 = vpop.eup %4350  ;;  %v969_v5 = vmul.f32 %v5672_v36, %v898_v48  ;;  %4364 = vrsqrt.f32 %v790_v24  ;;  %v791_v30 = vadd.f32 1e-05, %v727_v11  ;;  %v728_v25 = vmul.f32 0.03125, %v634_v40  ;;  %v8589_v48 = vld [vmem:[#allocation24_spill] sm:$0xff]  ;;  %v8590_v40 = vld [vmem:[#allocation26_spill] sm:$0xff] }
 0x1a2   :  { %1582 = vmatprep.mubr.f32.mxu1 %v8582_v41  ;;  %v4353_v29 = vpop.eup %4352  ;;  %v899_v31 = vmul.f32 %v4351_v9, %v5443_v49  ;;  %v1039_v20 = vadd.f32 %v5678_v6, %v968_v27  ;;  %v1055_v55 = vadd.f32 %v5678_v6, %v984_v13  ;;  %v985_v52 = vmul.f32 %v5672_v36, %v914_v7 }
 0x1a3   :  { %v915_v33 = vmul.f32 %v4353_v29, %v5539_v35  ;;  %4366 = vrsqrt.f32 %v775_v1  ;;  %v1040_v49 = vadd.f32 %v5678_v6, %v969_v5  ;;  %v792_v22 = vadd.f32 1e-05, %v728_v25 }
 0x1a4   :  { %4086 = vmatmul.mubr.msk.f32.gmra.mrb[44].mxu0 %vm102_vm0, %v1036_v19  ;;  %v970_v50 = vmul.f32 %v5672_v36, %v899_v31  ;;  %4368 = vrsqrt.f32 %v791_v30  ;;  %v729_v4 = vmul.f32 0.03125, %v637_v23  ;;  %v1056_v14 = vadd.f32 %v5678_v6, %v985_v52 }
 0x1a5   :  { %4102 = vmatmul.mubr.msk.f32.gmra.mrb[12].mxu1 %vm102_vm0, %v1052_v37  ;;  %1492 = vmatprep.mubr.f32.mxu0 %v8582_v41  ;;  %v4355_v51 = vpop.eup %4354  ;;  %v986_v57 = vmul.f32 %v5672_v36, %v915_v33  ;;  %4370 = vrsqrt.f32 %v792_v22  ;;  %v730_v59 = vmul.f32 0.03125, %v640_v12 }
 0x1a6   :  { %1588 = vmatprep.mubr.f32.mxu1 %v8582_v41  ;;  %v4357_v58 = vpop.eup %4356  ;;  %v900_v35 = vmul.f32 %v4355_v51, %v5452_v16  ;;  %v1041_v54 = vadd.f32 %v5678_v6, %v970_v50  ;;  %v793_v16 = vadd.f32 1e-05, %v729_v4 }
 0x1a7   :  { %v4359_v56 = vpop.eup %4358  ;;  %v916_v10 = vmul.f32 %v4357_v58, %v5548_v38  ;;  %v643_v38 = vpop.xlane.xlu1 %642  ;;  %v1057_v32 = vadd.f32 %v5678_v6, %v986_v57  ;;  %v794_v8 = vadd.f32 1e-05, %v730_v59 }
 0x1a8   :  { %4087 = vmatmul.mubr.msk.f32.gmra.mrb[46].mxu0 %vm102_vm0, %v1037_v21  ;;  %v4361_v34 = vpop.eup %4360  ;;  %v901_v19 = vmul.f32 %v4359_v56, %v5455_v53  ;;  %v971_v37 = vmul.f32 %v5672_v36, %v900_v35  ;;  %4372 = vrsqrt.f32 %v793_v16  ;;  %v731_v63 = vmul.f32 0.03125, %v643_v38  ;;  %v8592_v56 = vld [vmem:[#allocation28_spill] sm:$0xff] }
 0x1a9   :  { %4103 = vmatmul.mubr.msk.f32.gmra.mrb[14].mxu1 %vm102_vm0, %v1053_v60  ;;  %1498 = vmatprep.mubr.f32.mxu0 %v8582_v41  ;;  %v987_v46 = vmul.f32 %v5672_v36, %v916_v10  ;;  %v917_v2 = vmul.f32 %v4361_v34, %v5551_v43  ;;  %v646_v43 = vpop.xlane.xlu0 %645  ;;  %v8588_v60 = vld [vmem:[#allocation25_spill] sm:$0xff]  ;;  %4374 = vrsqrt.f32 %v794_v8 }
 0x1aa   :  { %1594 = vmatprep.mubr.f32.mxu1 %v8582_v41  ;;  %v4363_v0 = vpop.eup %4362  ;;  %v972_v53 = vmul.f32 %v5672_v36, %v901_v19  ;;  %v1042_v39 = vadd.f32 %v5678_v6, %v971_v37  ;;  %v795_v42 = vadd.f32 1e-05, %v731_v63  ;;  %v8593_v34 = vld [vmem:[#allocation5_spill] sm:$0xff]  ;;  %v8595_v63 = vld [vmem:[#allocation7_spill] sm:$0xff] }
 0x1ab   :  { %v4365_v18 = vpop.eup %4364  ;;  %v902_v21 = vmul.f32 %v4363_v0, %v8587_v26  ;;  %v1058_v15 = vadd.f32 %v5678_v6, %v987_v46  ;;  %v988_v44 = vmul.f32 %v5672_v36, %v917_v2  ;;  %v649_v24 = vpop.xlane.xlu1 %648  ;;  %v5977_v8 = vld [vmem:[%s8392_s1] ss:$0 sm:$0xff] }
 0x1ac   :  { %4088 = vmatmul.mubr.msk.f32.gmra.mrb[48].mxu0 %vm102_vm0, %v1038_v45  ;;  %v918_v3 = vmul.f32 %v4365_v18, %v8588_v60  ;;  %v1043_v61 = vadd.f32 %v5678_v6, %v972_v53  ;;  %v732_v45 = vmul.f32 0.03125, %v646_v43  ;;  %4376 = vrsqrt.f32 %v795_v42 }
 0x1ad   :  { %4104 = vmatmul.mubr.msk.f32.gmra.mrb[16].mxu1 %vm102_vm0, %v1054_v47  ;;  %1504 = vmatprep.mubr.f32.mxu0 %v8582_v41  ;;  %v4367_v17 = vpop.eup %4366  ;;  %v973_v62 = vmul.f32 %v5672_v36, %v902_v21  ;;  %v1059_v11 = vadd.f32 %v5678_v6, %v988_v44  ;;  %v733_v1 = vmul.f32 0.03125, %v649_v24  ;;  %v652_v31 = vpop.xlane.xlu0 %651 }
 0x1ae   :  { %1600 = vmatprep.mubr.f32.mxu1 %v8582_v41  ;;  %v4369_v28 = vpop.eup %4368  ;;  %v903_v9 = vmul.f32 %v4367_v17, %v8589_v48  ;;  %v989_v27 = vmul.f32 %v5672_v36, %v918_v3  ;;  %v796_v29 = vadd.f32 1e-05, %v732_v45  ;;  %v734_v52 = vmul.f32 0.03125, %v652_v31 }
 0x1af   :  { %v919_v47 = vmul.f32 %v4369_v28, %v8590_v40  ;;  %v4371_v13 = vpop.eup %4370  ;;  %v1044_v7 = vadd.f32 %v5678_v6, %v973_v62  ;;  %v655_v58 = vpop.xlane.xlu1 %654  ;;  %v8596_v28 = vld [vmem:[#allocation8_spill] sm:$0xff] }
 0x1b0   :  { %4089 = vmatmul.mubr.msk.f32.gmra.mrb[50].mxu0 %vm102_vm0, %v1039_v20  ;;  %v974_v5 = vmul.f32 %v5672_v36, %v903_v9  ;;  %v1060_v30 = vadd.f32 %v5678_v6, %v989_v27  ;;  %v8591_v20 = vld [vmem:[#allocation27_spill] sm:$0xff]  ;;  %4378 = vrsqrt.f32 %v796_v29  ;;  %v798_v35 = vadd.f32 1e-05, %v734_v52 }
 0x1b1   :  { %4105 = vmatmul.mubr.msk.f32.gmra.mrb[18].mxu1 %vm102_vm0, %v1055_v55  ;;  %1510 = vmatprep.mubr.f32.mxu0 %v8582_v41  ;;  %v990_v25 = vmul.f32 %v5672_v36, %v919_v47  ;;  %v920_v51 = vmul.f32 %v4371_v13, %v8591_v20  ;;  %v797_v55 = vadd.f32 1e-05, %v733_v1  ;;  %v735_v12 = vmul.f32 0.03125, %v655_v58  ;;  %v8599_v52 = vld [vmem:[#allocation11_spill] sm:$0xff] }
 0x1b2   :  { %1606 = vmatprep.mubr.f32.mxu1 %v8582_v41  ;;  %v4373_v23 = vpop.eup %4372  ;;  %v1045_v33 = vadd.f32 %v5678_v6, %v974_v5  ;;  %v8598_v5 = vld [vmem:[#allocation10_spill] sm:$0xff] }
 0x1b3   :  { %v991_v50 = vmul.f32 %v5672_v36, %v920_v51  ;;  %v921_v22 = vmul.f32 %v4373_v23, %v8592_v56  ;;  %v4375_v4 = vpop.eup %4374  ;;  %4380 = vrsqrt.f32 %v797_v55  ;;  %v799_v0 = vadd.f32 1e-05, %v735_v12  ;;  %v661_v59 = vpop.xlane.xlu1 %660 }
 0x1b4   :  { %4090 = vmatmul.mubr.msk.f32.gmra.mrb[52].mxu0 %vm102_vm0, %v1040_v49  ;;  %v1061_v49 = vadd.f32 %v5678_v6, %v990_v25  ;;  %4382 = vrsqrt.f32 %v798_v35  ;;  %v737_v53 = vmul.f32 0.03125, %v661_v59  ;;  %v8600_v35 = vld [vmem:[#allocation12_spill] sm:$0xff] }
 0x1b5   :  { %4106 = vmatmul.mubr.msk.f32.gmra.mrb[20].mxu1 %vm102_vm0, %v1056_v14  ;;  %1516 = vmatprep.mubr.f32.mxu0 %v8582_v41  ;;  %v658_v14 = vpop.xlane.xlu0 %657  ;;  %v1062_v57 = vadd.f32 %v5678_v6, %v991_v50  ;;  %v992_v10 = vmul.f32 %v5672_v36, %v921_v22  ;;  %4384 = vrsqrt.f32 %v799_v0 }
 0x1b6   :  { %1612 = vmatprep.mubr.f32.mxu1 %v8582_v41  ;;  %v4377_v19 = vpop.eup %4376  ;;  %v736_v16 = vmul.f32 0.03125, %v658_v14  ;;  %v801_v43 = vadd.f32 1e-05, %v737_v53 }
 0x1b7   :  { %v1063_v37 = vadd.f32 %v5678_v6, %v992_v10  ;;  %v667_v44 = vpop.xlane.xlu1 %666 }
 0x1b8   :  { %4091 = vmatmul.mubr.msk.f32.gmra.mrb[54].mxu0 %vm102_vm0, %v1041_v54  ;;  %v922_v54 = vmul.f32 %v4375_v4, %v8593_v34  ;;  %v800_v18 = vadd.f32 1e-05, %v736_v16  ;;  %v739_v45 = vmul.f32 0.03125, %v667_v44 }
 0x1b9   :  { %4107 = vmatmul.mubr.msk.f32.gmra.mrb[22].mxu1 %vm102_vm0, %v1057_v32  ;;  %1522 = vmatprep.mubr.f32.mxu0 %v8582_v41  ;;  %v8594_v32 = vld [vmem:[#allocation6_spill] sm:$0xff]  ;;  %v664_v26 = vpop.xlane.xlu0 %663 }
 0x1ba   :  { %1618 = vmatprep.mubr.f32.mxu1 %v8582_v41  ;;  %v993_v38 = vmul.f32 %v5672_v36, %v922_v54  ;;  %v923_v46 = vmul.f32 %v4377_v19, %v8594_v32  ;;  %v4379_v2 = vpop.eup %4378  ;;  %4386 = vrsqrt.f32 %v800_v18  ;;  %v803_v47 = vadd.f32 1e-05, %v739_v45  ;;  %v8601_v19 = vld [vmem:[#allocation13_spill] sm:$0xff]  ;;  %v8602_v32 = vld [vmem:[#allocation14_spill] sm:$0xff] }
 0x1bb   :  { %4388 = vrsqrt.f32 %v801_v43  ;;  %v8606_v45 = vld [vmem:[#allocation29_spill] sm:$0xff] }
 0x1bc   :  { %4092 = vmatmul.mubr.msk.f32.gmra.mrb[56].mxu0 %vm102_vm0, %v1042_v39  ;;  %v1064_v21 = vadd.f32 %v5678_v6, %v993_v38  ;;  %v994_v36 = vmul.f32 %v5977_v8, %v923_v46  ;;  %v924_v39 = vmul.f32 %v4379_v2, %v8595_v63  ;;  %v5986_v6 = vld [vmem:[%s8393_s2] ss:$0 sm:$0xff] }
 0x1bd   :  { %4108 = vmatmul.mubr.msk.f32.gmra.mrb[24].mxu1 %vm102_vm0, %v1058_v15  ;;  %1528 = vmatprep.mubr.f32.mxu0 %v8582_v41  ;;  %v4381_v17 = vpop.eup %4380  ;;  %v738_v15 = vmul.f32 0.03125, %v664_v26  ;;  %v670_v48 = vpop.xlane.xlu0 %669  ;;  %v8603_v26 = vld [vmem:[#allocation15_spill] sm:$0xff] }
 0x1be   :  { %1624 = vmatprep.mubr.f32.mxu1 %v8582_v41  ;;  %v1065_v60 = vadd.f32 %v5986_v6, %v994_v36  ;;  %v995_v3 = vmul.f32 %v5977_v8, %v924_v39  ;;  %v4383_v62 = vpop.eup %4382  ;;  %v740_v13 = vmul.f32 0.03125, %v670_v48 }
 0x1bf   :  { %v802_v42 = vadd.f32 1e-05, %v738_v15  ;;  %v4385_v40 = vpop.eup %4384 }
 0x1c0   :  { %4093 = vmatmul.mubr.msk.f32.gmra.mrb[58].mxu0 %vm102_vm0, %v1043_v61  ;;  %v925_v61 = vmul.f32 %v4381_v17, %v8596_v28  ;;  %v1066_v9 = vadd.f32 %v5986_v6, %v995_v3  ;;  %v927_v31 = vmul.f32 %v4385_v40, %v8598_v5  ;;  %v804_v25 = vadd.f32 1e-05, %v740_v13  ;;  %v8604_v17 = vld [vmem:[#allocation16_spill] sm:$0xff]  ;;  %v8605_v3 = vld [vmem:[#allocation17_spill] sm:$0xff] }
 0x1c1   :  { %4109 = vmatmul.mubr.msk.f32.gmra.mrb[26].mxu1 %vm102_vm0, %v1059_v11  ;;  %1534 = vmatprep.mubr.f32.mxu0 %v8582_v41  ;;  %v8597_v11 = vld [vmem:[#allocation9_spill] sm:$0xff]  ;;  %4390 = vrsqrt.f32 %v802_v42  ;;  %v676_v51 = vpop.xlane.xlu0 %675 }
 0x1c2   :  { %1630 = vmatprep.mubr.f32.mxu1 %v8582_v41  ;;  %v996_v24 = vmul.f32 %v5977_v8, %v925_v61  ;;  %v926_v27 = vmul.f32 %v4383_v62, %v8597_v11  ;;  %4392 = vrsqrt.f32 %v803_v47  ;;  %v998_v55 = vmul.f32 %v5977_v8, %v927_v31  ;;  %v1086_v13 = vld [vmem:[%s8395_s4] sm:$0x3]  ;;  %s4944_s4 = smov 96  }
 0x1c3   :  { %4394 = vrsqrt.f32 %v804_v25  ;;  %v742_v50 = vmul.f32 0.03125, %v676_v51 }
 0x1c4   :  { %4094 = vmatmul.mubr.msk.f32.gmra.mrb[60].mxu0 %vm102_vm0, %v1044_v7  ;;  %v673_v7 = vpop.xlane.xlu1 %672  ;;  %v1067_v29 = vadd.f32 %v5986_v6, %v996_v24  ;;  %v997_v1 = vmul.f32 %v5977_v8, %v926_v27  ;;  %v1069_v22 = vadd.f32 %v5986_v6, %v998_v55  ;;  %v1088_v27 = vlaneseq }
 0x1c5   :  { %4110 = vmatmul.mubr.msk.f32.gmra.mrb[28].mxu1 %vm102_vm0, %v1060_v30  ;;  %1540 = vmatprep.mubr.f32.mxu0 %v8582_v41  ;;  %v4387_v30 = vpop.eup %4386  ;;  %v741_v20 = vmul.f32 0.03125, %v673_v7 }
 0x1c6   :  { %1636 = vmatprep.mubr.f32.mxu1 %v8582_v41  ;;  %v1068_v23 = vadd.f32 %v5986_v6, %v997_v1  ;;  %v4389_v58 = vpop.eup %4388  ;;  %v1089_v40 = vshrl.u32 %v1088_v27, 7 }
 0x1c7   :  { %v929_v12 = vmul.f32 %v4389_v58, %v8600_v35 }
 0x1c8   :  { %4095 = vmatmul.mubr.msk.f32.gmra.mrb[62].mxu0 %vm102_vm0, %v1045_v33  ;;  %v928_v33 = vmul.f32 %v4387_v30, %v8599_v52  ;;  %v679_v56 = vpop.xlane.xlu1 %678  ;;  %v1090_v47 = vsub.s32 0, %v1089_v40  ;;  %v1094_v7 = vsub.s32 1, %v1089_v40 }
 0x1c9   :  { %4111 = vmatmul.mubr.msk.f32.gmra.mrb[30].mxu1 %vm102_vm0, %v1061_v49  ;;  %v805_v49 = vadd.f32 1e-05, %v741_v20  ;;  %v743_v10 = vmul.f32 0.03125, %v679_v56  ;;  %v1000_v54 = vmul.f32 %v5977_v8, %v929_v12 }
 0x1ca   :  { %1642 = vmatprep.mubr.f32.mxu1 %v8582_v41  ;;  %v999_v4 = vmul.f32 %v5977_v8, %v928_v33  ;;  %v6054_v1 = vrot.slane %v1086_v13, %v1094_v7 }
 0x1cb   :  { %v4391_v14 = vpop.eup %4390  ;;  %4396 = vrsqrt.f32 %v805_v49  ;;  %v807_v59 = vadd.f32 1e-05, %v743_v10 }
 0x1cc   :  { %v1070_v34 = vadd.f32 %v5986_v6, %v999_v4  ;;  %v930_v0 = vmul.f32 %v4391_v14, %v8601_v19  ;;  %v4393_v16 = vpop.eup %4392 }
 0x1cd   :  { %4112 = vmatmul.mubr.msk.f32.gmra.mrb[32].mxu1 %vm102_vm0, %v1062_v57  ;;  %v806_v57 = vadd.f32 1e-05, %v742_v50  ;;  %v931_v46 = vmul.f32 %v4393_v16, %v8602_v32  ;;  %v4395_v2 = vpop.eup %4394 }
 0x1ce   :  { %1648 = vmatprep.mubr.f32.mxu1 %v8582_v41  ;;  %v1001_v38 = vmul.f32 %v5977_v8, %v930_v0 }
 0x1cf   :  { %4398 = vrsqrt.f32 %v806_v57  ;;  %v1002_v53 = vmul.f32 %v5977_v8, %v931_v46 }
 0x1d0   :  { %4400 = vrsqrt.f32 %v807_v59  ;;  %v1072_v18 = vadd.f32 %v5986_v6, %v1001_v38 }
 0x1d1   :  { %4113 = vmatmul.mubr.msk.f32.gmra.mrb[34].mxu1 %vm102_vm0, %v1063_v37  ;;  %v1071_v37 = vadd.f32 %v5986_v6, %v1000_v54  ;;  %v1073_v63 = vadd.f32 %v5986_v6, %v1002_v53 }
 0x1d2   :  { %1654 = vmatprep.mubr.f32.mxu1 %v8582_v41 }
 0x1d5   :  { %4114 = vmatmul.mubr.msk.f32.gmra.mrb[36].mxu1 %vm102_vm0, %v1064_v21  ;;  %v932_v21 = vmul.f32 %v4395_v2, %v8603_v26  ;;  %v4397_v36 = vpop.eup %4396 }
 0x1d6   :  { %1660 = vmatprep.mubr.f32.mxu1 %v8582_v41  ;;  %v933_v43 = vmul.f32 %v4397_v36, %v8604_v17 }
 0x1d7   :  { %v1003_v39 = vmul.f32 %v5977_v8, %v932_v21 }
 0x1d9   :  { %4115 = vmatmul.mubr.msk.f32.gmra.mrb[38].mxu1 %vm102_vm0, %v1065_v60  ;;  %v4399_v15 = vpop.eup %4398  ;;  %v1074_v44 = vadd.f32 %v5986_v6, %v1003_v39  ;;  %v1004_v60 = vmul.f32 %v5977_v8, %v933_v43 }
 0x1da   :  { %1666 = vmatprep.mubr.f32.mxu1 %v8582_v41  ;;  %v934_v28 = vmul.f32 %v4399_v15, %v8605_v3  ;;  %v4401_v61 = vpop.eup %4400 }
 0x1db   :  { %v1075_v62 = vadd.f32 %v5986_v6, %v1004_v60  ;;  %v935_v48 = vmul.f32 %v4401_v61, %v8606_v45 }
 0x1dc   :  { %v1005_v42 = vmul.f32 %v5977_v8, %v934_v28 }
 0x1dd   :  { %4116 = vmatmul.mubr.msk.f32.gmra.mrb[40].mxu1 %vm102_vm0, %v1066_v9  ;;  %v1006_v24 = vmul.f32 %v5977_v8, %v935_v48 }
 0x1de   :  { %1672 = vmatprep.mubr.f32.mxu1 %v8582_v41  ;;  %v1076_v9 = vadd.f32 %v5986_v6, %v1005_v42 }
 0x1df   :  { %v1077_v11 = vadd.f32 %v5986_v6, %v1006_v24 }
 0x1e1   :  { %4117 = vmatmul.mubr.msk.f32.gmra.mrb[42].mxu1 %vm102_vm0, %v1067_v29  ;;  %v6052_v29 = vrot.slane %v1086_v13, %v1090_v47 }
 0x1e2   :  { %1678 = vmatprep.mubr.f32.mxu1 %v8582_v41 }
 0x1e5   :  { %4118 = vmatmul.mubr.msk.f32.gmra.mrb[44].mxu1 %vm102_vm0, %v1068_v23 }
 0x1e6   :  { %1684 = vmatprep.mubr.f32.mxu1 %v8582_v41 }
 0x1e9   :  { %4119 = vmatmul.mubr.msk.f32.gmra.mrb[46].mxu1 %vm102_vm0, %v1069_v22 }
 0x1ea   :  { %1690 = vmatprep.mubr.f32.mxu1 %v8582_v41 }
 0x1ed   :  { %4120 = vmatmul.mubr.msk.f32.gmra.mrb[48].mxu1 %vm102_vm0, %v1070_v34 }
 0x1ee   :  { %1696 = vmatprep.mubr.f32.mxu1 %v8582_v41 }
 0x1f1   :  { %4121 = vmatmul.mubr.msk.f32.gmra.mrb[50].mxu1 %vm102_vm0, %v1071_v37 }
 0x1f2   :  { %1702 = vmatprep.mubr.f32.mxu1 %v8582_v41 }
 0x1f5   :  { %4122 = vmatmul.mubr.msk.f32.gmra.mrb[52].mxu1 %vm102_vm0, %v1072_v18 }
 0x1f6   :  { %1708 = vmatprep.mubr.f32.mxu1 %v8582_v41 }
 0x1f9   :  { %4123 = vmatmul.mubr.msk.f32.gmra.mrb[54].mxu1 %vm102_vm0, %v1073_v63 }
 0x1fa   :  { %1714 = vmatprep.mubr.f32.mxu1 %v8582_v41 }
 0x1fd   :  { %4124 = vmatmul.mubr.msk.f32.gmra.mrb[56].mxu1 %vm102_vm0, %v1074_v44 }
 0x1fe   :  { %1720 = vmatprep.mubr.f32.mxu1 %v8582_v41 }
 0x201   :  { %4125 = vmatmul.mubr.msk.f32.gmra.mrb[58].mxu1 %vm102_vm0, %v1075_v62 }
 0x202   :  { %1726 = vmatprep.mubr.f32.mxu1 %v8582_v41 }
 0x205   :  { %4126 = vmatmul.mubr.msk.f32.gmra.mrb[60].mxu1 %vm102_vm0, %v1076_v9 }
 0x206   :  { %1732 = vmatprep.mubr.f32.mxu1 %v8582_v41 }
 0x209   :  { %4127 = vmatmul.mubr.msk.f32.gmra.mrb[62].mxu1 %vm102_vm0, %v1077_v11 }
 0x21f   :  { %v1356_v8 = vpop.f32.mrb[0].mxu0 }
 0x220   :  { %v6057_v5 = vadd.f32 %v1356_v8, %v6052_v29  ;;  %v1358_v41 = vpop.f32.mrb[1].mxu0 }
 0x221   :  { %v1359_v6 = vadd.f32 %v1358_v41, %v6054_v1 }
 0x222   :  { %v4128_v31 = vmul.f32 -1.442695, %v6057_v5 }
 0x223   :  { %v4192_v30 = vmul.f32 -1.442695, %v1359_v6  ;;  %v1362_v25 = vpop.f32.mrb[2].mxu0 }
 0x224   :  { %4402 = vpow2.f32 %v4128_v31  ;;  %v6062_v20 = vadd.f32 %v1362_v25, %v6052_v29  ;;  %v1364_v51 = vpop.f32.mrb[3].mxu0 }
 0x225   :  { %4404 = vpow2.f32 %v4192_v30  ;;  %v1365_v23 = vadd.f32 %v1364_v51, %v6054_v1 }
 0x226   :  { %v4129_v55 = vmul.f32 -1.442695, %v6062_v20 }
 0x227   :  { %v4193_v52 = vmul.f32 -1.442695, %v1365_v23  ;;  %v1368_v33 = vpop.f32.mrb[4].mxu0 }
 0x228   :  { %4406 = vpow2.f32 %v4129_v55  ;;  %v6067_v58 = vadd.f32 %v1368_v33, %v6052_v29  ;;  %v1370_v49 = vpop.f32.mrb[5].mxu0 }
 0x229   :  { %4408 = vpow2.f32 %v4193_v52  ;;  %v1371_v50 = vadd.f32 %v1370_v49, %v6054_v1 }
 0x22a   :  { %8607 = vst [vmem:[#allocation18_spill] sm:$0xff] %v6067_v58  ;;  %v4130_v4 = vmul.f32 -1.442695, %v6067_v58 }
 0x22b   :  { %v4194_v56 = vmul.f32 -1.442695, %v1371_v50  ;;  %v1374_v22 = vpop.f32.mrb[6].mxu0 }
 0x22c   :  { %v6072_v35 = vadd.f32 %v1374_v22, %v6052_v29  ;;  %v1376_v12 = vpop.f32.mrb[7].mxu0 }
 0x22d   :  { %4410 = vpow2.f32 %v4194_v56  ;;  %v1377_v14 = vadd.f32 %v1376_v12, %v6054_v1 }
 0x22e   :  { %8608 = vst [vmem:[#allocation19_spill] sm:$0xff] %v6072_v35  ;;  %v4403_v57 = vpop.eup %4402  ;;  %4412 = vpow2.f32 %v4130_v4  ;;  %v4131_v16 = vmul.f32 -1.442695, %v6072_v35 }
 0x22f   :  { %v4405_v10 = vpop.eup %4404  ;;  %v1931_v34 = vadd.f32 1.0, %v4403_v57  ;;  %v4195_v54 = vmul.f32 -1.442695, %v1377_v14  ;;  %v1380_v19 = vpop.f32.mrb[8].mxu0 }
 0x230   :  { %v2635_v0 = vadd.f32 1.0, %v4405_v10  ;;  %v6077_v59 = vadd.f32 %v1380_v19, %v6052_v29  ;;  %v1382_v37 = vpop.f32.mrb[9].mxu0 }
 0x231   :  { %4414 = vrcp.f32 %v1931_v34  ;;  %v1383_v38 = vadd.f32 %v1382_v37, %v6054_v1 }
 0x232   :  { %8609 = vst [vmem:[#allocation20_spill] sm:$0xff] %v6077_v59  ;;  %v4407_v32 = vpop.eup %4406  ;;  %4416 = vrcp.f32 %v2635_v0  ;;  %v4132_v21 = vmul.f32 -1.442695, %v6077_v59 }
 0x233   :  { %v4409_v46 = vpop.eup %4408  ;;  %v1932_v2 = vadd.f32 1.0, %v4407_v32  ;;  %4418 = vpow2.f32 %v4195_v54  ;;  %v4196_v18 = vmul.f32 -1.442695, %v1383_v38  ;;  %v1386_v53 = vpop.f32.mrb[10].mxu0 }
 0x234   :  { %v2636_v26 = vadd.f32 1.0, %v4409_v46  ;;  %4420 = vpow2.f32 %v4131_v16  ;;  %v1388_v36 = vpop.f32.mrb[11].mxu0  ;;  %v6082_v63 = vadd.f32 %v1386_v53, %v6052_v29 }
 0x235   :  { %4422 = vrcp.f32 %v1932_v2  ;;  %v1389_v39 = vadd.f32 %v1388_v36, %v6054_v1 }
 0x236   :  { %8610 = vst [vmem:[#allocation21_spill] sm:$0xff] %v6082_v63  ;;  %4424 = vrcp.f32 %v2636_v26  ;;  %v4133_v28 = vmul.f32 -1.442695, %v6082_v63 }
 0x237   :  { %v4411_v17 = vpop.eup %4410  ;;  %4426 = vpow2.f32 %v4196_v18  ;;  %v4197_v43 = vmul.f32 -1.442695, %v1389_v39  ;;  %v1392_v15 = vpop.f32.mrb[12].mxu0 }
 0x238   :  { %v2637_v44 = vadd.f32 1.0, %v4411_v17  ;;  %4428 = vpow2.f32 %v4132_v21  ;;  %v6086_v60 = vadd.f32 %v1392_v15, %v6052_v29  ;;  %v1394_v3 = vpop.f32.mrb[13].mxu0  ;;  %v4413_v62 = vpop.eup %4412 }
 0x239   :  { %v1395_v61 = vadd.f32 %v1394_v3, %v6054_v1  ;;  %v1933_v47 = vadd.f32 1.0, %v4413_v62 }
 0x23a   :  { %8611 = vst [vmem:[#allocation22_spill] sm:$0xff] %v6086_v60  ;;  %4430 = vrcp.f32 %v2637_v44  ;;  %v4134_v45 = vmul.f32 -1.442695, %v6086_v60 }
 0x23b   :  { %v4415_v42 = vpop.eup %4414  ;;  %4432 = vpow2.f32 %v4197_v43  ;;  %v4198_v48 = vmul.f32 -1.442695, %v1395_v61  ;;  %v1398_v9 = vpop.f32.mrb[14].mxu0 }
 0x23c   :  { %v4417_v24 = vpop.eup %4416  ;;  %v6092_v11 = vadd.f32 %v1398_v9, %v6052_v29  ;;  %2187 = vrot.lane.b32.xlu0 %v4415_v42, %s4944_s4  ;;  %v1400_v27 = vpop.f32.mrb[15].mxu0  ;;  %4434 = vpow2.f32 %v4133_v28 }
 0x23d   :  { %v4419_v40 = vpop.eup %4418  ;;  %2827 = vst.msk [vmem:[%s8398_s7] sm:$0xff] %vm102_vm0, %v4417_v24  ;;  %v1401_v13 = vadd.f32 %v1400_v27, %v6054_v1  ;;  %4436 = vpow2.f32 %v4198_v48 }
 0x23e   :  { %8612 = vst [vmem:[#allocation23_spill] sm:$0xff] %v6092_v11  ;;  %v4421_v7 = vpop.eup %4420  ;;  %v2638_v8 = vadd.f32 1.0, %v4419_v40  ;;  %v4135_v41 = vmul.f32 -1.442695, %v6092_v11  ;;  %4438 = vpow2.f32 %v4134_v45 }
 0x23f   :  { %v4423_v6 = vpop.eup %4422  ;;  %v4199_v31 = vmul.f32 -1.442695, %v1401_v13  ;;  %v1404_v30 = vpop.f32.mrb[16].mxu0  ;;  %v1934_v52 = vadd.f32 1.0, %v4421_v7 }
 0x240   :  { %v4425_v25 = vpop.eup %4424  ;;  %4440 = vrcp.f32 %v2638_v8  ;;  %v6102_v51 = vadd.f32 %v1404_v30, %v6052_v29  ;;  %2189 = vrot.lane.b32.xlu1 %v4423_v6, %s4944_s4  ;;  %v1406_v23 = vpop.f32.mrb[17].mxu0 }
 0x241   :  { %v4427_v55 = vpop.eup %4426  ;;  %2828 = vst.msk [vmem:[%s8398_s7 + $0x8] sm:$0xff] %vm102_vm0, %v4425_v25  ;;  %4442 = vrcp.f32 %v1933_v47  ;;  %v1407_v33 = vadd.f32 %v1406_v23, %v6054_v1 }
 0x242   :  { %8613 = vst [vmem:[#allocation25_spill] sm:$0xff] %v6102_v51  ;;  %v4429_v49 = vpop.eup %4428  ;;  %v2639_v50 = vadd.f32 1.0, %v4427_v55  ;;  %4444 = vpow2.f32 %v4135_v41  ;;  %v4136_v56 = vmul.f32 -1.442695, %v6102_v51 }
 0x243   :  { %4446 = vpow2.f32 %v4199_v31  ;;  %v4200_v22 = vmul.f32 -1.442695, %v1407_v33  ;;  %v1410_v4 = vpop.f32.mrb[18].mxu0  ;;  %v1935_v34 = vadd.f32 1.0, %v4429_v49 }
 0x244   :  { %v4431_v12 = vpop.eup %4430  ;;  %4448 = vrcp.f32 %v2639_v50  ;;  %v6112_v14 = vadd.f32 %v1410_v4, %v6052_v29  ;;  %v1412_v57 = vpop.f32.mrb[19].mxu0 }
 0x245   :  { %v4433_v10 = vpop.eup %4432  ;;  %2829 = vst.msk [vmem:[%s8398_s7 + $0x10] sm:$0xff] %vm102_vm0, %v4431_v12  ;;  %4450 = vrcp.f32 %v1934_v52  ;;  %v1413_v54 = vadd.f32 %v1412_v57, %v6054_v1 }
 0x246   :  { %8614 = vst [vmem:[#allocation24_spill] sm:$0xff] %v6112_v14  ;;  %v2640_v19 = vadd.f32 1.0, %v4433_v10  ;;  %4452 = vpow2.f32 %v4136_v56  ;;  %v4137_v0 = vmul.f32 -1.442695, %v6112_v14  ;;  %v4435_v16 = vpop.eup %4434 }
 0x247   :  { %4454 = vpow2.f32 %v4200_v22  ;;  %v1416_v37 = vpop.f32.mrb[20].mxu0  ;;  %v4437_v38 = vpop.eup %4436  ;;  %v4201_v32 = vmul.f32 -1.442695, %v1413_v54  ;;  %v1936_v17 = vadd.f32 1.0, %v4435_v16 }
 0x248   :  { %4456 = vrcp.f32 %v2640_v19  ;;  %v6121_v46 = vadd.f32 %v1416_v37, %v6052_v29  ;;  %v1418_v2 = vpop.f32.mrb[21].mxu0  ;;  %v4439_v18 = vpop.eup %4438  ;;  %v2641_v53 = vadd.f32 1.0, %v4437_v38 }
 0x249   :  { %4458 = vrcp.f32 %v1935_v34  ;;  %v1419_v26 = vadd.f32 %v1418_v2, %v6054_v1  ;;  %v1937_v62 = vadd.f32 1.0, %v4439_v18 }
 0x24a   :  { %8615 = vst [vmem:[#allocation26_spill] sm:$0xff] %v6121_v46  ;;  %v4441_v21 = vpop.eup %4440  ;;  %4460 = vpow2.f32 %v4137_v0  ;;  %v4138_v36 = vmul.f32 -1.442695, %v6121_v46 }
 0x24b   :  { %v6125_v39 = vpop.eup %4442  ;;  %2830 = vst.msk [vmem:[%s8398_s7 + $0x18] sm:$0xff] %vm102_vm0, %v4441_v21  ;;  %4462 = vrcp.f32 %v2641_v53  ;;  %v4202_v43 = vmul.f32 -1.442695, %v1419_v26  ;;  %v1422_v15 = vpop.f32.mrb[22].mxu0 }
 0x24c   :  { %v4445_v44 = vpop.eup %4444  ;;  %4464 = vpow2.f32 %v4201_v32  ;;  %v6132_v3 = vadd.f32 %v1422_v15, %v6052_v29  ;;  %v1424_v28 = vpop.f32.mrb[23].mxu0 }
 0x24d   :  { %v4447_v61 = vpop.eup %4446  ;;  %4466 = vpow2.f32 %v4138_v36  ;;  %v1425_v42 = vadd.f32 %v1424_v28, %v6054_v1  ;;  %v1938_v41 = vadd.f32 1.0, %v4445_v44 }
 0x24e   :  { %8616 = vst [vmem:[#allocation27_spill] sm:$0xff] %v6132_v3  ;;  %v4449_v45 = vpop.eup %4448  ;;  %v2642_v48 = vadd.f32 1.0, %v4447_v61  ;;  %4468 = vpow2.f32 %v4202_v43  ;;  %v4139_v24 = vmul.f32 -1.442695, %v6132_v3 }
 0x24f   :  { %v6135_v9 = vpop.eup %4450  ;;  %2831 = vst.msk [vmem:[%s8398_s7 + $0x20] sm:$0xff] %vm102_vm0, %v4449_v45  ;;  %4470 = vrcp.f32 %v1936_v17  ;;  %v4203_v27 = vmul.f32 -1.442695, %v1425_v42  ;;  %v1428_v40 = vpop.f32.mrb[24].mxu0 }
 0x250   :  { %v4453_v47 = vpop.eup %4452  ;;  %4472 = vrcp.f32 %v2642_v48  ;;  %v6143_v13 = vadd.f32 %v1428_v40, %v6052_v29  ;;  %v1430_v7 = vpop.f32.mrb[25].mxu0 }
 0x251   :  { %v4455_v8 = vpop.eup %4454  ;;  %4474 = vrcp.f32 %v1937_v62  ;;  %v1431_v6 = vadd.f32 %v1430_v7, %v6054_v1  ;;  %v1939_v23 = vadd.f32 1.0, %v4453_v47 }
 0x252   :  { %8617 = vst [vmem:[#allocation28_spill] sm:$0xff] %v6143_v13  ;;  %v4457_v31 = vpop.eup %4456  ;;  %v2643_v30 = vadd.f32 1.0, %v4455_v8  ;;  %4476 = vpow2.f32 %v4203_v27  ;;  %v4140_v49 = vmul.f32 -1.442695, %v6143_v13 }
 0x253   :  { %v6146_v25 = vpop.eup %4458  ;;  %2832 = vst.msk [vmem:[%s8398_s7 + $0x28] sm:$0xff] %vm102_vm0, %v4457_v31  ;;  %4478 = vpow2.f32 %v4139_v24  ;;  %v4204_v55 = vmul.f32 -1.442695, %v1431_v6  ;;  %v1434_v52 = vpop.f32.mrb[26].mxu0 }
 0x254   :  { %v4461_v33 = vpop.eup %4460  ;;  %4480 = vrcp.f32 %v2643_v30  ;;  %v6154_v50 = vadd.f32 %v1434_v52, %v6052_v29  ;;  %v1436_v56 = vpop.f32.mrb[27].mxu0 }
 0x255   :  { %v4463_v22 = vpop.eup %4462  ;;  %4482 = vrcp.f32 %v1938_v41  ;;  %v1437_v4 = vadd.f32 %v1436_v56, %v6054_v1  ;;  %v1940_v38 = vadd.f32 1.0, %v4461_v33 }
 0x256   :  { %8618 = vst [vmem:[#allocation5_spill] sm:$0xff] %v6154_v50  ;;  %v4465_v12 = vpop.eup %4464  ;;  %2833 = vst.msk [vmem:[%s8398_s7 + $0x30] sm:$0xff] %vm102_vm0, %v4463_v22  ;;  %4484 = vpow2.f32 %v4204_v55  ;;  %v4141_v57 = vmul.f32 -1.442695, %v6154_v50 }
 0x257   :  { %v4467_v10 = vpop.eup %4466  ;;  %4486 = vrcp.f32 %v1939_v23  ;;  %v2644_v34 = vadd.f32 1.0, %v4465_v12  ;;  %v1440_v54 = vpop.f32.mrb[28].mxu0  ;;  %v4205_v0 = vmul.f32 -1.442695, %v1437_v4 }
 0x258   :  { %v4469_v19 = vpop.eup %4468  ;;  %4488 = vpow2.f32 %v4140_v49  ;;  %v1442_v16 = vpop.f32.mrb[29].mxu0  ;;  %v1941_v53 = vadd.f32 1.0, %v4467_v10  ;;  %v6166_v26 = vadd.f32 %v1440_v54, %v6052_v29 }
 0x259   :  { %v6162_v37 = vpop.eup %4470  ;;  %4490 = vrcp.f32 %v2644_v34  ;;  %v2645_v32 = vadd.f32 1.0, %v4469_v19  ;;  %v1443_v2 = vadd.f32 %v1442_v16, %v6054_v1 }
 0x25a   :  { %v4473_v18 = vpop.eup %4472  ;;  %4492 = vpow2.f32 %v4141_v57  ;;  %8619 = vst [vmem:[#allocation6_spill] sm:$0xff] %v6166_v26  ;;  %v4142_v42 = vmul.f32 -1.442695, %v6166_v26 }
 0x25b   :  { %v6168_v21 = vpop.eup %4474  ;;  %2834 = vst.msk [vmem:[%s8398_s7 + $0x38] sm:$0xff] %vm102_vm0, %v4473_v18  ;;  %4494 = vrcp.f32 %v2645_v32  ;;  %v1446_v36 = vpop.f32.mrb[30].mxu0  ;;  %v4206_v43 = vmul.f32 -1.442695, %v1443_v2 }
 0x25c   :  { %v4477_v17 = vpop.eup %4476  ;;  %4496 = vpow2.f32 %v4205_v0  ;;  %v1448_v15 = vpop.f32.mrb[31].mxu0  ;;  %v6177_v45 = vadd.f32 %v1446_v36, %v6052_v29 }
 0x25d   :  { %v4479_v44 = vpop.eup %4478  ;;  %4498 = vrcp.f32 %v1940_v38  ;;  %v2646_v28 = vadd.f32 1.0, %v4477_v17  ;;  %v1449_v61 = vadd.f32 %v1448_v15, %v6054_v1 }
 0x25e   :  { %v4481_v62 = vpop.eup %4480  ;;  %4500 = vrcp.f32 %v1941_v53  ;;  %8620 = vst [vmem:[#allocation7_spill] sm:$0xff] %v6177_v45  ;;  %v1942_v41 = vadd.f32 1.0, %v4479_v44  ;;  %v4143_v52 = vmul.f32 -1.442695, %v6177_v45 }
 0x25f   :  { %v6179_v48 = vpop.eup %4482  ;;  %2835 = vst.msk [vmem:[%s8398_s7 + $0x40] sm:$0xff] %vm102_vm0, %v4481_v62  ;;  %4502 = vrcp.f32 %v2646_v28  ;;  %v1452_v24 = vpop.f32.mrb[32].mxu0  ;;  %v4207_v40 = vmul.f32 -1.442695, %v1449_v61 }
 0x260   :  { %v4485_v27 = vpop.eup %4484  ;;  %4504 = vpow2.f32 %v4206_v43  ;;  %v1548_v47 = vpop.f32.mrb[0].mxu1  ;;  %v6203_v16 = vadd.f32 %v1452_v24, %v6052_v29 }
 0x261   :  { %v1454_v7 = vpop.f32.mrb[33].mxu0  ;;  %v6185_v8 = vpop.eup %4486  ;;  %v2647_v6 = vadd.f32 1.0, %v4485_v27  ;;  %v6188_v31 = vadd.f32 %v1548_v47, %v6052_v29  ;;  %4506 = vpow2.f32 %v4142_v42 }
 0x262   :  { %v1455_v30 = vadd.f32 %v1454_v7, %v6054_v1  ;;  %v1550_v23 = vpop.f32.mrb[1].mxu1  ;;  %v4489_v55 = vpop.eup %4488  ;;  %8622 = vst [vmem:[#allocation9_spill] sm:$0xff] %v6203_v16  ;;  %v4144_v42 = vmul.f32 -1.442695, %v6203_v16 }
 0x263   :  { %8621 = vst [vmem:[#allocation8_spill] sm:$0xff] %v6188_v31  ;;  %v4491_v33 = vpop.eup %4490  ;;  %4508 = vrcp.f32 %v2647_v6  ;;  %v4160_v49 = vmul.f32 -1.442695, %v6188_v31  ;;  %v1551_v56 = vadd.f32 %v1550_v23, %v6054_v1  ;;  %v1458_v22 = vpop.f32.mrb[34].mxu0  ;;  %v1943_v0 = vadd.f32 1.0, %v4489_v55 }
 0x264   :  { %v4493_v4 = vpop.eup %4492  ;;  %2836 = vst.msk [vmem:[%s8398_s7 + $0x48] sm:$0xff] %vm102_vm0, %v4491_v33  ;;  %4510 = vpow2.f32 %v4207_v40  ;;  %v4208_v12 = vmul.f32 -1.442695, %v1455_v30  ;;  %v1554_v57 = vpop.f32.mrb[2].mxu1  ;;  %v6229_v33 = vadd.f32 %v1458_v22, %v6052_v29 }
 0x265   :  { %v1460_v10 = vpop.f32.mrb[35].mxu0  ;;  %v4495_v34 = vpop.eup %4494  ;;  %4512 = vrcp.f32 %v1942_v41  ;;  %v4224_v2 = vmul.f32 -1.442695, %v1551_v56  ;;  %v6208_v18 = vadd.f32 %v1554_v57, %v6052_v29  ;;  %v1944_v17 = vadd.f32 1.0, %v4493_v4 }
 0x266   :  { %v1556_v54 = vpop.f32.mrb[3].mxu1  ;;  %v4497_v19 = vpop.eup %4496  ;;  %2837 = vst.msk [vmem:[%s8398_s7 + $0x50] sm:$0xff] %vm102_vm0, %v4495_v34  ;;  %4514 = vpow2.f32 %v4143_v52  ;;  %v1461_v43 = vadd.f32 %v1460_v10, %v6054_v1  ;;  %8624 = vst [vmem:[#allocation11_spill] sm:$0xff] %v6229_v33 }
 0x267   :  { %v6205_v38 = vpop.eup %4498  ;;  %v2648_v32 = vadd.f32 1.0, %v4497_v19  ;;  %4516 = vpow2.f32 %v4160_v49  ;;  %8623 = vst [vmem:[#allocation10_spill] sm:$0xff] %v6208_v18  ;;  %v6210_v53 = vpop.f32.mrb[36].mxu0  ;;  %v1557_v24 = vadd.f32 %v1556_v54, %v6054_v1  ;;  %v4161_v40 = vmul.f32 -1.442695, %v6208_v18 }
 0x268   :  { %v6212_v36 = vpop.eup %4500  ;;  %4518 = vpow2.f32 %v4208_v12  ;;  %v1560_v15 = vpop.f32.mrb[4].mxu1  ;;  %v4209_v41 = vmul.f32 -1.442695, %v1461_v43 }
 0x269   :  { %v1466_v44 = vpop.f32.mrb[37].mxu0  ;;  %v4503_v28 = vpop.eup %4502  ;;  %4520 = vrcp.f32 %v2648_v32  ;;  %v4225_v49 = vmul.f32 -1.442695, %v1557_v24  ;;  %v6234_v57 = vadd.f32 %v1560_v15, %v6052_v29 }
 0x26a   :  { %v1562_v61 = vpop.f32.mrb[5].mxu1  ;;  %v4505_v62 = vpop.eup %4504  ;;  %2838 = vst.msk [vmem:[%s8398_s7 + $0x58] sm:$0xff] %vm102_vm0, %v4503_v28  ;;  %4522 = vrcp.f32 %v1943_v0  ;;  %v1467_v43 = vadd.f32 %v1466_v44, %v6054_v1 }
 0x26b   :  { %v2649_v27 = vadd.f32 1.0, %v4505_v62  ;;  %4524 = vpow2.f32 %v4224_v2  ;;  %v6222_v47 = vpop.f32.mrb[38].mxu0  ;;  %v4507_v7 = vpop.eup %4506  ;;  %8625 = vst [vmem:[#allocation12_spill] sm:$0xff] %v6234_v57  ;;  %v4162_v62 = vmul.f32 -1.442695, %v6234_v57 }
 0x26c   :  { %4526 = vrcp.f32 %v1944_v17  ;;  %v1566_v6 = vpop.f32.mrb[6].mxu1  ;;  %v1472_v30 = vpop.f32.mrb[39].mxu0  ;;  %v1945_v4 = vadd.f32 1.0, %v4507_v7  ;;  %v4145_v17 = vmul.f32 -1.442695, %v6229_v33 }
 0x26d   :  { %v4509_v23 = vpop.eup %4508  ;;  %4528 = vrcp.f32 %v2649_v27  ;;  %v1568_v55 = vpop.f32.mrb[7].mxu1 }
 0x26e   :  { %v4511_v52 = vpop.eup %4510  ;;  %2839 = vst.msk [vmem:[%s8398_s7 + $0x60] sm:$0xff] %vm102_vm0, %v4509_v23  ;;  %4530 = vpow2.f32 %v4144_v42  ;;  %v1563_v42 = vadd.f32 %v1562_v61, %v6054_v1 }
 0x26f   :  { %v6231_v56 = vpop.eup %4512  ;;  %v2650_v12 = vadd.f32 1.0, %v4511_v52  ;;  %4532 = vpow2.f32 %v4161_v40  ;;  %v6236_v10 = vpop.f32.mrb[40].mxu0 }
 0x270   :  { %v4515_v34 = vpop.eup %4514  ;;  %4534 = vpow2.f32 %v4209_v41  ;;  %v6238_v54 = vpop.f32.mrb[8].mxu1 }
 0x271   :  { %v6240_v19 = vpop.f32.mrb[41].mxu0  ;;  %v4517_v0 = vpop.eup %4516  ;;  %4536 = vrcp.f32 %v2650_v12  ;;  %v1946_v41 = vadd.f32 1.0, %v4515_v34  ;;  %v6275_v34 = vadd.f32 %v1566_v6, %v6052_v29 }
 0x272   :  { %v6242_v22 = vpop.f32.mrb[9].mxu1  ;;  %v4519_v32 = vpop.eup %4518  ;;  %v1963_v2 = vadd.f32 1.0, %v4517_v0  ;;  %4538 = vpow2.f32 %v4225_v49  ;;  %v6266_v49 = vadd.f32 %v6210_v53, %v6052_v29  ;;  %v4226_v0 = vmul.f32 -1.442695, %v1563_v42 }
 0x273   :  { %v4521_v15 = vpop.eup %4520  ;;  %4540 = vrcp.f32 %v1945_v4  ;;  %v2651_v28 = vadd.f32 1.0, %v4519_v32  ;;  %v6248_v24 = vpop.f32.mrb[42].mxu0  ;;  %v4210_v4 = vmul.f32 -1.442695, %v1467_v43  ;;  %8627 = vst [vmem:[#allocation14_spill] sm:$0xff] %v6275_v34 }
 0x274   :  { %v6250_v27 = vpop.eup %4522  ;;  %2840 = vst.msk [vmem:[%s8398_s7 + $0x68] sm:$0xff] %vm102_vm0, %v4521_v15  ;;  %4542 = vrcp.f32 %v1963_v2  ;;  %v6256_v40 = vpop.f32.mrb[10].mxu1  ;;  %8626 = vst [vmem:[#allocation13_spill] sm:$0xff] %v6266_v49  ;;  %v1473_v15 = vadd.f32 %v1472_v30, %v6054_v1  ;;  %v4163_v30 = vmul.f32 -1.442695, %v6275_v34 }
 0x275   :  { %v6258_v44 = vpop.f32.mrb[43].mxu0  ;;  %v4525_v7 = vpop.eup %4524  ;;  %4544 = vrcp.f32 %v2651_v28 }
 0x276   :  { %v6260_v23 = vpop.f32.mrb[11].mxu1  ;;  %v6262_v61 = vpop.eup %4526  ;;  %v2667_v52 = vadd.f32 1.0, %v4525_v7  ;;  %4546 = vpow2.f32 %v4145_v17  ;;  %v4146_v7 = vmul.f32 -1.442695, %v6266_v49 }
 0x277   :  { %v4529_v12 = vpop.eup %4528  ;;  %4548 = vpow2.f32 %v4162_v62  ;;  %v6268_v32 = vpop.f32.mrb[44].mxu0 }
 0x278   :  { %v4531_v2 = vpop.eup %4530  ;;  %2841 = vst.msk [vmem:[%s8398_s7 + $0x70] sm:$0xff] %vm102_vm0, %v4529_v12  ;;  %4550 = vrcp.f32 %v2667_v52  ;;  %v6277_v17 = vpop.f32.mrb[12].mxu1  ;;  %v1569_v52 = vadd.f32 %v1568_v55, %v6054_v1 }
 0x279   :  { %v6279_v53 = vpop.f32.mrb[45].mxu0  ;;  %v4533_v43 = vpop.eup %4532  ;;  %4552 = vrcp.f32 %v1946_v41  ;;  %v1947_v50 = vadd.f32 1.0, %v4531_v2 }
 0x27a   :  { %v6282_v28 = vpop.f32.mrb[13].mxu1  ;;  %v4535_v62 = vpop.eup %4534  ;;  %v1964_v42 = vadd.f32 1.0, %v4533_v43  ;;  %4554 = vpow2.f32 %v4210_v4 }
 0x27b   :  { %v4537_v12 = vpop.eup %4536  ;;  %v2652_v6 = vadd.f32 1.0, %v4535_v62  ;;  %4556 = vpow2.f32 %v4226_v0  ;;  %v6286_v33 = vpop.f32.mrb[46].mxu0  ;;  %v6301_v0 = vadd.f32 %v6222_v47, %v6052_v29  ;;  %v4211_v62 = vmul.f32 -1.442695, %v1473_v15 }
 0x27c   :  { %v4539_v16 = vpop.eup %4538  ;;  %2842 = vst.msk [vmem:[%s8398_s7 + $0x78] sm:$0xff] %vm102_vm0, %v4537_v12  ;;  %4558 = vrcp.f32 %v1964_v42  ;;  %v6293_v41 = vpop.f32.mrb[14].mxu1  ;;  %v4227_v42 = vmul.f32 -1.442695, %v1569_v52  ;;  %v6307_v12 = vadd.f32 %v6238_v54, %v6052_v29 }
 0x27d   :  { %v6295_v43 = vpop.f32.mrb[47].mxu0  ;;  %v6297_v4 = vpop.eup %4540  ;;  %4560 = vrcp.f32 %v2652_v6  ;;  %v2668_v55 = vadd.f32 1.0, %v4539_v16  ;;  %8628 = vst [vmem:[#allocation15_spill] sm:$0xff] %v6301_v0 }
 0x27e   :  { %v6303_v49 = vpop.f32.mrb[15].mxu1  ;;  %v4543_v45 = vpop.eup %4542  ;;  %4562 = vpow2.f32 %v4146_v7  ;;  %8629 = vst [vmem:[#allocation16_spill] sm:$0xff] %v6307_v12  ;;  %v4147_v7 = vmul.f32 -1.442695, %v6301_v0  ;;  %v4164_v34 = vmul.f32 -1.442695, %v6307_v12 }
 0x27f   :  { %v4545_v26 = vpop.eup %4544  ;;  %4564 = vrcp.f32 %v2668_v55  ;;  %2251 = vrot.lane.b32.xlu0 %v4543_v45, %s4944_s4  ;;  %v6310_v16 = vpop.f32.mrb[48].mxu0  ;;  %v1479_v45 = vadd.f32 %v6240_v19, %v6054_v1 }
 0x280   :  { %v4547_v6 = vpop.eup %4546  ;;  %2843 = vst.msk [vmem:[%s8398_s7 + $0x80] sm:$0xff] %vm102_vm0, %v4545_v26  ;;  %4566 = vpow2.f32 %v4163_v30  ;;  %v6316_v47 = vpop.f32.mrb[16].mxu1  ;;  %v1575_v26 = vadd.f32 %v6242_v22, %v6054_v1 }
 0x281   :  { %v6318_v15 = vpop.f32.mrb[49].mxu0  ;;  %v4549_v54 = vpop.eup %4548  ;;  %4568 = vpow2.f32 %v4211_v62 }
 0x282   :  { %v6323_v2 = vpop.f32.mrb[17].mxu1  ;;  %v4551_v52 = vpop.eup %4550  ;;  %v1965_v55 = vadd.f32 1.0, %v4549_v54  ;;  %4570 = vpow2.f32 %v4227_v42  ;;  %v6338_v42 = vadd.f32 %v6236_v10, %v6052_v29  ;;  %v4228_v3 = vmul.f32 -1.442695, %v1575_v26 }
 0x283   :  { %v6328_v30 = vpop.eup %4552  ;;  %4572 = vrcp.f32 %v1947_v50  ;;  %2859 = vst.msk [vmem:[%s8398_s7 + $0x100] sm:$0xff] %vm102_vm0, %v4551_v52  ;;  %v6334_v62 = vpop.f32.mrb[50].mxu0  ;;  %v4212_v50 = vmul.f32 -1.442695, %v1479_v45 }
 0x284   :  { %v4555_v19 = vpop.eup %4554  ;;  %4574 = vrcp.f32 %v1965_v55  ;;  %8630 = vst [vmem:[#allocation17_spill] sm:$0xff] %v6338_v42  ;;  %v6340_v54 = vpop.f32.mrb[18].mxu1  ;;  %v1948_v55 = vadd.f32 1.0, %v4547_v6  ;;  %v1485_v6 = vadd.f32 %v6258_v44, %v6054_v1 }
 0x285   :  { %v6342_v0 = vpop.f32.mrb[51].mxu0  ;;  %v4557_v22 = vpop.eup %4556  ;;  %v2653_v12 = vadd.f32 1.0, %v4555_v19  ;;  %4576 = vpow2.f32 %v4147_v7  ;;  %v4148_v7 = vmul.f32 -1.442695, %v6338_v42  ;;  %v1581_v42 = vadd.f32 %v6260_v23, %v6054_v1 }
 0x286   :  { %v6344_v13 = vpop.f32.mrb[19].mxu1  ;;  %v4559_v57 = vpop.eup %4558  ;;  %v2669_v52 = vadd.f32 1.0, %v4557_v22  ;;  %4578 = vpow2.f32 %v4164_v34  ;;  %v6356_v34 = vadd.f32 %v6256_v40, %v6052_v29 }
 0x287   :  { %v4561_v18 = vpop.eup %4560  ;;  %4580 = vrcp.f32 %v2653_v12  ;;  %2253 = vrot.lane.b32.xlu1 %v4559_v57, %s4944_s4  ;;  %v6347_v10 = vpop.f32.mrb[52].mxu0 }
 0x288   :  { %v4563_v46 = vpop.eup %4562  ;;  %2844 = vst.msk [vmem:[%s8398_s7 + $0x88] sm:$0xff] %vm102_vm0, %v4561_v18  ;;  %4582 = vrcp.f32 %v2669_v52  ;;  %8631 = vst [vmem:[#allocation29_spill] sm:$0xff] %v6356_v34  ;;  %v6358_v45 = vpop.f32.mrb[20].mxu1  ;;  %v4165_v44 = vmul.f32 -1.442695, %v6356_v34 }
 0x289   :  { %v6360_v12 = vpop.f32.mrb[53].mxu0  ;;  %v4565_v57 = vpop.eup %4564  ;;  %4584 = vpow2.f32 %v4212_v50  ;;  %v1949_v34 = vadd.f32 1.0, %v4563_v46 }
 0x28a   :  { %v6364_v26 = vpop.f32.mrb[21].mxu1  ;;  %v4567_v19 = vpop.eup %4566  ;;  %2860 = vst.msk [vmem:[%s8398_s7 + $0x108] sm:$0xff] %vm102_vm0, %v4565_v57  ;;  %4586 = vpow2.f32 %v4228_v3 }
 0x28b   :  { %v4569_v18 = vpop.eup %4568  ;;  %4588 = vrcp.f32 %v1948_v55  ;;  %v1966_v40 = vadd.f32 1.0, %v4567_v19  ;;  %2191 = vrot.lane.b32.xlu1 %v6125_v39, %s4944_s4  ;;  %v6372_v22 = vpop.f32.mrb[54].mxu0  ;;  %v6385_v39 = vadd.f32 %v6248_v24, %v6052_v29  ;;  %v4213_v19 = vmul.f32 -1.442695, %v1485_v6 }
 0x28c   :  { %v4571_v50 = vpop.eup %4570  ;;  %v2654_v52 = vadd.f32 1.0, %v4569_v18  ;;  %4590 = vpow2.f32 %v4148_v7  ;;  %v6377_v31 = vpop.f32.mrb[22].mxu1  ;;  %v6396_v24 = vadd.f32 %v6277_v17, %v6052_v29  ;;  %v1491_v17 = vadd.f32 %v6279_v53, %v6054_v1 }
 0x28d   :  { %v6379_v57 = vpop.f32.mrb[55].mxu0  ;;  %v6381_v3 = vpop.eup %4572  ;;  %4592 = vrcp.f32 %v1966_v40  ;;  %v2670_v55 = vadd.f32 1.0, %v4571_v50  ;;  %8632 = vst [vmem:[#allocation30_spill] sm:$0xff] %v6385_v39  ;;  %v4229_v50 = vmul.f32 -1.442695, %v1581_v42  ;;  %v6423_v53 = vadd.f32 %v6268_v32, %v6052_v29 }
 0x28e   :  { %v6387_v18 = vpop.f32.mrb[23].mxu1  ;;  %v4575_v7 = vpop.eup %4574  ;;  %4594 = vrcp.f32 %v2654_v52  ;;  %8633 = vst [vmem:[#allocation31_spill] sm:$0xff] %v6396_v24 }
 0x28f   :  { %v4577_v14 = vpop.eup %4576  ;;  %4596 = vrcp.f32 %v2670_v55  ;;  %2255 = vrot.lane.b32.xlu0 %v4575_v7, %s4944_s4  ;;  %2193 = vrot.lane.b32.xlu1 %v6135_v9, %s4944_s4  ;;  %v6392_v23 = vpop.f32.mrb[56].mxu0  ;;  %v4149_v7 = vmul.f32 -1.442695, %v6385_v39  ;;  %8634 = vst [vmem:[#allocation32_spill] sm:$0xff] %v6423_v53  ;;  %v4150_v35 = vmul.f32 -1.442695, %v6423_v53  ;;  %v6467_v53 = vadd.f32 %v6286_v33, %v6052_v29 }
 0x290   :  { %v4579_v40 = vpop.eup %4578  ;;  %4598 = vpow2.f32 %v4165_v44  ;;  %v6398_v6 = vpop.f32.mrb[24].mxu1  ;;  %v1587_v44 = vadd.f32 %v6282_v28, %v6054_v1  ;;  %v1950_v28 = vadd.f32 1.0, %v4577_v14  ;;  %v1497_v14 = vadd.f32 %v6295_v43, %v6054_v1 }
 0x291   :  { %v6400_v46 = vpop.f32.mrb[57].mxu0  ;;  %v4581_v52 = vpop.eup %4580  ;;  %v1967_v55 = vadd.f32 1.0, %v4579_v40  ;;  %4600 = vpow2.f32 %v4213_v19  ;;  %8638 = vst [vmem:[#allocation36_spill] sm:$0xff] %v6467_v53 }
 0x292   :  { %v6403_v51 = vpop.f32.mrb[25].mxu1  ;;  %v4583_v9 = vpop.eup %4582  ;;  %4602 = vrcp.f32 %v1949_v34  ;;  %2845 = vst.msk [vmem:[%s8398_s7 + $0x90] sm:$0xff] %vm102_vm0, %v4581_v52  ;;  %v4166_v52 = vmul.f32 -1.442695, %v6396_v24  ;;  %v4230_v32 = vmul.f32 -1.442695, %v1587_v44  ;;  %v6436_v24 = vadd.f32 %v6293_v41, %v6052_v29 }
 0x293   :  { %v4585_v42 = vpop.eup %4584  ;;  %2861 = vst.msk [vmem:[%s8398_s7 + $0x110] sm:$0xff] %vm102_vm0, %v4583_v9  ;;  %4604 = vrcp.f32 %v1967_v55  ;;  %2195 = vrot.lane.b32.xlu0 %v6146_v25, %s4944_s4  ;;  %v6419_v34 = vpop.f32.mrb[58].mxu0 }
 0x294   :  { %v4587_v19 = vpop.eup %4586  ;;  %v2655_v40 = vadd.f32 1.0, %v4585_v42  ;;  %4606 = vpow2.f32 %v4229_v50  ;;  %v6426_v39 = vpop.f32.mrb[26].mxu1  ;;  %v4214_v50 = vmul.f32 -1.442695, %v1491_v17  ;;  %8635 = vst [vmem:[#allocation33_spill] sm:$0xff] %v6436_v24 }
 0x295   :  { %v6428_v55 = vpop.f32.mrb[59].mxu0  ;;  %v6430_v9 = vpop.eup %4588  ;;  %v2671_v11 = vadd.f32 1.0, %v4587_v19  ;;  %4608 = vpow2.f32 %v4149_v7 }
 0x296   :  { %v6432_v25 = vpop.f32.mrb[27].mxu1  ;;  %v4591_v60 = vpop.eup %4590  ;;  %4610 = vrcp.f32 %v2655_v40  ;;  %v4167_v40 = vmul.f32 -1.442695, %v6436_v24 }
 0x297   :  { %v4593_v42 = vpop.eup %4592  ;;  %4612 = vrcp.f32 %v2671_v11  ;;  %v6438_v63 = vpop.f32.mrb[60].mxu0 }
 0x298   :  { %v4595_v59 = vpop.eup %4594  ;;  %4614 = vpow2.f32 %v4166_v52  ;;  %2257 = vrot.lane.b32.xlu1 %v4593_v42, %s4944_s4  ;;  %v6444_v7 = vpop.f32.mrb[28].mxu1  ;;  %v1593_v52 = vadd.f32 %v6303_v49, %v6054_v1 }
 0x299   :  { %v6446_v17 = vpop.f32.mrb[61].mxu0  ;;  %v4597_v11 = vpop.eup %4596  ;;  %4616 = vrcp.f32 %v1950_v28  ;;  %2846 = vst.msk [vmem:[%s8398_s7 + $0x98] sm:$0xff] %vm102_vm0, %v4595_v59 }
 0x29a   :  { %v6452_v41 = vpop.f32.mrb[29].mxu1  ;;  %v4599_v44 = vpop.eup %4598  ;;  %2862 = vst.msk [vmem:[%s8398_s7 + $0x118] sm:$0xff] %vm102_vm0, %v4597_v11  ;;  %4618 = vpow2.f32 %v4214_v50  ;;  %v4215_v11 = vmul.f32 -1.442695, %v1497_v14 }
 0x29b   :  { %v4601_v43 = vpop.eup %4600  ;;  %v1968_v19 = vadd.f32 1.0, %v4599_v44  ;;  %4620 = vpow2.f32 %v4230_v32  ;;  %v6461_v28 = vpop.f32.mrb[62].mxu0 }
 0x29c   :  { %8636 = vst [vmem:[#allocation34_spill] sm:$0xff] %v6461_v28  ;;  %v6463_v59 = vpop.eup %4602  ;;  %v2656_v42 = vadd.f32 1.0, %v4601_v43  ;;  %4622 = vpow2.f32 %v4150_v35  ;;  %2197 = vrot.lane.b32.xlu1 %v6162_v37, %s4944_s4  ;;  %v6471_v50 = vpop.f32.mrb[30].mxu1  ;;  %v1951_v28 = vadd.f32 1.0, %v4591_v60  ;;  %v6479_v35 = vadd.f32 %v6316_v47, %v6052_v29 }
 0x29d   :  { %8637 = vst [vmem:[#allocation35_spill] sm:$0xff] %v6463_v59  ;;  %v6473_v32 = vpop.f32.mrb[63].mxu0  ;;  %v4605_v44 = vpop.eup %4604  ;;  %4624 = vrcp.f32 %v1968_v19  ;;  %v4231_v37 = vmul.f32 -1.442695, %v1593_v52  ;;  %v4151_v59 = vmul.f32 -1.442695, %v6467_v53 }
 0x29e   :  { %v6475_v49 = vpop.f32.mrb[31].mxu1  ;;  %v4607_v24 = vpop.eup %4606  ;;  %4626 = vrcp.f32 %v2656_v42  ;;  %8639 = vst [vmem:[#allocation37_spill] sm:$0xff] %v6479_v35  ;;  %2259 = vrot.lane.b32.xlu0 %v4605_v44, %s4944_s4 }
 0x29f   :  { %v4609_v33 = vpop.eup %4608  ;;  %v2672_v14 = vadd.f32 1.0, %v4607_v24  ;;  %4628 = vpow2.f32 %v4167_v40  ;;  %v4168_v24 = vmul.f32 -1.442695, %v6479_v35  ;;  %v1503_v40 = vadd.f32 %v6318_v15, %v6054_v1 }
 0x2a0   :  { %v4611_v43 = vpop.eup %4610  ;;  %4630 = vpow2.f32 %v4215_v11  ;;  %v6483_v19 = vpop.f32.mrb[32].mxu1 }
 0x2a1   :  { %v4613_v58 = vpop.eup %4612  ;;  %2847 = vst.msk [vmem:[%s8398_s7 + $0xa0] sm:$0xff] %vm102_vm0, %v4611_v43  ;;  %4632 = vrcp.f32 %v2672_v14  ;;  %v6489_v60 = vpop.f32.mrb[33].mxu1  ;;  %v1952_v14 = vadd.f32 1.0, %v4609_v33 }
 0x2a2   :  { %v4615_v47 = vpop.eup %4614  ;;  %4634 = vrcp.f32 %v1951_v28  ;;  %2863 = vst.msk [vmem:[%s8398_s7 + $0x120] sm:$0xff] %vm102_vm0, %v4613_v58  ;;  %2199 = vrot.lane.b32.xlu0 %v6168_v21, %s4944_s4  ;;  %v1599_v28 = vadd.f32 %v6323_v2, %v6054_v1  ;;  %v4216_v21 = vmul.f32 -1.442695, %v1503_v40  ;;  %v6510_v2 = vadd.f32 %v6340_v54, %v6052_v29 }
 0x2a3   :  { %v6500_v52 = vpop.eup %4616  ;;  %v1969_v42 = vadd.f32 1.0, %v4615_v47  ;;  %4636 = vpow2.f32 %v4231_v37 }
 0x2a4   :  { %8640 = vst [vmem:[#allocation38_spill] sm:$0xff] %v6500_v52  ;;  %v4619_v11 = vpop.eup %4618  ;;  %4638 = vpow2.f32 %v4151_v59  ;;  %v6504_v44 = vpop.f32.mrb[34].mxu1  ;;  %v4232_v37 = vmul.f32 -1.442695, %v1599_v28  ;;  %8641 = vst [vmem:[#allocation39_spill] sm:$0xff] %v6510_v2 }
 0x2a5   :  { %v4621_v58 = vpop.eup %4620  ;;  %4640 = vrcp.f32 %v1969_v42  ;;  %v2657_v43 = vadd.f32 1.0, %v4619_v11  ;;  %v6506_v53 = vpop.f32.mrb[35].mxu1 }
 0x2a6   :  { %v4623_v15 = vpop.eup %4622  ;;  %v2673_v35 = vadd.f32 1.0, %v4621_v58  ;;  %4642 = vpow2.f32 %v4168_v24  ;;  %v6521_v24 = vadd.f32 %v6310_v16, %v6052_v29  ;;  %v4169_v58 = vmul.f32 -1.442695, %v6510_v2 }
 0x2a7   :  { %v4625_v52 = vpop.eup %4624  ;;  %4644 = vrcp.f32 %v2657_v43  ;;  %v1953_v42 = vadd.f32 1.0, %v4623_v15  ;;  %v1605_v16 = vadd.f32 %v6344_v13, %v6054_v1 }
 0x2a8   :  { %v4627_v59 = vpop.eup %4626  ;;  %4646 = vrcp.f32 %v2673_v35  ;;  %2261 = vrot.lane.b32.xlu1 %v4625_v52, %s4944_s4  ;;  %v6513_v33 = vpop.f32.mrb[36].mxu1  ;;  %8642 = vst [vmem:[#allocation40_spill] sm:$0xff] %v6521_v24  ;;  %v1509_v52 = vadd.f32 %v6342_v0, %v6054_v1  ;;  %v4152_v15 = vmul.f32 -1.442695, %v6521_v24 }
 0x2a9   :  { %v4629_v47 = vpop.eup %4628  ;;  %4648 = vrcp.f32 %v1952_v14  ;;  %2848 = vst.msk [vmem:[%s8398_s7 + $0xa8] sm:$0xff] %vm102_vm0, %v4627_v59  ;;  %v6523_v40 = vpop.f32.mrb[37].mxu1 }
 0x2aa   :  { %v4631_v54 = vpop.eup %4630  ;;  %v1970_v35 = vadd.f32 1.0, %v4629_v47  ;;  %4650 = vpow2.f32 %v4216_v21  ;;  %v4217_v47 = vmul.f32 -1.442695, %v1509_v52 }
 0x2ab   :  { %v4633_v28 = vpop.eup %4632  ;;  %v2658_v11 = vadd.f32 1.0, %v4631_v54  ;;  %4652 = vpow2.f32 %v4232_v37  ;;  %v6545_v54 = vadd.f32 %v6358_v45, %v6052_v29  ;;  %v1515_v45 = vadd.f32 %v6360_v12, %v6054_v1 }
 0x2ac   :  { %v6528_v14 = vpop.eup %4634  ;;  %2864 = vst.msk [vmem:[%s8398_s7 + $0x128] sm:$0xff] %vm102_vm0, %v4633_v28  ;;  %4654 = vrcp.f32 %v1970_v35  ;;  %2201 = vrot.lane.b32.xlu1 %v6179_v48, %s4944_s4  ;;  %v6538_v0 = vpop.f32.mrb[38].mxu1  ;;  %v6572_v12 = vadd.f32 %v6334_v62, %v6052_v29 }
 0x2ad   :  { %v4637_v43 = vpop.eup %4636  ;;  %4656 = vrcp.f32 %v2658_v11  ;;  %v6541_v21 = vpop.f32.mrb[39].mxu1  ;;  %8643 = vst [vmem:[#allocation41_spill] sm:$0xff] %v6545_v54  ;;  %v4233_v11 = vmul.f32 -1.442695, %v1605_v16  ;;  %v1611_v16 = vadd.f32 %v6364_v26, %v6054_v1 }
 0x2ae   :  { %v4639_v37 = vpop.eup %4638  ;;  %4658 = vrcp.f32 %v1953_v42  ;;  %v2674_v59 = vadd.f32 1.0, %v4637_v43  ;;  %v2188_v13 = vpop.permute.xlu0 %2187  ;;  %8644 = vst [vmem:[#allocation42_spill] sm:$0xff] %v6572_v12 }
 0x2af   :  { %v4641_v35 = vpop.eup %4640  ;;  %4660 = vpow2.f32 %v4169_v58  ;;  %v6548_v48 = vmul.f32 %v2188_v13, %v6057_v5  ;;  %v1954_v43 = vadd.f32 1.0, %v4639_v37  ;;  %v4170_v5 = vmul.f32 -1.442695, %v6545_v54 }
 0x2b0   :  { %v4643_v28 = vpop.eup %4642  ;;  %4662 = vrcp.f32 %v2674_v59  ;;  %2263 = vrot.lane.b32.xlu0 %v4641_v35, %s4944_s4  ;;  %v6551_v24 = vpop.f32.mrb[40].mxu1  ;;  %v6583_v13 = vadd.f32 %v6347_v10, %v6052_v29  ;;  %v4234_v10 = vmul.f32 -1.442695, %v1611_v16 }
 0x2b1   :  { %v4645_v42 = vpop.eup %4644  ;;  %4664 = vpow2.f32 %v4152_v15  ;;  %v1971_v52 = vadd.f32 1.0, %v4643_v28  ;;  %v6555_v2 = vpop.f32.mrb[41].mxu1  ;;  %v6576_v59 = vmul.f32 %v6548_v48, %v6548_v48 }
 0x2b2   :  { %v4647_v58 = vpop.eup %4646  ;;  %2849 = vst.msk [vmem:[%s8398_s7 + $0xb0] sm:$0xff] %vm102_vm0, %v4645_v42  ;;  %4666 = vpow2.f32 %v4217_v47  ;;  %v2190_v37 = vpop.permute.xlu1 %2189  ;;  %8646 = vst [vmem:[#allocation44_spill] sm:$0xff] %v6583_v13  ;;  %v4218_v42 = vmul.f32 -1.442695, %v1515_v45 }
 0x2b3   :  { %v6564_v15 = vpop.eup %4648  ;;  %2865 = vst.msk [vmem:[%s8398_s7 + $0x130] sm:$0xff] %vm102_vm0, %v4647_v58  ;;  %4668 = vrcp.f32 %v1971_v52  ;;  %8645 = vst [vmem:[#allocation43_spill] sm:$0xff] %v6576_v59  ;;  %v6579_v47 = vmul.f32 %v2190_v37, %v6062_v20  ;;  %v3867_v45 = vsel %vm3733_vm1, %v6576_v59, 0.0 }
 0x2b4   :  { %v4651_v26 = vpop.eup %4650  ;;  %4670 = vpow2.f32 %v4233_v11  ;;  %2203 = vrot.lane.b32.xlu0 %v6185_v8, %s4944_s4  ;;  %v6587_v35 = vpop.f32.mrb[42].mxu1  ;;  %v6597_v8 = vadd.f32 %v6377_v31, %v6052_v29  ;;  %v1521_v31 = vadd.f32 %v6379_v57, %v6054_v1 }
 0x2b5   :  { %v4653_v62 = vpop.eup %4652  ;;  %4672 = vrcp.f32 %v1954_v43  ;;  %v2659_v28 = vadd.f32 1.0, %v4651_v26  ;;  %v6591_v20 = vmul.f32 %v6579_v47, %v6579_v47  ;;  %v6593_v52 = vpop.f32.mrb[43].mxu1  ;;  %v4153_v43 = vmul.f32 -1.442695, %v6572_v12 }
 0x2b6   :  { %v4655_v11 = vpop.eup %4654  ;;  %v2675_v58 = vadd.f32 1.0, %v4653_v62  ;;  %4674 = vpow2.f32 %v4170_v5  ;;  %8648 = vst [vmem:[#allocation46_spill] sm:$0xff] %v6597_v8 }
 0x2b7   :  { %8647 = vst [vmem:[#allocation45_spill] sm:$0xff] %v6591_v20  ;;  %v4657_v37 = vpop.eup %4656  ;;  %4676 = vrcp.f32 %v2659_v28  ;;  %2265 = vrot.lane.b32.xlu1 %v4655_v11, %s4944_s4  ;;  %v3868_v26 = vsel %vm3733_vm1, %v6591_v20, 0.0  ;;  %v4154_v28 = vmul.f32 -1.442695, %v6583_v13  ;;  %v4171_v20 = vmul.f32 -1.442695, %v6597_v8 }
 0x2b8   :  { %v6605_v54 = vpop.eup %4658  ;;  %2850 = vst.msk [vmem:[%s8398_s7 + $0xb8] sm:$0xff] %vm102_vm0, %v4657_v37  ;;  %4678 = vrcp.f32 %v2675_v58  ;;  %v6613_v5 = vadd.f32 %v3868_v26, %v3867_v45  ;;  %v6615_v16 = vpop.f32.mrb[44].mxu1  ;;  %v1617_v58 = vadd.f32 %v6387_v18, %v6054_v1 }
 0x2b9   :  { %v4661_v62 = vpop.eup %4660  ;;  %4680 = vpow2.f32 %v4218_v42  ;;  %v6618_v11 = vpop.f32.mrb[45].mxu1  ;;  %v4219_v42 = vmul.f32 -1.442695, %v1521_v31 }
 0x2ba   :  { %v4663_v12 = vpop.eup %4662  ;;  %v1972_v59 = vadd.f32 1.0, %v4661_v62  ;;  %4682 = vpow2.f32 %v4234_v10  ;;  %v6633_v62 = vadd.f32 %v6372_v22, %v6052_v29  ;;  %v4235_v31 = vmul.f32 -1.442695, %v1617_v58 }
 0x2bb   :  { %v4665_v37 = vpop.eup %4664  ;;  %2866 = vst.msk [vmem:[%s8398_s7 + $0x138] sm:$0xff] %vm102_vm0, %v4663_v12  ;;  %4684 = vpow2.f32 %v4153_v43  ;;  %2205 = vrot.lane.b32.xlu1 %v6205_v38, %s4944_s4 }
 0x2bc   :  { %v4667_v57 = vpop.eup %4666  ;;  %4686 = vrcp.f32 %v1972_v59  ;;  %v6629_v45 = vpop.f32.mrb[46].mxu1  ;;  %8649 = vst [vmem:[#allocation47_spill] sm:$0xff] %v6633_v62  ;;  %v1955_v13 = vadd.f32 1.0, %v4665_v37  ;;  %v1527_v37 = vadd.f32 %v6400_v46, %v6054_v1 }
 0x2bd   :  { %v4669_v10 = vpop.eup %4668  ;;  %v2660_v26 = vadd.f32 1.0, %v4667_v57  ;;  %4688 = vpow2.f32 %v4154_v28  ;;  %v6635_v12 = vpop.f32.mrb[47].mxu1  ;;  %v6642_v28 = vadd.f32 %v6398_v6, %v6052_v29  ;;  %v6657_v6 = vadd.f32 %v6392_v23, %v6052_v29 }
 0x2be   :  { %v4671_v43 = vpop.eup %4670  ;;  %4690 = vpow2.f32 %v4171_v20  ;;  %2267 = vrot.lane.b32.xlu0 %v4669_v10, %s4944_s4  ;;  %v4155_v20 = vmul.f32 -1.442695, %v6633_v62 }
 0x2bf   :  { %v6638_v38 = vpop.eup %4672  ;;  %4692 = vrcp.f32 %v2660_v26  ;;  %v2676_v18 = vadd.f32 1.0, %v4671_v43  ;;  %8650 = vst [vmem:[#allocation48_spill] sm:$0xff] %v6642_v28  ;;  %8651 = vst [vmem:[#allocation49_spill] sm:$0xff] %v6657_v6  ;;  %v4172_v58 = vmul.f32 -1.442695, %v6642_v28  ;;  %v1623_v43 = vadd.f32 %v6403_v51, %v6054_v1 }
 0x2c0   :  { %v4675_v59 = vpop.eup %4674  ;;  %4694 = vpow2.f32 %v4219_v42  ;;  %v6644_v22 = vpop.f32.mrb[48].mxu1 }
 0x2c1   :  { %v4677_v57 = vpop.eup %4676  ;;  %4696 = vrcp.f32 %v2676_v18  ;;  %v1973_v8 = vadd.f32 1.0, %v4675_v59  ;;  %v6649_v10 = vpop.f32.mrb[49].mxu1 }
 0x2c2   :  { %v4679_v26 = vpop.eup %4678  ;;  %4698 = vrcp.f32 %v1955_v13  ;;  %2851 = vst.msk [vmem:[%s8398_s7 + $0xc0] sm:$0xff] %vm102_vm0, %v4677_v57  ;;  %2207 = vrot.lane.b32.xlu0 %v6212_v36, %s4944_s4  ;;  %v4220_v36 = vmul.f32 -1.442695, %v1527_v37 }
 0x2c3   :  { %v4681_v42 = vpop.eup %4680  ;;  %2867 = vst.msk [vmem:[%s8398_s7 + $0x140] sm:$0xff] %vm102_vm0, %v4679_v26  ;;  %4700 = vrcp.f32 %v1973_v8  ;;  %v4156_v8 = vmul.f32 -1.442695, %v6657_v6 }
 0x2c4   :  { %v4683_v46 = vpop.eup %4682  ;;  %v2661_v13 = vadd.f32 1.0, %v4681_v42  ;;  %4702 = vpow2.f32 %v4235_v31  ;;  %v6668_v23 = vpop.f32.mrb[50].mxu1  ;;  %v6675_v31 = vadd.f32 %v6426_v39, %v6052_v29  ;;  %v4236_v42 = vmul.f32 -1.442695, %v1623_v43 }
 0x2c5   :  { %v4685_v18 = vpop.eup %4684  ;;  %v2677_v59 = vadd.f32 1.0, %v4683_v46  ;;  %4704 = vpow2.f32 %v4155_v20  ;;  %v6670_v57 = vpop.f32.mrb[51].mxu1  ;;  %v1533_v20 = vadd.f32 %v6428_v55, %v6054_v1 }
 0x2c6   :  { %v4687_v62 = vpop.eup %4686  ;;  %4706 = vrcp.f32 %v2661_v13  ;;  %8652 = vst [vmem:[#allocation50_spill] sm:$0xff] %v6675_v31  ;;  %v1956_v28 = vadd.f32 1.0, %v4685_v18  ;;  %v4173_v55 = vmul.f32 -1.442695, %v6675_v31  ;;  %v6701_v18 = vadd.f32 %v6419_v34, %v6052_v29 }
 0x2c7   :  { %v4689_v26 = vpop.eup %4688  ;;  %4708 = vrcp.f32 %v2677_v59  ;;  %2269 = vrot.lane.b32.xlu1 %v4687_v62, %s4944_s4  ;;  %v6710_v34 = vadd.f32 %v6444_v7, %v6052_v29 }
 0x2c8   :  { %v4691_v51 = vpop.eup %4690  ;;  %4710 = vpow2.f32 %v4172_v58  ;;  %v6680_v37 = vpop.f32.mrb[52].mxu1  ;;  %v1629_v58 = vadd.f32 %v6432_v25, %v6054_v1  ;;  %8653 = vst [vmem:[#allocation51_spill] sm:$0xff] %v6701_v18 }
 0x2c9   :  { %v4693_v46 = vpop.eup %4692  ;;  %v1974_v13 = vadd.f32 1.0, %v4691_v51  ;;  %4712 = vpow2.f32 %v4220_v36  ;;  %v6682_v6 = vpop.f32.mrb[53].mxu1  ;;  %v4221_v36 = vmul.f32 -1.442695, %v1533_v20 }
 0x2ca   :  { %v4695_v59 = vpop.eup %4694  ;;  %2852 = vst.msk [vmem:[%s8398_s7 + $0xc8] sm:$0xff] %vm102_vm0, %v4693_v46  ;;  %4714 = vpow2.f32 %v4156_v8  ;;  %v1957_v46 = vadd.f32 1.0, %v4689_v26 }
 0x2cb   :  { %v4697_v39 = vpop.eup %4696  ;;  %4716 = vrcp.f32 %v1974_v13  ;;  %v2662_v62 = vadd.f32 1.0, %v4695_v59  ;;  %2209 = vrot.lane.b32.xlu1 %v6231_v56, %s4944_s4 }
 0x2cc   :  { %v6693_v43 = vpop.eup %4698  ;;  %2868 = vst.msk [vmem:[%s8398_s7 + $0x148] sm:$0xff] %vm102_vm0, %v4697_v39  ;;  %4718 = vpow2.f32 %v4236_v42  ;;  %v6703_v8 = vpop.f32.mrb[54].mxu1  ;;  %v4237_v42 = vmul.f32 -1.442695, %v1629_v58  ;;  %v4157_v39 = vmul.f32 -1.442695, %v6701_v18 }
 0x2cd   :  { %v4701_v51 = vpop.eup %4700  ;;  %4720 = vrcp.f32 %v2662_v62  ;;  %v6705_v25 = vpop.f32.mrb[55].mxu1  ;;  %v1539_v62 = vadd.f32 %v6446_v17, %v6054_v1  ;;  %v1635_v17 = vadd.f32 %v6452_v41, %v6054_v1 }
 0x2ce   :  { %v4703_v56 = vpop.eup %4702  ;;  %4722 = vrcp.f32 %v1956_v28  ;;  %2271 = vrot.lane.b32.xlu0 %v4701_v51, %s4944_s4 }
 0x2cf   :  { %v4705_v13 = vpop.eup %4704  ;;  %v2678_v59 = vadd.f32 1.0, %v4703_v56  ;;  %4724 = vpow2.f32 %v4173_v55  ;;  %v4238_v41 = vmul.f32 -1.442695, %v1635_v17 }
 0x2d0   :  { %v4707_v20 = vpop.eup %4706  ;;  %4726 = vpow2.f32 %v4221_v36  ;;  %v6715_v31 = vpop.f32.mrb[56].mxu1  ;;  %v4174_v36 = vmul.f32 -1.442695, %v6710_v34 }
 0x2d1   :  { %v4709_v28 = vpop.eup %4708  ;;  %2853 = vst.msk [vmem:[%s8398_s7 + $0xd0] sm:$0xff] %vm102_vm0, %v4707_v20  ;;  %4728 = vrcp.f32 %v2678_v59  ;;  %v6721_v26 = vpop.f32.mrb[57].mxu1 }
 0x2d2   :  { %v4711_v7 = vpop.eup %4710  ;;  %4730 = vrcp.f32 %v1957_v46  ;;  %2869 = vst.msk [vmem:[%s8398_s7 + $0x150] sm:$0xff] %vm102_vm0, %v4709_v28  ;;  %2211 = vrot.lane.b32.xlu0 %v6250_v27, %s4944_s4  ;;  %v4222_v46 = vmul.f32 -1.442695, %v1539_v62 }
 0x2d3   :  { %v4713_v55 = vpop.eup %4712  ;;  %v1975_v58 = vadd.f32 1.0, %v4711_v7  ;;  %4732 = vpow2.f32 %v4237_v42  ;;  %v1958_v7 = vadd.f32 1.0, %v4705_v13 }
 0x2d4   :  { %v4715_v51 = vpop.eup %4714  ;;  %v2663_v56 = vadd.f32 1.0, %v4713_v55  ;;  %4734 = vpow2.f32 %v4157_v39  ;;  %v6732_v59 = vpop.f32.mrb[58].mxu1  ;;  %v6739_v55 = vadd.f32 %v6471_v50, %v6052_v29 }
 0x2d5   :  { %v4717_v20 = vpop.eup %4716  ;;  %4736 = vrcp.f32 %v1975_v58  ;;  %v6734_v28 = vpop.f32.mrb[59].mxu1  ;;  %v1959_v58 = vadd.f32 1.0, %v4715_v51 }
 0x2d6   :  { %v4719_v18 = vpop.eup %4718  ;;  %4738 = vrcp.f32 %v2663_v56  ;;  %2273 = vrot.lane.b32.xlu1 %v4717_v20, %s4944_s4  ;;  %8654 = vst [vmem:[#allocation52_spill] sm:$0xff] %v6739_v55  ;;  %v1545_v56 = vadd.f32 %v6473_v32, %v6054_v1 }
 0x2d7   :  { %v4721_v27 = vpop.eup %4720  ;;  %v2679_v42 = vadd.f32 1.0, %v4719_v18  ;;  %4740 = vpow2.f32 %v4174_v36  ;;  %v6751_v18 = vadd.f32 %v6438_v63, %v6052_v29  ;;  %v1641_v63 = vadd.f32 %v6475_v49, %v6054_v1 }
 0x2d8   :  { %v6741_v39 = vpop.eup %4722  ;;  %2854 = vst.msk [vmem:[%s8398_s7 + $0xd8] sm:$0xff] %vm102_vm0, %v4721_v27  ;;  %4742 = vpow2.f32 %v4222_v46  ;;  %v6747_v62 = vpop.f32.mrb[60].mxu1  ;;  %v4175_v27 = vmul.f32 -1.442695, %v6739_v55  ;;  %v4223_v49 = vmul.f32 -1.442695, %v1545_v56 }
 0x2d9   :  { %v4725_v17 = vpop.eup %4724  ;;  %4744 = vrcp.f32 %v2679_v42  ;;  %8655 = vst [vmem:[#allocation53_spill] sm:$0xff] %v6751_v18  ;;  %v6753_v13 = vpop.f32.mrb[61].mxu1 }
 0x2da   :  { %v4727_v50 = vpop.eup %4726  ;;  %v1976_v36 = vadd.f32 1.0, %v4725_v17  ;;  %4746 = vpow2.f32 %v4238_v41  ;;  %2213 = vrot.lane.b32.xlu1 %v6262_v61, %s4944_s4  ;;  %v4158_v61 = vmul.f32 -1.442695, %v6751_v18 }
 0x2db   :  { %v4729_v46 = vpop.eup %4728  ;;  %4748 = vrcp.f32 %v1958_v7  ;;  %v2664_v20 = vadd.f32 1.0, %v4727_v50  ;;  %v6775_v50 = vadd.f32 %v6483_v19, %v6052_v29  ;;  %v6786_v19 = vadd.f32 %v6504_v44, %v6052_v29 }
 0x2dc   :  { %v6762_v42 = vpop.eup %4730  ;;  %2870 = vst.msk [vmem:[%s8398_s7 + $0x158] sm:$0xff] %vm102_vm0, %v4729_v46  ;;  %4750 = vrcp.f32 %v1976_v36  ;;  %v6768_v32 = vpop.f32.mrb[62].mxu1  ;;  %v4239_v46 = vmul.f32 -1.442695, %v1641_v63 }
 0x2dd   :  { %v4733_v51 = vpop.eup %4732  ;;  %4752 = vrcp.f32 %v2664_v20  ;;  %v6771_v41 = vpop.f32.mrb[63].mxu1  ;;  %8656 = vst [vmem:[#allocation54_spill] sm:$0xff] %v6775_v50  ;;  %v1647_v20 = vadd.f32 %v6489_v60, %v6054_v1  ;;  %v1653_v60 = vadd.f32 %v6506_v53, %v6054_v1  ;;  %v4177_v53 = vmul.f32 -1.442695, %v6786_v19 }
 0x2de   :  { %v4735_v7 = vpop.eup %4734  ;;  %4754 = vrcp.f32 %v1959_v58  ;;  %v2680_v17 = vadd.f32 1.0, %v4733_v51 }
 0x2df   :  { %v4737_v55 = vpop.eup %4736  ;;  %4756 = vpow2.f32 %v4175_v27  ;;  %v4176_v27 = vmul.f32 -1.442695, %v6775_v50  ;;  %v4240_v44 = vmul.f32 -1.442695, %v1647_v20 }
 0x2e0   :  { %v4739_v36 = vpop.eup %4738  ;;  %4758 = vrcp.f32 %v2680_v17  ;;  %2275 = vrot.lane.b32.xlu0 %v4737_v55, %s4944_s4  ;;  %v6802_v17 = vadd.f32 %v6513_v33, %v6052_v29 }
 0x2e1   :  { %v4741_v18 = vpop.eup %4740  ;;  %2855 = vst.msk [vmem:[%s8398_s7 + $0xe0] sm:$0xff] %vm102_vm0, %v4739_v36  ;;  %4760 = vpow2.f32 %v4158_v61  ;;  %v1659_v36 = vadd.f32 %v6523_v40, %v6054_v1  ;;  %v6816_v40 = vadd.f32 %v6538_v0, %v6052_v29 }
 0x2e2   :  { %v4743_v58 = vpop.eup %4742  ;;  %v1977_v56 = vadd.f32 1.0, %v4741_v18  ;;  %4762 = vpow2.f32 %v4223_v49  ;;  %8657 = vst [vmem:[#allocation55_spill] sm:$0xff] %v6802_v17 }
 0x2e3   :  { %v4745_v55 = vpop.eup %4744  ;;  %v2665_v63 = vadd.f32 1.0, %v4743_v58  ;;  %4764 = vpow2.f32 %v4239_v46  ;;  %v4241_v46 = vmul.f32 -1.442695, %v1653_v60  ;;  %v1960_v58 = vadd.f32 1.0, %v4735_v7 }
 0x2e4   :  { %v4747_v51 = vpop.eup %4746  ;;  %2871 = vst.msk [vmem:[%s8398_s7 + $0x160] sm:$0xff] %vm102_vm0, %v4745_v55  ;;  %4766 = vrcp.f32 %v1977_v56  ;;  %2215 = vrot.lane.b32.xlu0 %v6297_v4, %s4944_s4  ;;  %v4178_v56 = vmul.f32 -1.442695, %v6802_v17  ;;  %v4242_v60 = vmul.f32 -1.442695, %v1659_v36  ;;  %v1665_v55 = vadd.f32 %v6541_v21, %v6054_v1 }
 0x2e5   :  { %v6797_v18 = vpop.eup %4748  ;;  %4768 = vrcp.f32 %v2665_v63  ;;  %v2681_v61 = vadd.f32 1.0, %v4747_v51  ;;  %v6830_v51 = vadd.f32 %v6551_v24, %v6052_v29  ;;  %v4179_v21 = vmul.f32 -1.442695, %v6816_v40 }
 0x2e6   :  { %v4751_v49 = vpop.eup %4750  ;;  %4770 = vpow2.f32 %v4176_v27 }
 0x2e7   :  { %v4753_v20 = vpop.eup %4752  ;;  %4772 = vrcp.f32 %v2681_v61  ;;  %2277 = vrot.lane.b32.xlu1 %v4751_v49, %s4944_s4  ;;  %8658 = vst [vmem:[#allocation56_spill] sm:$0xff] %v6830_v51  ;;  %v4180_v24 = vmul.f32 -1.442695, %v6830_v51  ;;  %v8693_v51 = vld [vmem:[#allocation45_spill] sm:$0xff] }
 0x2e8   :  { %v6807_v4 = vpop.eup %4754  ;;  %2856 = vst.msk [vmem:[%s8398_s7 + $0xe8] sm:$0xff] %vm102_vm0, %v4753_v20  ;;  %4774 = vpow2.f32 %v4240_v44  ;;  %v1671_v20 = vadd.f32 %v6555_v2, %v6054_v1  ;;  %v3601_v17 = vsel %vm102_vm0, %v8693_v51, 0.0  ;;  %v8696_v51 = vld [vmem:[#allocation39_spill] sm:$0xff] }
 0x2e9   :  { %v4757_v33 = vpop.eup %4756  ;;  %4776 = vpow2.f32 %v4177_v53 }
 0x2ea   :  { %v4759_v7 = vpop.eup %4758  ;;  %v1978_v27 = vadd.f32 1.0, %v4757_v33  ;;  %4778 = vpow2.f32 %v4241_v46  ;;  %v4243_v46 = vmul.f32 -1.442695, %v1665_v55 }
 0x2eb   :  { %v6820_v63 = vpop.eup %4760  ;;  %4780 = vrcp.f32 %v1960_v58  ;;  %2872 = vst.msk [vmem:[%s8398_s7 + $0x168] sm:$0xff] %vm102_vm0, %v4759_v7  ;;  %2217 = vrot.lane.b32.xlu1 %v6328_v30, %s4944_s4 }
 0x2ec   :  { %v4763_v0 = vpop.eup %4762  ;;  %4782 = vrcp.f32 %v1978_v27 }
 0x2ed   :  { %v4765_v44 = vpop.eup %4764  ;;  %v2666_v61 = vadd.f32 1.0, %v4763_v0  ;;  %4784 = vpow2.f32 %v4178_v56  ;;  %v6843_v56 = vadd.f32 %v6587_v35, %v6052_v29  ;;  %v4244_v0 = vmul.f32 -1.442695, %v1671_v20 }
 0x2ee   :  { %v4767_v53 = vpop.eup %4766  ;;  %v2682_v49 = vadd.f32 1.0, %v4765_v44  ;;  %4786 = vpow2.f32 %v4242_v60  ;;  %v1677_v35 = vadd.f32 %v6593_v52, %v6054_v1 }
 0x2ef   :  { %v4769_v36 = vpop.eup %4768  ;;  %4788 = vrcp.f32 %v2666_v61  ;;  %2279 = vrot.lane.b32.xlu0 %v4767_v53, %s4944_s4  ;;  %v6858_v53 = vadd.f32 %v6615_v16, %v6052_v29 }
 0x2f0   :  { %v4771_v30 = vpop.eup %4770  ;;  %2857 = vst.msk [vmem:[%s8398_s7 + $0xf0] sm:$0xff] %vm102_vm0, %v4769_v36  ;;  %4790 = vrcp.f32 %v2682_v49  ;;  %v4245_v52 = vmul.f32 -1.442695, %v1677_v35 }
 0x2f1   :  { %v4773_v58 = vpop.eup %4772  ;;  %v1979_v33 = vadd.f32 1.0, %v4771_v30  ;;  %4792 = vpow2.f32 %v4179_v21  ;;  %v4181_v21 = vmul.f32 -1.442695, %v6843_v56  ;;  %8659 = vst [vmem:[#allocation57_spill] sm:$0xff] %v6858_v53  ;;  %v1683_v30 = vadd.f32 %v6618_v11, %v6054_v1 }
 0x2f2   :  { %v4775_v7 = vpop.eup %4774  ;;  %2873 = vst.msk [vmem:[%s8398_s7 + $0x170] sm:$0xff] %vm102_vm0, %v4773_v58  ;;  %4794 = vpow2.f32 %v4243_v46  ;;  %v4182_v58 = vmul.f32 -1.442695, %v6858_v53  ;;  %v1689_v11 = vadd.f32 %v6635_v12, %v6054_v1 }
 0x2f3   :  { %v4777_v27 = vpop.eup %4776  ;;  %4796 = vrcp.f32 %v1979_v33  ;;  %v2683_v60 = vadd.f32 1.0, %v4775_v7  ;;  %2219 = vrot.lane.b32.xlu0 %v6381_v3, %s4944_s4  ;;  %v6872_v7 = vadd.f32 %v6629_v45, %v6052_v29  ;;  %v6884_v45 = vadd.f32 %v6644_v22, %v6052_v29 }
 0x2f4   :  { %v4779_v2 = vpop.eup %4778  ;;  %v1980_v55 = vadd.f32 1.0, %v4777_v27  ;;  %4798 = vpow2.f32 %v4180_v24  ;;  %v4247_v22 = vmul.f32 -1.442695, %v1689_v11  ;;  %v1701_v11 = vadd.f32 %v6670_v57, %v6054_v1 }
 0x2f5   :  { %v6853_v44 = vpop.eup %4780  ;;  %4800 = vrcp.f32 %v2683_v60  ;;  %v2684_v61 = vadd.f32 1.0, %v4779_v2  ;;  %8660 = vst [vmem:[#allocation58_spill] sm:$0xff] %v6884_v45  ;;  %v4183_v12 = vmul.f32 -1.442695, %v6872_v7 }
 0x2f6   :  { %v4783_v49 = vpop.eup %4782  ;;  %4802 = vrcp.f32 %v1980_v55  ;;  %v4246_v55 = vmul.f32 -1.442695, %v1683_v30 }
 0x2f7   :  { %v4785_v3 = vpop.eup %4784  ;;  %4804 = vrcp.f32 %v2684_v61  ;;  %2281 = vrot.lane.b32.xlu1 %v4783_v49, %s4944_s4  ;;  %v6886_v61 = vpop.permute.xlu0 %2251 }
 0x2f8   :  { %v4787_v46 = vpop.eup %4786  ;;  %v1981_v36 = vadd.f32 1.0, %v4785_v3  ;;  %4806 = vpow2.f32 %v4244_v0 }
 0x2f9   :  { %v4789_v24 = vpop.eup %4788  ;;  %v2685_v20 = vadd.f32 1.0, %v4787_v46  ;;  %4808 = vpow2.f32 %v4181_v21  ;;  %v6864_v16 = vpop.permute.xlu1 %2253 }
 0x2fa   :  { %v4791_v33 = vpop.eup %4790  ;;  %2858 = vst.msk [vmem:[%s8398_s7 + $0xf8] sm:$0xff] %vm102_vm0, %v4789_v24  ;;  %4810 = vrcp.f32 %v1981_v36  ;;  %v4184_v24 = vmul.f32 -1.442695, %v6884_v45 }
 0x2fb   :  { %v4793_v27 = vpop.eup %4792  ;;  %2874 = vst.msk [vmem:[%s8398_s7 + $0x178] sm:$0xff] %vm102_vm0, %v4791_v33  ;;  %4812 = vrcp.f32 %v2685_v20  ;;  %2221 = vrot.lane.b32.xlu1 %v6430_v9, %s4944_s4  ;;  %v8661_v9 = vld [vmem:[#allocation18_spill] sm:$0xff]  ;;  %v6902_v20 = vadd.f32 %v6668_v23, %v6052_v29  ;;  %v8662_v23 = vld [vmem:[#allocation35_spill] sm:$0xff] }
 0x2fc   :  { %v4795_v60 = vpop.eup %4794  ;;  %v1982_v2 = vadd.f32 1.0, %v4793_v27  ;;  %4814 = vpow2.f32 %v4245_v52  ;;  %v1695_v52 = vadd.f32 %v6649_v10, %v6054_v1 }
 0x2fd   :  { %v4797_v0 = vpop.eup %4796  ;;  %v2686_v35 = vadd.f32 1.0, %v4795_v60  ;;  %4816 = vpow2.f32 %v4182_v58  ;;  %v2192_v21 = vpop.permute.xlu1 %2191 }
 0x2fe   :  { %v4799_v49 = vpop.eup %4798  ;;  %4818 = vrcp.f32 %v1982_v2  ;;  %2283 = vrot.lane.b32.xlu0 %v4797_v0, %s4944_s4  ;;  %v6891_v3 = vmul.f32 %v2192_v21, %v8661_v9 }
 0x2ff   :  { %v4801_v46 = vpop.eup %4800  ;;  %4820 = vrcp.f32 %v2686_v35  ;;  %v1983_v36 = vadd.f32 1.0, %v4799_v49  ;;  %v4248_v35 = vmul.f32 -1.442695, %v1695_v52 }
 0x300   :  { %v4803_v30 = vpop.eup %4802  ;;  %2875 = vst.msk [vmem:[%s8398_s7 + $0x180] sm:$0xff] %vm102_vm0, %v4801_v46  ;;  %4822 = vpow2.f32 %v4246_v55  ;;  %v6906_v58 = vmul.f32 %v6891_v3, %v6891_v3  ;;  %v6925_v46 = vadd.f32 %v6680_v37, %v6052_v29  ;;  %v1707_v37 = vadd.f32 %v6682_v6, %v6054_v1 }
 0x301   :  { %v4805_v33 = vpop.eup %4804  ;;  %4824 = vrcp.f32 %v1983_v36  ;;  %2285 = vrot.lane.b32.xlu1 %v4803_v30, %s4944_s4  ;;  %v6909_v10 = vpop.permute.xlu0 %2255  ;;  %v8664_v36 = vld [vmem:[#allocation38_spill] sm:$0xff]  ;;  %v8665_v30 = vld [vmem:[#allocation19_spill] sm:$0xff]  ;;  %v6949_v6 = vadd.f32 %v6703_v8, %v6052_v29 }
 0x302   :  { %v4807_v27 = vpop.eup %4806  ;;  %2876 = vst.msk [vmem:[%s8398_s7 + $0x188] sm:$0xff] %vm102_vm0, %v4805_v33  ;;  %4826 = vpow2.f32 %v4183_v12  ;;  %2223 = vrot.lane.b32.xlu0 %v8662_v23, %s4944_s4  ;;  %v3870_v60 = vsel %vm3733_vm1, %v6906_v58, 0.0  ;;  %v2194_v2 = vpop.permute.xlu1 %2193  ;;  %v4185_v12 = vmul.f32 -1.442695, %v6902_v20  ;;  %8663 = vst [vmem:[#allocation18_spill] sm:$0xff] %v6925_v46 }
 0x303   :  { %v4809_v55 = vpop.eup %4808  ;;  %v2687_v0 = vadd.f32 1.0, %v4807_v27  ;;  %4828 = vpow2.f32 %v4247_v22  ;;  %v3871_v21 = vadd.f32 %v3870_v60, %v6613_v5  ;;  %v6930_v33 = vmul.f32 %v2194_v2, %v8665_v30  ;;  %v8666_v60 = vld [vmem:[#allocation20_spill] sm:$0xff] }
 0x304   :  { %v4811_v49 = vpop.eup %4810  ;;  %v1984_v9 = vadd.f32 1.0, %v4809_v55  ;;  %4830 = vpow2.f32 %v4184_v24  ;;  %v4249_v5 = vmul.f32 -1.442695, %v1701_v11  ;;  %v1713_v11 = vadd.f32 %v6705_v25, %v6054_v1 }
 0x305   :  { %v4813_v57 = vpop.eup %4812  ;;  %4832 = vrcp.f32 %v2687_v0  ;;  %2225 = vrot.lane.b32.xlu1 %v8664_v36, %s4944_s4  ;;  %v2196_v22 = vpop.permute.xlu0 %2195  ;;  %v6941_v23 = vmul.f32 %v6930_v33, %v6930_v33  ;;  %v4250_v8 = vmul.f32 -1.442695, %v1707_v37  ;;  %v3408_v50 = vsel %vm102_vm0, %v6930_v33, 0.0 }
 0x306   :  { %v4815_v52 = vpop.eup %4814  ;;  %2877 = vst.msk [vmem:[%s8398_s7 + $0x190] sm:$0xff] %vm102_vm0, %v4813_v57  ;;  %4834 = vrcp.f32 %v1984_v9  ;;  %2287 = vrot.lane.b32.xlu0 %v4811_v49, %s4944_s4  ;;  %v6944_v2 = vmul.f32 %v2196_v22, %v8666_v60  ;;  %v4186_v9 = vmul.f32 -1.442695, %v6925_v46  ;;  %v4187_v60 = vmul.f32 -1.442695, %v6949_v6 }
 0x307   :  { %v4817_v24 = vpop.eup %4816  ;;  %v2688_v27 = vadd.f32 1.0, %v4815_v52  ;;  %4836 = vpow2.f32 %v4248_v35  ;;  %v3872_v35 = vsel %vm3733_vm1, %v6941_v23, 0.0  ;;  %v3406_v46 = vsel %vm102_vm0, %v6891_v3, 0.0 }
 0x308   :  { %v4819_v55 = vpop.eup %4818  ;;  %v1985_v0 = vadd.f32 1.0, %v4817_v24  ;;  %4838 = vpow2.f32 %v4185_v12  ;;  %v3873_v12 = vadd.f32 %v3872_v35, %v3871_v21  ;;  %v6966_v25 = vmul.f32 %v6944_v2, %v6944_v2 }
 0x309   :  { %v4821_v49 = vpop.eup %4820  ;;  %4840 = vrcp.f32 %v2688_v27  ;;  %2289 = vrot.lane.b32.xlu1 %v4819_v55, %s4944_s4  ;;  %v4251_v55 = vmul.f32 -1.442695, %v1713_v11  ;;  %v1719_v11 = vadd.f32 %v6721_v26, %v6054_v1 }
 0x30a   :  { %v4823_v57 = vpop.eup %4822  ;;  %2878 = vst.msk [vmem:[%s8398_s7 + $0x198] sm:$0xff] %vm102_vm0, %v4821_v49  ;;  %4842 = vrcp.f32 %v1985_v0  ;;  %2227 = vrot.lane.b32.xlu0 %v6528_v14, %s4944_s4  ;;  %v6962_v36 = vpop.permute.xlu1 %2257  ;;  %v3874_v37 = vsel %vm3733_vm1, %v6966_v25, 0.0 }
 0x30b   :  { %v4825_v30 = vpop.eup %4824  ;;  %v2689_v22 = vadd.f32 1.0, %v4823_v57  ;;  %4844 = vpow2.f32 %v4249_v5  ;;  %v6974_v5 = vadd.f32 %v6715_v31, %v6052_v29  ;;  %v8668_v57 = vld [vmem:[#allocation21_spill] sm:$0xff] }
 0x30c   :  { %v4827_v52 = vpop.eup %4826  ;;  %4846 = vpow2.f32 %v4186_v9 }
 0x30d   :  { %v4829_v24 = vpop.eup %4828  ;;  %4848 = vrcp.f32 %v2689_v22  ;;  %v1986_v27 = vadd.f32 1.0, %v4827_v52  ;;  %2229 = vrot.lane.b32.xlu1 %v6564_v15, %s4944_s4  ;;  %8667 = vst [vmem:[#allocation35_spill] sm:$0xff] %v6974_v5  ;;  %v3875_v15 = vadd.f32 %v3874_v37, %v3873_v12  ;;  %v4188_v26 = vmul.f32 -1.442695, %v6974_v5 }
 0x30e   :  { %v4831_v14 = vpop.eup %4830  ;;  %v2690_v21 = vadd.f32 1.0, %v4829_v24  ;;  %4850 = vpow2.f32 %v4250_v8  ;;  %2291 = vrot.lane.b32.xlu0 %v4825_v30, %s4944_s4  ;;  %v2198_v0 = vpop.permute.xlu1 %2197  ;;  %v6995_v12 = vadd.f32 %v6732_v59, %v6052_v29  ;;  %v4252_v37 = vmul.f32 -1.442695, %v1719_v11 }
 0x30f   :  { %v4833_v9 = vpop.eup %4832  ;;  %4852 = vrcp.f32 %v1986_v27  ;;  %v1987_v49 = vadd.f32 1.0, %v4831_v14  ;;  %v6987_v8 = vmul.f32 %v2198_v0, %v8668_v57  ;;  %v8669_v27 = vld [vmem:[#allocation34_spill] sm:$0xff] }
 0x310   :  { %v4835_v35 = vpop.eup %4834  ;;  %2879 = vst.msk [vmem:[%s8398_s7 + $0x1a0] sm:$0xff] %vm102_vm0, %v4833_v9  ;;  %4854 = vrcp.f32 %v2690_v21  ;;  %v6984_v31 = vpop.permute.xlu0 %2259  ;;  %v6999_v14 = vadd.f32 %v8669_v27, %v6052_v29  ;;  %v4189_v11 = vmul.f32 -1.442695, %v6995_v12 }
 0x311   :  { %v4837_v30 = vpop.eup %4836  ;;  %4856 = vrcp.f32 %v1987_v49  ;;  %2293 = vrot.lane.b32.xlu1 %v4835_v35, %s4944_s4  ;;  %v7009_v59 = vmul.f32 %v6987_v8, %v6987_v8 }
 0x312   :  { %v4839_v22 = vpop.eup %4838  ;;  %v2691_v52 = vadd.f32 1.0, %v4837_v30  ;;  %4858 = vpow2.f32 %v4187_v60  ;;  %2231 = vrot.lane.b32.xlu0 %v6605_v54, %s4944_s4  ;;  %v1725_v54 = vadd.f32 %v6734_v28, %v6054_v1  ;;  %v1731_v28 = vadd.f32 %v6753_v13, %v6054_v1 }
 0x313   :  { %v4841_v24 = vpop.eup %4840  ;;  %v1988_v21 = vadd.f32 1.0, %v4839_v22  ;;  %4860 = vpow2.f32 %v4251_v55  ;;  %v4159_v57 = vmul.f32 -1.442695, %v6999_v14 }
 0x314   :  { %v4843_v0 = vpop.eup %4842  ;;  %2880 = vst.msk [vmem:[%s8398_s7 + $0x1a8] sm:$0xff] %vm102_vm0, %v4841_v24  ;;  %4862 = vrcp.f32 %v2691_v52  ;;  %v2200_v55 = vpop.permute.xlu0 %2199  ;;  %v3876_v52 = vsel %vm3733_vm1, %v7009_v59, 0.0 }
 0x315   :  { %v4845_v60 = vpop.eup %4844  ;;  %4864 = vrcp.f32 %v1988_v21  ;;  %2233 = vrot.lane.b32.xlu1 %v6638_v38, %s4944_s4  ;;  %v4253_v38 = vmul.f32 -1.442695, %v1725_v54  ;;  %v7029_v21 = vadd.f32 %v6747_v62, %v6052_v29  ;;  %v4254_v54 = vmul.f32 -1.442695, %v1731_v28 }
 0x316   :  { %v4847_v9 = vpop.eup %4846  ;;  %v2692_v49 = vadd.f32 1.0, %v4845_v60  ;;  %4866 = vpow2.f32 %v4188_v26  ;;  %2295 = vrot.lane.b32.xlu0 %v4843_v0, %s4944_s4  ;;  %v8670_v26 = vld [vmem:[#allocation22_spill] sm:$0xff]  ;;  %v1737_v60 = vadd.f32 %v6771_v41, %v6054_v1 }
 0x317   :  { %v4849_v35 = vpop.eup %4848  ;;  %v1989_v30 = vadd.f32 1.0, %v4847_v9  ;;  %4868 = vpow2.f32 %v4252_v37  ;;  %v7025_v24 = vmul.f32 %v2200_v55, %v8670_v26  ;;  %8671 = vst [vmem:[#allocation38_spill] sm:$0xff] %v7029_v21  ;;  %v3877_v37 = vadd.f32 %v3876_v52, %v3875_v15 }
 0x318   :  { %v4851_v22 = vpop.eup %4850  ;;  %2881 = vst.msk [vmem:[%s8398_s7 + $0x1b0] sm:$0xff] %vm102_vm0, %v4849_v35  ;;  %4870 = vrcp.f32 %v2692_v49  ;;  %v4190_v41 = vmul.f32 -1.442695, %v7029_v21  ;;  %v8689_v21 = vld [vmem:[#allocation33_spill] sm:$0xff] }
 0x319   :  { %v4853_v13 = vpop.eup %4852  ;;  %4872 = vrcp.f32 %v1989_v30  ;;  %v2693_v27 = vadd.f32 1.0, %v4851_v22  ;;  %v7038_v55 = vmul.f32 %v7025_v24, %v7025_v24  ;;  %v7051_v30 = vadd.f32 %v6768_v32, %v6052_v29 }
 0x31a   :  { %v4855_v0 = vpop.eup %4854  ;;  %4874 = vpow2.f32 %v4189_v11  ;;  %2235 = vrot.lane.b32.xlu0 %v6693_v43, %s4944_s4  ;;  %2297 = vrot.lane.b32.xlu1 %v4853_v13, %s4944_s4  ;;  %v7040_v9 = vpop.permute.xlu1 %2261  ;;  %v4255_v22 = vmul.f32 -1.442695, %v1737_v60 }
 0x31b   :  { %v4857_v62 = vpop.eup %4856  ;;  %2882 = vst.msk [vmem:[%s8398_s7 + $0x1b8] sm:$0xff] %vm102_vm0, %v4855_v0  ;;  %4876 = vrcp.f32 %v2693_v27  ;;  %v3878_v15 = vsel %vm3733_vm1, %v7038_v55, 0.0  ;;  %8672 = vst [vmem:[#allocation19_spill] sm:$0xff] %v7051_v30  ;;  %v4191_v0 = vmul.f32 -1.442695, %v7051_v30 }
 0x31c   :  { %v4859_v43 = vpop.eup %4858  ;;  %4878 = vpow2.f32 %v4253_v38  ;;  %v3879_v11 = vadd.f32 %v3878_v15, %v3877_v37 }
 0x31d   :  { %v4861_v49 = vpop.eup %4860  ;;  %4880 = vpow2.f32 %v4159_v57  ;;  %v1990_v1 = vadd.f32 1.0, %v4859_v43  ;;  %v8673_v57 = vld [vmem:[#allocation23_spill] sm:$0xff] }
 0x31e   :  { %v4863_v28 = vpop.eup %4862  ;;  %v2694_v35 = vadd.f32 1.0, %v4861_v49  ;;  %4882 = vpow2.f32 %v4254_v54  ;;  %2299 = vrot.lane.b32.xlu0 %v4857_v62, %s4944_s4  ;;  %2237 = vrot.lane.b32.xlu1 %v6741_v39, %s4944_s4  ;;  %v2202_v38 = vpop.permute.xlu1 %2201 }
 0x31f   :  { %v4865_v52 = vpop.eup %4864  ;;  %2883 = vst.msk [vmem:[%s8398_s7 + $0x1c0] sm:$0xff] %vm102_vm0, %v4863_v28  ;;  %4884 = vrcp.f32 %v1990_v1  ;;  %v7061_v26 = vmul.f32 %v2202_v38, %v8673_v57  ;;  %v8674_v38 = vld [vmem:[#allocation25_spill] sm:$0xff] }
 0x320   :  { %v4867_v13 = vpop.eup %4866  ;;  %4886 = vrcp.f32 %v2694_v35 }
 0x321   :  { %v4869_v29 = vpop.eup %4868  ;;  %v1991_v32 = vadd.f32 1.0, %v4867_v13  ;;  %4888 = vpow2.f32 %v4190_v41  ;;  %v7065_v27 = vmul.f32 %v7061_v26, %v7061_v26 }
 0x322   :  { %v4871_v39 = vpop.eup %4870  ;;  %v2695_v37 = vadd.f32 1.0, %v4869_v29  ;;  %4890 = vpow2.f32 %v4255_v22  ;;  %2239 = vrot.lane.b32.xlu0 %v6762_v42, %s4944_s4  ;;  %2301 = vrot.lane.b32.xlu1 %v4865_v52, %s4944_s4  ;;  %v7071_v54 = vpop.permute.xlu0 %2263 }
 0x323   :  { %v4873_v60 = vpop.eup %4872  ;;  %2884 = vst.msk [vmem:[%s8398_s7 + $0x1c8] sm:$0xff] %vm102_vm0, %v4871_v39  ;;  %4892 = vrcp.f32 %v1991_v32  ;;  %v3880_v43 = vsel %vm3733_vm1, %v7065_v27, 0.0  ;;  %v1961_v39 = vadd.f32 1.0, %v6820_v63 }
 0x324   :  { %v4875_v62 = vpop.eup %4874  ;;  %4894 = vrcp.f32 %v2695_v37  ;;  %v3881_v42 = vadd.f32 %v3880_v43, %v3879_v11 }
 0x325   :  { %v4877_v15 = vpop.eup %4876  ;;  %v1992_v49 = vadd.f32 1.0, %v4875_v62  ;;  %4896 = vpow2.f32 %v4191_v0 }
 0x326   :  { %v4879_v1 = vpop.eup %4878  ;;  %2885 = vst.msk [vmem:[%s8398_s7 + $0x1d0] sm:$0xff] %vm102_vm0, %v4877_v15  ;;  %2303 = vrot.lane.b32.xlu0 %v4873_v60, %s4944_s4  ;;  %2241 = vrot.lane.b32.xlu1 %v6797_v18, %s4944_s4  ;;  %v2204_v41 = vpop.permute.xlu0 %2203 }
 0x327   :  { %v4881_v28 = vpop.eup %4880  ;;  %4898 = vrcp.f32 %v1992_v49  ;;  %v2696_v35 = vadd.f32 1.0, %v4879_v1  ;;  %v7087_v52 = vmul.f32 %v2204_v41, %v8674_v38  ;;  %v8675_v49 = vld [vmem:[#allocation24_spill] sm:$0xff] }
 0x328   :  { %v4883_v22 = vpop.eup %4882  ;;  %v1962_v15 = vadd.f32 1.0, %v4881_v28 }
 0x329   :  { %v4885_v57 = vpop.eup %4884  ;;  %4900 = vrcp.f32 %v2696_v35  ;;  %v2697_v13 = vadd.f32 1.0, %v4883_v22  ;;  %v7089_v29 = vpop.permute.xlu1 %2265  ;;  %v7097_v18 = vmul.f32 %v7087_v52, %v7087_v52 }
 0x32a   :  { %v4887_v32 = vpop.eup %4886  ;;  %2243 = vrot.lane.b32.xlu0 %v6807_v4, %s4944_s4  ;;  %2305 = vrot.lane.b32.xlu1 %v4885_v57, %s4944_s4  ;;  %v7247_v5 = vmul.f32 %v7089_v29, %v8689_v21  ;;  %v8691_v21 = vld [vmem:[#allocation37_spill] sm:$0xff] }
 0x32b   :  { %v4889_v11 = vpop.eup %4888  ;;  %2886 = vst.msk [vmem:[%s8398_s7 + $0x1d8] sm:$0xff] %vm102_vm0, %v4887_v32  ;;  %4902 = vrcp.f32 %v2697_v13  ;;  %v3882_v63 = vsel %vm3733_vm1, %v7097_v18, 0.0  ;;  %v8676_v13 = vld [vmem:[#allocation8_spill] sm:$0xff] }
 0x32c   :  { %v4891_v37 = vpop.eup %4890  ;;  %v3883_v4 = vadd.f32 %v3882_v63, %v3881_v42  ;;  %4904 = vrcp.f32 %v1961_v39  ;;  %v1993_v41 = vadd.f32 1.0, %v4889_v11  ;;  %v7132_v32 = vmul.f32 %v6886_v61, %v8676_v13  ;;  %v8677_v63 = vld [vmem:[#allocation26_spill] sm:$0xff]  ;;  %8690 = vst [vmem:[#allocation21_spill] sm:$0xff] %v7247_v5 }
 0x32d   :  { %v4893_v0 = vpop.eup %4892  ;;  %v2698_v60 = vadd.f32 1.0, %v4891_v37  ;;  %v2206_v62 = vpop.permute.xlu1 %2205 }
 0x32e   :  { %v4895_v43 = vpop.eup %4894  ;;  %2307 = vrot.lane.b32.xlu0 %v4893_v0, %s4944_s4  ;;  %2245 = vrot.lane.b32.xlu1 %v6853_v44, %s4944_s4  ;;  %v7109_v1 = vmul.f32 %v2206_v62, %v8675_v49 }
 0x32f   :  { %2887 = vst.msk [vmem:[%s8398_s7 + $0x1e0] sm:$0xff] %vm102_vm0, %v4895_v43  ;;  %4906 = vrcp.f32 %v2698_v60  ;;  %v4897_v42 = vpop.eup %4896 }
 0x330   :  { %v7115_v35 = vpop.permute.xlu0 %2267  ;;  %v7119_v28 = vmul.f32 %v7109_v1, %v7109_v1  ;;  %4908 = vrcp.f32 %v1962_v15  ;;  %v1994_v57 = vadd.f32 1.0, %v4897_v42 }
 0x331   :  { %v4899_v22 = vpop.eup %4898  ;;  %4910 = vrcp.f32 %v1993_v41  ;;  %v7265_v29 = vmul.f32 %v7115_v35, %v8691_v21  ;;  %v8694_v35 = vld [vmem:[#allocation7_spill] sm:$0xff] }
 0x332   :  { %3083 = vrot.lane.b32.xlu0 %v6548_v48, %s4945_s13  ;;  %2309 = vrot.lane.b32.xlu1 %v4899_v22, %s4944_s4  ;;  %v3884_v44 = vsel %vm3733_vm1, %v7119_v28, 0.0  ;;  %4912 = vrcp.f32 %v1994_v57 }
 0x333   :  { %v4901_v38 = vpop.eup %4900  ;;  %v3885_v39 = vadd.f32 %v3884_v44, %v3883_v4  ;;  %v8678_v4 = vld [vmem:[#allocation10_spill] sm:$0xff]  ;;  %v8679_v44 = vld [vmem:[#allocation27_spill] sm:$0xff]  ;;  %8692 = vst [vmem:[#allocation34_spill] sm:$0xff] %v7265_v29 }
 0x334   :  { %2888 = vst.msk [vmem:[%s8398_s7 + $0x1e8] sm:$0xff] %vm102_vm0, %v4901_v38  ;;  %v2208_v11 = vpop.permute.xlu0 %2207  ;;  %v7151_v62 = vmul.f32 %v6864_v16, %v8678_v4 }
 0x335   :  { %v4903_v37 = vpop.eup %4902  ;;  %v7135_v0 = vmul.f32 %v2208_v11, %v8677_v63 }
 0x336   :  { %2889 = vst.msk [vmem:[%s8398_s7 + $0x1f0] sm:$0xff] %vm102_vm0, %v4903_v37  ;;  %3147 = vrot.lane.b32.xlu0 %v7132_v32, %s4945_s13  ;;  %3085 = vrot.lane.b32.xlu1 %v6579_v47, %s4945_s13  ;;  %v4905_v60 = vpop.eup %4904  ;;  %v8680_v37 = vld [vmem:[#allocation12_spill] sm:$0xff] }
 0x337   :  { %v7147_v61 = vmul.f32 %v7135_v0, %v7135_v0  ;;  %v7182_v63 = vmul.f32 %v6909_v10, %v8680_v37 }
 0x339   :  { %v4907_v43 = vpop.eup %4906  ;;  %v3886_v15 = vsel %vm3733_vm1, %v7147_v61, 0.0  ;;  %v7155_v49 = vpop.permute.xlu1 %2269 }
 0x33a   :  { %2890 = vst.msk [vmem:[%s8398_s7 + $0x1f8] sm:$0xff] %vm102_vm0, %v4907_v43  ;;  %2247 = vrot.lane.b32.xlu0 %v4905_v60, %s4944_s4  ;;  %3149 = vrot.lane.b32.xlu1 %v7151_v62, %s4945_s13  ;;  %v3887_v41 = vadd.f32 %v3886_v15, %v3885_v39  ;;  %v4909_v42 = vpop.eup %4908  ;;  %v8681_v43 = vld [vmem:[#allocation28_spill] sm:$0xff] }
 0x33b   :  { %v4911_v16 = vpop.eup %4910 }
 0x33c   :  { %v4913_v11 = vpop.eup %4912 }
 0x33d   :  { %v2210_v22 = vpop.permute.xlu1 %2209 }
 0x33e   :  { %2311 = vrot.lane.b32.xlu0 %v4911_v16, %s4944_s4  ;;  %2249 = vrot.lane.b32.xlu1 %v4909_v42, %s4944_s4  ;;  %v7167_v38 = vmul.f32 %v2210_v22, %v8679_v44  ;;  %v8682_v16 = vld [vmem:[#allocation14_spill] sm:$0xff] }
 0x33f   :  { %v7197_v22 = vmul.f32 %v6962_v36, %v8682_v16  ;;  %v8685_v16 = vld [vmem:[#allocation29_spill] sm:$0xff] }
 0x340   :  { %v7169_v57 = vpop.permute.xlu0 %2271  ;;  %v7173_v13 = vmul.f32 %v7167_v38, %v7167_v38 }
 0x342   :  { %3087 = vrot.lane.b32.xlu0 %v6891_v3, %s4945_s13  ;;  %2313 = vrot.lane.b32.xlu1 %v4913_v11, %s4944_s4  ;;  %v3888_v39 = vsel %vm3733_vm1, %v7173_v13, 0.0  ;;  %v8683_v11 = vld [vmem:[#allocation16_spill] sm:$0xff] }
 0x343   :  { %v3889_v60 = vadd.f32 %v3888_v39, %v3887_v41  ;;  %v7209_v39 = vmul.f32 %v6984_v31, %v8683_v11 }
 0x344   :  { %v2212_v4 = vpop.permute.xlu0 %2211 }
 0x345   :  { %v7185_v15 = vmul.f32 %v2212_v4, %v8681_v43  ;;  %v8684_v4 = vld [vmem:[#allocation5_spill] sm:$0xff] }
 0x346   :  { %3151 = vrot.lane.b32.xlu0 %v7182_v63, %s4945_s13  ;;  %3089 = vrot.lane.b32.xlu1 %v6930_v33, %s4945_s13 }
 0x347   :  { %v7193_v42 = vmul.f32 %v7185_v15, %v7185_v15 }
 0x348   :  { %v7199_v10 = vpop.permute.xlu1 %2273 }
 0x349   :  { %v3890_v41 = vsel %vm3733_vm1, %v7193_v42, 0.0 }
 0x34a   :  { %3091 = vrot.lane.b32.xlu0 %v6944_v2, %s4945_s13  ;;  %3153 = vrot.lane.b32.xlu1 %v7197_v22, %s4945_s13  ;;  %v3891_v44 = vadd.f32 %v3890_v41, %v3889_v60  ;;  %v7224_v60 = vmul.f32 %v7040_v9, %v8685_v16  ;;  %v8688_v16 = vld [vmem:[#allocation6_spill] sm:$0xff] }
 0x34c   :  { %v2214_v37 = vpop.permute.xlu1 %2213 }
 0x34d   :  { %v7212_v36 = vmul.f32 %v2214_v37, %v8684_v4  ;;  %v8686_v37 = vld [vmem:[#allocation31_spill] sm:$0xff] }
 0x34e   :  { %3155 = vrot.lane.b32.xlu0 %v7209_v39, %s4945_s13  ;;  %3093 = vrot.lane.b32.xlu1 %v6987_v8, %s4945_s13  ;;  %v7236_v4 = vmul.f32 %v7071_v54, %v8686_v37 }
 0x34f   :  { %v7220_v43 = vmul.f32 %v7212_v36, %v7212_v36 }
 0x350   :  { %8687 = vst [vmem:[#allocation20_spill] sm:$0xff] %v7236_v4 }
 0x351   :  { %v3892_v31 = vsel %vm3733_vm1, %v7220_v43, 0.0 }
 0x352   :  { %3095 = vrot.lane.b32.xlu0 %v7025_v24, %s4945_s13  ;;  %3157 = vrot.lane.b32.xlu1 %v7224_v60, %s4945_s13  ;;  %v7232_v41 = vpop.permute.xlu0 %2275  ;;  %v3893_v11 = vadd.f32 %v3892_v31, %v3891_v44  ;;  %v3404_v31 = vsel %vm102_vm0, %v6579_v47, 0.0 }
 0x356   :  { %3159 = vrot.lane.b32.xlu0 %v7236_v4, %s4945_s13  ;;  %3097 = vrot.lane.b32.xlu1 %v7061_v26, %s4945_s13  ;;  %v2216_v9 = vpop.permute.xlu0 %2215 }
 0x357   :  { %v7243_v30 = vmul.f32 %v2216_v9, %v8688_v16  ;;  %v3403_v16 = vsel %vm102_vm0, %v6548_v48, 0.0 }
 0x358   :  { %v3405_v53 = vadd.f32 %v3404_v31, %v3403_v16  ;;  %v3603_v31 = vsel %vm102_vm0, %v6906_v58, 0.0  ;;  %v7288_v16 = vmul.f32 %v7155_v49, %v8696_v51  ;;  %v8698_v49 = vld [vmem:[#allocation41_spill] sm:$0xff] }
 0x359   :  { %v7251_v44 = vmul.f32 %v7243_v30, %v7243_v30  ;;  %v7253_v54 = vpop.permute.xlu1 %2277  ;;  %v7304_v51 = vmul.f32 %v7169_v57, %v8698_v49  ;;  %v3607_v57 = vsel %vm102_vm0, %v6966_v25, 0.0 }
 0x35a   :  { %3099 = vrot.lane.b32.xlu0 %v7087_v52, %s4945_s13  ;;  %3161 = vrot.lane.b32.xlu1 %v7247_v5, %s4945_s13  ;;  %v3407_v5 = vadd.f32 %v3406_v46, %v3405_v53  ;;  %8697 = vst [vmem:[#allocation22_spill] sm:$0xff] %v7288_v16 }
 0x35b   :  { %v3894_v37 = vsel %vm3733_vm1, %v7251_v44, 0.0  ;;  %8699 = vst [vmem:[#allocation23_spill] sm:$0xff] %v7304_v51 }
 0x35c   :  { %v3895_v9 = vadd.f32 %v3894_v37, %v3893_v11  ;;  %v8695_v11 = vld [vmem:[#allocation43_spill] sm:$0xff]  ;;  %v3409_v4 = vadd.f32 %v3408_v50, %v3407_v5  ;;  %v3410_v50 = vsel %vm102_vm0, %v6944_v2, 0.0 }
 0x35d   :  { %v2218_v45 = vpop.permute.xlu1 %2217  ;;  %v3600_v37 = vsel %vm102_vm0, %v8695_v11, 0.0  ;;  %v3605_v11 = vsel %vm102_vm0, %v6941_v23, 0.0  ;;  %v3412_v23 = vsel %vm102_vm0, %v6987_v8, 0.0 }
 0x35e   :  { %3163 = vrot.lane.b32.xlu0 %v7265_v29, %s4945_s13  ;;  %3101 = vrot.lane.b32.xlu1 %v7109_v1, %s4945_s13  ;;  %v7278_v21 = vmul.f32 %v2218_v45, %v8694_v35  ;;  %v3602_v45 = vadd.f32 %v3601_v17, %v3600_v37  ;;  %v3411_v37 = vadd.f32 %v3410_v50, %v3409_v4 }
 0x360   :  { %v7292_v29 = vmul.f32 %v7278_v21, %v7278_v21  ;;  %v3604_v58 = vadd.f32 %v3603_v31, %v3602_v45  ;;  %v3413_v45 = vadd.f32 %v3412_v23, %v3411_v37  ;;  %v3416_v23 = vsel %vm102_vm0, %v7061_v26, 0.0 }
 0x361   :  { %v2280_v35 = vpop.permute.xlu0 %2279 }
 0x362   :  { %3103 = vrot.lane.b32.xlu0 %v7135_v0, %s4945_s13  ;;  %3165 = vrot.lane.b32.xlu1 %v7288_v16, %s4945_s13  ;;  %v3896_v53 = vsel %vm3733_vm1, %v7292_v29, 0.0  ;;  %v3606_v17 = vadd.f32 %v3605_v11, %v3604_v58  ;;  %v3609_v11 = vsel %vm102_vm0, %v7009_v59, 0.0 }
 0x363   :  { %v3897_v46 = vadd.f32 %v3896_v53, %v3895_v9  ;;  %v8700_v9 = vld [vmem:[#allocation9_spill] sm:$0xff]  ;;  %v8701_v53 = vld [vmem:[#allocation46_spill] sm:$0xff] }
 0x364   :  { %v7323_v58 = vmul.f32 %v7199_v10, %v8701_v53  ;;  %v3608_v49 = vadd.f32 %v3607_v57, %v3606_v17  ;;  %v3414_v10 = vsel %vm102_vm0, %v7025_v24, 0.0  ;;  %v8703_v17 = vld [vmem:[#allocation48_spill] sm:$0xff]  ;;  %v3611_v53 = vsel %vm102_vm0, %v7038_v55, 0.0 }
 0x365   :  { %v2220_v5 = vpop.permute.xlu0 %2219  ;;  %v3415_v37 = vadd.f32 %v3414_v10, %v3413_v45 }
 0x366   :  { %3167 = vrot.lane.b32.xlu0 %v7304_v51, %s4945_s13  ;;  %3105 = vrot.lane.b32.xlu1 %v7167_v38, %s4945_s13  ;;  %v7315_v31 = vmul.f32 %v2220_v5, %v8700_v9  ;;  %8702 = vst [vmem:[#allocation25_spill] sm:$0xff] %v7323_v58  ;;  %v3610_v59 = vadd.f32 %v3609_v11, %v3608_v49  ;;  %v3613_v11 = vsel %vm102_vm0, %v7065_v27, 0.0 }
 0x367   :  { %v7341_v9 = vmul.f32 %v7232_v41, %v8703_v17  ;;  %v3417_v51 = vadd.f32 %v3416_v23, %v3415_v37  ;;  %v8706_v41 = vld [vmem:[#allocation50_spill] sm:$0xff]  ;;  %v3418_v23 = vsel %vm102_vm0, %v7087_v52, 0.0  ;;  %v3420_v37 = vsel %vm102_vm0, %v7109_v1, 0.0 }
 0x368   :  { %v7327_v4 = vmul.f32 %v7315_v31, %v7315_v31  ;;  %v3612_v49 = vadd.f32 %v3611_v53, %v3610_v59  ;;  %v3615_v59 = vsel %vm102_vm0, %v7097_v18, 0.0 }
 0x369   :  { %v2282_v50 = vpop.permute.xlu1 %2281  ;;  %8704 = vst [vmem:[#allocation24_spill] sm:$0xff] %v7341_v9  ;;  %v3419_v17 = vadd.f32 %v3418_v23, %v3417_v51  ;;  %v8710_v23 = vld [vmem:[#allocation13_spill] sm:$0xff] }
 0x36a   :  { %3107 = vrot.lane.b32.xlu0 %v7185_v15, %s4945_s13  ;;  %v3898_v25 = vsel %vm3733_vm1, %v7327_v4, 0.0  ;;  %3169 = vrot.lane.b32.xlu1 %v7323_v58, %s4945_s13  ;;  %v3614_v27 = vadd.f32 %v3613_v11, %v3612_v49  ;;  %v3617_v11 = vsel %vm102_vm0, %v7119_v28, 0.0 }
 0x36b   :  { %v3899_v5 = vadd.f32 %v3898_v25, %v3897_v46  ;;  %v8705_v46 = vld [vmem:[#allocation11_spill] sm:$0xff]  ;;  %v7356_v25 = vmul.f32 %v7253_v54, %v8706_v41  ;;  %v3421_v53 = vadd.f32 %v3420_v37, %v3419_v17  ;;  %v3422_v37 = vsel %vm102_vm0, %v7135_v0, 0.0 }
 0x36c   :  { %v3616_v41 = vadd.f32 %v3615_v59, %v3614_v27  ;;  %v8711_v27 = vld [vmem:[#allocation52_spill] sm:$0xff] }
 0x36d   :  { %v2222_v57 = vpop.permute.xlu1 %2221  ;;  %8707 = vst [vmem:[#allocation8_spill] sm:$0xff] %v7356_v25  ;;  %v7397_v17 = vmul.f32 %v2282_v50, %v8711_v27 }
 0x36e   :  { %3171 = vrot.lane.b32.xlu0 %v7341_v9, %s4945_s13  ;;  %3109 = vrot.lane.b32.xlu1 %v7212_v36, %s4945_s13  ;;  %v7352_v45 = vmul.f32 %v2222_v57, %v8705_v46  ;;  %v7379_v46 = vmul.f32 %v2280_v35, %v6710_v34  ;;  %v3618_v18 = vadd.f32 %v3617_v11, %v3616_v41  ;;  %v3424_v34 = vsel %vm102_vm0, %v7167_v38, 0.0  ;;  %v8714_v11 = vld [vmem:[#allocation15_spill] sm:$0xff] }
 0x36f   :  { %8712 = vst [vmem:[#allocation27_spill] sm:$0xff] %v7397_v17  ;;  %v3619_v41 = vsel %vm102_vm0, %v7147_v61, 0.0  ;;  %v3428_v61 = vsel %vm102_vm0, %v7212_v36, 0.0 }
 0x370   :  { %v7358_v10 = vpop.permute.xlu0 %2283  ;;  %v7362_v55 = vmul.f32 %v7352_v45, %v7352_v45  ;;  %8709 = vst [vmem:[#allocation10_spill] sm:$0xff] %v7379_v46  ;;  %v3620_v50 = vadd.f32 %v3619_v41, %v3618_v18  ;;  %v3623_v41 = vsel %vm102_vm0, %v7193_v42, 0.0 }
 0x371   :  { %8708 = vst [vmem:[#allocation26_spill] sm:$0xff] %v7358_v10 }
 0x372   :  { %3111 = vrot.lane.b32.xlu0 %v7243_v30, %s4945_s13  ;;  %v3900_v54 = vsel %vm3733_vm1, %v7362_v55, 0.0  ;;  %3173 = vrot.lane.b32.xlu1 %v7356_v25, %s4945_s13  ;;  %v3633_v58 = vsel %vm102_vm0, %v7362_v55, 0.0 }
 0x373   :  { %v2286_v57 = vpop.permute.xlu1 %2285  ;;  %v3901_v51 = vadd.f32 %v3900_v54, %v3899_v5  ;;  %v3423_v5 = vadd.f32 %v3422_v37, %v3421_v53 }
 0x374   :  { %v2224_v49 = vpop.permute.xlu0 %2223 }
 0x375   :  { %v7382_v10 = vmul.f32 %v2224_v49, %v8710_v23  ;;  %v3425_v23 = vadd.f32 %v3424_v34, %v3423_v5  ;;  %v8715_v34 = vld [vmem:[#allocation17_spill] sm:$0xff] }
 0x376   :  { %3175 = vrot.lane.b32.xlu0 %v7379_v46, %s4945_s13  ;;  %3113 = vrot.lane.b32.xlu1 %v7278_v21, %s4945_s13  ;;  %v3621_v46 = vsel %vm102_vm0, %v7173_v13, 0.0 }
 0x377   :  { %v7394_v28 = vmul.f32 %v7382_v10, %v7382_v10  ;;  %v2226_v35 = vpop.permute.xlu1 %2225 }
 0x378   :  { %v7399_v54 = vpop.permute.xlu0 %2287  ;;  %v7404_v49 = vmul.f32 %v2226_v35, %v8714_v11  ;;  %v3622_v35 = vadd.f32 %v3621_v46, %v3620_v50  ;;  %v3426_v11 = vsel %vm102_vm0, %v7185_v15, 0.0 }
 0x379   :  { %8713 = vst [vmem:[#allocation12_spill] sm:$0xff] %v7399_v54  ;;  %v3902_v59 = vsel %vm3733_vm1, %v7394_v28, 0.0  ;;  %v8718_v54 = vld [vmem:[#allocation30_spill] sm:$0xff] }
 0x37a   :  { %v3903_v25 = vadd.f32 %v3902_v59, %v3901_v51  ;;  %3177 = vrot.lane.b32.xlu1 %v7397_v17, %s4945_s13  ;;  %v7414_v37 = vmul.f32 %v7404_v49, %v7404_v49  ;;  %v3427_v51 = vadd.f32 %v3426_v11, %v3425_v23  ;;  %v7436_v23 = vmul.f32 %v2286_v57, %v6786_v19 }
 0x37b   :  { %v2290_v53 = vpop.permute.xlu1 %2289  ;;  %v3432_v19 = vsel %vm102_vm0, %v7278_v21, 0.0  ;;  %v3440_v55 = vsel %vm102_vm0, %v7404_v49, 0.0 }
 0x37c   :  { %v2228_v27 = vpop.permute.xlu0 %2227  ;;  %v3904_v18 = vsel %vm3733_vm1, %v7414_v37, 0.0  ;;  %v3429_v50 = vadd.f32 %v3428_v61, %v3427_v51  ;;  %8716 = vst [vmem:[#allocation28_spill] sm:$0xff] %v7436_v23 }
 0x37d   :  { %v7421_v13 = vmul.f32 %v2228_v27, %v8715_v34  ;;  %v3905_v5 = vadd.f32 %v3904_v18, %v3903_v25  ;;  %v3625_v27 = vsel %vm102_vm0, %v7220_v43, 0.0  ;;  %v3624_v34 = vadd.f32 %v3623_v41, %v3622_v35 }
 0x37e   :  { %3117 = vrot.lane.b32.xlu1 %v7352_v45, %s4945_s13  ;;  %v3430_v43 = vsel %vm102_vm0, %v7243_v30, 0.0 }
 0x37f   :  { %v7429_v46 = vmul.f32 %v7421_v13, %v7421_v13  ;;  %v2230_v59 = vpop.permute.xlu1 %2229  ;;  %v3626_v42 = vadd.f32 %v3625_v27, %v3624_v34  ;;  %v3431_v61 = vadd.f32 %v3430_v43, %v3429_v50  ;;  %v3629_v27 = vsel %vm102_vm0, %v7292_v29, 0.0 }
 0x380   :  { %v7438_v11 = vpop.permute.xlu0 %2291  ;;  %v7443_v17 = vmul.f32 %v2230_v59, %v8718_v54  ;;  %v3627_v59 = vsel %vm102_vm0, %v7251_v44, 0.0  ;;  %v7473_v44 = vmul.f32 %v2290_v53, %v6816_v40  ;;  %v3737_v40 = vsel %vm3733_vm1, %v6891_v3, 0.0 }
 0x381   :  { %8717 = vst [vmem:[#allocation14_spill] sm:$0xff] %v7438_v11  ;;  %v3906_v25 = vsel %vm3733_vm1, %v7429_v46, 0.0  ;;  %v3433_v41 = vadd.f32 %v3432_v19, %v3431_v61  ;;  %v3628_v34 = vadd.f32 %v3627_v59, %v3626_v42  ;;  %v3434_v42 = vsel %vm102_vm0, %v7315_v31, 0.0 }
 0x382   :  { %v3907_v18 = vadd.f32 %v3906_v25, %v3905_v5  ;;  %3181 = vrot.lane.b32.xlu1 %v7436_v23, %s4945_s13  ;;  %v7453_v51 = vmul.f32 %v7443_v17, %v7443_v17  ;;  %v8719_v5 = vld [vmem:[#allocation32_spill] sm:$0xff]  ;;  %8720 = vst [vmem:[#allocation16_spill] sm:$0xff] %v7473_v44  ;;  %v3734_v11 = vsel %vm3733_vm1, %v6548_v48, 0.0  ;;  %v3631_v23 = vsel %vm102_vm0, %v7327_v4, 0.0 }
 0x383   :  { %v2294_v57 = vpop.permute.xlu1 %2293  ;;  %v3630_v61 = vadd.f32 %v3629_v27, %v3628_v34  ;;  %v3435_v53 = vadd.f32 %v3434_v42, %v3433_v41  ;;  %v8722_v34 = vld [vmem:[#allocation36_spill] sm:$0xff] }
 0x384   :  { %v2232_v35 = vpop.permute.xlu0 %2231  ;;  %v3908_v50 = vsel %vm3733_vm1, %v7453_v51, 0.0 }
 0x385   :  { %v7456_v54 = vmul.f32 %v2232_v35, %v8719_v5  ;;  %v3735_v35 = vsel %vm3733_vm1, %v6579_v47, 0.0  ;;  %v3909_v19 = vadd.f32 %v3908_v50, %v3907_v18  ;;  %v3436_v5 = vsel %vm102_vm0, %v7352_v45, 0.0 }
 0x386   :  { %3121 = vrot.lane.b32.xlu1 %v7404_v49, %s4945_s13  ;;  %v3736_v27 = vadd.f32 %v3735_v35, %v3734_v11  ;;  %v3437_v9 = vadd.f32 %v3436_v5, %v3435_v53  ;;  %v3632_v42 = vadd.f32 %v3631_v23, %v3630_v61  ;;  %v3438_v5 = vsel %vm102_vm0, %v7382_v10, 0.0 }
 0x387   :  { %v7468_v25 = vmul.f32 %v7456_v54, %v7456_v54  ;;  %v2234_v43 = vpop.permute.xlu1 %2233  ;;  %v7512_v23 = vmul.f32 %v2294_v57, %v6843_v56  ;;  %v3741_v57 = vsel %vm3733_vm1, %v6944_v2, 0.0 }
 0x388   :  { %v7475_v29 = vpop.permute.xlu0 %2295  ;;  %v7490_v50 = vmul.f32 %v2234_v43, %v8722_v34  ;;  %v8723_v43 = vld [vmem:[#allocation40_spill] sm:$0xff]  ;;  %v3634_v4 = vadd.f32 %v3633_v58, %v3632_v42 }
 0x389   :  { %8721 = vst [vmem:[#allocation5_spill] sm:$0xff] %v7475_v29  ;;  %v3910_v59 = vsel %vm3733_vm1, %v7468_v25, 0.0  ;;  %v3739_v29 = vsel %vm3733_vm1, %v6930_v33, 0.0  ;;  %8724 = vst [vmem:[#allocation29_spill] sm:$0xff] %v7512_v23 }
 0x38a   :  { %v3911_v18 = vadd.f32 %v3910_v59, %v3909_v19  ;;  %3185 = vrot.lane.b32.xlu1 %v7473_v44, %s4945_s13  ;;  %v3738_v19 = vadd.f32 %v3737_v40, %v3736_v27  ;;  %v7500_v11 = vmul.f32 %v7490_v50, %v7490_v50  ;;  %v3439_v40 = vadd.f32 %v3438_v5, %v3437_v9 }
 0x38b   :  { %v3635_v27 = vsel %vm102_vm0, %v7394_v28, 0.0  ;;  %v3637_v9 = vsel %vm102_vm0, %v7414_v37, 0.0  ;;  %v8726_v28 = vld [vmem:[#allocation42_spill] sm:$0xff] }
 0x38c   :  { %v2236_v16 = vpop.permute.xlu0 %2235  ;;  %v2298_v41 = vpop.permute.xlu1 %2297  ;;  %v3740_v59 = vadd.f32 %v3739_v29, %v3738_v19  ;;  %v3912_v61 = vsel %vm3733_vm1, %v7500_v11, 0.0  ;;  %v3441_v34 = vadd.f32 %v3440_v55, %v3439_v40  ;;  %v3743_v19 = vsel %vm3733_vm1, %v6987_v8, 0.0 }
 0x38d   :  { %v7503_v35 = vmul.f32 %v2236_v16, %v8723_v43  ;;  %v3913_v29 = vadd.f32 %v3912_v61, %v3911_v18  ;;  %v3636_v18 = vadd.f32 %v3635_v27, %v3634_v4  ;;  %v3442_v61 = vsel %vm102_vm0, %v7421_v13, 0.0 }
 0x38e   :  { %3125 = vrot.lane.b32.xlu1 %v7443_v17, %s4945_s13  ;;  %v3742_v43 = vadd.f32 %v3741_v57, %v3740_v59  ;;  %v3641_v27 = vsel %vm102_vm0, %v7453_v51, 0.0 }
 0x38f   :  { %v7518_v16 = vmul.f32 %v7503_v35, %v7503_v35  ;;  %v3638_v40 = vadd.f32 %v3637_v9, %v3636_v18  ;;  %v7554_v9 = vmul.f32 %v2298_v41, %v6872_v7  ;;  %v3448_v18 = vsel %vm102_vm0, %v7490_v50, 0.0 }
 0x390   :  { %v7520_v53 = vpop.permute.xlu0 %2299  ;;  %v2238_v58 = vpop.permute.xlu1 %2237  ;;  %v3744_v4 = vadd.f32 %v3743_v19, %v3742_v43 }
 0x391   :  { %8725 = vst [vmem:[#allocation31_spill] sm:$0xff] %v7520_v53  ;;  %v3914_v56 = vsel %vm3733_vm1, %v7518_v16, 0.0  ;;  %v7535_v5 = vmul.f32 %v2238_v58, %v8726_v28  ;;  %v3444_v53 = vsel %vm102_vm0, %v7443_v17, 0.0 }
 0x392   :  { %3189 = vrot.lane.b32.xlu1 %v7512_v23, %s4945_s13  ;;  %v3915_v42 = vadd.f32 %v3914_v56, %v3913_v29  ;;  %v8727_v23 = vld [vmem:[#allocation44_spill] sm:$0xff]  ;;  %v3443_v29 = vadd.f32 %v3442_v61, %v3441_v34  ;;  %v8728_v61 = vld [vmem:[#allocation47_spill] sm:$0xff] }
 0x393   :  { %v3561_v59 = vmul.f32 %v7535_v5, %v7535_v5 }
 0x394   :  { %2891 = vxpose.xlu0.b32.start [1/16] (narrow) %v6548_v48, 32  ;;  %v2240_v37 = vpop.permute.xlu0 %2239  ;;  %v2302_v55 = vpop.permute.xlu1 %2301  ;;  %v3639_v48 = vsel %vm102_vm0, %v7429_v46, 0.0  ;;  %v3445_v58 = vadd.f32 %v3444_v53, %v3443_v29  ;;  %v3745_v46 = vsel %vm3733_vm1, %v7025_v24, 0.0  ;;  %v3747_v53 = vsel %vm3733_vm1, %v7061_v26, 0.0 }
 0x395   :  { %v7543_v44 = vmul.f32 %v2240_v37, %v8727_v23  ;;  %v3640_v57 = vadd.f32 %v3639_v48, %v3638_v40  ;;  %v3916_v51 = vsel %vm3733_vm1, %v3561_v59, 0.0  ;;  %v3746_v7 = vadd.f32 %v3745_v46, %v3744_v4  ;;  %v8729_v48 = vld [vmem:[#allocation49_spill] sm:$0xff] }
 0x396   :  { %3129 = vrot.lane.b32.xlu1 %v7490_v50, %s4945_s13  ;;  %v3917_v41 = vadd.f32 %v3916_v51, %v3915_v42  ;;  %v3643_v46 = vsel %vm102_vm0, %v7468_v25, 0.0  ;;  %v3645_v51 = vsel %vm102_vm0, %v7500_v11, 0.0  ;;  %v7596_v25 = vmul.f32 %v2302_v55, %v6902_v20 }
 0x397   :  { %v7558_v23 = vmul.f32 %v7543_v44, %v7543_v44  ;;  %v3642_v19 = vadd.f32 %v3641_v27, %v3640_v57  ;;  %v3748_v28 = vadd.f32 %v3747_v53, %v3746_v7 }
 0x398   :  { %2892 = vxpose.xlu0.b32.cont [2/16] (narrow) %v6579_v47, 32  ;;  %v7561_v34 = vpop.permute.xlu0 %2303  ;;  %v2242_v56 = vpop.permute.xlu1 %2241  ;;  %v3446_v47 = vsel %vm102_vm0, %v7456_v54, 0.0  ;;  %8730 = vst [vmem:[#allocation6_spill] sm:$0xff] %v7596_v25 }
 0x399   :  { %v3918_v43 = vsel %vm3733_vm1, %v7558_v23, 0.0  ;;  %v3447_v37 = vadd.f32 %v3446_v47, %v3445_v58  ;;  %v7577_v29 = vmul.f32 %v2242_v56, %v8728_v61  ;;  %v3749_v58 = vsel %vm3733_vm1, %v7087_v52, 0.0 }
 0x39a   :  { %3193 = vrot.lane.b32.xlu1 %v7554_v9, %s4945_s13  ;;  %v3919_v40 = vadd.f32 %v3918_v43, %v3917_v41  ;;  %v3644_v56 = vadd.f32 %v3643_v46, %v3642_v19  ;;  %v3750_v7 = vadd.f32 %v3749_v58, %v3748_v28  ;;  %v3450_v19 = vsel %vm102_vm0, %v7503_v35, 0.0 }
 0x39b   :  { %v3449_v57 = vadd.f32 %v3448_v18, %v3447_v37  ;;  %v3563_v53 = vmul.f32 %v7577_v29, %v7577_v29  ;;  %v3452_v43 = vsel %vm102_vm0, %v7535_v5, 0.0 }
 0x39c   :  { %2893 = vxpose.xlu0.b32.cont [3/16] (narrow) %v6891_v3, 32  ;;  %v2244_v42 = vpop.permute.xlu0 %2243  ;;  %v2306_v4 = vpop.permute.xlu1 %2305  ;;  %v3751_v3 = vsel %vm3733_vm1, %v7109_v1, 0.0  ;;  %v3646_v18 = vadd.f32 %v3645_v51, %v3644_v56  ;;  %v8732_v51 = vld [vmem:[#allocation51_spill] sm:$0xff]  ;;  %v3755_v56 = vsel %vm3733_vm1, %v7167_v38, 0.0 }
 0x39d   :  { %v7581_v27 = vmul.f32 %v2244_v42, %v8729_v48  ;;  %v3920_v28 = vsel %vm3733_vm1, %v3563_v53, 0.0  ;;  %v3752_v20 = vadd.f32 %v3751_v3, %v3750_v7  ;;  %v3451_v55 = vadd.f32 %v3450_v19, %v3449_v57 }
 0x39e   :  { %3133 = vrot.lane.b32.xlu1 %v7535_v5, %s4945_s13  ;;  %v3921_v37 = vadd.f32 %v3920_v28, %v3919_v40  ;;  %v3649_v48 = vsel %vm102_vm0, %v3561_v59, 0.0  ;;  %v3568_v3 = vmul.f32 %v7132_v32, %v7132_v32  ;;  %v7631_v59 = vsel %vm102_vm0, %v7132_v32, 0.0 }
 0x39f   :  { %v7600_v11 = vmul.f32 %v7581_v27, %v7581_v27  ;;  %v3453_v42 = vadd.f32 %v3452_v43, %v3451_v55  ;;  %v3454_v43 = vsel %vm102_vm0, %v7543_v44, 0.0  ;;  %v3456_v28 = vsel %vm102_vm0, %v7577_v29, 0.0 }
 0x3a0   :  { %2894 = vxpose.xlu0.b32.cont [4/16] (narrow) %v6930_v33, 32  ;;  %v7603_v41 = vpop.permute.xlu0 %2307  ;;  %v2246_v47 = vpop.permute.xlu1 %2245  ;;  %v3647_v33 = vsel %vm102_vm0, %v7518_v16, 0.0  ;;  %v3753_v16 = vsel %vm3733_vm1, %v7135_v0, 0.0  ;;  %v3569_v55 = vmul.f32 %v7151_v62, %v7151_v62 }
 0x3a1   :  { %8731 = vst [vmem:[#allocation33_spill] sm:$0xff] %v7603_v41  ;;  %v3922_v61 = vsel %vm3733_vm1, %v7600_v11, 0.0  ;;  %v7618_v58 = vmul.f32 %v2246_v47, %v8732_v51  ;;  %v3648_v7 = vadd.f32 %v3647_v33, %v3646_v18  ;;  %v3754_v47 = vadd.f32 %v3753_v16, %v3752_v20 }
 0x3a2   :  { %3197 = vrot.lane.b32.xlu1 %v7596_v25, %s4945_s13  ;;  %v3923_v46 = vadd.f32 %v3922_v61, %v3921_v37  ;;  %v3455_v33 = vadd.f32 %v3454_v43, %v3453_v42  ;;  %v7648_v20 = vmul.f32 %v2306_v4, %v6949_v6  ;;  %v7656_v51 = vsel %vm102_vm0, %v3568_v3, 0.0 }
 0x3a3   :  { %v3650_v19 = vadd.f32 %v3649_v48, %v3648_v7  ;;  %v3565_v18 = vmul.f32 %v7618_v58, %v7618_v58  ;;  %v3756_v37 = vadd.f32 %v3755_v56, %v3754_v47  ;;  %v7659_v16 = vsel %vm3733_vm1, %v3568_v3, 0.0 }
 0x3a4   :  { %2895 = vxpose.xlu0.b32.cont [5/16] (narrow) %v6944_v2, 32  ;;  %v7621_v57 = vpop.permute.xlu0 %3083  ;;  %v2310_v40 = vpop.permute.xlu1 %2309  ;;  %v7635_v2 = vsel %vm3733_vm1, %v7132_v32, 0.0  ;;  %8735 = vst [vmem:[#allocation7_spill] sm:$0xff] %v7648_v20  ;;  %v3570_v7 = vmul.f32 %v7182_v63, %v7182_v63  ;;  %v3651_v6 = vsel %vm102_vm0, %v7558_v23, 0.0  ;;  %v3457_v4 = vadd.f32 %v3456_v28, %v3455_v33 }
 0x3a5   :  { %8733 = vst [vmem:[#allocation37_spill] sm:$0xff] %v7621_v57  ;;  %8734 = vst [vmem:[#allocation45_spill] sm:$0xff] %v7635_v2  ;;  %v3924_v42 = vsel %vm3733_vm1, %v3565_v18, 0.0  ;;  %v7671_v47 = vsel %vm102_vm0, %v7151_v62, 0.0  ;;  %v7675_v3 = vsel %vm3733_vm1, %v7151_v62, 0.0  ;;  %v3757_v43 = vsel %vm3733_vm1, %v7185_v15, 0.0 }
 0x3a6   :  { %3137 = vrot.lane.b32.xlu1 %v7577_v29, %s4945_s13  ;;  %v3925_v56 = vadd.f32 %v3924_v42, %v3923_v46  ;;  %8738 = vst [vmem:[#allocation41_spill] sm:$0xff] %v7675_v3  ;;  %v7680_v23 = vsel %vm102_vm0, %v3569_v55, 0.0  ;;  %v3758_v46 = vadd.f32 %v3757_v43, %v3756_v37  ;;  %v3759_v28 = vsel %vm3733_vm1, %v7212_v36, 0.0 }
 0x3a7   :  { %v3458_v57 = vsel %vm102_vm0, %v7581_v27, 0.0  ;;  %v7700_v37 = vsel %vm102_vm0, %v3570_v7, 0.0 }
 0x3a8   :  { %2896 = vxpose.xlu0.b32.cont [6/16] (narrow) %v6987_v8, 32  ;;  %v7651_v61 = vpop.permute.xlu0 %3147  ;;  %v7653_v48 = vpop.permute.xlu1 %3085  ;;  %v3653_v8 = vsel %vm102_vm0, %v3563_v53, 0.0  ;;  %v7683_v53 = vsel %vm3733_vm1, %v3569_v55, 0.0  ;;  %v3470_v55 = vsel %vm102_vm0, %v7182_v63, 0.0  ;;  %v3760_v43 = vadd.f32 %v3759_v28, %v3758_v46 }
 0x3a9   :  { %8736 = vst [vmem:[#allocation43_spill] sm:$0xff] %v7651_v61  ;;  %8737 = vst [vmem:[#allocation39_spill] sm:$0xff] %v7653_v48  ;;  %v3652_v61 = vadd.f32 %v3651_v6, %v3650_v19  ;;  %v3460_v19 = vsel %vm102_vm0, %v7618_v58, 0.0  ;;  %v8740_v6 = vld [vmem:[#allocation53_spill] sm:$0xff]  ;;  %v3761_v46 = vsel %vm3733_vm1, %v7243_v30, 0.0 }
 0x3aa   :  { %3201 = vrot.lane.b32.xlu1 %v7648_v20, %s4945_s13 }
 0x3ab   :  { %v3654_v48 = vadd.f32 %v3653_v8, %v3652_v61  ;;  %v3459_v61 = vadd.f32 %v3458_v57, %v3457_v4  ;;  %v3571_v8 = vmul.f32 %v7197_v22, %v7197_v22  ;;  %v7718_v57 = vmul.f32 %v2310_v40, %v6995_v12 }
 0x3ac   :  { %2897 = vxpose.xlu0.b32.cont [7/16] (narrow) %v7025_v24, 32  ;;  %v2248_v33 = vpop.permute.xlu0 %2247  ;;  %v7688_v42 = vpop.permute.xlu1 %3149  ;;  %v7704_v24 = vsel %vm3733_vm1, %v7182_v63, 0.0  ;;  %v3762_v40 = vadd.f32 %v3761_v46, %v3760_v43 }
 0x3ad   :  { %8739 = vst [vmem:[#allocation9_spill] sm:$0xff] %v7688_v42  ;;  %v7695_v3 = vmul.f32 %v2248_v33, %v8740_v6  ;;  %8741 = vst [vmem:[#allocation46_spill] sm:$0xff] %v7704_v24  ;;  %v3655_v42 = vsel %vm102_vm0, %v7600_v11, 0.0  ;;  %v3461_v20 = vadd.f32 %v3460_v19, %v3459_v61  ;;  %v3657_v24 = vsel %vm102_vm0, %v3565_v18, 0.0 }
 0x3ae   :  { %3141 = vrot.lane.b32.xlu1 %v7618_v58, %s4945_s13  ;;  %8742 = vst [vmem:[#allocation48_spill] sm:$0xff] %v7718_v57  ;;  %v3656_v28 = vadd.f32 %v3655_v42, %v3654_v48  ;;  %v3763_v11 = vsel %vm3733_vm1, %v7278_v21, 0.0  ;;  %v3472_v61 = vsel %vm102_vm0, %v7197_v22, 0.0 }
 0x3af   :  { %v3462_v33 = vsel %vm102_vm0, %v7695_v3, 0.0  ;;  %v3566_v6 = vmul.f32 %v7695_v3, %v7695_v3  ;;  %v3764_v43 = vadd.f32 %v3763_v11, %v3762_v40  ;;  %v3765_v11 = vsel %vm3733_vm1, %v7315_v31, 0.0 }
 0x3b0   :  { %2898 = vxpose.xlu0.b32.cont [8/16] (narrow) %v7061_v26, 32  ;;  %v2250_v4 = vpop.permute.xlu1 %2249  ;;  %v3463_v19 = vadd.f32 %v3462_v33, %v3461_v20  ;;  %v3572_v26 = vmul.f32 %v7209_v39, %v7209_v39  ;;  %v3658_v48 = vadd.f32 %v3657_v24, %v3656_v28  ;;  %v3669_v33 = vsel %vm102_vm0, %v3571_v8, 0.0 }
 0x3b1   :  { %v3926_v41 = vsel %vm3733_vm1, %v3566_v6, 0.0  ;;  %v7725_v2 = vmul.f32 %v2250_v4, %v6999_v14  ;;  %v3659_v18 = vsel %vm102_vm0, %v3566_v6, 0.0  ;;  %v3934_v14 = vsel %vm3733_vm1, %v3570_v7, 0.0 }
 0x3b2   :  { %v3927_v12 = vadd.f32 %v3926_v41, %v3925_v56  ;;  %3205 = vrot.lane.b32.xlu1 %v7718_v57, %s4945_s13  ;;  %v3936_v24 = vsel %vm3733_vm1, %v3571_v8, 0.0  ;;  %v3660_v6 = vadd.f32 %v3659_v18, %v3658_v48  ;;  %v3573_v7 = vmul.f32 %v7224_v60, %v7224_v60  ;;  %v8744_v57 = vld [vmem:[#allocation20_spill] sm:$0xff] }
 0x3b3   :  { %v3464_v42 = vsel %vm102_vm0, %v7725_v2, 0.0  ;;  %v3567_v41 = vmul.f32 %v7725_v2, %v7725_v2  ;;  %v3574_v8 = vmul.f32 %v8744_v57, %v8744_v57  ;;  %v3938_v48 = vsel %vm3733_vm1, %v3572_v26, 0.0 }
 0x3b4   :  { %v3465_v20 = vadd.f32 %v3464_v42, %v3463_v19  ;;  %2899 = vxpose.xlu0.b32.cont [9/16] (narrow) %v7087_v52, 32  ;;  %v7742_v56 = vpop.permute.xlu1 %2313  ;;  %v3474_v52 = vsel %vm102_vm0, %v7209_v39, 0.0  ;;  %v3671_v19 = vsel %vm102_vm0, %v3572_v26, 0.0 }
 0x3b5   :  { %8743 = vst [vmem:[#allocation11_spill] sm:$0xff] %v7742_v56  ;;  %v3661_v46 = vsel %vm102_vm0, %v3567_v41, 0.0  ;;  %v3928_v28 = vsel %vm3733_vm1, %v3567_v41, 0.0 }
 0x3b6   :  { %v3467_v4 = vadd.f32 %v7631_v59, %v3465_v20  ;;  %v3662_v42 = vadd.f32 %v3661_v46, %v3660_v6  ;;  %v3929_v56 = vadd.f32 %v3928_v28, %v3927_v12  ;;  %v3767_v59 = vsel %vm3733_vm1, %v7352_v45, 0.0 }
 0x3b7   :  { %v3766_v20 = vadd.f32 %v3765_v11, %v3764_v43  ;;  %v3476_v6 = vsel %vm102_vm0, %v7224_v60, 0.0  ;;  %v3673_v46 = vsel %vm102_vm0, %v3573_v7, 0.0  ;;  %v3940_v28 = vsel %vm3733_vm1, %v3573_v7, 0.0 }
 0x3b8   :  { %v3469_v18 = vadd.f32 %v7671_v47, %v3467_v4  ;;  %2900 = vxpose.xlu0.b32.cont [10/16] (narrow) %v7109_v1, 32  ;;  %v7762_v40 = vpop.permute.xlu1 %3089  ;;  %v3664_v12 = vadd.f32 %v7656_v51, %v3662_v42  ;;  %v3931_v41 = vadd.f32 %v7659_v16, %v3929_v56  ;;  %v8746_v47 = vld [vmem:[#allocation21_spill] sm:$0xff]  ;;  %v3478_v51 = vsel %vm102_vm0, %v8744_v57, 0.0  ;;  %v8747_v56 = vld [vmem:[#allocation34_spill] sm:$0xff]  ;;  %v7780_v42 = vpop.permute.xlu0 %2311 }
 0x3b9   :  { %8745 = vst [vmem:[#allocation50_spill] sm:$0xff] %v7762_v40  ;;  %v3575_v1 = vmul.f32 %v8746_v47, %v8746_v47  ;;  %v3768_v4 = vadd.f32 %v3767_v59, %v3766_v20  ;;  %v3675_v16 = vsel %vm102_vm0, %v3574_v8, 0.0  ;;  %v3576_v43 = vmul.f32 %v8747_v56, %v8747_v56  ;;  %8748 = vst [vmem:[#allocation13_spill] sm:$0xff] %v7780_v42 }
 0x3ba   :  { %v3471_v25 = vadd.f32 %v3470_v55, %v3469_v18  ;;  %v3666_v40 = vadd.f32 %v7680_v23, %v3664_v12  ;;  %v3933_v26 = vadd.f32 %v7683_v53, %v3931_v41  ;;  %v3942_v11 = vsel %vm3733_vm1, %v3574_v8, 0.0  ;;  %v8750_v18 = vld [vmem:[#allocation22_spill] sm:$0xff] }
 0x3bb   :  { %v3480_v23 = vsel %vm102_vm0, %v8746_v47, 0.0  ;;  %v3577_v20 = vmul.f32 %v8750_v18, %v8750_v18  ;;  %v3769_v12 = vsel %vm3733_vm1, %v7382_v10, 0.0  ;;  %v3944_v47 = vsel %vm3733_vm1, %v3575_v1, 0.0 }
 0x3bc   :  { %v3473_v7 = vadd.f32 %v3472_v61, %v3471_v25  ;;  %2901 = vxpose.xlu0.b32.cont [11/16] (narrow) %v7135_v0, 32  ;;  %v7783_v55 = vpop.permute.xlu1 %3153  ;;  %v3668_v53 = vadd.f32 %v7700_v37, %v3666_v40  ;;  %v3935_v59 = vadd.f32 %v3934_v14, %v3933_v26  ;;  %v3771_v25 = vsel %vm3733_vm1, %v7404_v49, 0.0 }
 0x3bd   :  { %8749 = vst [vmem:[#allocation52_spill] sm:$0xff] %v7783_v55  ;;  %v3677_v61 = vsel %vm102_vm0, %v3575_v1, 0.0  ;;  %v3770_v41 = vadd.f32 %v3769_v12, %v3768_v4  ;;  %v3482_v37 = vsel %vm102_vm0, %v8747_v56, 0.0  ;;  %v3679_v14 = vsel %vm102_vm0, %v3576_v43, 0.0  ;;  %v8752_v1 = vld [vmem:[#allocation23_spill] sm:$0xff] }
 0x3be   :  { %v3475_v0 = vadd.f32 %v3474_v52, %v3473_v7  ;;  %v3670_v8 = vadd.f32 %v3669_v33, %v3668_v53  ;;  %v3937_v55 = vadd.f32 %v3936_v24, %v3935_v59  ;;  %v3946_v26 = vsel %vm3733_vm1, %v3576_v43, 0.0  ;;  %v7809_v59 = vpop.permute.xlu0 %3087 }
 0x3bf   :  { %v3772_v57 = vadd.f32 %v3771_v25, %v3770_v41  ;;  %v3484_v33 = vsel %vm102_vm0, %v8750_v18, 0.0  ;;  %v3681_v24 = vsel %vm102_vm0, %v3577_v20, 0.0  ;;  %v3578_v4 = vmul.f32 %v8752_v1, %v8752_v1  ;;  %8753 = vst [vmem:[#allocation17_spill] sm:$0xff] %v7809_v59 }
 0x3c0   :  { %v3477_v40 = vadd.f32 %v3476_v6, %v3475_v0  ;;  %2902 = vxpose.xlu0.b32.cont [12/16] (narrow) %v7167_v38, 32  ;;  %v3672_v42 = vadd.f32 %v3671_v19, %v3670_v8  ;;  %v3939_v52 = vadd.f32 %v3938_v48, %v3937_v55  ;;  %v7802_v7 = vpop.permute.xlu1 %3093  ;;  %v3948_v38 = vsel %vm3733_vm1, %v3577_v20, 0.0  ;;  %v8754_v6 = vld [vmem:[#allocation25_spill] sm:$0xff] }
 0x3c1   :  { %8751 = vst [vmem:[#allocation15_spill] sm:$0xff] %v7802_v7  ;;  %v3579_v43 = vmul.f32 %v8754_v6, %v8754_v6  ;;  %v3486_v55 = vsel %vm102_vm0, %v8752_v1, 0.0  ;;  %v3773_v12 = vsel %vm3733_vm1, %v7421_v13, 0.0  ;;  %v3775_v25 = vsel %vm3733_vm1, %v7443_v17, 0.0 }
 0x3c2   :  { %v3479_v53 = vadd.f32 %v3478_v51, %v3477_v40  ;;  %v3674_v19 = vadd.f32 %v3673_v46, %v3672_v42  ;;  %v3941_v48 = vadd.f32 %v3940_v28, %v3939_v52  ;;  %v8755_v51 = vld [vmem:[#allocation24_spill] sm:$0xff]  ;;  %v3774_v41 = vadd.f32 %v3773_v12, %v3772_v57  ;;  %v8759_v12 = vld [vmem:[#allocation10_spill] sm:$0xff] }
 0x3c3   :  { %v3580_v20 = vmul.f32 %v8755_v51, %v8755_v51  ;;  %v3683_v46 = vsel %vm102_vm0, %v3578_v4, 0.0  ;;  %v3950_v28 = vsel %vm3733_vm1, %v3578_v4, 0.0  ;;  %v3488_v42 = vsel %vm102_vm0, %v8754_v6, 0.0 }
 0x3c4   :  { %v3481_v0 = vadd.f32 %v3480_v23, %v3479_v53  ;;  %2903 = vxpose.xlu0.b32.cont [13/16] (narrow) %v7185_v15, 32  ;;  %v3676_v8 = vadd.f32 %v3675_v16, %v3674_v19  ;;  %v3943_v40 = vadd.f32 %v3942_v11, %v3941_v48  ;;  %v3685_v7 = vsel %vm102_vm0, %v3579_v43, 0.0  ;;  %v7828_v15 = vpop.permute.xlu1 %3157  ;;  %v8757_v16 = vld [vmem:[#allocation8_spill] sm:$0xff]  ;;  %v7835_v19 = vpop.permute.xlu0 %3151 }
 0x3c5   :  { %v3776_v59 = vadd.f32 %v3775_v25, %v3774_v41  ;;  %8756 = vst [vmem:[#allocation30_spill] sm:$0xff] %v7828_v15  ;;  %v3952_v1 = vsel %vm3733_vm1, %v3579_v43, 0.0  ;;  %v3490_v57 = vsel %vm102_vm0, %v8755_v51, 0.0  ;;  %v3581_v11 = vmul.f32 %v8757_v16, %v8757_v16  ;;  %8758 = vst [vmem:[#allocation32_spill] sm:$0xff] %v7835_v19  ;;  %v8760_v41 = vld [vmem:[#allocation54_spill] sm:$0xff] }
 0x3c6   :  { %v3483_v52 = vadd.f32 %v3482_v37, %v3481_v0  ;;  %v3678_v23 = vadd.f32 %v3677_v61, %v3676_v8  ;;  %v3945_v53 = vadd.f32 %v3944_v47, %v3943_v40  ;;  %v3687_v37 = vsel %vm102_vm0, %v3580_v20, 0.0  ;;  %v8761_v8 = vld [vmem:[#allocation26_spill] sm:$0xff] }
 0x3c7   :  { %v3954_v61 = vsel %vm3733_vm1, %v3580_v20, 0.0  ;;  %v3582_v43 = vmul.f32 %v8759_v12, %v8759_v12  ;;  %v3777_v25 = vsel %vm3733_vm1, %v7456_v54, 0.0  ;;  %v3779_v0 = vsel %vm3733_vm1, %v7490_v50, 0.0 }
 0x3c8   :  { %v3485_v4 = vadd.f32 %v3484_v33, %v3483_v52  ;;  %2904 = vxpose.xlu0.b32.cont [14/16] (narrow) %v7212_v36, 32  ;;  %v3680_v47 = vadd.f32 %v3679_v14, %v3678_v23  ;;  %v3947_v48 = vadd.f32 %v3946_v26, %v3945_v53  ;;  %v7848_v40 = vmul.f32 %v8761_v8, %v8760_v41  ;;  %v7857_v8 = vpop.permute.xlu1 %3097 }
 0x3c9   :  { %v3778_v36 = vadd.f32 %v3777_v25, %v3776_v59  ;;  %v3492_v14 = vsel %vm102_vm0, %v8757_v16, 0.0  ;;  %v3689_v26 = vsel %vm102_vm0, %v3581_v11, 0.0  ;;  %v3956_v20 = vsel %vm3733_vm1, %v3581_v11, 0.0  ;;  %8762 = vst [vmem:[#allocation36_spill] sm:$0xff] %v7857_v8  ;;  %v7863_v11 = vpop.permute.xlu0 %3091  ;;  %v8766_v25 = vld [vmem:[#allocation12_spill] sm:$0xff] }
 0x3ca   :  { %v3487_v33 = vadd.f32 %v3486_v55, %v3485_v4  ;;  %v3682_v52 = vadd.f32 %v3681_v24, %v3680_v47  ;;  %v3949_v15 = vadd.f32 %v3948_v38, %v3947_v48  ;;  %v3494_v55 = vsel %vm102_vm0, %v8759_v12, 0.0  ;;  %v8763_v38 = vld [vmem:[#allocation27_spill] sm:$0xff]  ;;  %8764 = vst [vmem:[#allocation40_spill] sm:$0xff] %v7863_v11 }
 0x3cb   :  { %v3780_v53 = vadd.f32 %v3779_v0, %v3778_v36  ;;  %v3691_v24 = vsel %vm102_vm0, %v3582_v43, 0.0  ;;  %v3958_v59 = vsel %vm3733_vm1, %v3582_v43, 0.0  ;;  %v3583_v47 = vmul.f32 %v8763_v38, %v8763_v38  ;;  %v8767_v36 = vld [vmem:[#allocation28_spill] sm:$0xff] }
 0x3cc   :  { %v3489_v23 = vadd.f32 %v3488_v42, %v3487_v33  ;;  %2905 = vxpose.xlu0.b32.cont [15/16] (narrow) %v7243_v30, 32  ;;  %v3684_v4 = vadd.f32 %v3683_v46, %v3682_v52  ;;  %v3951_v41 = vadd.f32 %v3950_v28, %v3949_v15  ;;  %v3496_v30 = vsel %vm102_vm0, %v8763_v38, 0.0  ;;  %v8765_v15 = vld [vmem:[#allocation55_spill] sm:$0xff] }
 0x3cd   :  { %v3584_v42 = vmul.f32 %v7848_v40, %v7848_v40  ;;  %v7871_v0 = vmul.f32 %v8766_v25, %v8765_v15  ;;  %v3781_v43 = vsel %vm3733_vm1, %v7503_v35, 0.0  ;;  %v3585_v52 = vmul.f32 %v8767_v36, %v8767_v36 }
 0x3ce   :  { %v3491_v48 = vadd.f32 %v3490_v57, %v3489_v23  ;;  %v3686_v46 = vadd.f32 %v3685_v7, %v3684_v4  ;;  %v3953_v28 = vadd.f32 %v3952_v1, %v3951_v41  ;;  %v3783_v57 = vsel %vm3733_vm1, %v7535_v5, 0.0 }
 0x3cf   :  { %v3782_v23 = vadd.f32 %v3781_v43, %v3780_v53  ;;  %v3693_v1 = vsel %vm102_vm0, %v3583_v47, 0.0  ;;  %v3960_v4 = vsel %vm3733_vm1, %v3583_v47, 0.0  ;;  %v3498_v41 = vsel %vm102_vm0, %v7848_v40, 0.0  ;;  %v8770_v53 = vld [vmem:[#allocation14_spill] sm:$0xff] }
 0x3d0   :  { %v3493_v33 = vadd.f32 %v3492_v14, %v3491_v48  ;;  %2906 = vxpose.xlu0.b32.end [16/16] (narrow) %v7278_v21, 32  ;;  %v3688_v19 = vadd.f32 %v3687_v37, %v3686_v46  ;;  %v3955_v7 = vadd.f32 %v3954_v61, %v3953_v28  ;;  %v3695_v25 = vsel %vm102_vm0, %v3584_v42, 0.0  ;;  %v7885_v21 = vpop.permute.xlu1 %3161  ;;  %v8769_v61 = vld [vmem:[#allocation56_spill] sm:$0xff]  ;;  %v7894_v28 = vpop.permute.xlu0 %3155 }
 0x3d1   :  { %v3784_v8 = vadd.f32 %v3783_v57, %v3782_v23  ;;  %8768 = vst [vmem:[#allocation42_spill] sm:$0xff] %v7885_v21  ;;  %v3962_v11 = vsel %vm3733_vm1, %v3584_v42, 0.0  ;;  %v3586_v37 = vmul.f32 %v7871_v0, %v7871_v0  ;;  %v7892_v46 = vmul.f32 %v8770_v53, %v8769_v61  ;;  %8771 = vst [vmem:[#allocation44_spill] sm:$0xff] %v7894_v28  ;;  %v8772_v42 = vld [vmem:[#allocation16_spill] sm:$0xff]  ;;  %v8787_v21 = vld [vmem:[#allocation7_spill] sm:$0xff] }
 0x3d2   :  { %v3495_v15 = vadd.f32 %v3494_v55, %v3493_v33  ;;  %v3690_v14 = vadd.f32 %v3689_v26, %v3688_v19  ;;  %v3957_v48 = vadd.f32 %v3956_v20, %v3955_v7  ;;  %v3500_v19 = vsel %vm102_vm0, %v8767_v36, 0.0  ;;  %v8793_v28 = vld [vmem:[#allocation20_spill] sm:$0xff] }
 0x3d3   :  { %v3697_v26 = vsel %vm102_vm0, %v3585_v52, 0.0  ;;  %v3587_v43 = vmul.f32 %v8772_v42, %v8772_v42  ;;  %v3785_v57 = vsel %vm3733_vm1, %v7543_v44, 0.0  ;;  %v3964_v23 = vsel %vm3733_vm1, %v3585_v52, 0.0 }
 0x3d4   :  { %v3497_v47 = vadd.f32 %v3496_v30, %v3495_v15  ;;  %2955 = vxpose.xlu0.b32.start [1/16] (narrow) %v7132_v32, 32  ;;  %v3692_v20 = vadd.f32 %v3691_v24, %v3690_v14  ;;  %v3959_v55 = vadd.f32 %v3958_v59, %v3957_v48  ;;  %v3787_v30 = vsel %vm3733_vm1, %v7577_v29, 0.0 }
 0x3d5   :  { %v3786_v32 = vadd.f32 %v3785_v57, %v3784_v8  ;;  %v3502_v61 = vsel %vm102_vm0, %v7871_v0, 0.0  ;;  %v3699_v24 = vsel %vm102_vm0, %v3586_v37, 0.0  ;;  %v3588_v59 = vmul.f32 %v7892_v46, %v7892_v46 }
 0x3d6   :  { %v3499_v33 = vadd.f32 %v3498_v41, %v3497_v47  ;;  %v3694_v7 = vadd.f32 %v3693_v1, %v3692_v20  ;;  %v3961_v15 = vadd.f32 %v3960_v4, %v3959_v55  ;;  %v3966_v48 = vsel %vm3733_vm1, %v3586_v37, 0.0  ;;  %v7914_v47 = vpop.permute.xlu1 %3101  ;;  %v7920_v55 = vpop.permute.xlu0 %3095  ;;  %v8775_v37 = vld [vmem:[#allocation5_spill] sm:$0xff] }
 0x3d7   :  { %v3788_v53 = vadd.f32 %v3787_v30, %v3786_v32  ;;  %8773 = vst [vmem:[#allocation47_spill] sm:$0xff] %v7914_v47  ;;  %v3504_v52 = vsel %vm102_vm0, %v8772_v42, 0.0  ;;  %v3701_v1 = vsel %vm102_vm0, %v3587_v43, 0.0  ;;  %v3968_v4 = vsel %vm3733_vm1, %v3587_v43, 0.0 }
 0x3d8   :  { %v3501_v14 = vadd.f32 %v3500_v19, %v3499_v33  ;;  %2956 = vxpose.xlu0.b32.cont [2/16] (narrow) %v7151_v62, 32  ;;  %v3696_v41 = vadd.f32 %v3695_v25, %v3694_v7  ;;  %v3963_v8 = vadd.f32 %v3962_v11, %v3961_v15  ;;  %v3506_v62 = vsel %vm102_vm0, %v7892_v46, 0.0  ;;  %v8774_v19 = vld [vmem:[#allocation57_spill] sm:$0xff] }
 0x3d9   :  { %v7926_v57 = vmul.f32 %v8775_v37, %v8774_v19  ;;  %v3703_v30 = vsel %vm102_vm0, %v3588_v59, 0.0  ;;  %v3789_v33 = vsel %vm3733_vm1, %v7581_v27, 0.0  ;;  %v3791_v43 = vsel %vm3733_vm1, %v7618_v58, 0.0 }
 0x3da   :  { %v3503_v20 = vadd.f32 %v3502_v61, %v3501_v14  ;;  %v3698_v25 = vadd.f32 %v3697_v26, %v3696_v41  ;;  %v3965_v11 = vadd.f32 %v3964_v23, %v3963_v8  ;;  %v3970_v7 = vsel %vm3733_vm1, %v3588_v59, 0.0  ;;  %v8776_v26 = vld [vmem:[#allocation29_spill] sm:$0xff]  ;;  %v7944_v37 = vpop.permute.xlu1 %3165 }
 0x3db   :  { %2923 = vxpose.xlu1.b32.start [1/16] (narrow) %v7315_v31, 32  ;;  %v3790_v15 = vadd.f32 %v3789_v33, %v3788_v53  ;;  %v3508_v41 = vsel %vm102_vm0, %v8776_v26, 0.0  ;;  %v3589_v23 = vmul.f32 %v8776_v26, %v8776_v26  ;;  %v3793_v8 = vsel %vm3733_vm1, %v7695_v3, 0.0  ;;  %8777 = vst [vmem:[#allocation49_spill] sm:$0xff] %v7944_v37  ;;  %v8779_v53 = vld [vmem:[#allocation31_spill] sm:$0xff]  ;;  %v7955_v33 = vpop.permute.xlu0 %3159 }
 0x3dc   :  { %v3505_v32 = vadd.f32 %v3504_v52, %v3503_v20  ;;  %2957 = vxpose.xlu0.b32.cont [3/16] (narrow) %v7182_v63, 32  ;;  %v3700_v61 = vadd.f32 %v3699_v24, %v3698_v25  ;;  %v3967_v14 = vadd.f32 %v3966_v48, %v3965_v11  ;;  %v3510_v52 = vsel %vm102_vm0, %v7926_v57, 0.0  ;;  %v8778_v48 = vld [vmem:[#allocation58_spill] sm:$0xff]  ;;  %8780 = vst [vmem:[#allocation51_spill] sm:$0xff] %v7955_v33 }
 0x3dd   :  { %v3792_v20 = vadd.f32 %v3791_v43, %v3790_v15  ;;  %v3590_v59 = vmul.f32 %v7926_v57, %v7926_v57  ;;  %v7951_v25 = vmul.f32 %v8779_v53, %v8778_v48  ;;  %v3972_v15 = vsel %vm3733_vm1, %v3589_v23, 0.0 }
 0x3de   :  { %v3507_v19 = vadd.f32 %v3506_v62, %v3505_v32  ;;  %v3702_v63 = vadd.f32 %v3701_v1, %v3700_v61  ;;  %v3969_v24 = vadd.f32 %v3968_v4, %v3967_v14  ;;  %v3795_v62 = vsel %vm3733_vm1, %v7725_v2, 0.0  ;;  %v8781_v61 = vld [vmem:[#allocation18_spill] sm:$0xff] }
 0x3df   :  { %2924 = vxpose.xlu1.b32.cont [2/16] (narrow) %v7352_v45, 32  ;;  %v3591_v1 = vmul.f32 %v7554_v9, %v7554_v9  ;;  %v3794_v45 = vadd.f32 %v3793_v8, %v3792_v20  ;;  %v3705_v32 = vsel %vm102_vm0, %v3589_v23, 0.0  ;;  %v7964_v14 = vmul.f32 %v7561_v34, %v8781_v61 }
 0x3e0   :  { %v3509_v11 = vadd.f32 %v3508_v41, %v3507_v19  ;;  %2958 = vxpose.xlu0.b32.cont [4/16] (narrow) %v7197_v22, 32  ;;  %v3704_v4 = vadd.f32 %v3703_v30, %v3702_v63  ;;  %v3971_v43 = vadd.f32 %v3970_v7, %v3969_v24  ;;  %v3512_v41 = vsel %vm102_vm0, %v7554_v9, 0.0  ;;  %v7977_v63 = vpop.permute.xlu1 %3105 }
 0x3e1   :  { %v3796_v19 = vadd.f32 %v3795_v62, %v3794_v45  ;;  %v3707_v30 = vsel %vm102_vm0, %v3590_v59, 0.0  ;;  %v3974_v7 = vsel %vm3733_vm1, %v3590_v59, 0.0  ;;  %v3592_v23 = vmul.f32 %v7951_v25, %v7951_v25  ;;  %8782 = vst [vmem:[#allocation53_spill] sm:$0xff] %v7977_v63 }
 0x3e2   :  { %v3511_v48 = vadd.f32 %v3510_v52, %v3509_v11  ;;  %v3706_v53 = vadd.f32 %v3705_v32, %v3704_v4  ;;  %v3973_v37 = vadd.f32 %v3972_v15, %v3971_v43  ;;  %v3709_v34 = vsel %vm102_vm0, %v3591_v1, 0.0  ;;  %v8783_v11 = vld [vmem:[#allocation6_spill] sm:$0xff]  ;;  %v7984_v43 = vpop.permute.xlu0 %3099  ;;  %v8784_v15 = vld [vmem:[#allocation45_spill] sm:$0xff] }
 0x3e3   :  { %2925 = vxpose.xlu1.b32.cont [3/16] (narrow) %v7382_v10, 32  ;;  %v3514_v52 = vsel %vm102_vm0, %v7951_v25, 0.0  ;;  %v3976_v62 = vsel %vm3733_vm1, %v3591_v1, 0.0  ;;  %v3593_v59 = vmul.f32 %v8783_v11, %v8783_v11  ;;  %v3594_v45 = vmul.f32 %v7964_v14, %v7964_v14 }
 0x3e4   :  { %v3513_v8 = vadd.f32 %v3512_v41, %v3511_v48  ;;  %2959 = vxpose.xlu0.b32.cont [5/16] (narrow) %v7209_v39, 32  ;;  %v3708_v20 = vadd.f32 %v3707_v30, %v3706_v53  ;;  %v3975_v24 = vadd.f32 %v3974_v7, %v3973_v37  ;;  %v3516_v32 = vsel %vm102_vm0, %v8783_v11, 0.0  ;;  %v8785_v53 = vld [vmem:[#allocation35_spill] sm:$0xff]  ;;  %v8786_v30 = vld [vmem:[#allocation33_spill] sm:$0xff] }
 0x3e5   :  { %v3798_v61 = vadd.f32 %v8784_v15, %v3796_v19  ;;  %v3711_v1 = vsel %vm102_vm0, %v3592_v23, 0.0  ;;  %v3978_v41 = vsel %vm3733_vm1, %v3592_v23, 0.0  ;;  %v7994_v7 = vmul.f32 %v8786_v30, %v8785_v53  ;;  %v8007_v30 = vpop.permute.xlu1 %3169 }
 0x3e6   :  { %v3515_v4 = vadd.f32 %v3514_v52, %v3513_v8  ;;  %v3710_v48 = vadd.f32 %v3709_v34, %v3708_v20  ;;  %v3977_v37 = vadd.f32 %v3976_v62, %v3975_v24  ;;  %v3518_v52 = vsel %vm102_vm0, %v7964_v14, 0.0  ;;  %8789 = vst [vmem:[#allocation34_spill] sm:$0xff] %v8007_v30  ;;  %v8795_v30 = vld [vmem:[#allocation19_spill] sm:$0xff] }
 0x3e7   :  { %2926 = vxpose.xlu1.b32.cont [4/16] (narrow) %v7404_v49, 32  ;;  %v3595_v19 = vmul.f32 %v8787_v21, %v8787_v21  ;;  %v3713_v20 = vsel %vm102_vm0, %v3593_v59, 0.0  ;;  %v3980_v24 = vsel %vm3733_vm1, %v3593_v59, 0.0  ;;  %v3715_v23 = vsel %vm102_vm0, %v3594_v45, 0.0  ;;  %v8790_v59 = vld [vmem:[#allocation38_spill] sm:$0xff] }
 0x3e8   :  { %v3517_v8 = vadd.f32 %v3516_v32, %v3515_v4  ;;  %2960 = vxpose.xlu0.b32.cont [6/16] (narrow) %v7224_v60, 32  ;;  %v3712_v34 = vadd.f32 %v3711_v1, %v3710_v48  ;;  %v3979_v49 = vadd.f32 %v3978_v41, %v3977_v37  ;;  %v3520_v4 = vsel %vm102_vm0, %v8787_v21, 0.0  ;;  %v8788_v32 = vld [vmem:[#allocation41_spill] sm:$0xff] }
 0x3e9   :  { %v3800_v15 = vadd.f32 %v8788_v32, %v3798_v61  ;;  %v3982_v48 = vsel %vm3733_vm1, %v3594_v45, 0.0  ;;  %v3596_v37 = vmul.f32 %v7994_v7, %v7994_v7  ;;  %v8791_v1 = vld [vmem:[#allocation13_spill] sm:$0xff]  ;;  %v3717_v61 = vsel %vm102_vm0, %v3595_v19, 0.0 }
 0x3ea   :  { %v3519_v62 = vadd.f32 %v3518_v52, %v3517_v8  ;;  %v3714_v53 = vadd.f32 %v3713_v20, %v3712_v34  ;;  %v3981_v33 = vadd.f32 %v3980_v24, %v3979_v49  ;;  %v8015_v41 = vmul.f32 %v8791_v1, %v8790_v59  ;;  %v8017_v52 = vpop.permute.xlu0 %3163  ;;  %v8794_v24 = vld [vmem:[#allocation48_spill] sm:$0xff]  ;;  %v8796_v59 = vld [vmem:[#allocation11_spill] sm:$0xff] }
 0x3eb   :  { %2927 = vxpose.xlu1.b32.cont [5/16] (narrow) %v7421_v13, 32  ;;  %8792 = vst [vmem:[#allocation22_spill] sm:$0xff] %v8017_v52  ;;  %v3522_v34 = vsel %vm102_vm0, %v7994_v7, 0.0  ;;  %v3984_v45 = vsel %vm3733_vm1, %v3595_v19, 0.0  ;;  %v3597_v32 = vmul.f32 %v8794_v24, %v8794_v24  ;;  %v8028_v1 = vmul.f32 %v8796_v59, %v8795_v30  ;;  %v8797_v52 = vld [vmem:[#allocation46_spill] sm:$0xff]  ;;  %v8798_v30 = vld [vmem:[#allocation21_spill] sm:$0xff] }
 0x3ec   :  { %v3521_v8 = vadd.f32 %v3520_v4, %v3519_v62  ;;  %2961 = vxpose.xlu0.b32.cont [7/16] (narrow) %v8793_v28, 32  ;;  %v3716_v49 = vadd.f32 %v3715_v23, %v3714_v53  ;;  %v3983_v20 = vadd.f32 %v3982_v48, %v3981_v33  ;;  %v3524_v4 = vsel %vm102_vm0, %v8794_v24, 0.0 }
 0x3ed   :  { %v3802_v63 = vadd.f32 %v8797_v52, %v3800_v15  ;;  %v3719_v33 = vsel %vm102_vm0, %v3596_v37, 0.0  ;;  %v3986_v19 = vsel %vm3733_vm1, %v3596_v37, 0.0  ;;  %v3598_v53 = vmul.f32 %v8015_v41, %v8015_v41 }
 0x3ee   :  { %v3523_v62 = vadd.f32 %v3522_v34, %v3521_v8  ;;  %v3718_v47 = vadd.f32 %v3717_v61, %v3716_v49  ;;  %v3985_v23 = vadd.f32 %v3984_v45, %v3983_v20  ;;  %v3803_v8 = vsel %vm3733_vm1, %v7197_v22, 0.0  ;;  %v8043_v61 = vpop.permute.xlu1 %3109  ;;  %v8049_v45 = vpop.permute.xlu0 %3103 }
 0x3ef   :  { %2928 = vxpose.xlu1.b32.cont [6/16] (narrow) %v7443_v17, 32  ;;  %v3526_v15 = vsel %vm102_vm0, %v8015_v41, 0.0  ;;  %v3721_v34 = vsel %vm102_vm0, %v3597_v32, 0.0  ;;  %v3988_v37 = vsel %vm3733_vm1, %v3597_v32, 0.0  ;;  %v3599_v20 = vmul.f32 %v8028_v1, %v8028_v1 }
 0x3f0   :  { %v3525_v48 = vadd.f32 %v3524_v4, %v3523_v62  ;;  %2962 = vxpose.xlu0.b32.cont [8/16] (narrow) %v8798_v30, 32  ;;  %v3720_v52 = vadd.f32 %v3719_v33, %v3718_v47  ;;  %v3987_v17 = vadd.f32 %v3986_v19, %v3985_v23  ;;  %v3804_v59 = vadd.f32 %v3803_v8, %v3802_v63 }
 0x3f1   :  { %v3528_v22 = vsel %vm102_vm0, %v8028_v1, 0.0  ;;  %v3723_v4 = vsel %vm102_vm0, %v3598_v53, 0.0  ;;  %v3990_v23 = vsel %vm3733_vm1, %v3598_v53, 0.0  ;;  %v3725_v8 = vsel %vm102_vm0, %v3599_v20, 0.0 }
 0x3f2   :  { %v3527_v49 = vadd.f32 %v3526_v15, %v3525_v48  ;;  %v3722_v62 = vadd.f32 %v3721_v34, %v3720_v52  ;;  %v3989_v47 = vadd.f32 %v3988_v37, %v3987_v17  ;;  %v3805_v48 = vsel %vm3733_vm1, %v7209_v39, 0.0  ;;  %v8061_v17 = vpop.permute.xlu1 %3173 }
 0x3f3   :  { %2929 = vxpose.xlu1.b32.cont [7/16] (narrow) %v7456_v54, 32  ;;  %v3992_v15 = vsel %vm3733_vm1, %v3599_v20, 0.0  ;;  %v3806_v52 = vadd.f32 %v3805_v48, %v3804_v59  ;;  %v3807_v39 = vsel %vm3733_vm1, %v7224_v60, 0.0  ;;  %v8799_v59 = vld [vmem:[#allocation23_spill] sm:$0xff] }
 0x3f4   :  { %v3529_v33 = vadd.f32 %v3528_v22, %v3527_v49  ;;  %2963 = vxpose.xlu0.b32.cont [9/16] (narrow) %v8747_v56, 32  ;;  %v3724_v32 = vadd.f32 %v3723_v4, %v3722_v62  ;;  %v3991_v19 = vadd.f32 %v3990_v23, %v3989_v47  ;;  %v8066_v49 = vpop.permute.xlu0 %3167 }
 0x3f5   :  { %v3808_v47 = vadd.f32 %v3807_v39, %v3806_v52  ;;  %v3815_v39 = vsel %vm3733_vm1, %v8750_v18, 0.0 }
 0x3f6   :  { %v3530_v63 = vrot.slane %v3529_v33, 4  ;;  %v3726_v34 = vadd.f32 %v3725_v8, %v3724_v32  ;;  %v8064_v53 = vadd.f32 %v3992_v15, %v3991_v19  ;;  %v3811_v15 = vsel %vm3733_vm1, %v8798_v30, 0.0 }
 0x3f7   :  { %2930 = vxpose.xlu1.b32.cont [8/16] (narrow) %v7490_v50, 32  ;;  %v8073_v50 = vpop.permute.xlu1 %3113  ;;  %v3813_v30 = vsel %vm3733_vm1, %v8747_v56, 0.0  ;;  %v3817_v56 = vsel %vm3733_vm1, %v8799_v59, 0.0 }
 0x3f8   :  { %v3531_v37 = vadd.f32 %v3530_v63, %v3529_v33  ;;  %2964 = vxpose.xlu0.b32.cont [10/16] (narrow) %v8750_v18, 32  ;;  %v3727_v22 = vrot.slane %v3726_v34, 4  ;;  %v3809_v33 = vsel %vm3733_vm1, %v8793_v28, 0.0  ;;  %v8077_v32 = vpop.permute.xlu0 %3107  ;;  %v3819_v18 = vsel %vm3733_vm1, %v8754_v6, 0.0 }
 0x3f9   :  { %v3810_v48 = vadd.f32 %v3809_v33, %v3808_v47 }
 0x3fa   :  { %v3532_v62 = vrot.slane %v3531_v37, 2  ;;  %v3728_v20 = vadd.f32 %v3727_v22, %v3726_v34 }
 0x3fb   :  { %2931 = vxpose.xlu1.b32.cont [9/16] (narrow) %v7503_v35, 32  ;;  %v3812_v28 = vadd.f32 %v3811_v15, %v3810_v48  ;;  %v8087_v52 = vpop.permute.xlu1 %3177 }
 0x3fc   :  { %2965 = vxpose.xlu0.b32.cont [11/16] (narrow) %v8799_v59, 32  ;;  %v3533_v4 = vadd.f32 %v3532_v62, %v3531_v37  ;;  %v3729_v23 = vrot.slane %v3728_v20, 2  ;;  %v8090_v34 = vpop.permute.xlu0 %3171 }
 0x3fd   :  { %v3814_v37 = vadd.f32 %v3813_v30, %v3812_v28 }
 0x3fe   :  { %v3534_v19 = vrot.slane %v3533_v4, 1  ;;  %v3730_v60 = vadd.f32 %v3729_v23, %v3728_v20 }
 0x3ff   :  { %2932 = vxpose.xlu1.b32.cont [10/16] (narrow) %v7535_v5, 32  ;;  %v8101_v22 = vpop.permute.xlu1 %3117  ;;  %v3816_v47 = vadd.f32 %v3815_v39, %v3814_v37  ;;  %v3829_v37 = vsel %vm3733_vm1, %v7848_v40, 0.0 }
 0x400   :  { %2966 = vxpose.xlu0.b32.cont [12/16] (narrow) %v8754_v6, 32  ;;  %v3535_v63 = vadd.f32 %v3534_v19, %v3533_v4  ;;  %v3731_v8 = vrot.slane %v3730_v60, 1  ;;  %v8105_v62 = vpop.permute.xlu0 %3111  ;;  %v3823_v6 = vsel %vm3733_vm1, %v8757_v16, 0.0 }
 0x401   :  { %v3818_v20 = vadd.f32 %v3817_v56, %v3816_v47  ;;  %v3831_v47 = vsel %vm3733_vm1, %v8767_v36, 0.0 }
 0x402   :  { %4033 = vst.msk [vmem:[%s8399_s8] sm:$0x1] %vm4032_vm2, %v3535_v63  ;;  %v3732_v5 = vadd.f32 %v3731_v8, %v3730_v60 }
 0x403   :  { %2933 = vxpose.xlu1.b32.cont [11/16] (narrow) %v7543_v44, 32  ;;  %v8111_v4 = vpop.permute.xlu1 %3181  ;;  %v3820_v23 = vadd.f32 %v3819_v18, %v3818_v20 }
 0x404   :  { %2967 = vxpose.xlu0.b32.cont [13/16] (narrow) %v8755_v51, 32  ;;  %4034 = vst.msk [vmem:[%s8399_s8 + $0x1] sm:$0x1] %vm4032_vm2, %v3732_v5 }
 0x407   :  { %2934 = vxpose.xlu1.b32.cont [12/16] (narrow) %v7577_v29, 32  ;;  %v8114_v29 = vpop.permute.xlu0 %3175  ;;  %v8120_v19 = vpop.permute.xlu1 %3121 }
 0x408   :  { %2968 = vxpose.xlu0.b32.cont [14/16] (narrow) %v8757_v16, 32  ;;  %v3827_v16 = vsel %vm3733_vm1, %v8763_v38, 0.0 }
 0x40b   :  { %2935 = vxpose.xlu1.b32.cont [13/16] (narrow) %v7581_v27, 32  ;;  %v8133_v63 = vpop.permute.xlu1 %3185 }
 0x40c   :  { %2969 = vxpose.xlu0.b32.cont [15/16] (narrow) %v8759_v12, 32 }
 0x40f   :  { %2936 = vxpose.xlu1.b32.cont [14/16] (narrow) %v7618_v58, 32  ;;  %v3821_v58 = vsel %vm3733_vm1, %v8755_v51, 0.0  ;;  %v3825_v51 = vsel %vm3733_vm1, %v8759_v12, 0.0  ;;  %v8142_v5 = vpop.permute.xlu1 %3125 }
 0x410   :  { %2970 = vxpose.xlu0.b32.end [16/16] (narrow) %v8763_v38, 32  ;;  %v3822_v59 = vadd.f32 %v3821_v58, %v3820_v23  ;;  %v3833_v38 = vsel %vm3733_vm1, %v7871_v0, 0.0  ;;  %v3835_v23 = vsel %vm3733_vm1, %v8772_v42, 0.0 }
 0x412   :  { %v3824_v60 = vadd.f32 %v3823_v6, %v3822_v59  ;;  %v3839_v6 = vsel %vm3733_vm1, %v8776_v26, 0.0 }
 0x413   :  { %2937 = vxpose.xlu1.b32.cont [15/16] (narrow) %v7695_v3, 32  ;;  %v8152_v12 = vpop.permute.xlu1 %3189 }
 0x414   :  { %v2907_v33 = vpop.trf.xlu0  ;;  %v3826_v15 = vadd.f32 %v3825_v51, %v3824_v60  ;;  %v3841_v60 = vsel %vm3733_vm1, %v7926_v57, 0.0 }
 0x415   :  { %4000 = vst [vmem:[%s8396_s5] sm:$0xff] %v2907_v33 }
 0x416   :  { %v3828_v30 = vadd.f32 %v3827_v16, %v3826_v15 }
 0x417   :  { %2938 = vxpose.xlu1.b32.end [16/16] (narrow) %v7725_v2, 32  ;;  %v8158_v20 = vpop.permute.xlu1 %3129 }
 0x418   :  { %v2908_v48 = vpop.trf.xlu0  ;;  %v3830_v39 = vadd.f32 %v3829_v37, %v3828_v30 }
 0x419   :  { %4004 = vst [vmem:[%s8396_s5 + $0x20] sm:$0xff] %v2908_v48 }
 0x41a   :  { %v3832_v56 = vadd.f32 %v3831_v47, %v3830_v39 }
 0x41b   :  { %2987 = vxpose.xlu1.b32.start [1/16] (narrow) %v7848_v40, 32  ;;  %v8165_v33 = vpop.permute.xlu1 %3193 }
 0x41c   :  { %v2909_v8 = vpop.trf.xlu0  ;;  %v3834_v18 = vadd.f32 %v3833_v38, %v3832_v56 }
 0x41d   :  { %4008 = vst [vmem:[%s8396_s5 + $0x40] sm:$0xff] %v2909_v8 }
 0x41e   :  { %v3836_v58 = vadd.f32 %v3835_v23, %v3834_v18 }
 0x41f   :  { %2988 = vxpose.xlu1.b32.cont [2/16] (narrow) %v8767_v36, 32  ;;  %v3837_v36 = vsel %vm3733_vm1, %v7892_v46, 0.0  ;;  %v8171_v48 = vpop.permute.xlu1 %3133 }
 0x420   :  { %v2910_v28 = vpop.trf.xlu0  ;;  %v3838_v59 = vadd.f32 %v3837_v36, %v3836_v58 }
 0x421   :  { %4012 = vst [vmem:[%s8396_s5 + $0x60] sm:$0xff] %v2910_v28 }
 0x423   :  { %2989 = vxpose.xlu1.b32.cont [3/16] (narrow) %v7871_v0, 32  ;;  %v8182_v8 = vpop.permute.xlu1 %3197 }
 0x427   :  { %2990 = vxpose.xlu1.b32.cont [4/16] (narrow) %v8772_v42, 32  ;;  %v3840_v42 = vadd.f32 %v3839_v6, %v3838_v59  ;;  %v8190_v15 = vpop.permute.xlu1 %3137 }
 0x429   :  { %v3842_v51 = vadd.f32 %v3841_v60, %v3840_v42  ;;  %v3994_v60 = vrot.slane %v8064_v53, 4 }
 0x42b   :  { %2991 = vxpose.xlu1.b32.cont [5/16] (narrow) %v7892_v46, 32 }
 0x42f   :  { %2992 = vxpose.xlu1.b32.cont [6/16] (narrow) %v8776_v26, 32 }
 0x433   :  { %2993 = vxpose.xlu1.b32.cont [7/16] (narrow) %v7926_v57, 32 }
 0x437   :  { %2994 = vxpose.xlu1.b32.cont [8/16] (narrow) %v7554_v9, 32 }
 0x439   :  { %3115 = vrot.lane.b32.xlu0 %v7315_v31, %s4945_s13  ;;  %v3843_v31 = vsel %vm3733_vm1, %v7554_v9, 0.0  ;;  %v8201_v9 = vpop.permute.xlu1 %3201 }
 0x43a   :  { %v3844_v26 = vadd.f32 %v3843_v31, %v3842_v51  ;;  %v3995_v31 = vadd.f32 %v3994_v60, %v8064_v53  ;;  %v8819_v60 = vld [vmem:[#allocation34_spill] sm:$0xff] }
 0x43b   :  { %2995 = vxpose.xlu1.b32.cont [9/16] (narrow) %v7951_v25, 32 }
 0x43d   :  { %3179 = vrot.lane.b32.xlu0 %v7848_v40, %s4945_s13  ;;  %v3845_v40 = vsel %vm3733_vm1, %v7951_v25, 0.0  ;;  %v8209_v37 = vpop.permute.xlu1 %3141 }
 0x43e   :  { %v3846_v28 = vadd.f32 %v3845_v40, %v3844_v26  ;;  %v3996_v26 = vrot.slane %v3995_v31, 2 }
 0x43f   :  { %2996 = vxpose.xlu1.b32.cont [10/16] (narrow) %v8783_v11, 32 }
 0x440   :  { %v3997_v40 = vadd.f32 %v3996_v26, %v3995_v31 }
 0x441   :  { %3119 = vrot.lane.b32.xlu0 %v7382_v10, %s4945_s13  ;;  %v3847_v10 = vsel %vm3733_vm1, %v8783_v11, 0.0  ;;  %v8223_v47 = vpop.permute.xlu1 %3205 }
 0x442   :  { %v3848_v16 = vadd.f32 %v3847_v10, %v3846_v28  ;;  %v3998_v28 = vrot.slane %v3997_v40, 1  ;;  %v8801_v10 = vld [vmem:[#allocation39_spill] sm:$0xff] }
 0x443   :  { %2997 = vxpose.xlu1.b32.cont [11/16] (narrow) %v7964_v14, 32 }
 0x444   :  { %v3999_v53 = vadd.f32 %v3998_v28, %v3997_v40 }
 0x445   :  { %3183 = vrot.lane.b32.xlu0 %v7871_v0, %s4945_s13  ;;  %v3849_v0 = vsel %vm3733_vm1, %v7964_v14, 0.0 }
 0x446   :  { %v3850_v30 = vadd.f32 %v3849_v0, %v3848_v16  ;;  %v8804_v0 = vld [vmem:[#allocation40_spill] sm:$0xff] }
 0x447   :  { %2998 = vxpose.xlu1.b32.cont [12/16] (narrow) %v8787_v21, 32 }
 0x449   :  { %3123 = vrot.lane.b32.xlu0 %v7421_v13, %s4945_s13  ;;  %v3851_v13 = vsel %vm3733_vm1, %v8787_v21, 0.0 }
 0x44a   :  { %v3852_v11 = vadd.f32 %v3851_v13, %v3850_v30  ;;  %v8805_v13 = vld [vmem:[#allocation15_spill] sm:$0xff] }
 0x44b   :  { %2999 = vxpose.xlu1.b32.cont [13/16] (narrow) %v7994_v7, 32 }
 0x44d   :  { %3187 = vrot.lane.b32.xlu0 %v7892_v46, %s4945_s13  ;;  %v3853_v46 = vsel %vm3733_vm1, %v7994_v7, 0.0 }
 0x44f   :  { %3000 = vxpose.xlu1.b32.cont [14/16] (narrow) %v8794_v24, 32 }
 0x451   :  { %3127 = vrot.lane.b32.xlu0 %v7456_v54, %s4945_s13  ;;  %v3854_v54 = vadd.f32 %v3853_v46, %v3852_v11  ;;  %v8806_v46 = vld [vmem:[#allocation36_spill] sm:$0xff] }
 0x453   :  { %3001 = vxpose.xlu1.b32.cont [15/16] (narrow) %v8015_v41, 32 }
 0x454   :  { %v2971_v39 = vpop.trf.xlu0 }
 0x455   :  { %3191 = vrot.lane.b32.xlu0 %v7926_v57, %s4945_s13  ;;  %4002 = vst [vmem:[%s8396_s5 + $0x10] sm:$0xff] %v2971_v39  ;;  %v3855_v57 = vsel %vm3733_vm1, %v8794_v24, 0.0 }
 0x456   :  { %v3856_v56 = vadd.f32 %v3855_v57, %v3854_v54  ;;  %v8807_v57 = vld [vmem:[#allocation47_spill] sm:$0xff] }
 0x457   :  { %3002 = vxpose.xlu1.b32.end [16/16] (narrow) %v8028_v1, 32 }
 0x458   :  { %v2972_v21 = vpop.trf.xlu0 }
 0x459   :  { %3131 = vrot.lane.b32.xlu0 %v7503_v35, %s4945_s13  ;;  %4006 = vst [vmem:[%s8396_s5 + $0x30] sm:$0xff] %v2972_v21  ;;  %v3857_v35 = vsel %vm3733_vm1, %v8015_v41, 0.0 }
 0x45a   :  { %v3858_v23 = vadd.f32 %v3857_v35, %v3856_v56  ;;  %v8809_v35 = vld [vmem:[#allocation43_spill] sm:$0xff] }
 0x45b   :  { %v2939_v38 = vpop.trf.xlu1 }
 0x45c   :  { %v2973_v18 = vpop.trf.xlu0  ;;  %4001 = vst [vmem:[%s8396_s5 + $0x8] sm:$0xff] %v2939_v38 }
 0x45d   :  { %3195 = vrot.lane.b32.xlu0 %v7951_v25, %s4945_s13  ;;  %4010 = vst [vmem:[%s8396_s5 + $0x50] sm:$0xff] %v2973_v18  ;;  %v3859_v25 = vsel %vm3733_vm1, %v8028_v1, 0.0 }
 0x45e   :  { %v3860_v36 = vadd.f32 %v3859_v25, %v3858_v23 }
 0x45f   :  { %v2940_v58 = vpop.trf.xlu1 }
 0x460   :  { %v2974_v24 = vpop.trf.xlu0  ;;  %4005 = vst [vmem:[%s8396_s5 + $0x28] sm:$0xff] %v2940_v58  ;;  %v3861_v6 = vrot.slane %v3860_v36, 4 }
 0x461   :  { %3135 = vrot.lane.b32.xlu0 %v7543_v44, %s4945_s13  ;;  %4014 = vst [vmem:[%s8396_s5 + $0x70] sm:$0xff] %v2974_v24  ;;  %v8814_v24 = vld [vmem:[#allocation30_spill] sm:$0xff] }
 0x462   :  { %v3862_v44 = vadd.f32 %v3861_v6, %v3860_v36  ;;  %v8815_v36 = vld [vmem:[#allocation51_spill] sm:$0xff] }
 0x463   :  { %v2941_v59 = vpop.trf.xlu1 }
 0x464   :  { %4009 = vst [vmem:[%s8396_s5 + $0x48] sm:$0xff] %v2941_v59  ;;  %v3863_v51 = vrot.slane %v3862_v44, 2  ;;  %v8816_v59 = vld [vmem:[#allocation42_spill] sm:$0xff] }
 0x465   :  { %3199 = vrot.lane.b32.xlu0 %v7964_v14, %s4945_s13 }
 0x466   :  { %v3864_v14 = vadd.f32 %v3863_v51, %v3862_v44  ;;  %v8818_v44 = vld [vmem:[#allocation49_spill] sm:$0xff] }
 0x467   :  { %v2942_v42 = vpop.trf.xlu1 }
 0x468   :  { %4013 = vst [vmem:[%s8396_s5 + $0x68] sm:$0xff] %v2942_v42 }
 0x469   :  { %3139 = vrot.lane.b32.xlu0 %v7581_v27, %s4945_s13  ;;  %v3865_v27 = vrot.slane %v3864_v14, 1 }
 0x46d   :  { %3203 = vrot.lane.b32.xlu0 %v7994_v7, %s4945_s13  ;;  %v3866_v7 = vadd.f32 %v3865_v27, %v3864_v14 }
 0x471   :  { %3143 = vrot.lane.b32.xlu0 %v7695_v3, %s4945_s13  ;;  %v8800_v3 = vld [vmem:[#allocation37_spill] sm:$0xff] }
 0x475   :  { %3207 = vrot.lane.b32.xlu0 %v8015_v41, %s4945_s13  ;;  %3145 = vrot.lane.b32.xlu1 %v7725_v2, %s4945_s13  ;;  %v8802_v41 = vld [vmem:[#allocation17_spill] sm:$0xff]  ;;  %v8803_v2 = vld [vmem:[#allocation50_spill] sm:$0xff] }
 0x479   :  { %3209 = vrot.lane.b32.xlu1 %v8028_v1, %s4945_s13 }
 0x47d   :  { %4036 = vrot.lane.b32.xlu1 %v3866_v7, %s4945_s13 }
 0x481   :  { %4041 = vrot.lane.b32.xlu1 %v3999_v53, %s4945_s13 }
 0x493   :  { %3275 = vxpose.xlu0.b32.start [1/16] (narrow) %v8800_v3, 32 }
 0x497   :  { %3276 = vxpose.xlu0.b32.cont [2/16] (narrow) %v8801_v10, 32 }
 0x49b   :  { %3277 = vxpose.xlu0.b32.cont [3/16] (narrow) %v8802_v41, 32  ;;  %v3003_v16 = vpop.trf.xlu1 }
 0x49c   :  { %4003 = vst [vmem:[%s8396_s5 + $0x18] sm:$0xff] %v3003_v16 }
 0x49f   :  { %3278 = vxpose.xlu0.b32.cont [4/16] (narrow) %v8803_v2, 32  ;;  %v3004_v1 = vpop.trf.xlu1 }
 0x4a0   :  { %4007 = vst [vmem:[%s8396_s5 + $0x38] sm:$0xff] %v3004_v1 }
 0x4a3   :  { %3279 = vxpose.xlu0.b32.cont [5/16] (narrow) %v8804_v0, 32  ;;  %v3005_v30 = vpop.trf.xlu1 }
 0x4a4   :  { %4011 = vst [vmem:[%s8396_s5 + $0x58] sm:$0xff] %v3005_v30 }
 0x4a7   :  { %3280 = vxpose.xlu0.b32.cont [6/16] (narrow) %v8805_v13, 32  ;;  %v3006_v11 = vpop.trf.xlu1 }
 0x4a8   :  { %4015 = vst [vmem:[%s8396_s5 + $0x78] sm:$0xff] %v3006_v11 }
 0x4ab   :  { %3281 = vxpose.xlu0.b32.cont [7/16] (narrow) %v7920_v55, 32  ;;  %v3116_v39 = vpop.permute.xlu0 %3115  ;;  %v8808_v55 = vld [vmem:[#allocation53_spill] sm:$0xff] }
 0x4ac   :  { %3307 = vxpose.xlu1.b32.start [1/16] (narrow) %v3116_v39, 32 }
 0x4af   :  { %3282 = vxpose.xlu0.b32.cont [8/16] (narrow) %v8806_v46, 32  ;;  %v3180_v54 = vpop.permute.xlu0 %3179 }
 0x4b0   :  { %3308 = vxpose.xlu1.b32.cont [2/16] (narrow) %v8101_v22, 32 }
 0x4b3   :  { %3283 = vxpose.xlu0.b32.cont [9/16] (narrow) %v7984_v43, 32  ;;  %v3120_v21 = vpop.permute.xlu0 %3119 }
 0x4b4   :  { %3309 = vxpose.xlu1.b32.cont [3/16] (narrow) %v3120_v21, 32 }
 0x4b7   :  { %3284 = vxpose.xlu0.b32.cont [10/16] (narrow) %v8807_v57, 32  ;;  %v3184_v56 = vpop.permute.xlu0 %3183 }
 0x4b8   :  { %3310 = vxpose.xlu1.b32.cont [4/16] (narrow) %v8120_v19, 32 }
 0x4bb   :  { %3285 = vxpose.xlu0.b32.cont [11/16] (narrow) %v8049_v45, 32  ;;  %v3124_v38 = vpop.permute.xlu0 %3123 }
 0x4bc   :  { %3311 = vxpose.xlu1.b32.cont [5/16] (narrow) %v3124_v38, 32 }
 0x4bf   :  { %3286 = vxpose.xlu0.b32.cont [12/16] (narrow) %v8808_v55, 32  ;;  %v3188_v18 = vpop.permute.xlu0 %3187 }
 0x4c0   :  { %3312 = vxpose.xlu1.b32.cont [6/16] (narrow) %v8142_v5, 32 }
 0x4c3   :  { %3287 = vxpose.xlu0.b32.cont [13/16] (narrow) %v8077_v32, 32  ;;  %v3128_v22 = vpop.permute.xlu0 %3127  ;;  %v8810_v32 = vld [vmem:[#allocation9_spill] sm:$0xff] }
 0x4c4   :  { %3313 = vxpose.xlu1.b32.cont [7/16] (narrow) %v3128_v22, 32 }
 0x4c7   :  { %3288 = vxpose.xlu0.b32.cont [14/16] (narrow) %v8043_v61, 32  ;;  %v3192_v43 = vpop.permute.xlu0 %3191  ;;  %v8811_v61 = vld [vmem:[#allocation32_spill] sm:$0xff] }
 0x4c8   :  { %3314 = vxpose.xlu1.b32.cont [8/16] (narrow) %v8158_v20, 32 }
 0x4cb   :  { %3289 = vxpose.xlu0.b32.cont [15/16] (narrow) %v8105_v62, 32  ;;  %v3132_v19 = vpop.permute.xlu0 %3131  ;;  %v8812_v62 = vld [vmem:[#allocation52_spill] sm:$0xff] }
 0x4cc   :  { %3315 = vxpose.xlu1.b32.cont [9/16] (narrow) %v3132_v19, 32 }
 0x4cf   :  { %3290 = vxpose.xlu0.b32.end [16/16] (narrow) %v8073_v50, 32  ;;  %v3196_v45 = vpop.permute.xlu0 %3195  ;;  %v8813_v50 = vld [vmem:[#allocation44_spill] sm:$0xff] }
 0x4d0   :  { %3316 = vxpose.xlu1.b32.cont [10/16] (narrow) %v8171_v48, 32 }
 0x4d3   :  { %3339 = vxpose.xlu0.b32.start [1/16] (narrow) %v8809_v35, 32  ;;  %v3136_v5 = vpop.permute.xlu0 %3135 }
 0x4d4   :  { %3317 = vxpose.xlu1.b32.cont [11/16] (narrow) %v3136_v5, 32 }
 0x4d7   :  { %3340 = vxpose.xlu0.b32.cont [2/16] (narrow) %v8810_v32, 32  ;;  %v3200_v23 = vpop.permute.xlu0 %3199 }
 0x4d8   :  { %3318 = vxpose.xlu1.b32.cont [12/16] (narrow) %v8190_v15, 32 }
 0x4db   :  { %3341 = vxpose.xlu0.b32.cont [3/16] (narrow) %v8811_v61, 32  ;;  %v3140_v20 = vpop.permute.xlu0 %3139 }
 0x4dc   :  { %3319 = vxpose.xlu1.b32.cont [13/16] (narrow) %v3140_v20, 32 }
 0x4df   :  { %3342 = vxpose.xlu0.b32.cont [4/16] (narrow) %v8812_v62, 32  ;;  %v3204_v58 = vpop.permute.xlu0 %3203 }
 0x4e0   :  { %3320 = vxpose.xlu1.b32.cont [14/16] (narrow) %v8209_v37, 32  ;;  %v8817_v37 = vld [vmem:[#allocation22_spill] sm:$0xff] }
 0x4e3   :  { %3343 = vxpose.xlu0.b32.cont [5/16] (narrow) %v8813_v50, 32  ;;  %v3144_v48 = vpop.permute.xlu0 %3143 }
 0x4e4   :  { %3321 = vxpose.xlu1.b32.cont [15/16] (narrow) %v3144_v48, 32 }
 0x4e7   :  { %3344 = vxpose.xlu0.b32.cont [6/16] (narrow) %v8814_v24, 32  ;;  %v3146_v25 = vpop.permute.xlu1 %3145 }
 0x4e8   :  { %3322 = vxpose.xlu1.b32.end [16/16] (narrow) %v3146_v25, 32 }
 0x4eb   :  { %3345 = vxpose.xlu0.b32.cont [7/16] (narrow) %v8815_v36, 32  ;;  %v3210_v15 = vpop.permute.xlu1 %3209 }
 0x4ec   :  { %3371 = vxpose.xlu1.b32.start [1/16] (narrow) %v3180_v54, 32 }
 0x4ef   :  { %3346 = vxpose.xlu0.b32.cont [8/16] (narrow) %v8816_v59, 32  ;;  %v4037_v6 = vpop.permute.xlu1 %4036 }
 0x4f0   :  { %4039 = vst.msk [vmem:[%s8399_s8 + $0x2] sm:$0x1] %vm4032_vm2, %v4037_v6  ;;  %3372 = vxpose.xlu1.b32.cont [2/16] (narrow) %v8111_v4, 32  ;;  %v3208_v4 = vpop.permute.xlu0 %3207 }
 0x4f3   :  { %3347 = vxpose.xlu0.b32.cont [9/16] (narrow) %v8817_v37, 32  ;;  %v4042_v42 = vpop.permute.xlu1 %4041 }
 0x4f4   :  { %4044 = vst.msk [vmem:[%s8399_s8 + $0x3] sm:$0x1] %vm4032_vm2, %v4042_v42  ;;  %3373 = vxpose.xlu1.b32.cont [3/16] (narrow) %v3184_v56, 32 }
 0x4f7   :  { %3348 = vxpose.xlu0.b32.cont [10/16] (narrow) %v8818_v44, 32 }
 0x4f8   :  { %3374 = vxpose.xlu1.b32.cont [4/16] (narrow) %v8133_v63, 32 }
 0x4fb   :  { %3349 = vxpose.xlu0.b32.cont [11/16] (narrow) %v8066_v49, 32 }
 0x4fc   :  { %3375 = vxpose.xlu1.b32.cont [5/16] (narrow) %v3188_v18, 32 }
 0x4ff   :  { %3350 = vxpose.xlu0.b32.cont [12/16] (narrow) %v8819_v60, 32 }
 0x500   :  { %3376 = vxpose.xlu1.b32.cont [6/16] (narrow) %v8152_v12, 32 }
 0x503   :  { %3351 = vxpose.xlu0.b32.cont [13/16] (narrow) %v8090_v34, 32 }
 0x504   :  { %3377 = vxpose.xlu1.b32.cont [7/16] (narrow) %v3192_v43, 32 }
 0x507   :  { %3352 = vxpose.xlu0.b32.cont [14/16] (narrow) %v8061_v17, 32 }
 0x508   :  { %3378 = vxpose.xlu1.b32.cont [8/16] (narrow) %v8165_v33, 32 }
 0x50b   :  { %3353 = vxpose.xlu0.b32.cont [15/16] (narrow) %v8114_v29, 32 }
 0x50c   :  { %3379 = vxpose.xlu1.b32.cont [9/16] (narrow) %v3196_v45, 32 }
 0x50f   :  { %3354 = vxpose.xlu0.b32.end [16/16] (narrow) %v8087_v52, 32 }
 0x510   :  { %3380 = vxpose.xlu1.b32.cont [10/16] (narrow) %v8182_v8, 32 }
 0x513   :  { %v3291_v49 = vpop.trf.xlu0 }
 0x514   :  { %3381 = vxpose.xlu1.b32.cont [11/16] (narrow) %v3200_v23, 32  ;;  %4016 = vst [vmem:[%s8397_s6] sm:$0xff] %v3291_v49 }
 0x517   :  { %v3292_v34 = vpop.trf.xlu0 }
 0x518   :  { %3382 = vxpose.xlu1.b32.cont [12/16] (narrow) %v8201_v9, 32  ;;  %4020 = vst [vmem:[%s8397_s6 + $0x20] sm:$0xff] %v3292_v34 }
 0x51b   :  { %v3293_v17 = vpop.trf.xlu0 }
 0x51c   :  { %3383 = vxpose.xlu1.b32.cont [13/16] (narrow) %v3204_v58, 32  ;;  %4024 = vst [vmem:[%s8397_s6 + $0x40] sm:$0xff] %v3293_v17 }
 0x51f   :  { %v3294_v52 = vpop.trf.xlu0 }
 0x520   :  { %3384 = vxpose.xlu1.b32.cont [14/16] (narrow) %v8223_v47, 32  ;;  %4028 = vst [vmem:[%s8397_s6 + $0x60] sm:$0xff] %v3294_v52 }
 0x524   :  { %3385 = vxpose.xlu1.b32.cont [15/16] (narrow) %v3208_v4, 32 }
 0x528   :  { %3386 = vxpose.xlu1.b32.end [16/16] (narrow) %v3210_v15, 32 }
 0x52c   :  { %v3323_v29 = vpop.trf.xlu1 }
 0x52d   :  { %4017 = vst [vmem:[%s8397_s6 + $0x8] sm:$0xff] %v3323_v29 }
 0x530   :  { %v3324_v63 = vpop.trf.xlu1 }
 0x531   :  { %4021 = vst [vmem:[%s8397_s6 + $0x28] sm:$0xff] %v3324_v63 }
 0x534   :  { %v3325_v12 = vpop.trf.xlu1 }
 0x535   :  { %4025 = vst [vmem:[%s8397_s6 + $0x48] sm:$0xff] %v3325_v12 }
 0x538   :  { %v3326_v33 = vpop.trf.xlu1 }
 0x539   :  { %4029 = vst [vmem:[%s8397_s6 + $0x68] sm:$0xff] %v3326_v33 }
 0x553   :  { %v3355_v8 = vpop.trf.xlu0 }
 0x554   :  { %4018 = vst [vmem:[%s8397_s6 + $0x10] sm:$0xff] %v3355_v8 }
 0x557   :  { %v3356_v9 = vpop.trf.xlu0 }
 0x558   :  { %4022 = vst [vmem:[%s8397_s6 + $0x30] sm:$0xff] %v3356_v9 }
 0x55b   :  { %v3357_v47 = vpop.trf.xlu0 }
 0x55c   :  { %4026 = vst [vmem:[%s8397_s6 + $0x50] sm:$0xff] %v3357_v47 }
 0x55f   :  { %v3358_v51 = vpop.trf.xlu0 }
 0x560   :  { %4030 = vst [vmem:[%s8397_s6 + $0x70] sm:$0xff] %v3358_v51 }
 0x56c   :  { %v3387_v31 = vpop.trf.xlu1 }
 0x56d   :  { %4019 = vst [vmem:[%s8397_s6 + $0x18] sm:$0xff] %v3387_v31 }
 0x570   :  { %v3388_v14 = vpop.trf.xlu1 }
 0x571   :  { %4023 = vst [vmem:[%s8397_s6 + $0x38] sm:$0xff] %v3388_v14 }
 0x574   :  { %v3389_v26 = vpop.trf.xlu1 }
 0x575   :  { %4027 = vst [vmem:[%s8397_s6 + $0x58] sm:$0xff] %v3389_v26 }
 0x578   :  { %v3390_v27 = vpop.trf.xlu1 }
 0x579   :  { %4031 = vst [vmem:[%s8397_s6 + $0x78] sm:$0xff] %v3390_v27 }
 0x57a   :  { %4061 = vsyncpa [#allocation3], 1 }

// kernel: triangle_multiplication_incoming.4
= control target key start
LH: loop header
LB: loop body
LE: loop exit
PB: predicated region body
PF: predicated region fallthrough
CT: control target
= control target key end

     0   :  { %s5974_s9 = smov 0   ;;  %s5976_s10 = smov 0   ;;  %s6984_s0 = inlined_call_operand.vmem [shape: f32[32,32,16], index: 0, kind: input, shape index: {}]   ;;  %s6985_s1 = inlined_call_operand.vmem [shape: f32[32,32,16], index: 1, kind: input, shape index: {}]   ;;  %s6986_s2 = inlined_call_operand.vmem [shape: f32[32,32,16], index: 2, kind: output, shape index: {}]  }
   0x1   :  { %s5978_s11 = smov 0   ;;  %s5980_s12 = smov 0  }
   0x2   :  { %s5982_s13 = smov 0  }
   0x3 LB: > { %s38_s14 = sadd.s32 1, %s5952_s12  ;;  %s5311_s15 = sadd.s32 4294967295, %s5956_s13   ;;  %s5956_s13 = sphi %s5982_s13, %s12_s13   ;;  %s5952_s12 = sphi %s5980_s12, %s6992_s12   ;;  %s5948_s11 = sphi %s5978_s11, %s6991_s11   ;;  %s5944_s10 = sphi %s5976_s10, %s6990_s10   ;;  %s5940_s9 = sphi %s5974_s9, %s6989_s9  }
   0x4   : > { %p40_p0 = scmp.ge.s32.totalorder %s38_s14, 2  ;;  %p56_p1 = scmp.ne.s32.totalorder %s5944_s10, %s5940_s9 }
   0x5   : > { %p57_p2 = scmp.eq.s32.totalorder %s5956_s13, 0  ;;  %p120_p4 = scmp.eq.s32.totalorder %s5311_s15, 1 }
   0x6   : > { %s6994_s14 = smov (%p40_p0, %s38_s14), 0  ;;  %s49_s18 = sadd.s32 1, %s5944_s10 }
   0x7   : > { %p6006_p3 = por %p57_p2, %p56_p1  ;;  %s44_s17 = ssub.s32 %s5952_s12, %s6994_s14 }
   0x8   : > { %p47_p5 = scmp.eq.s32.totalorder %s44_s17, 0  ;;  %p6013_p6 = por %p120_p4, %p56_p1 }
   0x9   : > { %p5314_p7 = scmp.ge.s32.totalorder %s5956_s13, 2 }
   0xa   : > { %s6018_s20 = scalar_select %p47_p5, %s5944_s10, %s49_s18  }
   0xb   : > { %142 = sbr.rel (%p5314_p7) target bundleno = 90 (0x5a), region = 16 }
  0x12   : > { %145 = sbr.rel (!%p6006_p3) target bundleno = 54 (0x36), region = 20  ;;  %s147_s21 = sand.u32 (%p6006_p3), 1, %s5944_s10  }
  0x13   : > { %s5394_s22 = sshll.u32 (%p6006_p3), %s5952_s12, 4  ;;  %s5315_s23 = sshll.u32 (%p6006_p3), %s147_s21, 9 }
  0x14   : > { %s6028_s26 = scalar_lea.vmem (%p6006_p3), %s6984_s0, %s5394_s22  ;;  %s6033_s27 = scalar_lea.vmem (%p6006_p3), [#allocation3], %s5315_s23 }
  0x15   : > { %v308_v0 = vld [vmem:[%s6028_s26] sm:$0xff] (%p6006_p3)  ;;  %v310_v1 = vld [vmem:[%s6028_s26 + $0x8] sm:$0xff] (%p6006_p3) }
  0x16   : > { %v312_v2 = vld [vmem:[%s6028_s26 + $0x20] sm:$0xff] (%p6006_p3)  ;;  %309 = vst [vmem:[%s6033_s27] sm:$0xff] (%p6006_p3), %v308_v0  ;;  %311 = vst [vmem:[%s6033_s27 + $0x8] sm:$0xff] (%p6006_p3), %v310_v1  ;;  %v314_v3 = vld [vmem:[%s6028_s26 + $0x28] sm:$0xff] (%p6006_p3) }
  0x17   : > { %313 = vst [vmem:[%s6033_s27 + $0x10] sm:$0xff] (%p6006_p3), %v312_v2  ;;  %v316_v4 = vld [vmem:[%s6028_s26 + $0x40] sm:$0xff] (%p6006_p3)  ;;  %v318_v5 = vld [vmem:[%s6028_s26 + $0x48] sm:$0xff] (%p6006_p3)  ;;  %315 = vst [vmem:[%s6033_s27 + $0x18] sm:$0xff] (%p6006_p3), %v314_v3 }
  0x18   : > { %317 = vst [vmem:[%s6033_s27 + $0x20] sm:$0xff] (%p6006_p3), %v316_v4  ;;  %319 = vst [vmem:[%s6033_s27 + $0x28] sm:$0xff] (%p6006_p3), %v318_v5  ;;  %v320_v6 = vld [vmem:[%s6028_s26 + $0x60] sm:$0xff] (%p6006_p3)  ;;  %v322_v7 = vld [vmem:[%s6028_s26 + $0x68] sm:$0xff] (%p6006_p3) }
  0x19   : > { %v324_v8 = vld [vmem:[%s6028_s26 + $0x80] sm:$0xff]  ;;  %321 = vst [vmem:[%s6033_s27 + $0x30] sm:$0xff] %v320_v6  ;;  %323 = vst [vmem:[%s6033_s27 + $0x38] sm:$0xff] %v322_v7  ;;  %v326_v9 = vld [vmem:[%s6028_s26 + $0x88] sm:$0xff] }
  0x1a   : > { %325 = vst [vmem:[%s6033_s27 + $0x40] sm:$0xff] %v324_v8  ;;  %v328_v10 = vld [vmem:[%s6028_s26 + $0xa0] sm:$0xff]  ;;  %v330_v11 = vld [vmem:[%s6028_s26 + $0xa8] sm:$0xff]  ;;  %327 = vst [vmem:[%s6033_s27 + $0x48] sm:$0xff] %v326_v9 }
  0x1b   : > { %329 = vst [vmem:[%s6033_s27 + $0x50] sm:$0xff] %v328_v10  ;;  %331 = vst [vmem:[%s6033_s27 + $0x58] sm:$0xff] %v330_v11  ;;  %v332_v12 = vld [vmem:[%s6028_s26 + $0xc0] sm:$0xff]  ;;  %v334_v13 = vld [vmem:[%s6028_s26 + $0xc8] sm:$0xff] }
  0x1c   : > { %v336_v14 = vld [vmem:[%s6028_s26 + $0xe0] sm:$0xff]  ;;  %333 = vst [vmem:[%s6033_s27 + $0x60] sm:$0xff] %v332_v12  ;;  %335 = vst [vmem:[%s6033_s27 + $0x68] sm:$0xff] %v334_v13  ;;  %v338_v15 = vld [vmem:[%s6028_s26 + $0xe8] sm:$0xff] }
  0x1d   : > { %337 = vst [vmem:[%s6033_s27 + $0x70] sm:$0xff] %v336_v14  ;;  %v340_v16 = vld [vmem:[%s6028_s26 + $0x100] sm:$0xff]  ;;  %v342_v17 = vld [vmem:[%s6028_s26 + $0x108] sm:$0xff]  ;;  %339 = vst [vmem:[%s6033_s27 + $0x78] sm:$0xff] %v338_v15 }
  0x1e   : > { %341 = vst [vmem:[%s6033_s27 + $0x80] sm:$0xff] %v340_v16  ;;  %343 = vst [vmem:[%s6033_s27 + $0x88] sm:$0xff] %v342_v17  ;;  %v344_v18 = vld [vmem:[%s6028_s26 + $0x120] sm:$0xff]  ;;  %v346_v19 = vld [vmem:[%s6028_s26 + $0x128] sm:$0xff] }
  0x1f   : > { %v348_v20 = vld [vmem:[%s6028_s26 + $0x140] sm:$0xff]  ;;  %345 = vst [vmem:[%s6033_s27 + $0x90] sm:$0xff] %v344_v18  ;;  %347 = vst [vmem:[%s6033_s27 + $0x98] sm:$0xff] %v346_v19  ;;  %v350_v21 = vld [vmem:[%s6028_s26 + $0x148] sm:$0xff] }
  0x20   : > { %349 = vst [vmem:[%s6033_s27 + $0xa0] sm:$0xff] %v348_v20  ;;  %v352_v22 = vld [vmem:[%s6028_s26 + $0x160] sm:$0xff]  ;;  %v354_v23 = vld [vmem:[%s6028_s26 + $0x168] sm:$0xff]  ;;  %351 = vst [vmem:[%s6033_s27 + $0xa8] sm:$0xff] %v350_v21 }
  0x21   : > { %353 = vst [vmem:[%s6033_s27 + $0xb0] sm:$0xff] %v352_v22  ;;  %355 = vst [vmem:[%s6033_s27 + $0xb8] sm:$0xff] %v354_v23  ;;  %v356_v24 = vld [vmem:[%s6028_s26 + $0x180] sm:$0xff]  ;;  %v358_v25 = vld [vmem:[%s6028_s26 + $0x188] sm:$0xff] }
  0x22   : > { %v360_v26 = vld [vmem:[%s6028_s26 + $0x1a0] sm:$0xff]  ;;  %357 = vst [vmem:[%s6033_s27 + $0xc0] sm:$0xff] %v356_v24  ;;  %359 = vst [vmem:[%s6033_s27 + $0xc8] sm:$0xff] %v358_v25  ;;  %v362_v27 = vld [vmem:[%s6028_s26 + $0x1a8] sm:$0xff] }
  0x23   : > { %361 = vst [vmem:[%s6033_s27 + $0xd0] sm:$0xff] %v360_v26  ;;  %v364_v28 = vld [vmem:[%s6028_s26 + $0x1c0] sm:$0xff]  ;;  %v366_v29 = vld [vmem:[%s6028_s26 + $0x1c8] sm:$0xff]  ;;  %363 = vst [vmem:[%s6033_s27 + $0xd8] sm:$0xff] %v362_v27 }
  0x24   : > { %365 = vst [vmem:[%s6033_s27 + $0xe0] sm:$0xff] %v364_v28  ;;  %367 = vst [vmem:[%s6033_s27 + $0xe8] sm:$0xff] %v366_v29  ;;  %v368_v30 = vld [vmem:[%s6028_s26 + $0x1e0] sm:$0xff]  ;;  %v370_v31 = vld [vmem:[%s6028_s26 + $0x1e8] sm:$0xff] }
  0x25   : > { %v372_v32 = vld [vmem:[%s6028_s26 + $0x200] sm:$0xff]  ;;  %369 = vst [vmem:[%s6033_s27 + $0xf0] sm:$0xff] %v368_v30  ;;  %371 = vst [vmem:[%s6033_s27 + $0xf8] sm:$0xff] %v370_v31  ;;  %v374_v33 = vld [vmem:[%s6028_s26 + $0x208] sm:$0xff] }
  0x26   : > { %373 = vst [vmem:[%s6033_s27 + $0x100] sm:$0xff] %v372_v32  ;;  %v376_v34 = vld [vmem:[%s6028_s26 + $0x220] sm:$0xff]  ;;  %v378_v35 = vld [vmem:[%s6028_s26 + $0x228] sm:$0xff]  ;;  %375 = vst [vmem:[%s6033_s27 + $0x108] sm:$0xff] %v374_v33 }
  0x27   : > { %377 = vst [vmem:[%s6033_s27 + $0x110] sm:$0xff] %v376_v34  ;;  %379 = vst [vmem:[%s6033_s27 + $0x118] sm:$0xff] %v378_v35  ;;  %v380_v36 = vld [vmem:[%s6028_s26 + $0x240] sm:$0xff]  ;;  %v382_v37 = vld [vmem:[%s6028_s26 + $0x248] sm:$0xff] }
  0x28   : > { %v384_v38 = vld [vmem:[%s6028_s26 + $0x260] sm:$0xff]  ;;  %381 = vst [vmem:[%s6033_s27 + $0x120] sm:$0xff] %v380_v36  ;;  %383 = vst [vmem:[%s6033_s27 + $0x128] sm:$0xff] %v382_v37  ;;  %v386_v39 = vld [vmem:[%s6028_s26 + $0x268] sm:$0xff] }
  0x29   : > { %385 = vst [vmem:[%s6033_s27 + $0x130] sm:$0xff] %v384_v38  ;;  %v388_v40 = vld [vmem:[%s6028_s26 + $0x280] sm:$0xff]  ;;  %v390_v41 = vld [vmem:[%s6028_s26 + $0x288] sm:$0xff]  ;;  %387 = vst [vmem:[%s6033_s27 + $0x138] sm:$0xff] %v386_v39 }
  0x2a   : > { %389 = vst [vmem:[%s6033_s27 + $0x140] sm:$0xff] %v388_v40  ;;  %391 = vst [vmem:[%s6033_s27 + $0x148] sm:$0xff] %v390_v41  ;;  %v392_v42 = vld [vmem:[%s6028_s26 + $0x2a0] sm:$0xff]  ;;  %v394_v43 = vld [vmem:[%s6028_s26 + $0x2a8] sm:$0xff] }
  0x2b   : > { %v396_v44 = vld [vmem:[%s6028_s26 + $0x2c0] sm:$0xff]  ;;  %393 = vst [vmem:[%s6033_s27 + $0x150] sm:$0xff] %v392_v42  ;;  %395 = vst [vmem:[%s6033_s27 + $0x158] sm:$0xff] %v394_v43  ;;  %v398_v45 = vld [vmem:[%s6028_s26 + $0x2c8] sm:$0xff] }
  0x2c   : > { %397 = vst [vmem:[%s6033_s27 + $0x160] sm:$0xff] %v396_v44  ;;  %v400_v46 = vld [vmem:[%s6028_s26 + $0x2e0] sm:$0xff]  ;;  %v402_v47 = vld [vmem:[%s6028_s26 + $0x2e8] sm:$0xff]  ;;  %399 = vst [vmem:[%s6033_s27 + $0x168] sm:$0xff] %v398_v45 }
  0x2d   : > { %401 = vst [vmem:[%s6033_s27 + $0x170] sm:$0xff] %v400_v46  ;;  %403 = vst [vmem:[%s6033_s27 + $0x178] sm:$0xff] %v402_v47  ;;  %v404_v48 = vld [vmem:[%s6028_s26 + $0x300] sm:$0xff]  ;;  %v406_v49 = vld [vmem:[%s6028_s26 + $0x308] sm:$0xff] }
  0x2e   : > { %v408_v50 = vld [vmem:[%s6028_s26 + $0x320] sm:$0xff]  ;;  %405 = vst [vmem:[%s6033_s27 + $0x180] sm:$0xff] %v404_v48  ;;  %407 = vst [vmem:[%s6033_s27 + $0x188] sm:$0xff] %v406_v49  ;;  %v410_v51 = vld [vmem:[%s6028_s26 + $0x328] sm:$0xff] }
  0x2f   : > { %409 = vst [vmem:[%s6033_s27 + $0x190] sm:$0xff] %v408_v50  ;;  %v412_v52 = vld [vmem:[%s6028_s26 + $0x340] sm:$0xff]  ;;  %v414_v53 = vld [vmem:[%s6028_s26 + $0x348] sm:$0xff]  ;;  %411 = vst [vmem:[%s6033_s27 + $0x198] sm:$0xff] %v410_v51 }
  0x30   : > { %413 = vst [vmem:[%s6033_s27 + $0x1a0] sm:$0xff] %v412_v52  ;;  %415 = vst [vmem:[%s6033_s27 + $0x1a8] sm:$0xff] %v414_v53  ;;  %v416_v54 = vld [vmem:[%s6028_s26 + $0x360] sm:$0xff]  ;;  %v418_v55 = vld [vmem:[%s6028_s26 + $0x368] sm:$0xff] }
  0x31   : > { %v420_v56 = vld [vmem:[%s6028_s26 + $0x380] sm:$0xff]  ;;  %417 = vst [vmem:[%s6033_s27 + $0x1b0] sm:$0xff] %v416_v54  ;;  %419 = vst [vmem:[%s6033_s27 + $0x1b8] sm:$0xff] %v418_v55  ;;  %v422_v57 = vld [vmem:[%s6028_s26 + $0x388] sm:$0xff] }
  0x32   : > { %421 = vst [vmem:[%s6033_s27 + $0x1c0] sm:$0xff] %v420_v56  ;;  %v424_v58 = vld [vmem:[%s6028_s26 + $0x3a0] sm:$0xff]  ;;  %v426_v59 = vld [vmem:[%s6028_s26 + $0x3a8] sm:$0xff]  ;;  %423 = vst [vmem:[%s6033_s27 + $0x1c8] sm:$0xff] %v422_v57 }
  0x33   : > { %425 = vst [vmem:[%s6033_s27 + $0x1d0] sm:$0xff] %v424_v58  ;;  %427 = vst [vmem:[%s6033_s27 + $0x1d8] sm:$0xff] %v426_v59  ;;  %v428_v60 = vld [vmem:[%s6028_s26 + $0x3c0] sm:$0xff]  ;;  %v430_v61 = vld [vmem:[%s6028_s26 + $0x3c8] sm:$0xff] }
  0x34   : > { %v432_v62 = vld [vmem:[%s6028_s26 + $0x3e0] sm:$0xff]  ;;  %429 = vst [vmem:[%s6033_s27 + $0x1e0] sm:$0xff] %v428_v60  ;;  %431 = vst [vmem:[%s6033_s27 + $0x1e8] sm:$0xff] %v430_v61  ;;  %v434_v63 = vld [vmem:[%s6028_s26 + $0x3e8] sm:$0xff] }
  0x35   : > { %433 = vst [vmem:[%s6033_s27 + $0x1f0] sm:$0xff] %v432_v62  ;;  %435 = vst [vmem:[%s6033_s27 + $0x1f8] sm:$0xff] %v434_v63 }
  0x36 PF: > { %441 = sbr.rel (!%p6006_p3) target bundleno = 90 (0x5a), region = 58  ;;  %s443_s28 = sand.u32 (%p6006_p3), 1, %s5944_s10  }
  0x37   : > { %s5395_s29 = sshll.u32 (%p6006_p3), %s5952_s12, 4  ;;  %s5318_s30 = sshll.u32 (%p6006_p3), %s443_s28, 9 }
  0x38   : > { %s6167_s5 = scalar_lea.vmem (%p6006_p3), %s6985_s1, %s5395_s29  ;;  %s6172_s6 = scalar_lea.vmem (%p6006_p3), [#allocation4], %s5318_s30 }
  0x39   : > { %v604_v0 = vld [vmem:[%s6167_s5] sm:$0xff] (%p6006_p3)  ;;  %v606_v1 = vld [vmem:[%s6167_s5 + $0x8] sm:$0xff] (%p6006_p3) }
  0x3a   : > { %v608_v2 = vld [vmem:[%s6167_s5 + $0x20] sm:$0xff] (%p6006_p3)  ;;  %605 = vst [vmem:[%s6172_s6] sm:$0xff] (%p6006_p3), %v604_v0  ;;  %607 = vst [vmem:[%s6172_s6 + $0x8] sm:$0xff] (%p6006_p3), %v606_v1  ;;  %v610_v3 = vld [vmem:[%s6167_s5 + $0x28] sm:$0xff] (%p6006_p3) }
  0x3b   : > { %609 = vst [vmem:[%s6172_s6 + $0x10] sm:$0xff] (%p6006_p3), %v608_v2  ;;  %v612_v4 = vld [vmem:[%s6167_s5 + $0x40] sm:$0xff] (%p6006_p3)  ;;  %v614_v5 = vld [vmem:[%s6167_s5 + $0x48] sm:$0xff] (%p6006_p3)  ;;  %611 = vst [vmem:[%s6172_s6 + $0x18] sm:$0xff] (%p6006_p3), %v610_v3 }
  0x3c   : > { %613 = vst [vmem:[%s6172_s6 + $0x20] sm:$0xff] (%p6006_p3), %v612_v4  ;;  %615 = vst [vmem:[%s6172_s6 + $0x28] sm:$0xff] (%p6006_p3), %v614_v5  ;;  %v616_v6 = vld [vmem:[%s6167_s5 + $0x60] sm:$0xff] (%p6006_p3)  ;;  %v618_v7 = vld [vmem:[%s6167_s5 + $0x68] sm:$0xff] (%p6006_p3) }
  0x3d   : > { %v620_v8 = vld [vmem:[%s6167_s5 + $0x80] sm:$0xff]  ;;  %617 = vst [vmem:[%s6172_s6 + $0x30] sm:$0xff] %v616_v6  ;;  %619 = vst [vmem:[%s6172_s6 + $0x38] sm:$0xff] %v618_v7  ;;  %v622_v9 = vld [vmem:[%s6167_s5 + $0x88] sm:$0xff] }
  0x3e   : > { %621 = vst [vmem:[%s6172_s6 + $0x40] sm:$0xff] %v620_v8  ;;  %v624_v10 = vld [vmem:[%s6167_s5 + $0xa0] sm:$0xff]  ;;  %v626_v11 = vld [vmem:[%s6167_s5 + $0xa8] sm:$0xff]  ;;  %623 = vst [vmem:[%s6172_s6 + $0x48] sm:$0xff] %v622_v9 }
  0x3f   : > { %625 = vst [vmem:[%s6172_s6 + $0x50] sm:$0xff] %v624_v10  ;;  %627 = vst [vmem:[%s6172_s6 + $0x58] sm:$0xff] %v626_v11  ;;  %v628_v12 = vld [vmem:[%s6167_s5 + $0xc0] sm:$0xff]  ;;  %v630_v13 = vld [vmem:[%s6167_s5 + $0xc8] sm:$0xff] }
  0x40   : > { %v632_v14 = vld [vmem:[%s6167_s5 + $0xe0] sm:$0xff]  ;;  %629 = vst [vmem:[%s6172_s6 + $0x60] sm:$0xff] %v628_v12  ;;  %631 = vst [vmem:[%s6172_s6 + $0x68] sm:$0xff] %v630_v13  ;;  %v634_v15 = vld [vmem:[%s6167_s5 + $0xe8] sm:$0xff] }
  0x41   : > { %633 = vst [vmem:[%s6172_s6 + $0x70] sm:$0xff] %v632_v14  ;;  %v636_v16 = vld [vmem:[%s6167_s5 + $0x100] sm:$0xff]  ;;  %v638_v17 = vld [vmem:[%s6167_s5 + $0x108] sm:$0xff]  ;;  %635 = vst [vmem:[%s6172_s6 + $0x78] sm:$0xff] %v634_v15 }
  0x42   : > { %637 = vst [vmem:[%s6172_s6 + $0x80] sm:$0xff] %v636_v16  ;;  %639 = vst [vmem:[%s6172_s6 + $0x88] sm:$0xff] %v638_v17  ;;  %v640_v18 = vld [vmem:[%s6167_s5 + $0x120] sm:$0xff]  ;;  %v642_v19 = vld [vmem:[%s6167_s5 + $0x128] sm:$0xff] }
  0x43   : > { %v644_v20 = vld [vmem:[%s6167_s5 + $0x140] sm:$0xff]  ;;  %641 = vst [vmem:[%s6172_s6 + $0x90] sm:$0xff] %v640_v18  ;;  %643 = vst [vmem:[%s6172_s6 + $0x98] sm:$0xff] %v642_v19  ;;  %v646_v21 = vld [vmem:[%s6167_s5 + $0x148] sm:$0xff] }
  0x44   : > { %645 = vst [vmem:[%s6172_s6 + $0xa0] sm:$0xff] %v644_v20  ;;  %v648_v22 = vld [vmem:[%s6167_s5 + $0x160] sm:$0xff]  ;;  %v650_v23 = vld [vmem:[%s6167_s5 + $0x168] sm:$0xff]  ;;  %647 = vst [vmem:[%s6172_s6 + $0xa8] sm:$0xff] %v646_v21 }
  0x45   : > { %649 = vst [vmem:[%s6172_s6 + $0xb0] sm:$0xff] %v648_v22  ;;  %651 = vst [vmem:[%s6172_s6 + $0xb8] sm:$0xff] %v650_v23  ;;  %v652_v24 = vld [vmem:[%s6167_s5 + $0x180] sm:$0xff]  ;;  %v654_v25 = vld [vmem:[%s6167_s5 + $0x188] sm:$0xff] }
  0x46   : > { %v656_v26 = vld [vmem:[%s6167_s5 + $0x1a0] sm:$0xff]  ;;  %653 = vst [vmem:[%s6172_s6 + $0xc0] sm:$0xff] %v652_v24  ;;  %655 = vst [vmem:[%s6172_s6 + $0xc8] sm:$0xff] %v654_v25  ;;  %v658_v27 = vld [vmem:[%s6167_s5 + $0x1a8] sm:$0xff] }
  0x47   : > { %657 = vst [vmem:[%s6172_s6 + $0xd0] sm:$0xff] %v656_v26  ;;  %v660_v28 = vld [vmem:[%s6167_s5 + $0x1c0] sm:$0xff]  ;;  %v662_v29 = vld [vmem:[%s6167_s5 + $0x1c8] sm:$0xff]  ;;  %659 = vst [vmem:[%s6172_s6 + $0xd8] sm:$0xff] %v658_v27 }
  0x48   : > { %661 = vst [vmem:[%s6172_s6 + $0xe0] sm:$0xff] %v660_v28  ;;  %663 = vst [vmem:[%s6172_s6 + $0xe8] sm:$0xff] %v662_v29  ;;  %v664_v30 = vld [vmem:[%s6167_s5 + $0x1e0] sm:$0xff]  ;;  %v666_v31 = vld [vmem:[%s6167_s5 + $0x1e8] sm:$0xff] }
  0x49   : > { %v668_v32 = vld [vmem:[%s6167_s5 + $0x200] sm:$0xff]  ;;  %665 = vst [vmem:[%s6172_s6 + $0xf0] sm:$0xff] %v664_v30  ;;  %667 = vst [vmem:[%s6172_s6 + $0xf8] sm:$0xff] %v666_v31  ;;  %v670_v33 = vld [vmem:[%s6167_s5 + $0x208] sm:$0xff] }
  0x4a   : > { %669 = vst [vmem:[%s6172_s6 + $0x100] sm:$0xff] %v668_v32  ;;  %v672_v34 = vld [vmem:[%s6167_s5 + $0x220] sm:$0xff]  ;;  %v674_v35 = vld [vmem:[%s6167_s5 + $0x228] sm:$0xff]  ;;  %671 = vst [vmem:[%s6172_s6 + $0x108] sm:$0xff] %v670_v33 }
  0x4b   : > { %673 = vst [vmem:[%s6172_s6 + $0x110] sm:$0xff] %v672_v34  ;;  %675 = vst [vmem:[%s6172_s6 + $0x118] sm:$0xff] %v674_v35  ;;  %v676_v36 = vld [vmem:[%s6167_s5 + $0x240] sm:$0xff]  ;;  %v678_v37 = vld [vmem:[%s6167_s5 + $0x248] sm:$0xff] }
  0x4c   : > { %v680_v38 = vld [vmem:[%s6167_s5 + $0x260] sm:$0xff]  ;;  %677 = vst [vmem:[%s6172_s6 + $0x120] sm:$0xff] %v676_v36  ;;  %679 = vst [vmem:[%s6172_s6 + $0x128] sm:$0xff] %v678_v37  ;;  %v682_v39 = vld [vmem:[%s6167_s5 + $0x268] sm:$0xff] }
  0x4d   : > { %681 = vst [vmem:[%s6172_s6 + $0x130] sm:$0xff] %v680_v38  ;;  %v684_v40 = vld [vmem:[%s6167_s5 + $0x280] sm:$0xff]  ;;  %v686_v41 = vld [vmem:[%s6167_s5 + $0x288] sm:$0xff]  ;;  %683 = vst [vmem:[%s6172_s6 + $0x138] sm:$0xff] %v682_v39 }
  0x4e   : > { %685 = vst [vmem:[%s6172_s6 + $0x140] sm:$0xff] %v684_v40  ;;  %687 = vst [vmem:[%s6172_s6 + $0x148] sm:$0xff] %v686_v41  ;;  %v688_v42 = vld [vmem:[%s6167_s5 + $0x2a0] sm:$0xff]  ;;  %v690_v43 = vld [vmem:[%s6167_s5 + $0x2a8] sm:$0xff] }
  0x4f   : > { %v692_v44 = vld [vmem:[%s6167_s5 + $0x2c0] sm:$0xff]  ;;  %689 = vst [vmem:[%s6172_s6 + $0x150] sm:$0xff] %v688_v42  ;;  %691 = vst [vmem:[%s6172_s6 + $0x158] sm:$0xff] %v690_v43  ;;  %v694_v45 = vld [vmem:[%s6167_s5 + $0x2c8] sm:$0xff] }
  0x50   : > { %693 = vst [vmem:[%s6172_s6 + $0x160] sm:$0xff] %v692_v44  ;;  %v696_v46 = vld [vmem:[%s6167_s5 + $0x2e0] sm:$0xff]  ;;  %v698_v47 = vld [vmem:[%s6167_s5 + $0x2e8] sm:$0xff]  ;;  %695 = vst [vmem:[%s6172_s6 + $0x168] sm:$0xff] %v694_v45 }
  0x51   : > { %697 = vst [vmem:[%s6172_s6 + $0x170] sm:$0xff] %v696_v46  ;;  %699 = vst [vmem:[%s6172_s6 + $0x178] sm:$0xff] %v698_v47  ;;  %v700_v48 = vld [vmem:[%s6167_s5 + $0x300] sm:$0xff]  ;;  %v702_v49 = vld [vmem:[%s6167_s5 + $0x308] sm:$0xff] }
  0x52   : > { %v704_v50 = vld [vmem:[%s6167_s5 + $0x320] sm:$0xff]  ;;  %701 = vst [vmem:[%s6172_s6 + $0x180] sm:$0xff] %v700_v48  ;;  %703 = vst [vmem:[%s6172_s6 + $0x188] sm:$0xff] %v702_v49  ;;  %v706_v51 = vld [vmem:[%s6167_s5 + $0x328] sm:$0xff] }
  0x53   : > { %705 = vst [vmem:[%s6172_s6 + $0x190] sm:$0xff] %v704_v50  ;;  %v708_v52 = vld [vmem:[%s6167_s5 + $0x340] sm:$0xff]  ;;  %v710_v53 = vld [vmem:[%s6167_s5 + $0x348] sm:$0xff]  ;;  %707 = vst [vmem:[%s6172_s6 + $0x198] sm:$0xff] %v706_v51 }
  0x54   : > { %709 = vst [vmem:[%s6172_s6 + $0x1a0] sm:$0xff] %v708_v52  ;;  %711 = vst [vmem:[%s6172_s6 + $0x1a8] sm:$0xff] %v710_v53  ;;  %v712_v54 = vld [vmem:[%s6167_s5 + $0x360] sm:$0xff]  ;;  %v714_v55 = vld [vmem:[%s6167_s5 + $0x368] sm:$0xff] }
  0x55   : > { %v716_v56 = vld [vmem:[%s6167_s5 + $0x380] sm:$0xff]  ;;  %713 = vst [vmem:[%s6172_s6 + $0x1b0] sm:$0xff] %v712_v54  ;;  %715 = vst [vmem:[%s6172_s6 + $0x1b8] sm:$0xff] %v714_v55  ;;  %v718_v57 = vld [vmem:[%s6167_s5 + $0x388] sm:$0xff] }
  0x56   : > { %717 = vst [vmem:[%s6172_s6 + $0x1c0] sm:$0xff] %v716_v56  ;;  %v720_v58 = vld [vmem:[%s6167_s5 + $0x3a0] sm:$0xff]  ;;  %v722_v59 = vld [vmem:[%s6167_s5 + $0x3a8] sm:$0xff]  ;;  %719 = vst [vmem:[%s6172_s6 + $0x1c8] sm:$0xff] %v718_v57 }
  0x57   : > { %721 = vst [vmem:[%s6172_s6 + $0x1d0] sm:$0xff] %v720_v58  ;;  %723 = vst [vmem:[%s6172_s6 + $0x1d8] sm:$0xff] %v722_v59  ;;  %v724_v60 = vld [vmem:[%s6167_s5 + $0x3c0] sm:$0xff]  ;;  %v726_v61 = vld [vmem:[%s6167_s5 + $0x3c8] sm:$0xff] }
  0x58   : > { %v728_v62 = vld [vmem:[%s6167_s5 + $0x3e0] sm:$0xff]  ;;  %725 = vst [vmem:[%s6172_s6 + $0x1e0] sm:$0xff] %v724_v60  ;;  %727 = vst [vmem:[%s6172_s6 + $0x1e8] sm:$0xff] %v726_v61  ;;  %v730_v63 = vld [vmem:[%s6167_s5 + $0x3e8] sm:$0xff] }
  0x59   : > { %729 = vst [vmem:[%s6172_s6 + $0x1f0] sm:$0xff] %v728_v62  ;;  %731 = vst [vmem:[%s6172_s6 + $0x1f8] sm:$0xff] %v730_v63 }
  0x5a PF: > { %p5321_p8 = scmp.ge.s32.totalorder %s5956_s13, 1  ;;  %p736_p9 = scmp.lt.s32.totalorder %s5956_s13, 3 }
  0x5c   : > { %p737_p10 = pnand %p5321_p8, %p736_p9 }
  0x5d   : > { %s743_s7 = sand.u32 (!%p737_p10), 1, %s5940_s9   ;;  %vm784_vm0 = vcmask (!%p737_p10), 130048  }
  0x5e   : > { %740 = sbr.rel (%p737_p10) target bundleno = 589 (0x24d), region = 96  ;;  %s6302_s8 = sshll.u32 (!%p737_p10), %s743_s7, 9 }
  0x5f   : > { %s6305_s15 = scalar_lea.vmem (!%p737_p10), [#allocation3], %s6302_s8  ;;  %s6322_s9 = scalar_lea.vmem (!%p737_p10), [#allocation4], %s6302_s8 }
  0x60   : > { %v851_v0 = vld [vmem:[%s6305_s15 + $0x10] sm:$0xff] (!%p737_p10)  ;;  %v849_v1 = vld [vmem:[%s6305_s15] sm:$0xff] (!%p737_p10)  ;;  %v852_v2 = vld [vmem:[%s6305_s15 + $0x18] sm:$0xff] (!%p737_p10)  ;;  %s6643_s16 = scalar_lea.vmem (!%p737_p10), [#allocation5], %s6302_s8 }
  0x61   : > { %945 = vxpose.xlu1.b32.start [1/2] (short) (narrow) (!%p737_p10), %v851_v0, 16  ;;  %913 = vxpose.xlu0.b32.start [1/2] (short) (narrow) (!%p737_p10), %v849_v1, 16  ;;  %v850_v3 = vld [vmem:[%s6305_s15 + $0x8] sm:$0xff] (!%p737_p10)  ;;  %v855_v4 = vld [vmem:[%s6305_s15 + $0x30] sm:$0xff] (!%p737_p10)  ;;  %v853_v5 = vld [vmem:[%s6305_s15 + $0x20] sm:$0xff] (!%p737_p10) }
  0x62   : > { %v856_v6 = vld [vmem:[%s6305_s15 + $0x38] sm:$0xff] (!%p737_p10)  ;;  %v854_v7 = vld [vmem:[%s6305_s15 + $0x28] sm:$0xff] (!%p737_p10)  ;;  %v859_v8 = vld [vmem:[%s6305_s15 + $0x50] sm:$0xff] (!%p737_p10) }
  0x63   : > { %v857_v9 = vld [vmem:[%s6305_s15 + $0x40] sm:$0xff] (!%p737_p10)  ;;  %v860_v10 = vld [vmem:[%s6305_s15 + $0x58] sm:$0xff] (!%p737_p10)  ;;  %v858_v11 = vld [vmem:[%s6305_s15 + $0x48] sm:$0xff] (!%p737_p10) }
  0x64   : > { %v863_v12 = vld [vmem:[%s6305_s15 + $0x70] sm:$0xff] (!%p737_p10)  ;;  %v861_v13 = vld [vmem:[%s6305_s15 + $0x60] sm:$0xff] (!%p737_p10)  ;;  %v2002_v15 = vld [vmem:[%s6322_s9 + $0x8] sm:$0xff] (!%p737_p10) }
  0x65   : > { %946 = vxpose.xlu1.b32.end [2/2] (short) (narrow) %v852_v2, 16  ;;  %914 = vxpose.xlu0.b32.end [2/2] (short) (narrow) %v850_v3, 16  ;;  %v2001_v14 = vld [vmem:[%s6322_s9] sm:$0xff]  ;;  %v2003_v17 = vld [vmem:[%s6322_s9 + $0x10] sm:$0xff]  ;;  %v2004_v18 = vld [vmem:[%s6322_s9 + $0x18] sm:$0xff]  ;;  %s5396_s17 = sshll.u32 (%p6013_p6), %s5948_s11, 4 }
  0x66   : > { %v5749_v16 = vpack.c.bf16 %v2002_v15, %v2001_v14  ;;  %v2005_v19 = vld [vmem:[%s6322_s9 + $0x20] sm:$0xff]  ;;  %v5753_v20 = vpack.c.bf16 %v2004_v18, %v2003_v17  ;;  %v2006_v21 = vld [vmem:[%s6322_s9 + $0x28] sm:$0xff]  ;;  %v2007_v22 = vld [vmem:[%s6322_s9 + $0x30] sm:$0xff]  ;;  %s6842_s22 = scalar_lea.vmem (%p6013_p6), %s6986_s2, %s5396_s17 }
  0x67   : > { %v2008_v23 = vld [vmem:[%s6322_s9 + $0x38] sm:$0xff]  ;;  %v6332_v24 = vpack.c.bf16 %v2006_v21, %v2005_v19  ;;  %v862_v27 = vld [vmem:[%s6305_s15 + $0x68] sm:$0xff]  ;;  %v867_v28 = vld [vmem:[%s6305_s15 + $0x90] sm:$0xff] }
  0x68   : > { %5750 = vmatprep.subr.bf16.mxu0 %v5749_v16  ;;  %v6334_v25 = vpack.c.bf16 %v2008_v23, %v2007_v22  ;;  %v864_v26 = vld [vmem:[%s6305_s15 + $0x78] sm:$0xff]  ;;  %5754 = vmatprep.subr.bf16.mxu1 %v5753_v20  ;;  %v865_v29 = vld [vmem:[%s6305_s15 + $0x80] sm:$0xff]  ;;  %v866_v31 = vld [vmem:[%s6305_s15 + $0x88] sm:$0xff] }
  0x69   : > { %1009 = vxpose.xlu1.b32.start [1/2] (short) (narrow) %v855_v4, 16  ;;  %977 = vxpose.xlu0.b32.start [1/2] (short) (narrow) %v853_v5, 16  ;;  %v868_v30 = vld [vmem:[%s6305_s15 + $0x98] sm:$0xff]  ;;  %v871_v32 = vld [vmem:[%s6305_s15 + $0xb0] sm:$0xff]  ;;  %v869_v33 = vld [vmem:[%s6305_s15 + $0xa0] sm:$0xff] }
  0x6a   : > { %5752 = vmatpush3.bf16.msra.mxu0 %v5749_v16  ;;  %5756 = vmatpush3.bf16.msra.mxu1 %v5753_v20  ;;  %v872_v34 = vld [vmem:[%s6305_s15 + $0xb8] sm:$0xff]  ;;  %v870_v35 = vld [vmem:[%s6305_s15 + $0xa8] sm:$0xff]  ;;  %v875_v36 = vld [vmem:[%s6305_s15 + $0xd0] sm:$0xff] }
  0x6b   : > { %5758 = vmatprep.subr.bf16.mxu0 %v6332_v24  ;;  %5762 = vmatprep.subr.bf16.mxu1 %v6334_v25  ;;  %v873_v37 = vld [vmem:[%s6305_s15 + $0xc0] sm:$0xff]  ;;  %v876_v38 = vld [vmem:[%s6305_s15 + $0xd8] sm:$0xff]  ;;  %v874_v39 = vld [vmem:[%s6305_s15 + $0xc8] sm:$0xff] }
  0x6c   : > { %v879_v40 = vld [vmem:[%s6305_s15 + $0xf0] sm:$0xff]  ;;  %v877_v41 = vld [vmem:[%s6305_s15 + $0xe0] sm:$0xff]  ;;  %v880_v42 = vld [vmem:[%s6305_s15 + $0xf8] sm:$0xff] }
  0x6d   : > { %1010 = vxpose.xlu1.b32.end [2/2] (short) (narrow) %v856_v6, 16  ;;  %978 = vxpose.xlu0.b32.end [2/2] (short) (narrow) %v854_v7, 16  ;;  %v878_v43 = vld [vmem:[%s6305_s15 + $0xe8] sm:$0xff]  ;;  %v883_v44 = vld [vmem:[%s6305_s15 + $0x110] sm:$0xff]  ;;  %v881_v45 = vld [vmem:[%s6305_s15 + $0x100] sm:$0xff] }
  0x6e   : > { %v884_v46 = vld [vmem:[%s6305_s15 + $0x118] sm:$0xff]  ;;  %v882_v47 = vld [vmem:[%s6305_s15 + $0x108] sm:$0xff]  ;;  %v887_v48 = vld [vmem:[%s6305_s15 + $0x130] sm:$0xff] }
  0x6f   : > { %v885_v49 = vld [vmem:[%s6305_s15 + $0x120] sm:$0xff]  ;;  %v888_v50 = vld [vmem:[%s6305_s15 + $0x138] sm:$0xff]  ;;  %v886_v51 = vld [vmem:[%s6305_s15 + $0x128] sm:$0xff] }
  0x70   : > { %v891_v52 = vld [vmem:[%s6305_s15 + $0x150] sm:$0xff]  ;;  %v889_v53 = vld [vmem:[%s6305_s15 + $0x140] sm:$0xff]  ;;  %v892_v54 = vld [vmem:[%s6305_s15 + $0x158] sm:$0xff] }
  0x71   : > { %1073 = vxpose.xlu1.b32.start [1/2] (short) (narrow) %v859_v8, 16  ;;  %1041 = vxpose.xlu0.b32.start [1/2] (short) (narrow) %v857_v9, 16  ;;  %v890_v55 = vld [vmem:[%s6305_s15 + $0x148] sm:$0xff]  ;;  %v895_v56 = vld [vmem:[%s6305_s15 + $0x170] sm:$0xff]  ;;  %v893_v57 = vld [vmem:[%s6305_s15 + $0x160] sm:$0xff] }
  0x72   : > { %v896_v58 = vld [vmem:[%s6305_s15 + $0x178] sm:$0xff]  ;;  %v894_v59 = vld [vmem:[%s6305_s15 + $0x168] sm:$0xff]  ;;  %v899_v60 = vld [vmem:[%s6305_s15 + $0x190] sm:$0xff] }
  0x73   : > { %v897_v61 = vld [vmem:[%s6305_s15 + $0x180] sm:$0xff]  ;;  %v900_v62 = vld [vmem:[%s6305_s15 + $0x198] sm:$0xff]  ;;  %v898_v63 = vld [vmem:[%s6305_s15 + $0x188] sm:$0xff] }
  0x74   : > { %v903_v0 = vld [vmem:[%s6305_s15 + $0x1b0] sm:$0xff]  ;;  %v901_v1 = vld [vmem:[%s6305_s15 + $0x1a0] sm:$0xff]  ;;  %v904_v2 = vld [vmem:[%s6305_s15 + $0x1b8] sm:$0xff] }
  0x75   : > { %1074 = vxpose.xlu1.b32.end [2/2] (short) (narrow) %v860_v10, 16  ;;  %1042 = vxpose.xlu0.b32.end [2/2] (short) (narrow) %v858_v11, 16  ;;  %v902_v3 = vld [vmem:[%s6305_s15 + $0x1a8] sm:$0xff]  ;;  %v907_v4 = vld [vmem:[%s6305_s15 + $0x1d0] sm:$0xff]  ;;  %v905_v5 = vld [vmem:[%s6305_s15 + $0x1c0] sm:$0xff] }
  0x76   : > { %v908_v6 = vld [vmem:[%s6305_s15 + $0x1d8] sm:$0xff]  ;;  %v906_v7 = vld [vmem:[%s6305_s15 + $0x1c8] sm:$0xff]  ;;  %v911_v8 = vld [vmem:[%s6305_s15 + $0x1f0] sm:$0xff] }
  0x77   : > { %v909_v9 = vld [vmem:[%s6305_s15 + $0x1e0] sm:$0xff]  ;;  %v912_v10 = vld [vmem:[%s6305_s15 + $0x1f8] sm:$0xff]  ;;  %v910_v11 = vld [vmem:[%s6305_s15 + $0x1e8] sm:$0xff] }
  0x78   : > { %v2010_v16 = vld [vmem:[%s6322_s9 + $0x48] sm:$0xff]  ;;  %v2011_v17 = vld [vmem:[%s6322_s9 + $0x50] sm:$0xff]  ;;  %v2012_v18 = vld [vmem:[%s6322_s9 + $0x58] sm:$0xff] }
  0x79   : > { %1137 = vxpose.xlu1.b32.start [1/2] (short) (narrow) %v863_v12, 16  ;;  %1105 = vxpose.xlu0.b32.start [1/2] (short) (narrow) %v861_v13, 16  ;;  %v5958_v12 = vmov 0.0   ;;  %v2009_v13 = vld [vmem:[%s6322_s9 + $0x40] sm:$0xff]  ;;  %v5769_v20 = vpack.c.bf16 %v2012_v18, %v2011_v17 }
  0x7a   : > { %786 = vst.msk [vmem:[#allocation2 + $0x8] sm:$0xff] %vm784_vm0, %v5958_v12  ;;  %785 = vst.msk [vmem:[#allocation2] sm:$0xff] %vm784_vm0, %v5958_v12  ;;  %v5765_v19 = vpack.c.bf16 %v2010_v16, %v2009_v13  ;;  %v2013_v23 = vld [vmem:[%s6322_s9 + $0x60] sm:$0xff]  ;;  %v2035_v13 = vld [vmem:[%s6322_s9 + $0x110] sm:$0xff] }
  0x7b   : > { %787 = vst.msk [vmem:[#allocation2 + $0x10] sm:$0xff] %vm784_vm0, %v5958_v12  ;;  %788 = vst.msk [vmem:[#allocation2 + $0x18] sm:$0xff] %vm784_vm0, %v5958_v12 }
  0x7c   : > { %789 = vst.msk [vmem:[#allocation2 + $0x20] sm:$0xff] %vm784_vm0, %v5958_v12  ;;  %790 = vst.msk [vmem:[#allocation2 + $0x28] sm:$0xff] %vm784_vm0, %v5958_v12 }
  0x7d   : > { %1138 = vxpose.xlu1.b32.end [2/2] (short) (narrow) %v864_v26, 16  ;;  %1106 = vxpose.xlu0.b32.end [2/2] (short) (narrow) %v862_v27, 16  ;;  %791 = vst.msk [vmem:[#allocation2 + $0x30] sm:$0xff] %vm784_vm0, %v5958_v12  ;;  %792 = vst.msk [vmem:[#allocation2 + $0x38] sm:$0xff] %vm784_vm0, %v5958_v12 }
  0x7e   : > { %793 = vst.msk [vmem:[#allocation2 + $0x40] sm:$0xff] %vm784_vm0, %v5958_v12  ;;  %794 = vst.msk [vmem:[#allocation2 + $0x48] sm:$0xff] %vm784_vm0, %v5958_v12 }
  0x7f   : > { %795 = vst.msk [vmem:[#allocation2 + $0x50] sm:$0xff] %vm784_vm0, %v5958_v12  ;;  %796 = vst.msk [vmem:[#allocation2 + $0x58] sm:$0xff] %vm784_vm0, %v5958_v12 }
  0x80   : > { %797 = vst.msk [vmem:[#allocation2 + $0x60] sm:$0xff] %vm784_vm0, %v5958_v12  ;;  %798 = vst.msk [vmem:[#allocation2 + $0x68] sm:$0xff] %vm784_vm0, %v5958_v12 }
  0x81   : > { %1201 = vxpose.xlu1.b32.start [1/2] (short) (narrow) %v867_v28, 16  ;;  %1169 = vxpose.xlu0.b32.start [1/2] (short) (narrow) %v865_v29, 16  ;;  %799 = vst.msk [vmem:[#allocation2 + $0x70] sm:$0xff] %vm784_vm0, %v5958_v12  ;;  %800 = vst.msk [vmem:[#allocation2 + $0x78] sm:$0xff] %vm784_vm0, %v5958_v12  ;;  %v2014_v28 = vld [vmem:[%s6322_s9 + $0x68] sm:$0xff]  ;;  %v2015_v29 = vld [vmem:[%s6322_s9 + $0x70] sm:$0xff] }
  0x82   : > { %801 = vst.msk [vmem:[#allocation2 + $0x80] sm:$0xff] %vm784_vm0, %v5958_v12  ;;  %802 = vst.msk [vmem:[#allocation2 + $0x88] sm:$0xff] %vm784_vm0, %v5958_v12 }
  0x83   : > { %803 = vst.msk [vmem:[#allocation2 + $0x90] sm:$0xff] %vm784_vm0, %v5958_v12  ;;  %804 = vst.msk [vmem:[#allocation2 + $0x98] sm:$0xff] %vm784_vm0, %v5958_v12 }
  0x84   : > { %805 = vst.msk [vmem:[#allocation2 + $0xa0] sm:$0xff] %vm784_vm0, %v5958_v12  ;;  %806 = vst.msk [vmem:[#allocation2 + $0xa8] sm:$0xff] %vm784_vm0, %v5958_v12 }
  0x85   : > { %1202 = vxpose.xlu1.b32.end [2/2] (short) (narrow) %v868_v30, 16  ;;  %1170 = vxpose.xlu0.b32.end [2/2] (short) (narrow) %v866_v31, 16  ;;  %807 = vst.msk [vmem:[#allocation2 + $0xb0] sm:$0xff] %vm784_vm0, %v5958_v12  ;;  %808 = vst.msk [vmem:[#allocation2 + $0xb8] sm:$0xff] %vm784_vm0, %v5958_v12  ;;  %v2016_v30 = vld [vmem:[%s6322_s9 + $0x78] sm:$0xff]  ;;  %v5773_v31 = vpack.c.bf16 %v2014_v28, %v2013_v23  ;;  %v2039_v23 = vld [vmem:[%s6322_s9 + $0x130] sm:$0xff] }
  0x86   : > { %809 = vst.msk [vmem:[#allocation2 + $0xc0] sm:$0xff] %vm784_vm0, %v5958_v12  ;;  %810 = vst.msk [vmem:[#allocation2 + $0xc8] sm:$0xff] %vm784_vm0, %v5958_v12 }
  0x87   : > { %811 = vst.msk [vmem:[#allocation2 + $0xd0] sm:$0xff] %vm784_vm0, %v5958_v12  ;;  %812 = vst.msk [vmem:[#allocation2 + $0xd8] sm:$0xff] %vm784_vm0, %v5958_v12 }
  0x88   : > { %813 = vst.msk [vmem:[#allocation2 + $0xe0] sm:$0xff] %vm784_vm0, %v5958_v12  ;;  %814 = vst.msk [vmem:[#allocation2 + $0xe8] sm:$0xff] %vm784_vm0, %v5958_v12 }
  0x89   : > { %1265 = vxpose.xlu1.b32.start [1/2] (short) (narrow) %v871_v32, 16  ;;  %1233 = vxpose.xlu0.b32.start [1/2] (short) (narrow) %v869_v33, 16  ;;  %815 = vst.msk [vmem:[#allocation2 + $0xf0] sm:$0xff] %vm784_vm0, %v5958_v12  ;;  %816 = vst.msk [vmem:[#allocation2 + $0xf8] sm:$0xff] %vm784_vm0, %v5958_v12  ;;  %v2017_v33 = vld [vmem:[%s6322_s9 + $0x80] sm:$0xff] }
  0x8a   : > { %817 = vst.msk [vmem:[#allocation2 + $0x100] sm:$0xff] %vm784_vm0, %v5958_v12  ;;  %818 = vst.msk [vmem:[#allocation2 + $0x108] sm:$0xff] %vm784_vm0, %v5958_v12 }
  0x8b   : > { %819 = vst.msk [vmem:[#allocation2 + $0x110] sm:$0xff] %vm784_vm0, %v5958_v12  ;;  %820 = vst.msk [vmem:[#allocation2 + $0x118] sm:$0xff] %vm784_vm0, %v5958_v12 }
  0x8c   : > { %821 = vst.msk [vmem:[#allocation2 + $0x120] sm:$0xff] %vm784_vm0, %v5958_v12  ;;  %822 = vst.msk [vmem:[#allocation2 + $0x128] sm:$0xff] %vm784_vm0, %v5958_v12 }
  0x8d   : > { %1266 = vxpose.xlu1.b32.end [2/2] (short) (narrow) %v872_v34, 16  ;;  %1234 = vxpose.xlu0.b32.end [2/2] (short) (narrow) %v870_v35, 16  ;;  %823 = vst.msk [vmem:[#allocation2 + $0x130] sm:$0xff] %vm784_vm0, %v5958_v12  ;;  %824 = vst.msk [vmem:[#allocation2 + $0x138] sm:$0xff] %vm784_vm0, %v5958_v12 }
  0x8e   : > { %825 = vst.msk [vmem:[#allocation2 + $0x140] sm:$0xff] %vm784_vm0, %v5958_v12  ;;  %826 = vst.msk [vmem:[#allocation2 + $0x148] sm:$0xff] %vm784_vm0, %v5958_v12 }
  0x8f   : > { %827 = vst.msk [vmem:[#allocation2 + $0x150] sm:$0xff] %vm784_vm0, %v5958_v12  ;;  %828 = vst.msk [vmem:[#allocation2 + $0x158] sm:$0xff] %vm784_vm0, %v5958_v12 }
  0x90   : > { %829 = vst.msk [vmem:[#allocation2 + $0x160] sm:$0xff] %vm784_vm0, %v5958_v12  ;;  %830 = vst.msk [vmem:[#allocation2 + $0x168] sm:$0xff] %vm784_vm0, %v5958_v12 }
  0x91   : > { %1329 = vxpose.xlu1.b32.start [1/2] (short) (narrow) %v875_v36, 16  ;;  %1297 = vxpose.xlu0.b32.start [1/2] (short) (narrow) %v873_v37, 16  ;;  %831 = vst.msk [vmem:[#allocation2 + $0x170] sm:$0xff] %vm784_vm0, %v5958_v12  ;;  %832 = vst.msk [vmem:[#allocation2 + $0x178] sm:$0xff] %vm784_vm0, %v5958_v12  ;;  %v2018_v36 = vld [vmem:[%s6322_s9 + $0x88] sm:$0xff]  ;;  %v2019_v37 = vld [vmem:[%s6322_s9 + $0x90] sm:$0xff] }
  0x92   : > { %833 = vst.msk [vmem:[#allocation2 + $0x180] sm:$0xff] %vm784_vm0, %v5958_v12  ;;  %834 = vst.msk [vmem:[#allocation2 + $0x188] sm:$0xff] %vm784_vm0, %v5958_v12 }
  0x93   : > { %835 = vst.msk [vmem:[#allocation2 + $0x190] sm:$0xff] %vm784_vm0, %v5958_v12  ;;  %836 = vst.msk [vmem:[#allocation2 + $0x198] sm:$0xff] %vm784_vm0, %v5958_v12 }
  0x94   : > { %837 = vst.msk [vmem:[#allocation2 + $0x1a0] sm:$0xff] %vm784_vm0, %v5958_v12  ;;  %838 = vst.msk [vmem:[#allocation2 + $0x1a8] sm:$0xff] %vm784_vm0, %v5958_v12 }
  0x95   : > { %1330 = vxpose.xlu1.b32.end [2/2] (short) (narrow) %v876_v38, 16  ;;  %1298 = vxpose.xlu0.b32.end [2/2] (short) (narrow) %v874_v39, 16  ;;  %839 = vst.msk [vmem:[#allocation2 + $0x1b0] sm:$0xff] %vm784_vm0, %v5958_v12  ;;  %840 = vst.msk [vmem:[#allocation2 + $0x1b8] sm:$0xff] %vm784_vm0, %v5958_v12  ;;  %v2020_v38 = vld [vmem:[%s6322_s9 + $0x98] sm:$0xff]  ;;  %v5781_v39 = vpack.c.bf16 %v2018_v36, %v2017_v33  ;;  %v2043_v33 = vld [vmem:[%s6322_s9 + $0x150] sm:$0xff] }
  0x96   : > { %841 = vst.msk [vmem:[#allocation2 + $0x1c0] sm:$0xff] %vm784_vm0, %v5958_v12  ;;  %842 = vst.msk [vmem:[#allocation2 + $0x1c8] sm:$0xff] %vm784_vm0, %v5958_v12 }
  0x97   : > { %843 = vst.msk [vmem:[#allocation2 + $0x1d0] sm:$0xff] %vm784_vm0, %v5958_v12  ;;  %844 = vst.msk [vmem:[#allocation2 + $0x1d8] sm:$0xff] %vm784_vm0, %v5958_v12 }
  0x98   : > { %845 = vst.msk [vmem:[#allocation2 + $0x1e0] sm:$0xff] %vm784_vm0, %v5958_v12  ;;  %846 = vst.msk [vmem:[#allocation2 + $0x1e8] sm:$0xff] %vm784_vm0, %v5958_v12 }
  0x99   : > { %1393 = vxpose.xlu1.b32.start [1/2] (short) (narrow) %v879_v40, 16  ;;  %1361 = vxpose.xlu0.b32.start [1/2] (short) (narrow) %v877_v41, 16  ;;  %847 = vst.msk [vmem:[#allocation2 + $0x1f0] sm:$0xff] %vm784_vm0, %v5958_v12  ;;  %848 = vst.msk [vmem:[#allocation2 + $0x1f8] sm:$0xff] %vm784_vm0, %v5958_v12  ;;  %v5785_v40 = vpack.c.bf16 %v2020_v38, %v2019_v37  ;;  %v2034_v12 = vld [vmem:[%s6322_s9 + $0x108] sm:$0xff] }
  0x9d   : > { %1394 = vxpose.xlu1.b32.end [2/2] (short) (narrow) %v880_v42, 16  ;;  %1362 = vxpose.xlu0.b32.end [2/2] (short) (narrow) %v878_v43, 16  ;;  %v2021_v43 = vld [vmem:[%s6322_s9 + $0xa0] sm:$0xff] }
  0xa1   : > { %1457 = vxpose.xlu1.b32.start [1/2] (short) (narrow) %v883_v44, 16  ;;  %1425 = vxpose.xlu0.b32.start [1/2] (short) (narrow) %v881_v45, 16 }
  0xa5   : > { %1458 = vxpose.xlu1.b32.end [2/2] (short) (narrow) %v884_v46, 16  ;;  %1426 = vxpose.xlu0.b32.end [2/2] (short) (narrow) %v882_v47, 16  ;;  %v2022_v46 = vld [vmem:[%s6322_s9 + $0xa8] sm:$0xff]  ;;  %v2023_v47 = vld [vmem:[%s6322_s9 + $0xb0] sm:$0xff] }
  0xa9   : > { %1521 = vxpose.xlu1.b32.start [1/2] (short) (narrow) %v887_v48, 16  ;;  %1489 = vxpose.xlu0.b32.start [1/2] (short) (narrow) %v885_v49, 16  ;;  %v2024_v48 = vld [vmem:[%s6322_s9 + $0xb8] sm:$0xff]  ;;  %v5789_v49 = vpack.c.bf16 %v2022_v46, %v2021_v43  ;;  %v2047_v43 = vld [vmem:[%s6322_s9 + $0x170] sm:$0xff] }
  0xad   : > { %1522 = vxpose.xlu1.b32.end [2/2] (short) (narrow) %v888_v50, 16  ;;  %1490 = vxpose.xlu0.b32.end [2/2] (short) (narrow) %v886_v51, 16  ;;  %v5793_v50 = vpack.c.bf16 %v2024_v48, %v2023_v47 }
  0xb1   : > { %1585 = vxpose.xlu1.b32.start [1/2] (short) (narrow) %v891_v52, 16  ;;  %1553 = vxpose.xlu0.b32.start [1/2] (short) (narrow) %v889_v53, 16  ;;  %v2025_v53 = vld [vmem:[%s6322_s9 + $0xc0] sm:$0xff] }
  0xb5   : > { %1586 = vxpose.xlu1.b32.end [2/2] (short) (narrow) %v892_v54, 16  ;;  %1554 = vxpose.xlu0.b32.end [2/2] (short) (narrow) %v890_v55, 16 }
  0xb9   : > { %1649 = vxpose.xlu1.b32.start [1/2] (short) (narrow) %v895_v56, 16  ;;  %1617 = vxpose.xlu0.b32.start [1/2] (short) (narrow) %v893_v57, 16  ;;  %v2026_v56 = vld [vmem:[%s6322_s9 + $0xc8] sm:$0xff]  ;;  %v2027_v57 = vld [vmem:[%s6322_s9 + $0xd0] sm:$0xff] }
  0xbd   : > { %1650 = vxpose.xlu1.b32.end [2/2] (short) (narrow) %v896_v58, 16  ;;  %1618 = vxpose.xlu0.b32.end [2/2] (short) (narrow) %v894_v59, 16  ;;  %v2028_v58 = vld [vmem:[%s6322_s9 + $0xd8] sm:$0xff]  ;;  %v5797_v59 = vpack.c.bf16 %v2026_v56, %v2025_v53  ;;  %v2051_v53 = vld [vmem:[%s6322_s9 + $0x190] sm:$0xff] }
  0xc1   : > { %1713 = vxpose.xlu1.b32.start [1/2] (short) (narrow) %v899_v60, 16  ;;  %1681 = vxpose.xlu0.b32.start [1/2] (short) (narrow) %v897_v61, 16  ;;  %v5801_v60 = vpack.c.bf16 %v2028_v58, %v2027_v57 }
  0xc5   : > { %1714 = vxpose.xlu1.b32.end [2/2] (short) (narrow) %v900_v62, 16  ;;  %1682 = vxpose.xlu0.b32.end [2/2] (short) (narrow) %v898_v63, 16  ;;  %v2029_v63 = vld [vmem:[%s6322_s9 + $0xe0] sm:$0xff] }
  0xc9   : > { %1777 = vxpose.xlu1.b32.start [1/2] (short) (narrow) %v903_v0, 16  ;;  %1745 = vxpose.xlu0.b32.start [1/2] (short) (narrow) %v901_v1, 16 }
  0xcd   : > { %1778 = vxpose.xlu1.b32.end [2/2] (short) (narrow) %v904_v2, 16  ;;  %1746 = vxpose.xlu0.b32.end [2/2] (short) (narrow) %v902_v3, 16  ;;  %v2030_v2 = vld [vmem:[%s6322_s9 + $0xe8] sm:$0xff]  ;;  %v2031_v3 = vld [vmem:[%s6322_s9 + $0xf0] sm:$0xff] }
  0xd1   : > { %1841 = vxpose.xlu1.b32.start [1/2] (short) (narrow) %v907_v4, 16  ;;  %1809 = vxpose.xlu0.b32.start [1/2] (short) (narrow) %v905_v5, 16  ;;  %v2032_v4 = vld [vmem:[%s6322_s9 + $0xf8] sm:$0xff]  ;;  %v5805_v5 = vpack.c.bf16 %v2030_v2, %v2029_v63  ;;  %v2055_v63 = vld [vmem:[%s6322_s9 + $0x1b0] sm:$0xff] }
  0xd5   : > { %1842 = vxpose.xlu1.b32.end [2/2] (short) (narrow) %v908_v6, 16  ;;  %1810 = vxpose.xlu0.b32.end [2/2] (short) (narrow) %v906_v7, 16  ;;  %v5809_v6 = vpack.c.bf16 %v2032_v4, %v2031_v3 }
  0xd9   : > { %1905 = vxpose.xlu1.b32.start [1/2] (short) (narrow) %v911_v8, 16  ;;  %1873 = vxpose.xlu0.b32.start [1/2] (short) (narrow) %v909_v9, 16  ;;  %v2033_v9 = vld [vmem:[%s6322_s9 + $0x100] sm:$0xff] }
  0xdd   : > { %1906 = vxpose.xlu1.b32.end [2/2] (short) (narrow) %v912_v10, 16  ;;  %1874 = vxpose.xlu0.b32.end [2/2] (short) (narrow) %v910_v11, 16 }
  0xe1   : > { %v961_v14 = vpop.trf.xlu1  ;;  %v929_v15 = vpop.trf.xlu0 }
  0xe2   : > { %5529 = vmatprep.mubr.msk.f32.mxu0 %vm784_vm0, %v929_v15  ;;  %5536 = vmatprep.mubr.msk.f32.mxu1 %vm784_vm0, %v961_v14  ;;  %v2036_v14 = vld [vmem:[%s6322_s9 + $0x118] sm:$0xff]  ;;  %v5813_v15 = vpack.c.bf16 %v2034_v12, %v2033_v9  ;;  %v2059_v9 = vld [vmem:[%s6322_s9 + $0x1d0] sm:$0xff] }
  0xe3   : > { %v5817_v16 = vpack.c.bf16 %v2036_v14, %v2035_v13 }
  0xe5   : > { %v962_v21 = vpop.trf.xlu1  ;;  %v930_v22 = vpop.trf.xlu0 }
  0xe6   : > { %5530 = vmatmul.mubr.msk.f32.vlgmr.msra.gmra.mrb[0].mxu0 %vm784_vm0, %v930_v22  ;;  %5537 = vmatmul.mubr.msk.f32.vlgmr.msra.gmra.mrb[0].mxu1 %vm784_vm0, %v962_v21  ;;  %v2038_v22 = vld [vmem:[%s6322_s9 + $0x128] sm:$0xff] }
  0xe7   : > { %5760 = vmatpush3.bf16.msra.mxu0 %v6332_v24  ;;  %5764 = vmatpush3.bf16.msra.mxu1 %v6334_v25  ;;  %v5777_v24 = vpack.c.bf16 %v2016_v30, %v2015_v29 }
  0xe8   : > { %5766 = vmatprep.subr.bf16.mxu0 %v5765_v19  ;;  %5770 = vmatprep.subr.bf16.mxu1 %v5769_v20 }
  0xe9   : > { %v1025_v26 = vpop.trf.xlu1  ;;  %v993_v27 = vpop.trf.xlu0 }
  0xea   : > { %5543 = vmatprep.mubr.msk.f32.mxu0 %vm784_vm0, %v993_v27  ;;  %5550 = vmatprep.mubr.msk.f32.mxu1 %vm784_vm0, %v1025_v26  ;;  %v2040_v26 = vld [vmem:[%s6322_s9 + $0x138] sm:$0xff] }
  0xeb   : > { %v5825_v28 = vpack.c.bf16 %v2040_v26, %v2039_v23 }
  0xed   : > { %v1026_v32 = vpop.trf.xlu1  ;;  %v994_v25 = vpop.trf.xlu0 }
  0xee   : > { %5544 = vmatmul.mubr.msk.f32.vlgmr.msra.gmra.mrb[2].mxu0 %vm784_vm0, %v994_v25  ;;  %5551 = vmatmul.mubr.msk.f32.vlgmr.msra.gmra.mrb[2].mxu1 %vm784_vm0, %v1026_v32  ;;  %v2042_v25 = vld [vmem:[%s6322_s9 + $0x148] sm:$0xff] }
  0xef   : > { %5768 = vmatpush3.bf16.msra.mxu0 %v5765_v19  ;;  %5772 = vmatpush3.bf16.msra.mxu1 %v5769_v20  ;;  %v2037_v19 = vld [vmem:[%s6322_s9 + $0x120] sm:$0xff] }
  0xf0   : > { %5774 = vmatprep.subr.bf16.mxu0 %v5773_v31  ;;  %5778 = vmatprep.subr.bf16.mxu1 %v5777_v24  ;;  %v5821_v27 = vpack.c.bf16 %v2038_v22, %v2037_v19  ;;  %v2061_v19 = vld [vmem:[%s6322_s9 + $0x1e0] sm:$0xff] }
  0xf1   : > { %v1089_v34 = vpop.trf.xlu1  ;;  %v1057_v35 = vpop.trf.xlu0 }
  0xf2   : > { %5557 = vmatprep.mubr.msk.f32.mxu0 %vm784_vm0, %v1057_v35  ;;  %5564 = vmatprep.mubr.msk.f32.mxu1 %vm784_vm0, %v1089_v34  ;;  %v2044_v34 = vld [vmem:[%s6322_s9 + $0x158] sm:$0xff] }
  0xf3   : > { %v5833_v36 = vpack.c.bf16 %v2044_v34, %v2043_v33  ;;  %v1938_v33 = vld [vmem:[#allocation2 + $0x8] sm:$0xff]  ;;  %v1940_v34 = vld [vmem:[#allocation2 + $0x18] sm:$0xff] }
  0xf5   : > { %v1090_v41 = vpop.trf.xlu1  ;;  %v1058_v42 = vpop.trf.xlu0 }
  0xf6   : > { %5558 = vmatmul.mubr.msk.f32.vlgmr.msra.gmra.mrb[4].mxu0 %vm784_vm0, %v1058_v42  ;;  %5565 = vmatmul.mubr.msk.f32.vlgmr.msra.gmra.mrb[4].mxu1 %vm784_vm0, %v1090_v41  ;;  %v2046_v42 = vld [vmem:[%s6322_s9 + $0x168] sm:$0xff] }
  0xf7   : > { %5776 = vmatpush3.bf16.msra.mxu0 %v5773_v31  ;;  %5780 = vmatpush3.bf16.msra.mxu1 %v5777_v24  ;;  %v2041_v31 = vld [vmem:[%s6322_s9 + $0x140] sm:$0xff] }
  0xf8   : > { %5782 = vmatprep.subr.bf16.mxu0 %v5781_v39  ;;  %5786 = vmatprep.subr.bf16.mxu1 %v5785_v40  ;;  %v5829_v35 = vpack.c.bf16 %v2042_v25, %v2041_v31 }
  0xf9   : > { %v1153_v44 = vpop.trf.xlu1  ;;  %v1121_v45 = vpop.trf.xlu0 }
  0xfa   : > { %5571 = vmatprep.mubr.msk.f32.mxu0 %vm784_vm0, %v1121_v45  ;;  %5578 = vmatprep.mubr.msk.f32.mxu1 %vm784_vm0, %v1153_v44  ;;  %v2048_v44 = vld [vmem:[%s6322_s9 + $0x178] sm:$0xff] }
  0xfb   : > { %v5841_v46 = vpack.c.bf16 %v2048_v44, %v2047_v43 }
  0xfd   : > { %v1154_v51 = vpop.trf.xlu1  ;;  %v1122_v52 = vpop.trf.xlu0 }
  0xfe   : > { %5572 = vmatmul.mubr.msk.f32.vlgmr.msra.gmra.mrb[6].mxu0 %vm784_vm0, %v1122_v52  ;;  %5579 = vmatmul.mubr.msk.f32.vlgmr.msra.gmra.mrb[6].mxu1 %vm784_vm0, %v1154_v51  ;;  %v2050_v52 = vld [vmem:[%s6322_s9 + $0x188] sm:$0xff] }
  0xff   : > { %5784 = vmatpush3.bf16.msra.mxu0 %v5781_v39  ;;  %5788 = vmatpush3.bf16.msra.mxu1 %v5785_v40  ;;  %v2045_v39 = vld [vmem:[%s6322_s9 + $0x160] sm:$0xff] }
 0x100   : > { %5790 = vmatprep.subr.bf16.mxu0 %v5789_v49  ;;  %5794 = vmatprep.subr.bf16.mxu1 %v5793_v50  ;;  %v5837_v45 = vpack.c.bf16 %v2046_v42, %v2045_v39 }
 0x101   : > { %v1217_v54 = vpop.trf.xlu1  ;;  %v1185_v55 = vpop.trf.xlu0 }
 0x102   : > { %5585 = vmatprep.mubr.msk.f32.mxu0 %vm784_vm0, %v1185_v55  ;;  %5592 = vmatprep.mubr.msk.f32.mxu1 %vm784_vm0, %v1217_v54  ;;  %v2052_v54 = vld [vmem:[%s6322_s9 + $0x198] sm:$0xff] }
 0x103   : > { %v5849_v56 = vpack.c.bf16 %v2052_v54, %v2051_v53 }
 0x105   : > { %v1218_v61 = vpop.trf.xlu1  ;;  %v1186_v62 = vpop.trf.xlu0 }
 0x106   : > { %5586 = vmatmul.mubr.msk.f32.vlgmr.msra.gmra.mrb[8].mxu0 %vm784_vm0, %v1186_v62  ;;  %5593 = vmatmul.mubr.msk.f32.vlgmr.msra.gmra.mrb[8].mxu1 %vm784_vm0, %v1218_v61  ;;  %v2054_v62 = vld [vmem:[%s6322_s9 + $0x1a8] sm:$0xff] }
 0x107   : > { %5792 = vmatpush3.bf16.msra.mxu0 %v5789_v49  ;;  %5796 = vmatpush3.bf16.msra.mxu1 %v5793_v50  ;;  %v2049_v49 = vld [vmem:[%s6322_s9 + $0x180] sm:$0xff] }
 0x108   : > { %5798 = vmatprep.subr.bf16.mxu0 %v5797_v59  ;;  %5802 = vmatprep.subr.bf16.mxu1 %v5801_v60  ;;  %v5845_v55 = vpack.c.bf16 %v2050_v52, %v2049_v49 }
 0x109   : > { %v1281_v0 = vpop.trf.xlu1  ;;  %v1249_v1 = vpop.trf.xlu0 }
 0x10a   : > { %5599 = vmatprep.mubr.msk.f32.mxu0 %vm784_vm0, %v1249_v1  ;;  %5606 = vmatprep.mubr.msk.f32.mxu1 %vm784_vm0, %v1281_v0  ;;  %v2056_v0 = vld [vmem:[%s6322_s9 + $0x1b8] sm:$0xff] }
 0x10b   : > { %v5857_v2 = vpack.c.bf16 %v2056_v0, %v2055_v63  ;;  %v1945_v63 = vld [vmem:[#allocation2 + $0x40] sm:$0xff]  ;;  %v1947_v0 = vld [vmem:[#allocation2 + $0x50] sm:$0xff] }
 0x10d   : > { %v1282_v7 = vpop.trf.xlu1  ;;  %v1250_v8 = vpop.trf.xlu0 }
 0x10e   : > { %5600 = vmatmul.mubr.msk.f32.vlgmr.msra.gmra.mrb[10].mxu0 %vm784_vm0, %v1250_v8  ;;  %5607 = vmatmul.mubr.msk.f32.vlgmr.msra.gmra.mrb[10].mxu1 %vm784_vm0, %v1282_v7  ;;  %v2058_v8 = vld [vmem:[%s6322_s9 + $0x1c8] sm:$0xff] }
 0x10f   : > { %5800 = vmatpush3.bf16.msra.mxu0 %v5797_v59  ;;  %5804 = vmatpush3.bf16.msra.mxu1 %v5801_v60  ;;  %v2053_v59 = vld [vmem:[%s6322_s9 + $0x1a0] sm:$0xff] }
 0x110   : > { %5806 = vmatprep.subr.bf16.mxu0 %v5805_v5  ;;  %5810 = vmatprep.subr.bf16.mxu1 %v5809_v6  ;;  %v5853_v1 = vpack.c.bf16 %v2054_v62, %v2053_v59  ;;  %v1948_v62 = vld [vmem:[#allocation2 + $0x58] sm:$0xff] }
 0x111   : > { %v1345_v10 = vpop.trf.xlu1  ;;  %v1313_v11 = vpop.trf.xlu0 }
 0x112   : > { %5613 = vmatprep.mubr.msk.f32.mxu0 %vm784_vm0, %v1313_v11  ;;  %5620 = vmatprep.mubr.msk.f32.mxu1 %vm784_vm0, %v1345_v10  ;;  %v2060_v10 = vld [vmem:[%s6322_s9 + $0x1d8] sm:$0xff] }
 0x113   : > { %v5865_v12 = vpack.c.bf16 %v2060_v10, %v2059_v9 }
 0x115   : > { %v1346_v17 = vpop.trf.xlu1  ;;  %v1314_v18 = vpop.trf.xlu0 }
 0x116   : > { %5614 = vmatmul.mubr.msk.f32.vlgmr.msra.gmra.mrb[12].mxu0 %vm784_vm0, %v1314_v18  ;;  %5621 = vmatmul.mubr.msk.f32.vlgmr.msra.gmra.mrb[12].mxu1 %vm784_vm0, %v1346_v17  ;;  %v2064_v18 = vld [vmem:[%s6322_s9 + $0x1f8] sm:$0xff] }
 0x117   : > { %5808 = vmatpush3.bf16.msra.mxu0 %v5805_v5  ;;  %5812 = vmatpush3.bf16.msra.mxu1 %v5809_v6  ;;  %v2057_v5 = vld [vmem:[%s6322_s9 + $0x1c0] sm:$0xff] }
 0x118   : > { %5814 = vmatprep.subr.bf16.mxu0 %v5813_v15  ;;  %5818 = vmatprep.subr.bf16.mxu1 %v5817_v16  ;;  %v5861_v11 = vpack.c.bf16 %v2058_v8, %v2057_v5 }
 0x119   : > { %v1409_v20 = vpop.trf.xlu1  ;;  %v1377_v21 = vpop.trf.xlu0 }
 0x11a   : > { %5627 = vmatprep.mubr.msk.f32.mxu0 %vm784_vm0, %v1377_v21  ;;  %5634 = vmatprep.mubr.msk.f32.mxu1 %vm784_vm0, %v1409_v20  ;;  %v2062_v20 = vld [vmem:[%s6322_s9 + $0x1e8] sm:$0xff] }
 0x11b   : > { %v5869_v22 = vpack.c.bf16 %v2062_v20, %v2061_v19 }
 0x11d   : > { %v1410_v29 = vpop.trf.xlu1  ;;  %v1378_v30 = vpop.trf.xlu0 }
 0x11e   : > { %5628 = vmatmul.mubr.msk.f32.vlgmr.msra.gmra.mrb[14].mxu0 %vm784_vm0, %v1378_v30  ;;  %5635 = vmatmul.mubr.msk.f32.vlgmr.msra.gmra.mrb[14].mxu1 %vm784_vm0, %v1410_v29 }
 0x11f   : > { %5816 = vmatpush3.bf16.msra.mxu0 %v5813_v15  ;;  %5820 = vmatpush3.bf16.msra.mxu1 %v5817_v16  ;;  %v2063_v15 = vld [vmem:[%s6322_s9 + $0x1f0] sm:$0xff] }
 0x120   : > { %5822 = vmatprep.subr.bf16.mxu0 %v5821_v27  ;;  %5826 = vmatprep.subr.bf16.mxu1 %v5825_v28  ;;  %v5873_v21 = vpack.c.bf16 %v2064_v18, %v2063_v15  ;;  %v1949_v15 = vld [vmem:[#allocation2 + $0x60] sm:$0xff] }
 0x121   : > { %v1473_v24 = vpop.trf.xlu1  ;;  %v1441_v32 = vpop.trf.xlu0 }
 0x122   : > { %5641 = vmatprep.mubr.msk.f32.mxu0 %vm784_vm0, %v1441_v32  ;;  %5648 = vmatprep.mubr.msk.f32.mxu1 %vm784_vm0, %v1473_v24 }
 0x125   : > { %v1474_v37 = vpop.trf.xlu1  ;;  %v1442_v38 = vpop.trf.xlu0 }
 0x126   : > { %5642 = vmatmul.mubr.msk.f32.vlgmr.msra.gmra.mrb[16].mxu0 %vm784_vm0, %v1442_v38  ;;  %5649 = vmatmul.mubr.msk.f32.vlgmr.msra.gmra.mrb[16].mxu1 %vm784_vm0, %v1474_v37 }
 0x127   : > { %5824 = vmatpush3.bf16.msra.mxu0 %v5821_v27  ;;  %5828 = vmatpush3.bf16.msra.mxu1 %v5825_v28 }
 0x128   : > { %5830 = vmatprep.subr.bf16.mxu0 %v5829_v35  ;;  %5834 = vmatprep.subr.bf16.mxu1 %v5833_v36 }
 0x129   : > { %v1537_v40 = vpop.trf.xlu1  ;;  %v1505_v41 = vpop.trf.xlu0 }
 0x12a   : > { %5655 = vmatprep.mubr.msk.f32.mxu0 %vm784_vm0, %v1505_v41  ;;  %5662 = vmatprep.mubr.msk.f32.mxu1 %vm784_vm0, %v1537_v40 }
 0x12d   : > { %v1538_v47 = vpop.trf.xlu1  ;;  %v1506_v48 = vpop.trf.xlu0 }
 0x12e   : > { %5656 = vmatmul.mubr.msk.f32.vlgmr.msra.gmra.mrb[18].mxu0 %vm784_vm0, %v1506_v48  ;;  %5663 = vmatmul.mubr.msk.f32.vlgmr.msra.gmra.mrb[18].mxu1 %vm784_vm0, %v1538_v47  ;;  %v1941_v47 = vld [vmem:[#allocation2 + $0x20] sm:$0xff]  ;;  %v1943_v48 = vld [vmem:[#allocation2 + $0x30] sm:$0xff] }
 0x12f   : > { %5832 = vmatpush3.bf16.msra.mxu0 %v5829_v35  ;;  %5836 = vmatpush3.bf16.msra.mxu1 %v5833_v36  ;;  %v1937_v35 = vld [vmem:[#allocation2] sm:$0xff]  ;;  %v1939_v36 = vld [vmem:[#allocation2 + $0x10] sm:$0xff] }
 0x130   : > { %5838 = vmatprep.subr.bf16.mxu0 %v5837_v45  ;;  %5842 = vmatprep.subr.bf16.mxu1 %v5841_v46 }
 0x131   : > { %v1601_v50 = vpop.trf.xlu1  ;;  %v1569_v51 = vpop.trf.xlu0 }
 0x132   : > { %5669 = vmatprep.mubr.msk.f32.mxu0 %vm784_vm0, %v1569_v51  ;;  %5676 = vmatprep.mubr.msk.f32.mxu1 %vm784_vm0, %v1601_v50 }
 0x135   : > { %v1602_v57 = vpop.trf.xlu1  ;;  %v1570_v58 = vpop.trf.xlu0 }
 0x136   : > { %5670 = vmatmul.mubr.msk.f32.vlgmr.msra.gmra.mrb[20].mxu0 %vm784_vm0, %v1570_v58  ;;  %5677 = vmatmul.mubr.msk.f32.vlgmr.msra.gmra.mrb[20].mxu1 %vm784_vm0, %v1602_v57 }
 0x137   : > { %5840 = vmatpush3.bf16.msra.mxu0 %v5837_v45  ;;  %5844 = vmatpush3.bf16.msra.mxu1 %v5841_v46  ;;  %v1942_v45 = vld [vmem:[#allocation2 + $0x28] sm:$0xff]  ;;  %v1944_v46 = vld [vmem:[#allocation2 + $0x38] sm:$0xff] }
 0x138   : > { %5846 = vmatprep.subr.bf16.mxu0 %v5845_v55  ;;  %5850 = vmatprep.subr.bf16.mxu1 %v5849_v56 }
 0x139   : > { %v1665_v60 = vpop.trf.xlu1  ;;  %v1633_v61 = vpop.trf.xlu0 }
 0x13a   : > { %5683 = vmatprep.mubr.msk.f32.mxu0 %vm784_vm0, %v1633_v61  ;;  %5690 = vmatprep.mubr.msk.f32.mxu1 %vm784_vm0, %v1665_v60  ;;  %v1946_v61 = vld [vmem:[#allocation2 + $0x48] sm:$0xff] }
 0x13d   : > { %v1666_v3 = vpop.trf.xlu1  ;;  %v1634_v4 = vpop.trf.xlu0 }
 0x13e   : > { %5684 = vmatmul.mubr.msk.f32.vlgmr.msra.gmra.mrb[22].mxu0 %vm784_vm0, %v1634_v4  ;;  %5691 = vmatmul.mubr.msk.f32.vlgmr.msra.gmra.mrb[22].mxu1 %vm784_vm0, %v1666_v3 }
 0x13f   : > { %5848 = vmatpush3.bf16.msra.mxu0 %v5845_v55  ;;  %5852 = vmatpush3.bf16.msra.mxu1 %v5849_v56 }
 0x140   : > { %5854 = vmatprep.subr.bf16.mxu0 %v5853_v1  ;;  %5858 = vmatprep.subr.bf16.mxu1 %v5857_v2 }
 0x141   : > { %v1729_v6 = vpop.trf.xlu1  ;;  %v1697_v7 = vpop.trf.xlu0 }
 0x142   : > { %5697 = vmatprep.mubr.msk.f32.mxu0 %vm784_vm0, %v1697_v7  ;;  %5704 = vmatprep.mubr.msk.f32.mxu1 %vm784_vm0, %v1729_v6 }
 0x145   : > { %v1730_v13 = vpop.trf.xlu1  ;;  %v1698_v14 = vpop.trf.xlu0 }
 0x146   : > { %5698 = vmatmul.mubr.msk.f32.vlgmr.msra.gmra.mrb[24].mxu0 %vm784_vm0, %v1698_v14  ;;  %5705 = vmatmul.mubr.msk.f32.vlgmr.msra.gmra.mrb[24].mxu1 %vm784_vm0, %v1730_v13  ;;  %v1950_v13 = vld [vmem:[#allocation2 + $0x68] sm:$0xff]  ;;  %v1952_v14 = vld [vmem:[#allocation2 + $0x78] sm:$0xff] }
 0x147   : > { %5856 = vmatpush3.bf16.msra.mxu0 %v5853_v1  ;;  %5860 = vmatpush3.bf16.msra.mxu1 %v5857_v2 }
 0x148   : > { %5862 = vmatprep.subr.bf16.mxu0 %v5861_v11  ;;  %5866 = vmatprep.subr.bf16.mxu1 %v5865_v12 }
 0x149   : > { %v1793_v16 = vpop.trf.xlu1  ;;  %v1761_v17 = vpop.trf.xlu0 }
 0x14a   : > { %5711 = vmatprep.mubr.msk.f32.mxu0 %vm784_vm0, %v1761_v17  ;;  %5718 = vmatprep.mubr.msk.f32.mxu1 %vm784_vm0, %v1793_v16  ;;  %v1951_v16 = vld [vmem:[#allocation2 + $0x70] sm:$0xff] }
 0x14d   : > { %v1794_v23 = vpop.trf.xlu1  ;;  %v1762_v26 = vpop.trf.xlu0 }
 0x14e   : > { %5712 = vmatmul.mubr.msk.f32.vlgmr.msra.gmra.mrb[26].mxu0 %vm784_vm0, %v1762_v26  ;;  %5719 = vmatmul.mubr.msk.f32.vlgmr.msra.gmra.mrb[26].mxu1 %vm784_vm0, %v1794_v23 }
 0x14f   : > { %5864 = vmatpush3.bf16.msra.mxu0 %v5861_v11  ;;  %5868 = vmatpush3.bf16.msra.mxu1 %v5865_v12 }
 0x150   : > { %5874 = vmatprep.subr.bf16.mxu1 %v5873_v21  ;;  %5870 = vmatprep.subr.bf16.mxu0 %v5869_v22 }
 0x151   : > { %v1857_v27 = vpop.trf.xlu1  ;;  %v1825_v28 = vpop.trf.xlu0 }
 0x152   : > { %5725 = vmatprep.mubr.msk.f32.mxu0 %vm784_vm0, %v1825_v28  ;;  %5732 = vmatprep.mubr.msk.f32.mxu1 %vm784_vm0, %v1857_v27 }
 0x155   : > { %v1858_v29 = vpop.trf.xlu1  ;;  %v1826_v30 = vpop.trf.xlu0 }
 0x156   : > { %5726 = vmatmul.mubr.msk.f32.vlgmr.msra.gmra.mrb[28].mxu0 %vm784_vm0, %v1826_v30  ;;  %5733 = vmatmul.mubr.msk.f32.vlgmr.msra.gmra.mrb[28].mxu1 %vm784_vm0, %v1858_v29 }
 0x157   : > { %5872 = vmatpush3.bf16.msra.mxu0 %v5869_v22  ;;  %5876 = vmatpush3.bf16.msra.mxu1 %v5873_v21 }
 0x159   : > { %v1921_v31 = vpop.trf.xlu1  ;;  %v1889_v24 = vpop.trf.xlu0 }
 0x15a   : > { %5739 = vmatprep.mubr.msk.f32.mxu0 %vm784_vm0, %v1889_v24  ;;  %5746 = vmatprep.mubr.msk.f32.mxu1 %vm784_vm0, %v1921_v31  ;;  %v1954_v31 = vld [vmem:[#allocation2 + $0x88] sm:$0xff]  ;;  %v1956_v24 = vld [vmem:[#allocation2 + $0x98] sm:$0xff] }
 0x15d   : > { %v1922_v32 = vpop.trf.xlu1  ;;  %v1890_v25 = vpop.trf.xlu0 }
 0x15e   : > { %5740 = vmatmul.mubr.msk.f32.vlgmr.msra.gmra.mrb[30].mxu0 %vm784_vm0, %v1890_v25  ;;  %5747 = vmatmul.mubr.msk.f32.vlgmr.msra.gmra.mrb[30].mxu1 %vm784_vm0, %v1922_v32  ;;  %v1953_v32 = vld [vmem:[#allocation2 + $0x80] sm:$0xff]  ;;  %v1955_v25 = vld [vmem:[#allocation2 + $0x90] sm:$0xff] }
 0x1b9   : > { %v5531_v37 = vpop.f32.mrb[0].mxu0  ;;  %v5538_v38 = vpop.f32.mrb[0].mxu1 }
 0x1ba   : > { %v4659_v39 = vadd.f32 %v5531_v37, %v1938_v33  ;;  %v4661_v40 = vadd.f32 %v5538_v38, %v1940_v34  ;;  %v2138_v41 = vpop.f32.mrb[1].mxu0  ;;  %v2219_v42 = vpop.f32.mrb[1].mxu1 }
 0x1bb   : > { %v4658_v43 = vadd.f32 %v2138_v41, %v1937_v35  ;;  %v4660_v44 = vadd.f32 %v2219_v42, %v1939_v36 }
 0x1bc   : > { %4723 = vst.msk [vmem:[#allocation2 + $0x8] sm:$0xff] %vm784_vm0, %v4659_v39  ;;  %4725 = vst.msk [vmem:[#allocation2 + $0x18] sm:$0xff] %vm784_vm0, %v4661_v40 }
 0x1bd   : > { %4722 = vst.msk [vmem:[#allocation2] sm:$0xff] %vm784_vm0, %v4658_v43  ;;  %4724 = vst.msk [vmem:[#allocation2 + $0x10] sm:$0xff] %vm784_vm0, %v4660_v44 }
 0x1c1   : > { %v5545_v49 = vpop.f32.mrb[2].mxu0  ;;  %v5552_v50 = vpop.f32.mrb[2].mxu1 }
 0x1c2   : > { %v4663_v51 = vadd.f32 %v5545_v49, %v1942_v45  ;;  %v4665_v52 = vadd.f32 %v5552_v50, %v1944_v46  ;;  %v2300_v53 = vpop.f32.mrb[3].mxu0  ;;  %v2381_v54 = vpop.f32.mrb[3].mxu1  ;;  %v1958_v45 = vld [vmem:[#allocation2 + $0xa8] sm:$0xff]  ;;  %v1960_v46 = vld [vmem:[#allocation2 + $0xb8] sm:$0xff] }
 0x1c3   : > { %v4790_v55 = vld [vmem:[#allocation2 + $0x8] sm:$0xff]  ;;  %v4792_v56 = vld [vmem:[#allocation2 + $0x18] sm:$0xff]  ;;  %v4662_v57 = vadd.f32 %v2300_v53, %v1941_v47  ;;  %v4664_v58 = vadd.f32 %v2381_v54, %v1943_v48  ;;  %v1957_v47 = vld [vmem:[#allocation2 + $0xa0] sm:$0xff] }
 0x1c4   : > { %4854 = vst.msk [vmem:[%s6643_s16 + $0x8] sm:$0xff] %vm784_vm0, %v4790_v55  ;;  %4856 = vst.msk [vmem:[%s6643_s16 + $0x18] sm:$0xff] %vm784_vm0, %v4792_v56  ;;  %v4789_v59 = vld [vmem:[#allocation2] sm:$0xff]  ;;  %v4791_v60 = vld [vmem:[#allocation2 + $0x10] sm:$0xff] }
 0x1c5   : > { %4727 = vst.msk [vmem:[#allocation2 + $0x28] sm:$0xff] %vm784_vm0, %v4663_v51  ;;  %4729 = vst.msk [vmem:[#allocation2 + $0x38] sm:$0xff] %vm784_vm0, %v4665_v52  ;;  %v1959_v48 = vld [vmem:[#allocation2 + $0xb0] sm:$0xff] }
 0x1c6   : > { %4853 = vst.msk [vmem:[%s6643_s16] sm:$0xff] %vm784_vm0, %v4789_v59  ;;  %4855 = vst.msk [vmem:[%s6643_s16 + $0x10] sm:$0xff] %vm784_vm0, %v4791_v60 }
 0x1c7   : > { %4726 = vst.msk [vmem:[#allocation2 + $0x20] sm:$0xff] %vm784_vm0, %v4662_v57  ;;  %4728 = vst.msk [vmem:[#allocation2 + $0x30] sm:$0xff] %vm784_vm0, %v4664_v58 }
 0x1c9   : > { %v5559_v1 = vpop.f32.mrb[4].mxu0  ;;  %v5566_v2 = vpop.f32.mrb[4].mxu1 }
 0x1ca   : > { %v4667_v3 = vadd.f32 %v5559_v1, %v1946_v61  ;;  %v4669_v4 = vadd.f32 %v5566_v2, %v1948_v62  ;;  %v2462_v5 = vpop.f32.mrb[5].mxu0  ;;  %v2543_v6 = vpop.f32.mrb[5].mxu1  ;;  %v1962_v61 = vld [vmem:[#allocation2 + $0xc8] sm:$0xff]  ;;  %v1964_v62 = vld [vmem:[#allocation2 + $0xd8] sm:$0xff] }
 0x1cb   : > { %v4666_v9 = vadd.f32 %v2462_v5, %v1945_v63  ;;  %v4668_v10 = vadd.f32 %v2543_v6, %v1947_v0  ;;  %v1961_v63 = vld [vmem:[#allocation2 + $0xc0] sm:$0xff]  ;;  %v1963_v0 = vld [vmem:[#allocation2 + $0xd0] sm:$0xff] }
 0x1cc   : > { %v4794_v7 = vld [vmem:[#allocation2 + $0x28] sm:$0xff]  ;;  %v4796_v8 = vld [vmem:[#allocation2 + $0x38] sm:$0xff]  ;;  %4731 = vst.msk [vmem:[#allocation2 + $0x48] sm:$0xff] %vm784_vm0, %v4667_v3  ;;  %4733 = vst.msk [vmem:[#allocation2 + $0x58] sm:$0xff] %vm784_vm0, %v4669_v4 }
 0x1cd   : > { %4858 = vst.msk [vmem:[%s6643_s16 + $0x28] sm:$0xff] %vm784_vm0, %v4794_v7  ;;  %4860 = vst.msk [vmem:[%s6643_s16 + $0x38] sm:$0xff] %vm784_vm0, %v4796_v8 }
 0x1ce   : > { %v4793_v11 = vld [vmem:[#allocation2 + $0x20] sm:$0xff]  ;;  %v4795_v12 = vld [vmem:[#allocation2 + $0x30] sm:$0xff]  ;;  %4730 = vst.msk [vmem:[#allocation2 + $0x40] sm:$0xff] %vm784_vm0, %v4666_v9  ;;  %4732 = vst.msk [vmem:[#allocation2 + $0x50] sm:$0xff] %vm784_vm0, %v4668_v10 }
 0x1cf   : > { %4857 = vst.msk [vmem:[%s6643_s16 + $0x20] sm:$0xff] %vm784_vm0, %v4793_v11  ;;  %4859 = vst.msk [vmem:[%s6643_s16 + $0x30] sm:$0xff] %vm784_vm0, %v4795_v12 }
 0x1d1   : > { %v5573_v17 = vpop.f32.mrb[6].mxu0  ;;  %v5580_v18 = vpop.f32.mrb[6].mxu1 }
 0x1d2   : > { %v4671_v19 = vadd.f32 %v5573_v17, %v1950_v13  ;;  %v4673_v20 = vadd.f32 %v5580_v18, %v1952_v14  ;;  %v2624_v21 = vpop.f32.mrb[7].mxu0  ;;  %v2705_v22 = vpop.f32.mrb[7].mxu1  ;;  %v1966_v13 = vld [vmem:[#allocation2 + $0xe8] sm:$0xff]  ;;  %v1968_v14 = vld [vmem:[#allocation2 + $0xf8] sm:$0xff] }
 0x1d3   : > { %v4798_v23 = vld [vmem:[#allocation2 + $0x48] sm:$0xff]  ;;  %v4800_v26 = vld [vmem:[#allocation2 + $0x58] sm:$0xff]  ;;  %v4670_v27 = vadd.f32 %v2624_v21, %v1949_v15  ;;  %v4672_v28 = vadd.f32 %v2705_v22, %v1951_v16  ;;  %v1965_v15 = vld [vmem:[#allocation2 + $0xe0] sm:$0xff] }
 0x1d4   : > { %4862 = vst.msk [vmem:[%s6643_s16 + $0x48] sm:$0xff] %vm784_vm0, %v4798_v23  ;;  %4864 = vst.msk [vmem:[%s6643_s16 + $0x58] sm:$0xff] %vm784_vm0, %v4800_v26  ;;  %v1967_v16 = vld [vmem:[#allocation2 + $0xf0] sm:$0xff] }
 0x1d5   : > { %v4797_v29 = vld [vmem:[#allocation2 + $0x40] sm:$0xff]  ;;  %v4799_v30 = vld [vmem:[#allocation2 + $0x50] sm:$0xff]  ;;  %4735 = vst.msk [vmem:[#allocation2 + $0x68] sm:$0xff] %vm784_vm0, %v4671_v19  ;;  %4737 = vst.msk [vmem:[#allocation2 + $0x78] sm:$0xff] %vm784_vm0, %v4673_v20 }
 0x1d6   : > { %4861 = vst.msk [vmem:[%s6643_s16 + $0x40] sm:$0xff] %vm784_vm0, %v4797_v29  ;;  %4863 = vst.msk [vmem:[%s6643_s16 + $0x50] sm:$0xff] %vm784_vm0, %v4799_v30 }
 0x1d7   : > { %4734 = vst.msk [vmem:[#allocation2 + $0x60] sm:$0xff] %vm784_vm0, %v4670_v27  ;;  %4736 = vst.msk [vmem:[#allocation2 + $0x70] sm:$0xff] %vm784_vm0, %v4672_v28 }
 0x1d9   : > { %v5587_v33 = vpop.f32.mrb[8].mxu0  ;;  %v5594_v34 = vpop.f32.mrb[8].mxu1 }
 0x1da   : > { %v4675_v35 = vadd.f32 %v5587_v33, %v1954_v31  ;;  %v4677_v36 = vadd.f32 %v5594_v34, %v1956_v24  ;;  %v2786_v37 = vpop.f32.mrb[9].mxu0  ;;  %v2867_v38 = vpop.f32.mrb[9].mxu1  ;;  %v1970_v31 = vld [vmem:[#allocation2 + $0x108] sm:$0xff]  ;;  %v1972_v24 = vld [vmem:[#allocation2 + $0x118] sm:$0xff] }
 0x1db   : > { %v4674_v41 = vadd.f32 %v2786_v37, %v1953_v32  ;;  %v4676_v42 = vadd.f32 %v2867_v38, %v1955_v25  ;;  %v1969_v32 = vld [vmem:[#allocation2 + $0x100] sm:$0xff]  ;;  %v1971_v25 = vld [vmem:[#allocation2 + $0x110] sm:$0xff] }
 0x1dc   : > { %v4802_v39 = vld [vmem:[#allocation2 + $0x68] sm:$0xff]  ;;  %v4804_v40 = vld [vmem:[#allocation2 + $0x78] sm:$0xff]  ;;  %4739 = vst.msk [vmem:[#allocation2 + $0x88] sm:$0xff] %vm784_vm0, %v4675_v35  ;;  %4741 = vst.msk [vmem:[#allocation2 + $0x98] sm:$0xff] %vm784_vm0, %v4677_v36 }
 0x1dd   : > { %4866 = vst.msk [vmem:[%s6643_s16 + $0x68] sm:$0xff] %vm784_vm0, %v4802_v39  ;;  %4868 = vst.msk [vmem:[%s6643_s16 + $0x78] sm:$0xff] %vm784_vm0, %v4804_v40 }
 0x1de   : > { %v4801_v43 = vld [vmem:[#allocation2 + $0x60] sm:$0xff]  ;;  %v4803_v44 = vld [vmem:[#allocation2 + $0x70] sm:$0xff]  ;;  %4738 = vst.msk [vmem:[#allocation2 + $0x80] sm:$0xff] %vm784_vm0, %v4674_v41  ;;  %4740 = vst.msk [vmem:[#allocation2 + $0x90] sm:$0xff] %vm784_vm0, %v4676_v42 }
 0x1df   : > { %4865 = vst.msk [vmem:[%s6643_s16 + $0x60] sm:$0xff] %vm784_vm0, %v4801_v43  ;;  %4867 = vst.msk [vmem:[%s6643_s16 + $0x70] sm:$0xff] %vm784_vm0, %v4803_v44 }
 0x1e1   : > { %v5601_v49 = vpop.f32.mrb[10].mxu0  ;;  %v5608_v50 = vpop.f32.mrb[10].mxu1 }
 0x1e2   : > { %v4679_v51 = vadd.f32 %v5601_v49, %v1958_v45  ;;  %v4681_v52 = vadd.f32 %v5608_v50, %v1960_v46  ;;  %v2948_v53 = vpop.f32.mrb[11].mxu0  ;;  %v3029_v54 = vpop.f32.mrb[11].mxu1  ;;  %v1974_v45 = vld [vmem:[#allocation2 + $0x128] sm:$0xff]  ;;  %v1976_v46 = vld [vmem:[#allocation2 + $0x138] sm:$0xff] }
 0x1e3   : > { %v4806_v55 = vld [vmem:[#allocation2 + $0x88] sm:$0xff]  ;;  %v4808_v56 = vld [vmem:[#allocation2 + $0x98] sm:$0xff]  ;;  %v4678_v57 = vadd.f32 %v2948_v53, %v1957_v47  ;;  %v4680_v58 = vadd.f32 %v3029_v54, %v1959_v48  ;;  %v1973_v47 = vld [vmem:[#allocation2 + $0x120] sm:$0xff] }
 0x1e4   : > { %4870 = vst.msk [vmem:[%s6643_s16 + $0x88] sm:$0xff] %vm784_vm0, %v4806_v55  ;;  %4872 = vst.msk [vmem:[%s6643_s16 + $0x98] sm:$0xff] %vm784_vm0, %v4808_v56  ;;  %v1975_v48 = vld [vmem:[#allocation2 + $0x130] sm:$0xff] }
 0x1e5   : > { %v4805_v59 = vld [vmem:[#allocation2 + $0x80] sm:$0xff]  ;;  %v4807_v60 = vld [vmem:[#allocation2 + $0x90] sm:$0xff]  ;;  %4743 = vst.msk [vmem:[#allocation2 + $0xa8] sm:$0xff] %vm784_vm0, %v4679_v51  ;;  %4745 = vst.msk [vmem:[#allocation2 + $0xb8] sm:$0xff] %vm784_vm0, %v4681_v52 }
 0x1e6   : > { %4869 = vst.msk [vmem:[%s6643_s16 + $0x80] sm:$0xff] %vm784_vm0, %v4805_v59  ;;  %4871 = vst.msk [vmem:[%s6643_s16 + $0x90] sm:$0xff] %vm784_vm0, %v4807_v60 }
 0x1e7   : > { %4742 = vst.msk [vmem:[#allocation2 + $0xa0] sm:$0xff] %vm784_vm0, %v4678_v57  ;;  %4744 = vst.msk [vmem:[#allocation2 + $0xb0] sm:$0xff] %vm784_vm0, %v4680_v58 }
 0x1e9   : > { %v5615_v1 = vpop.f32.mrb[12].mxu0  ;;  %v5622_v2 = vpop.f32.mrb[12].mxu1 }
 0x1ea   : > { %v4683_v3 = vadd.f32 %v5615_v1, %v1962_v61  ;;  %v4685_v4 = vadd.f32 %v5622_v2, %v1964_v62  ;;  %v3110_v5 = vpop.f32.mrb[13].mxu0  ;;  %v3191_v6 = vpop.f32.mrb[13].mxu1  ;;  %v1978_v61 = vld [vmem:[#allocation2 + $0x148] sm:$0xff]  ;;  %v1980_v62 = vld [vmem:[#allocation2 + $0x158] sm:$0xff] }
 0x1eb   : > { %v4682_v9 = vadd.f32 %v3110_v5, %v1961_v63  ;;  %v4684_v10 = vadd.f32 %v3191_v6, %v1963_v0  ;;  %v1977_v63 = vld [vmem:[#allocation2 + $0x140] sm:$0xff]  ;;  %v1979_v0 = vld [vmem:[#allocation2 + $0x150] sm:$0xff] }
 0x1ec   : > { %v4810_v7 = vld [vmem:[#allocation2 + $0xa8] sm:$0xff]  ;;  %v4812_v8 = vld [vmem:[#allocation2 + $0xb8] sm:$0xff]  ;;  %4747 = vst.msk [vmem:[#allocation2 + $0xc8] sm:$0xff] %vm784_vm0, %v4683_v3  ;;  %4749 = vst.msk [vmem:[#allocation2 + $0xd8] sm:$0xff] %vm784_vm0, %v4685_v4 }
 0x1ed   : > { %4874 = vst.msk [vmem:[%s6643_s16 + $0xa8] sm:$0xff] %vm784_vm0, %v4810_v7  ;;  %4876 = vst.msk [vmem:[%s6643_s16 + $0xb8] sm:$0xff] %vm784_vm0, %v4812_v8 }
 0x1ee   : > { %v4809_v11 = vld [vmem:[#allocation2 + $0xa0] sm:$0xff]  ;;  %v4811_v12 = vld [vmem:[#allocation2 + $0xb0] sm:$0xff]  ;;  %4746 = vst.msk [vmem:[#allocation2 + $0xc0] sm:$0xff] %vm784_vm0, %v4682_v9  ;;  %4748 = vst.msk [vmem:[#allocation2 + $0xd0] sm:$0xff] %vm784_vm0, %v4684_v10 }
 0x1ef   : > { %4873 = vst.msk [vmem:[%s6643_s16 + $0xa0] sm:$0xff] %vm784_vm0, %v4809_v11  ;;  %4875 = vst.msk [vmem:[%s6643_s16 + $0xb0] sm:$0xff] %vm784_vm0, %v4811_v12 }
 0x1f1   : > { %v5629_v17 = vpop.f32.mrb[14].mxu0  ;;  %v5636_v18 = vpop.f32.mrb[14].mxu1 }
 0x1f2   : > { %v4687_v19 = vadd.f32 %v5629_v17, %v1966_v13  ;;  %v4689_v20 = vadd.f32 %v5636_v18, %v1968_v14  ;;  %v3272_v21 = vpop.f32.mrb[15].mxu0  ;;  %v3353_v22 = vpop.f32.mrb[15].mxu1  ;;  %v1982_v13 = vld [vmem:[#allocation2 + $0x168] sm:$0xff]  ;;  %v1984_v14 = vld [vmem:[#allocation2 + $0x178] sm:$0xff] }
 0x1f3   : > { %v4814_v23 = vld [vmem:[#allocation2 + $0xc8] sm:$0xff]  ;;  %v4816_v26 = vld [vmem:[#allocation2 + $0xd8] sm:$0xff]  ;;  %v4686_v27 = vadd.f32 %v3272_v21, %v1965_v15  ;;  %v4688_v28 = vadd.f32 %v3353_v22, %v1967_v16  ;;  %v1981_v15 = vld [vmem:[#allocation2 + $0x160] sm:$0xff] }
 0x1f4   : > { %4878 = vst.msk [vmem:[%s6643_s16 + $0xc8] sm:$0xff] %vm784_vm0, %v4814_v23  ;;  %4880 = vst.msk [vmem:[%s6643_s16 + $0xd8] sm:$0xff] %vm784_vm0, %v4816_v26  ;;  %v1983_v16 = vld [vmem:[#allocation2 + $0x170] sm:$0xff] }
 0x1f5   : > { %v4813_v29 = vld [vmem:[#allocation2 + $0xc0] sm:$0xff]  ;;  %v4815_v30 = vld [vmem:[#allocation2 + $0xd0] sm:$0xff]  ;;  %4751 = vst.msk [vmem:[#allocation2 + $0xe8] sm:$0xff] %vm784_vm0, %v4687_v19  ;;  %4753 = vst.msk [vmem:[#allocation2 + $0xf8] sm:$0xff] %vm784_vm0, %v4689_v20 }
 0x1f6   : > { %4877 = vst.msk [vmem:[%s6643_s16 + $0xc0] sm:$0xff] %vm784_vm0, %v4813_v29  ;;  %4879 = vst.msk [vmem:[%s6643_s16 + $0xd0] sm:$0xff] %vm784_vm0, %v4815_v30 }
 0x1f7   : > { %4750 = vst.msk [vmem:[#allocation2 + $0xe0] sm:$0xff] %vm784_vm0, %v4686_v27  ;;  %4752 = vst.msk [vmem:[#allocation2 + $0xf0] sm:$0xff] %vm784_vm0, %v4688_v28 }
 0x1f9   : > { %v5643_v33 = vpop.f32.mrb[16].mxu0  ;;  %v5650_v34 = vpop.f32.mrb[16].mxu1 }
 0x1fa   : > { %v4691_v35 = vadd.f32 %v5643_v33, %v1970_v31  ;;  %v4693_v36 = vadd.f32 %v5650_v34, %v1972_v24  ;;  %v3434_v37 = vpop.f32.mrb[17].mxu0  ;;  %v3515_v38 = vpop.f32.mrb[17].mxu1  ;;  %v1986_v31 = vld [vmem:[#allocation2 + $0x188] sm:$0xff]  ;;  %v1988_v24 = vld [vmem:[#allocation2 + $0x198] sm:$0xff] }
 0x1fb   : > { %v4690_v41 = vadd.f32 %v3434_v37, %v1969_v32  ;;  %v4692_v42 = vadd.f32 %v3515_v38, %v1971_v25  ;;  %v1985_v32 = vld [vmem:[#allocation2 + $0x180] sm:$0xff]  ;;  %v1987_v25 = vld [vmem:[#allocation2 + $0x190] sm:$0xff] }
 0x1fc   : > { %v4818_v39 = vld [vmem:[#allocation2 + $0xe8] sm:$0xff]  ;;  %v4820_v40 = vld [vmem:[#allocation2 + $0xf8] sm:$0xff]  ;;  %4755 = vst.msk [vmem:[#allocation2 + $0x108] sm:$0xff] %vm784_vm0, %v4691_v35  ;;  %4757 = vst.msk [vmem:[#allocation2 + $0x118] sm:$0xff] %vm784_vm0, %v4693_v36 }
 0x1fd   : > { %4882 = vst.msk [vmem:[%s6643_s16 + $0xe8] sm:$0xff] %vm784_vm0, %v4818_v39  ;;  %4884 = vst.msk [vmem:[%s6643_s16 + $0xf8] sm:$0xff] %vm784_vm0, %v4820_v40 }
 0x1fe   : > { %v4817_v43 = vld [vmem:[#allocation2 + $0xe0] sm:$0xff]  ;;  %v4819_v44 = vld [vmem:[#allocation2 + $0xf0] sm:$0xff]  ;;  %4754 = vst.msk [vmem:[#allocation2 + $0x100] sm:$0xff] %vm784_vm0, %v4690_v41  ;;  %4756 = vst.msk [vmem:[#allocation2 + $0x110] sm:$0xff] %vm784_vm0, %v4692_v42 }
 0x1ff   : > { %4881 = vst.msk [vmem:[%s6643_s16 + $0xe0] sm:$0xff] %vm784_vm0, %v4817_v43  ;;  %4883 = vst.msk [vmem:[%s6643_s16 + $0xf0] sm:$0xff] %vm784_vm0, %v4819_v44 }
 0x201   : > { %v5657_v49 = vpop.f32.mrb[18].mxu0  ;;  %v5664_v50 = vpop.f32.mrb[18].mxu1 }
 0x202   : > { %v4695_v51 = vadd.f32 %v5657_v49, %v1974_v45  ;;  %v4697_v52 = vadd.f32 %v5664_v50, %v1976_v46  ;;  %v3596_v53 = vpop.f32.mrb[19].mxu0  ;;  %v3677_v54 = vpop.f32.mrb[19].mxu1  ;;  %v1990_v45 = vld [vmem:[#allocation2 + $0x1a8] sm:$0xff]  ;;  %v1992_v46 = vld [vmem:[#allocation2 + $0x1b8] sm:$0xff] }
 0x203   : > { %v4822_v55 = vld [vmem:[#allocation2 + $0x108] sm:$0xff]  ;;  %v4824_v56 = vld [vmem:[#allocation2 + $0x118] sm:$0xff]  ;;  %v4694_v57 = vadd.f32 %v3596_v53, %v1973_v47  ;;  %v4696_v58 = vadd.f32 %v3677_v54, %v1975_v48  ;;  %v1989_v47 = vld [vmem:[#allocation2 + $0x1a0] sm:$0xff] }
 0x204   : > { %4886 = vst.msk [vmem:[%s6643_s16 + $0x108] sm:$0xff] %vm784_vm0, %v4822_v55  ;;  %4888 = vst.msk [vmem:[%s6643_s16 + $0x118] sm:$0xff] %vm784_vm0, %v4824_v56  ;;  %v1991_v48 = vld [vmem:[#allocation2 + $0x1b0] sm:$0xff] }
 0x205   : > { %v4821_v59 = vld [vmem:[#allocation2 + $0x100] sm:$0xff]  ;;  %v4823_v60 = vld [vmem:[#allocation2 + $0x110] sm:$0xff]  ;;  %4759 = vst.msk [vmem:[#allocation2 + $0x128] sm:$0xff] %vm784_vm0, %v4695_v51  ;;  %4761 = vst.msk [vmem:[#allocation2 + $0x138] sm:$0xff] %vm784_vm0, %v4697_v52 }
 0x206   : > { %4885 = vst.msk [vmem:[%s6643_s16 + $0x100] sm:$0xff] %vm784_vm0, %v4821_v59  ;;  %4887 = vst.msk [vmem:[%s6643_s16 + $0x110] sm:$0xff] %vm784_vm0, %v4823_v60 }
 0x207   : > { %4758 = vst.msk [vmem:[#allocation2 + $0x120] sm:$0xff] %vm784_vm0, %v4694_v57  ;;  %4760 = vst.msk [vmem:[#allocation2 + $0x130] sm:$0xff] %vm784_vm0, %v4696_v58 }
 0x209   : > { %v5671_v1 = vpop.f32.mrb[20].mxu0  ;;  %v5678_v2 = vpop.f32.mrb[20].mxu1 }
 0x20a   : > { %v4699_v3 = vadd.f32 %v5671_v1, %v1978_v61  ;;  %v4701_v4 = vadd.f32 %v5678_v2, %v1980_v62  ;;  %v3758_v5 = vpop.f32.mrb[21].mxu0  ;;  %v3839_v6 = vpop.f32.mrb[21].mxu1  ;;  %v1994_v61 = vld [vmem:[#allocation2 + $0x1c8] sm:$0xff]  ;;  %v1996_v62 = vld [vmem:[#allocation2 + $0x1d8] sm:$0xff] }
 0x20b   : > { %v4698_v9 = vadd.f32 %v3758_v5, %v1977_v63  ;;  %v4700_v10 = vadd.f32 %v3839_v6, %v1979_v0  ;;  %v1993_v63 = vld [vmem:[#allocation2 + $0x1c0] sm:$0xff]  ;;  %v1995_v0 = vld [vmem:[#allocation2 + $0x1d0] sm:$0xff] }
 0x20c   : > { %v4826_v7 = vld [vmem:[#allocation2 + $0x128] sm:$0xff]  ;;  %v4828_v8 = vld [vmem:[#allocation2 + $0x138] sm:$0xff]  ;;  %4763 = vst.msk [vmem:[#allocation2 + $0x148] sm:$0xff] %vm784_vm0, %v4699_v3  ;;  %4765 = vst.msk [vmem:[#allocation2 + $0x158] sm:$0xff] %vm784_vm0, %v4701_v4 }
 0x20d   : > { %4890 = vst.msk [vmem:[%s6643_s16 + $0x128] sm:$0xff] %vm784_vm0, %v4826_v7  ;;  %4892 = vst.msk [vmem:[%s6643_s16 + $0x138] sm:$0xff] %vm784_vm0, %v4828_v8 }
 0x20e   : > { %v4825_v11 = vld [vmem:[#allocation2 + $0x120] sm:$0xff]  ;;  %v4827_v12 = vld [vmem:[#allocation2 + $0x130] sm:$0xff]  ;;  %4762 = vst.msk [vmem:[#allocation2 + $0x140] sm:$0xff] %vm784_vm0, %v4698_v9  ;;  %4764 = vst.msk [vmem:[#allocation2 + $0x150] sm:$0xff] %vm784_vm0, %v4700_v10 }
 0x20f   : > { %4889 = vst.msk [vmem:[%s6643_s16 + $0x120] sm:$0xff] %vm784_vm0, %v4825_v11  ;;  %4891 = vst.msk [vmem:[%s6643_s16 + $0x130] sm:$0xff] %vm784_vm0, %v4827_v12 }
 0x211   : > { %v5685_v17 = vpop.f32.mrb[22].mxu0  ;;  %v5692_v18 = vpop.f32.mrb[22].mxu1 }
 0x212   : > { %v4703_v19 = vadd.f32 %v5685_v17, %v1982_v13  ;;  %v4705_v20 = vadd.f32 %v5692_v18, %v1984_v14  ;;  %v3920_v21 = vpop.f32.mrb[23].mxu0  ;;  %v4001_v22 = vpop.f32.mrb[23].mxu1  ;;  %v1998_v13 = vld [vmem:[#allocation2 + $0x1e8] sm:$0xff]  ;;  %v2000_v14 = vld [vmem:[#allocation2 + $0x1f8] sm:$0xff] }
 0x213   : > { %v4830_v23 = vld [vmem:[#allocation2 + $0x148] sm:$0xff]  ;;  %v4832_v26 = vld [vmem:[#allocation2 + $0x158] sm:$0xff]  ;;  %v4702_v27 = vadd.f32 %v3920_v21, %v1981_v15  ;;  %v4704_v28 = vadd.f32 %v4001_v22, %v1983_v16  ;;  %v1997_v15 = vld [vmem:[#allocation2 + $0x1e0] sm:$0xff] }
 0x214   : > { %4894 = vst.msk [vmem:[%s6643_s16 + $0x148] sm:$0xff] %vm784_vm0, %v4830_v23  ;;  %4896 = vst.msk [vmem:[%s6643_s16 + $0x158] sm:$0xff] %vm784_vm0, %v4832_v26  ;;  %v1999_v16 = vld [vmem:[#allocation2 + $0x1f0] sm:$0xff] }
 0x215   : > { %v4829_v29 = vld [vmem:[#allocation2 + $0x140] sm:$0xff]  ;;  %v4831_v30 = vld [vmem:[#allocation2 + $0x150] sm:$0xff]  ;;  %4767 = vst.msk [vmem:[#allocation2 + $0x168] sm:$0xff] %vm784_vm0, %v4703_v19  ;;  %4769 = vst.msk [vmem:[#allocation2 + $0x178] sm:$0xff] %vm784_vm0, %v4705_v20 }
 0x216   : > { %4893 = vst.msk [vmem:[%s6643_s16 + $0x140] sm:$0xff] %vm784_vm0, %v4829_v29  ;;  %4895 = vst.msk [vmem:[%s6643_s16 + $0x150] sm:$0xff] %vm784_vm0, %v4831_v30 }
 0x217   : > { %4766 = vst.msk [vmem:[#allocation2 + $0x160] sm:$0xff] %vm784_vm0, %v4702_v27  ;;  %4768 = vst.msk [vmem:[#allocation2 + $0x170] sm:$0xff] %vm784_vm0, %v4704_v28 }
 0x219   : > { %v5699_v33 = vpop.f32.mrb[24].mxu0  ;;  %v5706_v34 = vpop.f32.mrb[24].mxu1 }
 0x21a   : > { %v4707_v35 = vadd.f32 %v5699_v33, %v1986_v31  ;;  %v4709_v36 = vadd.f32 %v5706_v34, %v1988_v24  ;;  %v4082_v37 = vpop.f32.mrb[25].mxu0  ;;  %v4163_v38 = vpop.f32.mrb[25].mxu1  ;;  %v5082_v33 = vld [vmem:[%s6643_s16] sm:$0xff] (%p6013_p6)  ;;  %v5084_v34 = vld [vmem:[%s6643_s16 + $0x8] sm:$0xff] (%p6013_p6) }
 0x21b   : > { %v4706_v41 = vadd.f32 %v4082_v37, %v1985_v32  ;;  %v4708_v42 = vadd.f32 %v4163_v38, %v1987_v25  ;;  %v5090_v37 = vld [vmem:[%s6643_s16 + $0x20] sm:$0xff] (%p6013_p6)  ;;  %v5092_v38 = vld [vmem:[%s6643_s16 + $0x28] sm:$0xff] (%p6013_p6)  ;;  %5083 = vst [vmem:[%s6842_s22] sm:$0xff] (%p6013_p6), %v5082_v33  ;;  %5085 = vst [vmem:[%s6842_s22 + $0x8] sm:$0xff] (%p6013_p6), %v5084_v34 }
 0x21c   : > { %v4834_v39 = vld [vmem:[#allocation2 + $0x168] sm:$0xff]  ;;  %v4836_v40 = vld [vmem:[#allocation2 + $0x178] sm:$0xff]  ;;  %4771 = vst.msk [vmem:[#allocation2 + $0x188] sm:$0xff] %vm784_vm0, %v4707_v35  ;;  %4773 = vst.msk [vmem:[#allocation2 + $0x198] sm:$0xff] %vm784_vm0, %v4709_v36 }
 0x21d   : > { %4898 = vst.msk [vmem:[%s6643_s16 + $0x168] sm:$0xff] %vm784_vm0, %v4834_v39  ;;  %4900 = vst.msk [vmem:[%s6643_s16 + $0x178] sm:$0xff] %vm784_vm0, %v4836_v40  ;;  %v5086_v35 = vld [vmem:[%s6643_s16 + $0x10] sm:$0xff] (%p6013_p6)  ;;  %v5088_v36 = vld [vmem:[%s6643_s16 + $0x18] sm:$0xff] (%p6013_p6) }
 0x21e   : > { %v4833_v43 = vld [vmem:[#allocation2 + $0x160] sm:$0xff]  ;;  %v4835_v44 = vld [vmem:[#allocation2 + $0x170] sm:$0xff]  ;;  %4770 = vst.msk [vmem:[#allocation2 + $0x180] sm:$0xff] %vm784_vm0, %v4706_v41  ;;  %4772 = vst.msk [vmem:[#allocation2 + $0x190] sm:$0xff] %vm784_vm0, %v4708_v42 }
 0x21f   : > { %4897 = vst.msk [vmem:[%s6643_s16 + $0x160] sm:$0xff] %vm784_vm0, %v4833_v43  ;;  %4899 = vst.msk [vmem:[%s6643_s16 + $0x170] sm:$0xff] %vm784_vm0, %v4835_v44  ;;  %v5094_v39 = vld [vmem:[%s6643_s16 + $0x30] sm:$0xff] (%p6013_p6)  ;;  %v5096_v40 = vld [vmem:[%s6643_s16 + $0x38] sm:$0xff] (%p6013_p6) }
 0x220   : > { %5087 = vst [vmem:[%s6842_s22 + $0x20] sm:$0xff] (%p6013_p6), %v5086_v35  ;;  %5089 = vst [vmem:[%s6842_s22 + $0x28] sm:$0xff] (%p6013_p6), %v5088_v36  ;;  %v5098_v41 = vld [vmem:[%s6643_s16 + $0x40] sm:$0xff] (%p6013_p6)  ;;  %v5100_v42 = vld [vmem:[%s6643_s16 + $0x48] sm:$0xff] (%p6013_p6) }
 0x221   : > { %v5713_v49 = vpop.f32.mrb[26].mxu0  ;;  %v5720_v50 = vpop.f32.mrb[26].mxu1  ;;  %5091 = vst [vmem:[%s6842_s22 + $0x40] sm:$0xff] (%p6013_p6), %v5090_v37  ;;  %5093 = vst [vmem:[%s6842_s22 + $0x48] sm:$0xff] (%p6013_p6), %v5092_v38  ;;  %v5102_v43 = vld [vmem:[%s6643_s16 + $0x50] sm:$0xff] (%p6013_p6)  ;;  %v5104_v44 = vld [vmem:[%s6643_s16 + $0x58] sm:$0xff] (%p6013_p6) }
 0x222   : > { %v4711_v51 = vadd.f32 %v5713_v49, %v1990_v45  ;;  %v4713_v52 = vadd.f32 %v5720_v50, %v1992_v46  ;;  %v4244_v53 = vpop.f32.mrb[27].mxu0  ;;  %v4325_v54 = vpop.f32.mrb[27].mxu1  ;;  %5095 = vst [vmem:[%s6842_s22 + $0x60] sm:$0xff] (%p6013_p6), %v5094_v39  ;;  %5097 = vst [vmem:[%s6842_s22 + $0x68] sm:$0xff] (%p6013_p6), %v5096_v40  ;;  %v5106_v45 = vld [vmem:[%s6643_s16 + $0x60] sm:$0xff] (%p6013_p6)  ;;  %v5108_v46 = vld [vmem:[%s6643_s16 + $0x68] sm:$0xff] (%p6013_p6) }
 0x223   : > { %v4838_v55 = vld [vmem:[#allocation2 + $0x188] sm:$0xff]  ;;  %v4840_v56 = vld [vmem:[#allocation2 + $0x198] sm:$0xff]  ;;  %v4710_v57 = vadd.f32 %v4244_v53, %v1989_v47  ;;  %v4712_v58 = vadd.f32 %v4325_v54, %v1991_v48  ;;  %5099 = vst [vmem:[%s6842_s22 + $0x80] sm:$0xff] (%p6013_p6), %v5098_v41  ;;  %5101 = vst [vmem:[%s6842_s22 + $0x88] sm:$0xff] (%p6013_p6), %v5100_v42 }
 0x224   : > { %4902 = vst.msk [vmem:[%s6643_s16 + $0x188] sm:$0xff] %vm784_vm0, %v4838_v55  ;;  %4904 = vst.msk [vmem:[%s6643_s16 + $0x198] sm:$0xff] %vm784_vm0, %v4840_v56  ;;  %v5110_v47 = vld [vmem:[%s6643_s16 + $0x70] sm:$0xff] (%p6013_p6)  ;;  %v5112_v48 = vld [vmem:[%s6643_s16 + $0x78] sm:$0xff] (%p6013_p6) }
 0x225   : > { %v4837_v59 = vld [vmem:[#allocation2 + $0x180] sm:$0xff]  ;;  %v4839_v60 = vld [vmem:[#allocation2 + $0x190] sm:$0xff]  ;;  %4775 = vst.msk [vmem:[#allocation2 + $0x1a8] sm:$0xff] %vm784_vm0, %v4711_v51  ;;  %4777 = vst.msk [vmem:[#allocation2 + $0x1b8] sm:$0xff] %vm784_vm0, %v4713_v52 }
 0x226   : > { %4901 = vst.msk [vmem:[%s6643_s16 + $0x180] sm:$0xff] %vm784_vm0, %v4837_v59  ;;  %4903 = vst.msk [vmem:[%s6643_s16 + $0x190] sm:$0xff] %vm784_vm0, %v4839_v60  ;;  %v5114_v49 = vld [vmem:[%s6643_s16 + $0x80] sm:$0xff] (%p6013_p6)  ;;  %v5116_v50 = vld [vmem:[%s6643_s16 + $0x88] sm:$0xff] (%p6013_p6) }
 0x227   : > { %4774 = vst.msk [vmem:[#allocation2 + $0x1a0] sm:$0xff] %vm784_vm0, %v4710_v57  ;;  %4776 = vst.msk [vmem:[#allocation2 + $0x1b0] sm:$0xff] %vm784_vm0, %v4712_v58  ;;  %v5118_v51 = vld [vmem:[%s6643_s16 + $0x90] sm:$0xff] (%p6013_p6)  ;;  %v5120_v52 = vld [vmem:[%s6643_s16 + $0x98] sm:$0xff] (%p6013_p6) }
 0x228   : > { %5103 = vst [vmem:[%s6842_s22 + $0xa0] sm:$0xff] (%p6013_p6), %v5102_v43  ;;  %5105 = vst [vmem:[%s6842_s22 + $0xa8] sm:$0xff] (%p6013_p6), %v5104_v44  ;;  %v5122_v53 = vld [vmem:[%s6643_s16 + $0xa0] sm:$0xff] (%p6013_p6)  ;;  %v5124_v54 = vld [vmem:[%s6643_s16 + $0xa8] sm:$0xff] (%p6013_p6) }
 0x229   : > { %v5727_v1 = vpop.f32.mrb[28].mxu0  ;;  %v5734_v2 = vpop.f32.mrb[28].mxu1  ;;  %5107 = vst [vmem:[%s6842_s22 + $0xc0] sm:$0xff] (%p6013_p6), %v5106_v45  ;;  %5109 = vst [vmem:[%s6842_s22 + $0xc8] sm:$0xff] (%p6013_p6), %v5108_v46  ;;  %v5126_v55 = vld [vmem:[%s6643_s16 + $0xb0] sm:$0xff] (%p6013_p6)  ;;  %v5128_v56 = vld [vmem:[%s6643_s16 + $0xb8] sm:$0xff] (%p6013_p6) }
 0x22a   : > { %v4715_v3 = vadd.f32 %v5727_v1, %v1994_v61  ;;  %v4717_v4 = vadd.f32 %v5734_v2, %v1996_v62  ;;  %v4406_v5 = vpop.f32.mrb[29].mxu0  ;;  %v4487_v6 = vpop.f32.mrb[29].mxu1  ;;  %5111 = vst [vmem:[%s6842_s22 + $0xe0] sm:$0xff] (%p6013_p6), %v5110_v47  ;;  %5113 = vst [vmem:[%s6842_s22 + $0xe8] sm:$0xff] (%p6013_p6), %v5112_v48  ;;  %v5130_v57 = vld [vmem:[%s6643_s16 + $0xc0] sm:$0xff] (%p6013_p6)  ;;  %v5132_v58 = vld [vmem:[%s6643_s16 + $0xc8] sm:$0xff] (%p6013_p6) }
 0x22b   : > { %v4714_v9 = vadd.f32 %v4406_v5, %v1993_v63  ;;  %v4716_v10 = vadd.f32 %v4487_v6, %v1995_v0  ;;  %5115 = vst [vmem:[%s6842_s22 + $0x100] sm:$0xff] (%p6013_p6), %v5114_v49  ;;  %5117 = vst [vmem:[%s6842_s22 + $0x108] sm:$0xff] (%p6013_p6), %v5116_v50  ;;  %v5134_v59 = vld [vmem:[%s6643_s16 + $0xd0] sm:$0xff] (%p6013_p6)  ;;  %v5136_v60 = vld [vmem:[%s6643_s16 + $0xd8] sm:$0xff] (%p6013_p6) }
 0x22c   : > { %v4842_v7 = vld [vmem:[#allocation2 + $0x1a8] sm:$0xff]  ;;  %v4844_v8 = vld [vmem:[#allocation2 + $0x1b8] sm:$0xff]  ;;  %4779 = vst.msk [vmem:[#allocation2 + $0x1c8] sm:$0xff] %vm784_vm0, %v4715_v3  ;;  %4781 = vst.msk [vmem:[#allocation2 + $0x1d8] sm:$0xff] %vm784_vm0, %v4717_v4 }
 0x22d   : > { %4906 = vst.msk [vmem:[%s6643_s16 + $0x1a8] sm:$0xff] %vm784_vm0, %v4842_v7  ;;  %4908 = vst.msk [vmem:[%s6643_s16 + $0x1b8] sm:$0xff] %vm784_vm0, %v4844_v8  ;;  %v5138_v61 = vld [vmem:[%s6643_s16 + $0xe0] sm:$0xff] (%p6013_p6)  ;;  %v5140_v62 = vld [vmem:[%s6643_s16 + $0xe8] sm:$0xff] (%p6013_p6) }
 0x22e   : > { %v4841_v11 = vld [vmem:[#allocation2 + $0x1a0] sm:$0xff]  ;;  %v4843_v12 = vld [vmem:[#allocation2 + $0x1b0] sm:$0xff]  ;;  %4778 = vst.msk [vmem:[#allocation2 + $0x1c0] sm:$0xff] %vm784_vm0, %v4714_v9  ;;  %4780 = vst.msk [vmem:[#allocation2 + $0x1d0] sm:$0xff] %vm784_vm0, %v4716_v10 }
 0x22f   : > { %4905 = vst.msk [vmem:[%s6643_s16 + $0x1a0] sm:$0xff] %vm784_vm0, %v4841_v11  ;;  %4907 = vst.msk [vmem:[%s6643_s16 + $0x1b0] sm:$0xff] %vm784_vm0, %v4843_v12  ;;  %v5142_v63 = vld [vmem:[%s6643_s16 + $0xf0] sm:$0xff] (%p6013_p6)  ;;  %v5144_v0 = vld [vmem:[%s6643_s16 + $0xf8] sm:$0xff] (%p6013_p6) }
 0x230   : > { %5119 = vst [vmem:[%s6842_s22 + $0x120] sm:$0xff] (%p6013_p6), %v5118_v51  ;;  %5121 = vst [vmem:[%s6842_s22 + $0x128] sm:$0xff] (%p6013_p6), %v5120_v52  ;;  %v5146_v1 = vld [vmem:[%s6643_s16 + $0x100] sm:$0xff] (%p6013_p6)  ;;  %v5148_v2 = vld [vmem:[%s6643_s16 + $0x108] sm:$0xff] (%p6013_p6) }
 0x231   : > { %v5741_v17 = vpop.f32.mrb[30].mxu0  ;;  %v5748_v18 = vpop.f32.mrb[30].mxu1  ;;  %5123 = vst [vmem:[%s6842_s22 + $0x140] sm:$0xff] (%p6013_p6), %v5122_v53  ;;  %5125 = vst [vmem:[%s6842_s22 + $0x148] sm:$0xff] (%p6013_p6), %v5124_v54  ;;  %v5150_v3 = vld [vmem:[%s6643_s16 + $0x110] sm:$0xff] (%p6013_p6)  ;;  %v5152_v4 = vld [vmem:[%s6643_s16 + $0x118] sm:$0xff] (%p6013_p6) }
 0x232   : > { %v4719_v19 = vadd.f32 %v5741_v17, %v1998_v13  ;;  %v4721_v20 = vadd.f32 %v5748_v18, %v2000_v14  ;;  %v4568_v21 = vpop.f32.mrb[31].mxu0  ;;  %v4649_v22 = vpop.f32.mrb[31].mxu1  ;;  %5127 = vst [vmem:[%s6842_s22 + $0x160] sm:$0xff] (%p6013_p6), %v5126_v55  ;;  %5129 = vst [vmem:[%s6842_s22 + $0x168] sm:$0xff] (%p6013_p6), %v5128_v56  ;;  %v5154_v5 = vld [vmem:[%s6643_s16 + $0x120] sm:$0xff] (%p6013_p6)  ;;  %v5156_v6 = vld [vmem:[%s6643_s16 + $0x128] sm:$0xff] (%p6013_p6) }
 0x233   : > { %v4846_v23 = vld [vmem:[#allocation2 + $0x1c8] sm:$0xff]  ;;  %v4848_v26 = vld [vmem:[#allocation2 + $0x1d8] sm:$0xff]  ;;  %v4718_v27 = vadd.f32 %v4568_v21, %v1997_v15  ;;  %v4720_v28 = vadd.f32 %v4649_v22, %v1999_v16  ;;  %5131 = vst [vmem:[%s6842_s22 + $0x180] sm:$0xff] (%p6013_p6), %v5130_v57  ;;  %5133 = vst [vmem:[%s6842_s22 + $0x188] sm:$0xff] (%p6013_p6), %v5132_v58 }
 0x234   : > { %4910 = vst.msk [vmem:[%s6643_s16 + $0x1c8] sm:$0xff] %vm784_vm0, %v4846_v23  ;;  %4912 = vst.msk [vmem:[%s6643_s16 + $0x1d8] sm:$0xff] %vm784_vm0, %v4848_v26  ;;  %v5158_v7 = vld [vmem:[%s6643_s16 + $0x130] sm:$0xff] (%p6013_p6)  ;;  %v5160_v8 = vld [vmem:[%s6643_s16 + $0x138] sm:$0xff] (%p6013_p6) }
 0x235   : > { %v4845_v29 = vld [vmem:[#allocation2 + $0x1c0] sm:$0xff]  ;;  %v4847_v30 = vld [vmem:[#allocation2 + $0x1d0] sm:$0xff]  ;;  %4783 = vst.msk [vmem:[#allocation2 + $0x1e8] sm:$0xff] %vm784_vm0, %v4719_v19  ;;  %4785 = vst.msk [vmem:[#allocation2 + $0x1f8] sm:$0xff] %vm784_vm0, %v4721_v20 }
 0x236   : > { %4909 = vst.msk [vmem:[%s6643_s16 + $0x1c0] sm:$0xff] %vm784_vm0, %v4845_v29  ;;  %4911 = vst.msk [vmem:[%s6643_s16 + $0x1d0] sm:$0xff] %vm784_vm0, %v4847_v30  ;;  %v5162_v9 = vld [vmem:[%s6643_s16 + $0x140] sm:$0xff] (%p6013_p6)  ;;  %v5164_v10 = vld [vmem:[%s6643_s16 + $0x148] sm:$0xff] (%p6013_p6) }
 0x237   : > { %4782 = vst.msk [vmem:[#allocation2 + $0x1e0] sm:$0xff] %vm784_vm0, %v4718_v27  ;;  %4784 = vst.msk [vmem:[#allocation2 + $0x1f0] sm:$0xff] %vm784_vm0, %v4720_v28  ;;  %v5166_v11 = vld [vmem:[%s6643_s16 + $0x150] sm:$0xff] (%p6013_p6)  ;;  %v5168_v12 = vld [vmem:[%s6643_s16 + $0x158] sm:$0xff] (%p6013_p6) }
 0x238   : > { %5135 = vst [vmem:[%s6842_s22 + $0x1a0] sm:$0xff] (%p6013_p6), %v5134_v59  ;;  %5137 = vst [vmem:[%s6842_s22 + $0x1a8] sm:$0xff] (%p6013_p6), %v5136_v60  ;;  %v5170_v13 = vld [vmem:[%s6643_s16 + $0x160] sm:$0xff] (%p6013_p6)  ;;  %v5172_v14 = vld [vmem:[%s6643_s16 + $0x168] sm:$0xff] (%p6013_p6) }
 0x239   : > { %4923 = sbr.rel (!%p6013_p6) target bundleno = 589 (0x24d), region = 116  ;;  %5139 = vst [vmem:[%s6842_s22 + $0x1c0] sm:$0xff] (%p6013_p6), %v5138_v61  ;;  %5141 = vst [vmem:[%s6842_s22 + $0x1c8] sm:$0xff] (%p6013_p6), %v5140_v62  ;;  %v5174_v15 = vld [vmem:[%s6643_s16 + $0x170] sm:$0xff] (%p6013_p6)  ;;  %v5176_v16 = vld [vmem:[%s6643_s16 + $0x178] sm:$0xff] (%p6013_p6) }
 0x23a   : > { %5143 = vst [vmem:[%s6842_s22 + $0x1e0] sm:$0xff] (%p6013_p6), %v5142_v63  ;;  %5145 = vst [vmem:[%s6842_s22 + $0x1e8] sm:$0xff] (%p6013_p6), %v5144_v0  ;;  %v5178_v17 = vld [vmem:[%s6643_s16 + $0x180] sm:$0xff] (%p6013_p6)  ;;  %v5180_v18 = vld [vmem:[%s6643_s16 + $0x188] sm:$0xff] (%p6013_p6) }
 0x23b   : > { %5147 = vst [vmem:[%s6842_s22 + $0x200] sm:$0xff] (%p6013_p6), %v5146_v1  ;;  %5149 = vst [vmem:[%s6842_s22 + $0x208] sm:$0xff] (%p6013_p6), %v5148_v2  ;;  %v5182_v19 = vld [vmem:[%s6643_s16 + $0x190] sm:$0xff] (%p6013_p6)  ;;  %v5184_v20 = vld [vmem:[%s6643_s16 + $0x198] sm:$0xff] (%p6013_p6) }
 0x23c   : > { %v4850_v31 = vld [vmem:[#allocation2 + $0x1e8] sm:$0xff]  ;;  %v4852_v24 = vld [vmem:[#allocation2 + $0x1f8] sm:$0xff]  ;;  %5151 = vst [vmem:[%s6842_s22 + $0x220] sm:$0xff] (%p6013_p6), %v5150_v3  ;;  %5153 = vst [vmem:[%s6842_s22 + $0x228] sm:$0xff] (%p6013_p6), %v5152_v4 }
 0x23d   : > { %4914 = vst.msk [vmem:[%s6643_s16 + $0x1e8] sm:$0xff] %vm784_vm0, %v4850_v31  ;;  %4916 = vst.msk [vmem:[%s6643_s16 + $0x1f8] sm:$0xff] %vm784_vm0, %v4852_v24  ;;  %v5186_v21 = vld [vmem:[%s6643_s16 + $0x1a0] sm:$0xff] (%p6013_p6)  ;;  %v5188_v22 = vld [vmem:[%s6643_s16 + $0x1a8] sm:$0xff] (%p6013_p6) }
 0x23e   : > { %v4849_v32 = vld [vmem:[#allocation2 + $0x1e0] sm:$0xff]  ;;  %v4851_v25 = vld [vmem:[#allocation2 + $0x1f0] sm:$0xff]  ;;  %5155 = vst [vmem:[%s6842_s22 + $0x240] sm:$0xff] (%p6013_p6), %v5154_v5  ;;  %5157 = vst [vmem:[%s6842_s22 + $0x248] sm:$0xff] (%p6013_p6), %v5156_v6 }
 0x23f   : > { %4913 = vst.msk [vmem:[%s6643_s16 + $0x1e0] sm:$0xff] %vm784_vm0, %v4849_v32  ;;  %4915 = vst.msk [vmem:[%s6643_s16 + $0x1f0] sm:$0xff] %vm784_vm0, %v4851_v25  ;;  %v5190_v23 = vld [vmem:[%s6643_s16 + $0x1b0] sm:$0xff] (%p6013_p6)  ;;  %v5192_v26 = vld [vmem:[%s6643_s16 + $0x1b8] sm:$0xff] (%p6013_p6) }
 0x240   : > { %5159 = vst [vmem:[%s6842_s22 + $0x260] sm:$0xff] %v5158_v7  ;;  %5161 = vst [vmem:[%s6842_s22 + $0x268] sm:$0xff] %v5160_v8  ;;  %v5194_v27 = vld [vmem:[%s6643_s16 + $0x1c0] sm:$0xff]  ;;  %v5196_v28 = vld [vmem:[%s6643_s16 + $0x1c8] sm:$0xff] }
 0x241   : > { %5163 = vst [vmem:[%s6842_s22 + $0x280] sm:$0xff] %v5162_v9  ;;  %5165 = vst [vmem:[%s6842_s22 + $0x288] sm:$0xff] %v5164_v10  ;;  %v5198_v29 = vld [vmem:[%s6643_s16 + $0x1d0] sm:$0xff]  ;;  %v5200_v30 = vld [vmem:[%s6643_s16 + $0x1d8] sm:$0xff] }
 0x242   : > { %5167 = vst [vmem:[%s6842_s22 + $0x2a0] sm:$0xff] %v5166_v11  ;;  %5169 = vst [vmem:[%s6842_s22 + $0x2a8] sm:$0xff] %v5168_v12 }
 0x243   : > { %5171 = vst [vmem:[%s6842_s22 + $0x2c0] sm:$0xff] %v5170_v13  ;;  %5173 = vst [vmem:[%s6842_s22 + $0x2c8] sm:$0xff] %v5172_v14 }
 0x244   : > { %5175 = vst [vmem:[%s6842_s22 + $0x2e0] sm:$0xff] %v5174_v15  ;;  %5177 = vst [vmem:[%s6842_s22 + $0x2e8] sm:$0xff] %v5176_v16  ;;  %v5204_v24 = vld [vmem:[%s6643_s16 + $0x1e8] sm:$0xff]  ;;  %v5208_v25 = vld [vmem:[%s6643_s16 + $0x1f8] sm:$0xff] }
 0x245   : > { %5179 = vst [vmem:[%s6842_s22 + $0x300] sm:$0xff] %v5178_v17  ;;  %5181 = vst [vmem:[%s6842_s22 + $0x308] sm:$0xff] %v5180_v18 }
 0x246   : > { %5183 = vst [vmem:[%s6842_s22 + $0x320] sm:$0xff] %v5182_v19  ;;  %5185 = vst [vmem:[%s6842_s22 + $0x328] sm:$0xff] %v5184_v20  ;;  %v5202_v31 = vld [vmem:[%s6643_s16 + $0x1e0] sm:$0xff]  ;;  %v5206_v32 = vld [vmem:[%s6643_s16 + $0x1f0] sm:$0xff] }
 0x247   : > { %5187 = vst [vmem:[%s6842_s22 + $0x340] sm:$0xff] %v5186_v21  ;;  %5189 = vst [vmem:[%s6842_s22 + $0x348] sm:$0xff] %v5188_v22 }
 0x248   : > { %5191 = vst [vmem:[%s6842_s22 + $0x360] sm:$0xff] %v5190_v23  ;;  %5193 = vst [vmem:[%s6842_s22 + $0x368] sm:$0xff] %v5192_v26 }
 0x249   : > { %5195 = vst [vmem:[%s6842_s22 + $0x380] sm:$0xff] %v5194_v27  ;;  %5197 = vst [vmem:[%s6842_s22 + $0x388] sm:$0xff] %v5196_v28 }
 0x24a   : > { %5199 = vst [vmem:[%s6842_s22 + $0x3a0] sm:$0xff] %v5198_v29  ;;  %5201 = vst [vmem:[%s6842_s22 + $0x3a8] sm:$0xff] %v5200_v30 }
 0x24b   : > { %5203 = vst [vmem:[%s6842_s22 + $0x3c0] sm:$0xff] %v5202_v31  ;;  %5205 = vst [vmem:[%s6842_s22 + $0x3c8] sm:$0xff] %v5204_v24 }
 0x24c   : > { %5207 = vst [vmem:[%s6842_s22 + $0x3e0] sm:$0xff] %v5206_v32  ;;  %5209 = vst [vmem:[%s6842_s22 + $0x3e8] sm:$0xff] %v5208_v25 }
 0x24d PF: > { %s12_s13 = sadd.s32 1, %s5956_s13   ;;  %s6989_s9 = smov %s5944_s10 }
 0x24e   : > { %p9_p11 = scmp.ge.s32.totalorder %s12_s13, 4   ;;  %s6990_s10 = smov %s6018_s20 }
 0x24f   : > { %s6991_s11 = smov %s5952_s12  ;;  %s6992_s12 = smov %s6994_s14 }
 0x250   :  { %11 = sbr.rel (!%p9_p11) target bundleno = 3 (0x3), region = 193 }

// kernel: triangle_multiplication_incoming.5
= control target key start
LH: loop header
LB: loop body
LE: loop exit
PB: predicated region body
PF: predicated region fallthrough
CT: control target
= control target key end

     0   :  { %s3824_s0 = inlined_call_operand.<no memory space> [shape: f32[1], index: 0, kind: input, shape index: {}]   ;;  %s3825_s1 = inlined_call_operand.vmem [shape: f32[32,512], index: 1, kind: input, shape index: {}]   ;;  %s3826_s2 = inlined_call_operand.vmem [shape: f32[512,32], index: 2, kind: input, shape index: {}]   ;;  %s3827_s3 = inlined_call_operand.vmem [shape: f32[1,32], index: 3, kind: input, shape index: {}]   ;;  %s3828_s4 = inlined_call_operand.vmem [shape: f32[1,32], index: 4, kind: input, shape index: {}]   ;;  %s3829_s5 = inlined_call_operand.vmem [shape: f32[32,32], index: 5, kind: input, shape index: {}]   ;;  %s3830_s6 = inlined_call_operand.vmem [shape: f32[1,32], index: 6, kind: input, shape index: {}]   ;;  %s3831_s7 = inlined_call_operand.hbm [shape: f32[512,32], index: 7, kind: output, shape index: {}]  }
   0x1   :  { %v30_v0 = vld [vmem:[%s3825_s1 + $0x10] sm:$0xff]  ;;  %v28_v1 = vld [vmem:[%s3825_s1] sm:$0xff] }
   0x2   :  { %108 = vxpose.xlu1.b32.start [1/4] (short) %v30_v0, 128  ;;  %44 = vxpose.xlu0.b32.start [1/4] (short) %v28_v1, 128  ;;  %v34_v2 = vld [vmem:[%s3825_s1 + $0x30] sm:$0xff]  ;;  %v32_v3 = vld [vmem:[%s3825_s1 + $0x20] sm:$0xff] }
   0x6   :  { %109 = vxpose.xlu1.b32.cont [2/4] (short) %v34_v2, 128  ;;  %45 = vxpose.xlu0.b32.cont [2/4] (short) %v32_v3, 128 }
   0x7   :  { %13 = vsyncpa [#allocation4], 0  ;;  %v38_v4 = vld [vmem:[%s3825_s1 + $0x50] sm:$0xff]  ;;  %v36_v5 = vld [vmem:[%s3825_s1 + $0x40] sm:$0xff]  ;;  %v2513_v28 = vstv %s3824_s0  ;;  %vm238_vm0 = vcmask 261120   ;;  %s2419_s11 = smov [#allocation3]  }
   0x8   :  { %v42_v6 = vld [vmem:[%s3825_s1 + $0x70] sm:$0xff]  ;;  %v40_v7 = vld [vmem:[%s3825_s1 + $0x60] sm:$0xff]  ;;  %v31_v8 = vld [vmem:[%s3825_s1 + $0x18] sm:$0xff]  ;;  %s1999_s0 = sshll.u32 %s2419_s11, 4  ;;  %s2000_s0 = int_to_ptr.vmem [resolvable:$true] %s1999_s0 }
   0x9   :  { %v29_v9 = vld [vmem:[%s3825_s1 + $0x8] sm:$0xff]  ;;  %v35_v10 = vld [vmem:[%s3825_s1 + $0x38] sm:$0xff]  ;;  %s2395_s13 = scalar_lea.vmem %s2000_s0, 8192  ;;  %p2400_p1 = scmp.lt.s32.totalorder %s2000_s0, %s2000_s0 }
   0xa   :  { %110 = vxpose.xlu1.b32.cont [3/4] (short) %v38_v4, 128  ;;  %46 = vxpose.xlu0.b32.cont [3/4] (short) %v36_v5, 128  ;;  %v33_v11 = vld [vmem:[%s3825_s1 + $0x28] sm:$0xff]  ;;  %v39_v12 = vld [vmem:[%s3825_s1 + $0x58] sm:$0xff]  ;;  %p2396_p0 = scmp.ne.s32.totalorder %s2000_s0, %s2395_s13  ;;  %p2401_p2 = scmp.lt.s32.totalorder %s2395_s13, %s2395_s13 }
   0xb   :  { %v37_v13 = vld [vmem:[%s3825_s1 + $0x48] sm:$0xff]  ;;  %v43_v14 = vld [vmem:[%s3825_s1 + $0x78] sm:$0xff] }
   0xc   :  { %v41_v15 = vld [vmem:[%s3825_s1 + $0x68] sm:$0xff]  ;;  %p2402_p3 = por %p2401_p2, %p2400_p1 }
   0xe   :  { %111 = vxpose.xlu1.b32.end [4/4] (short) %v42_v6, 128  ;;  %47 = vxpose.xlu0.b32.end [4/4] (short) %v40_v7, 128  ;;  %p2403_p4 = pnand %p2402_p3, %p2396_p0 }
  0x3f   :  { %140 = vxpose.xlu1.b32.start [1/4] (short) %v31_v8, 128  ;;  %76 = vxpose.xlu0.b32.start [1/4] (short) %v29_v9, 128 }
  0x43   :  { %141 = vxpose.xlu1.b32.cont [2/4] (short) %v35_v10, 128  ;;  %77 = vxpose.xlu0.b32.cont [2/4] (short) %v33_v11, 128 }
  0x47   :  { %142 = vxpose.xlu1.b32.cont [3/4] (short) %v39_v12, 128  ;;  %78 = vxpose.xlu0.b32.cont [3/4] (short) %v37_v13, 128 }
  0x4b   :  { %143 = vxpose.xlu1.b32.end [4/4] (short) %v43_v14, 128  ;;  %79 = vxpose.xlu0.b32.end [4/4] (short) %v41_v15, 128 }
  0x82   :  { %v124_v16 = vpop.trf.xlu1  ;;  %v60_v17 = vpop.trf.xlu0 }
  0x83   :  { %v2516_v31 = vmul.f32 %v2513_v28, %v124_v16  ;;  %v2524_v38 = vmul.f32 %v2513_v28, %v60_v17 }
  0x85   :  { %v335_v34 = vsel %vm238_vm0, %v2516_v31, 0.0  ;;  %v239_v44 = vsel %vm238_vm0, %v2524_v38, 0.0 }
  0x86   :  { %v61_v18 = vpop.trf.xlu0  ;;  %v125_v19 = vpop.trf.xlu1 }
  0x87   :  { %v2521_v35 = vmul.f32 %v2513_v28, %v61_v18  ;;  %v2527_v39 = vmul.f32 %v2513_v28, %v125_v19 }
  0x89   :  { %v242_v40 = vsel %vm238_vm0, %v2521_v35, 0.0  ;;  %v338_v46 = vsel %vm238_vm0, %v2527_v39, 0.0 }
  0x8a   :  { %v62_v20 = vpop.trf.xlu0  ;;  %v126_v21 = vpop.trf.xlu1 }
  0x8b   :  { %v2532_v41 = vmul.f32 %v2513_v28, %v62_v20  ;;  %v2537_v45 = vmul.f32 %v2513_v28, %v126_v21 }
  0x8d   :  { %v245_v47 = vsel %vm238_vm0, %v2532_v41, 0.0  ;;  %v341_v52 = vsel %vm238_vm0, %v2537_v45, 0.0 }
  0x8e   :  { %v63_v22 = vpop.trf.xlu0  ;;  %v127_v23 = vpop.trf.xlu1 }
  0x8f   :  { %v2544_v48 = vmul.f32 %v2513_v28, %v63_v22  ;;  %v2547_v51 = vmul.f32 %v2513_v28, %v127_v23 }
  0x91   :  { %v248_v53 = vsel %vm238_vm0, %v2544_v48, 0.0  ;;  %v344_v58 = vsel %vm238_vm0, %v2547_v51, 0.0 }
  0x92   :  { %v64_v24 = vpop.trf.xlu0  ;;  %v128_v25 = vpop.trf.xlu1 }
  0x93   :  { %v2554_v54 = vmul.f32 %v2513_v28, %v64_v24  ;;  %v2557_v57 = vmul.f32 %v2513_v28, %v128_v25 }
  0x95   :  { %v251_v59 = vsel %vm238_vm0, %v2554_v54, 0.0  ;;  %v347_v0 = vsel %vm238_vm0, %v2557_v57, 0.0 }
  0x96   :  { %v65_v26 = vpop.trf.xlu0  ;;  %v129_v27 = vpop.trf.xlu1 }
  0x97   :  { %v2564_v60 = vmul.f32 %v2513_v28, %v65_v26  ;;  %v2567_v63 = vmul.f32 %v2513_v28, %v129_v27 }
  0x99   :  { %v254_v1 = vsel %vm238_vm0, %v2564_v60, 0.0  ;;  %v350_v6 = vsel %vm238_vm0, %v2567_v63, 0.0 }
  0x9a   :  { %v66_v29 = vpop.trf.xlu0  ;;  %v130_v30 = vpop.trf.xlu1 }
  0x9b   :  { %v2574_v2 = vmul.f32 %v2513_v28, %v66_v29  ;;  %v2577_v5 = vmul.f32 %v2513_v28, %v130_v30 }
  0x9d   :  { %v257_v7 = vsel %vm238_vm0, %v2574_v2, 0.0  ;;  %v353_v12 = vsel %vm238_vm0, %v2577_v5, 0.0 }
  0x9e   :  { %v67_v32 = vpop.trf.xlu0  ;;  %v131_v33 = vpop.trf.xlu1 }
  0x9f   :  { %v2584_v8 = vmul.f32 %v2513_v28, %v67_v32  ;;  %v2587_v11 = vmul.f32 %v2513_v28, %v131_v33 }
  0xa1   :  { %v260_v13 = vsel %vm238_vm0, %v2584_v8, 0.0  ;;  %v356_v18 = vsel %vm238_vm0, %v2587_v11, 0.0 }
  0xa2   :  { %336 = vadd.xlane.f32.xlu1 %v335_v34  ;;  %v68_v36 = vpop.trf.xlu0  ;;  %v132_v37 = vpop.trf.xlu1 }
  0xa3   :  { %v2594_v14 = vmul.f32 %v2513_v28, %v68_v36  ;;  %v2597_v17 = vmul.f32 %v2513_v28, %v132_v37 }
  0xa5   :  { %v263_v19 = vsel %vm238_vm0, %v2594_v14, 0.0  ;;  %v359_v24 = vsel %vm238_vm0, %v2597_v17, 0.0 }
  0xa6   :  { %243 = vadd.xlane.f32.xlu1 %v242_v40  ;;  %v69_v42 = vpop.trf.xlu0  ;;  %v133_v43 = vpop.trf.xlu1 }
  0xa7   :  { %v2604_v20 = vmul.f32 %v2513_v28, %v69_v42  ;;  %v2607_v23 = vmul.f32 %v2513_v28, %v133_v43 }
  0xa8   :  { %240 = vadd.xlane.f32.xlu0 %v239_v44 }
  0xa9   :  { %v266_v25 = vsel %vm238_vm0, %v2604_v20, 0.0  ;;  %v362_v32 = vsel %vm238_vm0, %v2607_v23, 0.0 }
  0xaa   :  { %339 = vadd.xlane.f32.xlu1 %v338_v46  ;;  %v70_v49 = vpop.trf.xlu0  ;;  %v134_v50 = vpop.trf.xlu1 }
  0xab   :  { %v2614_v26 = vmul.f32 %v2513_v28, %v70_v49  ;;  %v2617_v30 = vmul.f32 %v2513_v28, %v134_v50 }
  0xac   :  { %246 = vadd.xlane.f32.xlu0 %v245_v47 }
  0xad   :  { %v269_v33 = vsel %vm238_vm0, %v2614_v26, 0.0  ;;  %v365_v42 = vsel %vm238_vm0, %v2617_v30, 0.0 }
  0xae   :  { %342 = vadd.xlane.f32.xlu1 %v341_v52  ;;  %v71_v55 = vpop.trf.xlu0  ;;  %v135_v56 = vpop.trf.xlu1 }
  0xaf   :  { %v2624_v34 = vmul.f32 %v2513_v28, %v71_v55  ;;  %v2627_v40 = vmul.f32 %v2513_v28, %v135_v56 }
  0xb0   :  { %249 = vadd.xlane.f32.xlu0 %v248_v53 }
  0xb1   :  { %v272_v43 = vsel %vm238_vm0, %v2624_v34, 0.0  ;;  %v368_v49 = vsel %vm238_vm0, %v2627_v40, 0.0 }
  0xb2   :  { %345 = vadd.xlane.f32.xlu1 %v344_v58  ;;  %v72_v61 = vpop.trf.xlu0  ;;  %v136_v62 = vpop.trf.xlu1 }
  0xb3   :  { %v2634_v44 = vmul.f32 %v2513_v28, %v72_v61  ;;  %v2637_v47 = vmul.f32 %v2513_v28, %v136_v62 }
  0xb4   :  { %252 = vadd.xlane.f32.xlu0 %v251_v59 }
  0xb5   :  { %v275_v52 = vsel %vm238_vm0, %v2634_v44, 0.0  ;;  %v371_v56 = vsel %vm238_vm0, %v2637_v47, 0.0 }
  0xb6   :  { %348 = vadd.xlane.f32.xlu1 %v347_v0  ;;  %v73_v3 = vpop.trf.xlu0  ;;  %v137_v4 = vpop.trf.xlu1 }
  0xb7   :  { %v2644_v53 = vmul.f32 %v2513_v28, %v73_v3  ;;  %v2647_v55 = vmul.f32 %v2513_v28, %v137_v4 }
  0xb8   :  { %255 = vadd.xlane.f32.xlu0 %v254_v1 }
  0xb9   :  { %v278_v59 = vsel %vm238_vm0, %v2644_v53, 0.0  ;;  %v374_v1 = vsel %vm238_vm0, %v2647_v55, 0.0 }
  0xba   :  { %351 = vadd.xlane.f32.xlu1 %v350_v6  ;;  %v74_v9 = vpop.trf.xlu0  ;;  %v138_v10 = vpop.trf.xlu1 }
  0xbb   :  { %v2654_v61 = vmul.f32 %v2513_v28, %v74_v9  ;;  %v2657_v0 = vmul.f32 %v2513_v28, %v138_v10 }
  0xbc   :  { %258 = vadd.xlane.f32.xlu0 %v257_v7 }
  0xbd   :  { %v281_v3 = vsel %vm238_vm0, %v2654_v61, 0.0  ;;  %v377_v9 = vsel %vm238_vm0, %v2657_v0, 0.0 }
  0xbe   :  { %354 = vadd.xlane.f32.xlu1 %v353_v12  ;;  %v75_v15 = vpop.trf.xlu0  ;;  %v139_v16 = vpop.trf.xlu1 }
  0xbf   :  { %v2664_v4 = vmul.f32 %v2513_v28, %v75_v15  ;;  %v2667_v7 = vmul.f32 %v2513_v28, %v139_v16 }
  0xc0   :  { %261 = vadd.xlane.f32.xlu0 %v260_v13 }
  0xc1   :  { %v284_v12 = vsel %vm238_vm0, %v2664_v4, 0.0 }
  0xc2   :  { %357 = vadd.xlane.f32.xlu1 %v356_v18  ;;  %v92_v21 = vpop.trf.xlu0  ;;  %v156_v22 = vpop.trf.xlu1  ;;  %v380_v18 = vsel %vm238_vm0, %v2667_v7, 0.0 }
  0xc3   :  { %v2674_v13 = vmul.f32 %v2513_v28, %v92_v21  ;;  %v2677_v15 = vmul.f32 %v2513_v28, %v156_v22 }
  0xc4   :  { %264 = vadd.xlane.f32.xlu0 %v263_v19 }
  0xc5   :  { %v287_v19 = vsel %vm238_vm0, %v2674_v13, 0.0  ;;  %v383_v22 = vsel %vm238_vm0, %v2677_v15, 0.0 }
  0xc6   :  { %360 = vadd.xlane.f32.xlu1 %v359_v24  ;;  %v93_v27 = vpop.trf.xlu0  ;;  %v157_v29 = vpop.trf.xlu1 }
  0xc7   :  { %v2684_v24 = vmul.f32 %v2513_v28, %v93_v27  ;;  %v2687_v21 = vmul.f32 %v2513_v28, %v157_v29 }
  0xc8   :  { %267 = vadd.xlane.f32.xlu0 %v266_v25 }
  0xca   :  { %363 = vadd.xlane.f32.xlu1 %v362_v32  ;;  %v94_v36 = vpop.trf.xlu0  ;;  %v158_v37 = vpop.trf.xlu1  ;;  %v290_v32 = vsel %vm238_vm0, %v2684_v24, 0.0 }
  0xcb   :  { %v2697_v27 = vmul.f32 %v2513_v28, %v158_v37 }
  0xcc   :  { %270 = vadd.xlane.f32.xlu0 %v269_v33  ;;  %v2694_v33 = vmul.f32 %v2513_v28, %v94_v36 }
  0xce   :  { %366 = vadd.xlane.f32.xlu1 %v365_v42  ;;  %v95_v46 = vpop.trf.xlu0  ;;  %v159_v50 = vpop.trf.xlu1 }
  0xcf   :  { %v2707_v36 = vmul.f32 %v2513_v28, %v159_v50 }
  0xd0   :  { %273 = vadd.xlane.f32.xlu0 %v272_v43  ;;  %v386_v43 = vsel %vm238_vm0, %v2687_v21, 0.0 }
  0xd1   :  { %v392_v50 = vsel %vm238_vm0, %v2707_v36, 0.0 }
  0xd2   :  { %369 = vadd.xlane.f32.xlu1 %v368_v49  ;;  %v96_v58 = vpop.trf.xlu0  ;;  %v160_v62 = vpop.trf.xlu1  ;;  %v293_v49 = vsel %vm238_vm0, %v2694_v33, 0.0 }
  0xd4   :  { %276 = vadd.xlane.f32.xlu0 %v275_v52  ;;  %v2704_v52 = vmul.f32 %v2513_v28, %v95_v46  ;;  %v2717_v46 = vmul.f32 %v2513_v28, %v160_v62 }
  0xd6   :  { %372 = vadd.xlane.f32.xlu1 %v371_v56  ;;  %v97_v6 = vpop.trf.xlu0  ;;  %v161_v10 = vpop.trf.xlu1  ;;  %v389_v56 = vsel %vm238_vm0, %v2697_v27, 0.0 }
  0xd8   :  { %279 = vadd.xlane.f32.xlu0 %v278_v59  ;;  %v296_v59 = vsel %vm238_vm0, %v2704_v52, 0.0 }
  0xda   :  { %375 = vadd.xlane.f32.xlu1 %v374_v1  ;;  %v98_v16 = vpop.trf.xlu0  ;;  %v162_v25 = vpop.trf.xlu1  ;;  %v2714_v1 = vmul.f32 %v2513_v28, %v96_v58  ;;  %v2727_v58 = vmul.f32 %v2513_v28, %v161_v10 }
  0xdc   :  { %282 = vadd.xlane.f32.xlu0 %v281_v3 }
  0xde   :  { %378 = vadd.xlane.f32.xlu1 %v377_v9  ;;  %v99_v42 = vpop.trf.xlu0  ;;  %v163_v29 = vpop.trf.xlu1  ;;  %v299_v9 = vsel %vm238_vm0, %v2714_v1, 0.0 }
  0xe0   :  { %285 = vadd.xlane.f32.xlu0 %v284_v12  ;;  %v2724_v12 = vmul.f32 %v2513_v28, %v97_v6  ;;  %v2737_v6 = vmul.f32 %v2513_v28, %v162_v25 }
  0xe2   :  { %381 = vadd.xlane.f32.xlu1 %v380_v18  ;;  %v100_v37 = vpop.trf.xlu0  ;;  %v164_v3 = vpop.trf.xlu1  ;;  %v401_v25 = vsel %vm238_vm0, %v2737_v6, 0.0 }
  0xe4   :  { %288 = vadd.xlane.f32.xlu0 %v287_v19  ;;  %v395_v19 = vsel %vm238_vm0, %v2717_v46, 0.0 }
  0xe6   :  { %384 = vadd.xlane.f32.xlu1 %v383_v22  ;;  %v101_v18 = vpop.trf.xlu0  ;;  %v165_v62 = vpop.trf.xlu1  ;;  %v302_v22 = vsel %vm238_vm0, %v2724_v12, 0.0 }
  0xe8   :  { %291 = vadd.xlane.f32.xlu0 %v290_v32  ;;  %v2734_v32 = vmul.f32 %v2513_v28, %v98_v16  ;;  %v2747_v16 = vmul.f32 %v2513_v28, %v163_v29 }
  0xea   :  { %387 = vadd.xlane.f32.xlu1 %v386_v43  ;;  %v398_v43 = vsel %vm238_vm0, %v2727_v58, 0.0  ;;  %v102_v10 = vpop.trf.xlu0  ;;  %3864 = vst [vmem:[#allocation6_spill] sm:$0xff] %v2747_v16 }
  0xec   :  { %294 = vadd.xlane.f32.xlu0 %v293_v49  ;;  %v305_v49 = vsel %vm238_vm0, %v2734_v32, 0.0 }
  0xee   :  { %390 = vadd.xlane.f32.xlu1 %v389_v56  ;;  %v2744_v56 = vmul.f32 %v2513_v28, %v99_v42  ;;  %v2757_v42 = vmul.f32 %v2513_v28, %v164_v3 }
  0xf0   :  { %297 = vadd.xlane.f32.xlu0 %v296_v59  ;;  %v166_v59 = vpop.trf.xlu1 }
  0xf2   :  { %393 = vadd.xlane.f32.xlu1 %v392_v50  ;;  %v308_v50 = vsel %vm238_vm0, %v2744_v56, 0.0 }
  0xf4   :  { %300 = vadd.xlane.f32.xlu0 %v299_v9  ;;  %v2754_v9 = vmul.f32 %v2513_v28, %v100_v37  ;;  %v167_v29 = vpop.trf.xlu1  ;;  %v2767_v37 = vmul.f32 %v2513_v28, %v165_v62 }
  0xf6   :  { %396 = vadd.xlane.f32.xlu1 %v395_v19  ;;  %3865 = vst [vmem:[#allocation7_spill] sm:$0xff] %v2754_v9  ;;  %v103_v19 = vpop.trf.xlu0  ;;  %3867 = vst [vmem:[#allocation9_spill] sm:$0xff] %v2767_v37  ;;  %v410_v62 = vsel %vm238_vm0, %v2767_v37, 0.0 }
  0xf8   :  { %303 = vadd.xlane.f32.xlu0 %v302_v22  ;;  %v404_v22 = vsel %vm238_vm0, %v2747_v16, 0.0 }
  0xfa   :  { %399 = vadd.xlane.f32.xlu1 %v398_v43  ;;  %v311_v43 = vsel %vm238_vm0, %v2754_v9, 0.0  ;;  %v104_v3 = vpop.trf.xlu0  ;;  %v168_v9 = vpop.trf.xlu1 }
  0xfc   :  { %306 = vadd.xlane.f32.xlu0 %v305_v49  ;;  %v2764_v49 = vmul.f32 %v2513_v28, %v101_v18  ;;  %v2777_v18 = vmul.f32 %v2513_v28, %v166_v59 }
  0xfe   :  { %402 = vadd.xlane.f32.xlu1 %v401_v25  ;;  %3866 = vst [vmem:[#allocation8_spill] sm:$0xff] %v2764_v49  ;;  %v407_v25 = vsel %vm238_vm0, %v2757_v42, 0.0  ;;  %v314_v16 = vsel %vm238_vm0, %v2764_v49, 0.0  ;;  %3868 = vst [vmem:[#allocation10_spill] sm:$0xff] %v2777_v18  ;;  %v105_v49 = vpop.trf.xlu0  ;;  %v169_v59 = vpop.trf.xlu1 }
 0x100   :  { %309 = vadd.xlane.f32.xlu0 %v308_v50  ;;  %v2774_v50 = vmul.f32 %v2513_v28, %v102_v10  ;;  %v2787_v10 = vmul.f32 %v2513_v28, %v167_v29 }
 0x102   :  { %405 = vadd.xlane.f32.xlu1 %v404_v22  ;;  %v317_v22 = vsel %vm238_vm0, %v2774_v50, 0.0  ;;  %v106_v29 = vpop.trf.xlu0 }
 0x104   :  { %312 = vadd.xlane.f32.xlu0 %v311_v43  ;;  %v2784_v43 = vmul.f32 %v2513_v28, %v103_v19  ;;  %v2797_v19 = vmul.f32 %v2513_v28, %v168_v9 }
 0x106   :  { %408 = vadd.xlane.f32.xlu1 %v407_v25  ;;  %3869 = vst [vmem:[#allocation11_spill] sm:$0xff] %v2784_v43  ;;  %v413_v25 = vsel %vm238_vm0, %v2777_v18, 0.0  ;;  %v320_v37 = vsel %vm238_vm0, %v2784_v43, 0.0  ;;  %3871 = vst [vmem:[#allocation13_spill] sm:$0xff] %v2797_v19  ;;  %v170_v43 = vpop.trf.xlu1  ;;  %v419_v9 = vsel %vm238_vm0, %v2797_v19, 0.0 }
 0x108   :  { %315 = vadd.xlane.f32.xlu0 %v314_v16  ;;  %v2794_v16 = vmul.f32 %v2513_v28, %v104_v3  ;;  %v2807_v3 = vmul.f32 %v2513_v28, %v169_v59 }
 0x10a   :  { %411 = vadd.xlane.f32.xlu1 %v410_v62  ;;  %3870 = vst [vmem:[#allocation12_spill] sm:$0xff] %v2794_v16  ;;  %v416_v62 = vsel %vm238_vm0, %v2787_v10, 0.0  ;;  %v323_v18 = vsel %vm238_vm0, %v2794_v16, 0.0  ;;  %3872 = vst [vmem:[#allocation14_spill] sm:$0xff] %v2807_v3  ;;  %v107_v16 = vpop.trf.xlu0  ;;  %v171_v59 = vpop.trf.xlu1 }
 0x10c   :  { %318 = vadd.xlane.f32.xlu0 %v317_v22  ;;  %v2804_v22 = vmul.f32 %v2513_v28, %v105_v49  ;;  %v2817_v49 = vmul.f32 %v2513_v28, %v170_v43 }
 0x10e   :  { %414 = vadd.xlane.f32.xlu1 %v413_v25  ;;  %v326_v25 = vsel %vm238_vm0, %v2804_v22, 0.0  ;;  %3874 = vst [vmem:[#allocation16_spill] sm:$0xff] %v2817_v49 }
 0x110   :  { %321 = vadd.xlane.f32.xlu0 %v320_v37  ;;  %v2814_v37 = vmul.f32 %v2513_v28, %v106_v29  ;;  %v2827_v29 = vmul.f32 %v2513_v28, %v171_v59 }
 0x112   :  { %417 = vadd.xlane.f32.xlu1 %v416_v62  ;;  %3873 = vst [vmem:[#allocation15_spill] sm:$0xff] %v2814_v37  ;;  %v422_v62 = vsel %vm238_vm0, %v2807_v3, 0.0  ;;  %v329_v19 = vsel %vm238_vm0, %v2814_v37, 0.0 }
 0x114   :  { %324 = vadd.xlane.f32.xlu0 %v323_v18  ;;  %v2824_v18 = vmul.f32 %v2513_v28, %v107_v16 }
 0x116   :  { %420 = vadd.xlane.f32.xlu1 %v419_v9  ;;  %3875 = vst [vmem:[#allocation17_spill] sm:$0xff] %v2824_v18  ;;  %v425_v9 = vsel %vm238_vm0, %v2817_v49, 0.0  ;;  %v332_v43 = vsel %vm238_vm0, %v2824_v18, 0.0 }
 0x118   :  { %327 = vadd.xlane.f32.xlu0 %v326_v25  ;;  %v428_v25 = vsel %vm238_vm0, %v2827_v29, 0.0 }
 0x11a   :  { %423 = vadd.xlane.f32.xlu1 %v422_v62 }
 0x11c   :  { %330 = vadd.xlane.f32.xlu0 %v329_v19 }
 0x11e   :  { %426 = vadd.xlane.f32.xlu1 %v425_v9 }
 0x120   :  { %333 = vadd.xlane.f32.xlu0 %v332_v43 }
 0x122   :  { %429 = vadd.xlane.f32.xlu1 %v428_v25 }
 0x12f   :  { %v337_v37 = vpop.xlane.xlu1 %336 }
 0x130   :  { %v464_v16 = vmul.f32 0.03125, %v337_v37 }
 0x132   :  { %v2836_v62 = vsub.f32 %v2516_v31, %v464_v16 }
 0x133   :  { %v244_v28 = vpop.xlane.xlu1 %243 }
 0x134   :  { %3876 = vst [vmem:[#allocation18_spill] sm:$0xff] %v2836_v62  ;;  %v433_v59 = vmul.f32 0.03125, %v244_v28  ;;  %v592_v49 = vmul.f32 %v2836_v62, %v2836_v62 }
 0x135   :  { %v241_v19 = vpop.xlane.xlu0 %240 }
 0x136   :  { %v432_v3 = vmul.f32 0.03125, %v241_v19  ;;  %v720_v18 = vsel %vm238_vm0, %v592_v49, 0.0  ;;  %v2842_v9 = vsub.f32 %v2521_v35, %v433_v59 }
 0x137   :  { %721 = vadd.xlane.f32.xlu1 %v720_v18  ;;  %v340_v43 = vpop.xlane.xlu1 %339 }
 0x138   :  { %3877 = vst [vmem:[#allocation19_spill] sm:$0xff] %v2842_v9  ;;  %v2845_v25 = vsub.f32 %v2524_v38, %v432_v3  ;;  %v465_v37 = vmul.f32 0.03125, %v340_v43  ;;  %v561_v49 = vmul.f32 %v2842_v9, %v2842_v9 }
 0x139   :  { %v247_v31 = vpop.xlane.xlu0 %246 }
 0x13a   :  { %v2848_v16 = vsub.f32 %v2527_v39, %v465_v37  ;;  %v434_v28 = vmul.f32 0.03125, %v247_v31  ;;  %v560_v62 = vmul.f32 %v2845_v25, %v2845_v25  ;;  %v627_v9 = vsel %vm238_vm0, %v561_v49, 0.0 }
 0x13b   :  { %v343_v19 = vpop.xlane.xlu1 %342 }
 0x13c   :  { %v2855_v35 = vsub.f32 %v2532_v41, %v434_v28  ;;  %v466_v18 = vmul.f32 0.03125, %v343_v19  ;;  %v624_v38 = vsel %vm238_vm0, %v560_v62, 0.0  ;;  %v593_v3 = vmul.f32 %v2848_v16, %v2848_v16 }
 0x13d   :  { %625 = vadd.xlane.f32.xlu0 %v624_v38  ;;  %v250_v39 = vpop.xlane.xlu0 %249 }
 0x13e   :  { %v2861_v59 = vsub.f32 %v2537_v45, %v466_v18  ;;  %v435_v43 = vmul.f32 0.03125, %v250_v39  ;;  %v723_v37 = vsel %vm238_vm0, %v593_v3, 0.0  ;;  %v562_v19 = vmul.f32 %v2855_v35, %v2855_v35 }
 0x13f   :  { %724 = vadd.xlane.f32.xlu1 %v723_v37  ;;  %v346_v31 = vpop.xlane.xlu1 %345 }
 0x140   :  { %v2866_v41 = vsub.f32 %v2544_v48, %v435_v43  ;;  %v467_v28 = vmul.f32 0.03125, %v346_v31  ;;  %v594_v62 = vmul.f32 %v2861_v59, %v2861_v59  ;;  %v630_v37 = vsel %vm238_vm0, %v562_v19, 0.0 }
 0x141   :  { %628 = vadd.xlane.f32.xlu0 %v627_v9  ;;  %v253_v45 = vpop.xlane.xlu0 %252 }
 0x142   :  { %v2873_v18 = vsub.f32 %v2547_v51, %v467_v28  ;;  %v436_v38 = vmul.f32 0.03125, %v253_v45  ;;  %v726_v3 = vsel %vm238_vm0, %v594_v62, 0.0  ;;  %v563_v48 = vmul.f32 %v2866_v41, %v2866_v41 }
 0x143   :  { %727 = vadd.xlane.f32.xlu1 %v726_v3  ;;  %v349_v49 = vpop.xlane.xlu1 %348 }
 0x144   :  { %v2879_v39 = vsub.f32 %v2554_v54, %v436_v38  ;;  %v468_v43 = vmul.f32 0.03125, %v349_v49  ;;  %v595_v9 = vmul.f32 %v2873_v18, %v2873_v18  ;;  %v633_v3 = vsel %vm238_vm0, %v563_v48, 0.0 }
 0x145   :  { %631 = vadd.xlane.f32.xlu0 %v630_v37  ;;  %v256_v51 = vpop.xlane.xlu0 %255 }
 0x146   :  { %v2885_v31 = vsub.f32 %v2557_v57, %v468_v43  ;;  %v437_v28 = vmul.f32 0.03125, %v256_v51  ;;  %v729_v62 = vsel %vm238_vm0, %v595_v9, 0.0  ;;  %v564_v49 = vmul.f32 %v2879_v39, %v2879_v39 }
 0x147   :  { %730 = vadd.xlane.f32.xlu1 %v729_v62  ;;  %v352_v45 = vpop.xlane.xlu1 %351 }
 0x148   :  { %v2890_v54 = vsub.f32 %v2564_v60, %v437_v28  ;;  %v469_v38 = vmul.f32 0.03125, %v352_v45  ;;  %v596_v19 = vmul.f32 %v2885_v31, %v2885_v31  ;;  %v636_v62 = vsel %vm238_vm0, %v564_v49, 0.0 }
 0x149   :  { %634 = vadd.xlane.f32.xlu0 %v633_v3  ;;  %v259_v57 = vpop.xlane.xlu0 %258 }
 0x14a   :  { %v2897_v43 = vsub.f32 %v2567_v63, %v469_v38  ;;  %v438_v37 = vmul.f32 0.03125, %v259_v57  ;;  %v732_v9 = vsel %vm238_vm0, %v596_v19, 0.0  ;;  %v565_v60 = vmul.f32 %v2890_v54, %v2890_v54 }
 0x14b   :  { %733 = vadd.xlane.f32.xlu1 %v732_v9  ;;  %v355_v48 = vpop.xlane.xlu1 %354 }
 0x14c   :  { %v2903_v51 = vsub.f32 %v2574_v2, %v438_v37  ;;  %v470_v28 = vmul.f32 0.03125, %v355_v48  ;;  %v597_v45 = vmul.f32 %v2897_v43, %v2897_v43  ;;  %v639_v9 = vsel %vm238_vm0, %v565_v60, 0.0 }
 0x14d   :  { %637 = vadd.xlane.f32.xlu0 %v636_v62  ;;  %v262_v63 = vpop.xlane.xlu0 %261 }
 0x14e   :  { %v2909_v3 = vsub.f32 %v2577_v5, %v470_v28  ;;  %v439_v38 = vmul.f32 0.03125, %v262_v63  ;;  %v735_v19 = vsel %vm238_vm0, %v597_v45, 0.0  ;;  %v566_v48 = vmul.f32 %v2903_v51, %v2903_v51 }
 0x14f   :  { %736 = vadd.xlane.f32.xlu1 %v735_v19  ;;  %v358_v57 = vpop.xlane.xlu1 %357 }
 0x150   :  { %v2914_v2 = vsub.f32 %v2584_v8, %v439_v38  ;;  %v471_v37 = vmul.f32 0.03125, %v358_v57  ;;  %v598_v49 = vmul.f32 %v2909_v3, %v2909_v3  ;;  %v642_v19 = vsel %vm238_vm0, %v566_v48, 0.0  ;;  %v1215_v48 = vld [vmem:[%s3829_s5 + $0x8] sm:$0xff] }
 0x151   :  { %640 = vadd.xlane.f32.xlu0 %v639_v9  ;;  %v265_v5 = vpop.xlane.xlu0 %264 }
 0x152   :  { %3878 = vst [vmem:[#allocation20_spill] sm:$0xff] %v2914_v2  ;;  %v2921_v28 = vsub.f32 %v2587_v11, %v471_v37  ;;  %v440_v62 = vmul.f32 0.03125, %v265_v5  ;;  %v738_v45 = vsel %vm238_vm0, %v598_v49, 0.0  ;;  %v567_v8 = vmul.f32 %v2914_v2, %v2914_v2 }
 0x153   :  { %739 = vadd.xlane.f32.xlu1 %v738_v45  ;;  %v361_v60 = vpop.xlane.xlu1 %360 }
 0x154   :  { %v2927_v63 = vsub.f32 %v2594_v14, %v440_v62  ;;  %v472_v38 = vmul.f32 0.03125, %v361_v60  ;;  %v599_v57 = vmul.f32 %v2921_v28, %v2921_v28  ;;  %v645_v45 = vsel %vm238_vm0, %v567_v8, 0.0  ;;  %v1214_v14 = vld [vmem:[%s3829_s5] sm:$0xff] }
 0x155   :  { %643 = vadd.xlane.f32.xlu0 %v642_v19  ;;  %v268_v11 = vpop.xlane.xlu0 %267  ;;  %v2249_v19 = vpack.c.bf16 %v1215_v48, %v1214_v14 }
 0x156   :  { %v2933_v9 = vsub.f32 %v2597_v17, %v472_v38  ;;  %v441_v37 = vmul.f32 0.03125, %v268_v11  ;;  %v741_v49 = vsel %vm238_vm0, %v599_v57, 0.0  ;;  %v568_v38 = vmul.f32 %v2927_v63, %v2927_v63 }
 0x157   :  { %742 = vadd.xlane.f32.xlu1 %v741_v49  ;;  %v364_v5 = vpop.xlane.xlu1 %363  ;;  %2257 = vmatprep.subr.bf16.mxu1 %v2249_v19 }
 0x158   :  { %v2944_v62 = vsub.f32 %v2604_v20, %v441_v37  ;;  %v473_v17 = vmul.f32 0.03125, %v364_v5  ;;  %v600_v60 = vmul.f32 %v2933_v9, %v2933_v9  ;;  %v1216_v37 = vld [vmem:[%s3829_s5 + $0x10] sm:$0xff]  ;;  %v1217_v5 = vld [vmem:[%s3829_s5 + $0x18] sm:$0xff]  ;;  %v648_v14 = vsel %vm238_vm0, %v568_v38, 0.0  ;;  %2259 = vmatpush3.bf16.msra.mxu1 %v2249_v19  ;;  %2250 = vmatprep.subr.bf16.mxu0 %v2249_v19 }
 0x159   :  { %646 = vadd.xlane.f32.xlu0 %v645_v45  ;;  %v271_v8 = vpop.xlane.xlu0 %270  ;;  %2252 = vmatpush3.bf16.msra.mxu0 %v2249_v19 }
 0x15a   :  { %3879 = vst [vmem:[#allocation21_spill] sm:$0xff] %v2944_v62  ;;  %v2951_v57 = vsub.f32 %v2607_v23, %v473_v17  ;;  %v442_v11 = vmul.f32 0.03125, %v271_v8  ;;  %v744_v49 = vsel %vm238_vm0, %v600_v60, 0.0  ;;  %v569_v20 = vmul.f32 %v2944_v62, %v2944_v62 }
 0x15b   :  { %745 = vadd.xlane.f32.xlu1 %v744_v49  ;;  %v367_v2 = vpop.xlane.xlu1 %366  ;;  %v2253_v60 = vpack.c.bf16 %v1217_v5, %v1216_v37 }
 0x15c   :  { %v2963_v23 = vsub.f32 %v2614_v26, %v442_v11  ;;  %v474_v45 = vmul.f32 0.03125, %v367_v2  ;;  %v601_v48 = vmul.f32 %v2951_v57, %v2951_v57  ;;  %v651_v2 = vsel %vm238_vm0, %v569_v20, 0.0 }
 0x15d   :  { %649 = vadd.xlane.f32.xlu0 %v648_v14  ;;  %v274_v17 = vpop.xlane.xlu0 %273  ;;  %2258 = vmatprep.subr.bf16.mxu1 %v2253_v60 }
 0x15e   :  { %v2969_v8 = vsub.f32 %v2617_v30, %v474_v45  ;;  %v443_v49 = vmul.f32 0.03125, %v274_v17  ;;  %v747_v62 = vsel %vm238_vm0, %v601_v48, 0.0  ;;  %v570_v19 = vmul.f32 %v2963_v23, %v2963_v23  ;;  %2260 = vmatpush3.bf16.msra.mxu1 %v2253_v60  ;;  %2254 = vmatprep.subr.bf16.mxu0 %v2253_v60 }
 0x15f   :  { %748 = vadd.xlane.f32.xlu1 %v747_v62  ;;  %v370_v26 = vpop.xlane.xlu1 %369  ;;  %2256 = vmatpush3.bf16.msra.mxu0 %v2253_v60 }
 0x160   :  { %v2974_v38 = vsub.f32 %v2624_v34, %v443_v49  ;;  %v475_v11 = vmul.f32 0.03125, %v370_v26  ;;  %v602_v14 = vmul.f32 %v2969_v8, %v2969_v8  ;;  %v654_v17 = vsel %vm238_vm0, %v570_v19, 0.0 }
 0x161   :  { %652 = vadd.xlane.f32.xlu0 %v651_v2  ;;  %v277_v30 = vpop.xlane.xlu0 %276 }
 0x162   :  { %v2981_v62 = vsub.f32 %v2627_v40, %v475_v11  ;;  %v444_v20 = vmul.f32 0.03125, %v277_v30  ;;  %v750_v37 = vsel %vm238_vm0, %v602_v14, 0.0  ;;  %v571_v5 = vmul.f32 %v2974_v38, %v2974_v38 }
 0x163   :  { %751 = vadd.xlane.f32.xlu1 %v750_v37  ;;  %v373_v34 = vpop.xlane.xlu1 %372 }
 0x164   :  { %v2987_v45 = vsub.f32 %v2634_v44, %v444_v20  ;;  %v476_v48 = vmul.f32 0.03125, %v373_v34  ;;  %v603_v60 = vmul.f32 %v2981_v62, %v2981_v62  ;;  %v657_v14 = vsel %vm238_vm0, %v571_v5, 0.0 }
 0x165   :  { %655 = vadd.xlane.f32.xlu0 %v654_v17  ;;  %v280_v40 = vpop.xlane.xlu0 %279 }
 0x166   :  { %v2993_v49 = vsub.f32 %v2637_v47, %v476_v48  ;;  %v445_v26 = vmul.f32 0.03125, %v280_v40  ;;  %v753_v2 = vsel %vm238_vm0, %v603_v60, 0.0  ;;  %v572_v20 = vmul.f32 %v2987_v45, %v2987_v45 }
 0x167   :  { %754 = vadd.xlane.f32.xlu1 %v753_v2  ;;  %v376_v11 = vpop.xlane.xlu1 %375 }
 0x168   :  { %v2998_v44 = vsub.f32 %v2644_v53, %v445_v26  ;;  %v477_v30 = vmul.f32 0.03125, %v376_v11  ;;  %v604_v19 = vmul.f32 %v2993_v49, %v2993_v49  ;;  %v660_v40 = vsel %vm238_vm0, %v572_v20, 0.0 }
 0x169   :  { %658 = vadd.xlane.f32.xlu0 %v657_v14  ;;  %v283_v47 = vpop.xlane.xlu0 %282 }
 0x16a   :  { %v3005_v37 = vsub.f32 %v2647_v55, %v477_v30  ;;  %v446_v34 = vmul.f32 0.03125, %v283_v47  ;;  %v756_v48 = vsel %vm238_vm0, %v604_v19, 0.0  ;;  %v573_v53 = vmul.f32 %v2998_v44, %v2998_v44 }
 0x16b   :  { %757 = vadd.xlane.f32.xlu1 %v756_v48  ;;  %v379_v5 = vpop.xlane.xlu1 %378 }
 0x16c   :  { %v3011_v17 = vsub.f32 %v2654_v61, %v446_v34  ;;  %v478_v60 = vmul.f32 0.03125, %v379_v5  ;;  %v605_v26 = vmul.f32 %v3005_v37, %v3005_v37  ;;  %v663_v19 = vsel %vm238_vm0, %v573_v53, 0.0 }
 0x16d   :  { %661 = vadd.xlane.f32.xlu0 %v660_v40  ;;  %v286_v55 = vpop.xlane.xlu0 %285 }
 0x16e   :  { %v3017_v2 = vsub.f32 %v2657_v0, %v478_v60  ;;  %v447_v11 = vmul.f32 0.03125, %v286_v55  ;;  %v759_v14 = vsel %vm238_vm0, %v605_v26, 0.0  ;;  %v574_v34 = vmul.f32 %v3011_v17, %v3011_v17 }
 0x16f   :  { %760 = vadd.xlane.f32.xlu1 %v759_v14  ;;  %v382_v30 = vpop.xlane.xlu1 %381 }
 0x170   :  { %v3022_v61 = vsub.f32 %v2664_v4, %v447_v11  ;;  %v479_v47 = vmul.f32 0.03125, %v382_v30  ;;  %v606_v20 = vmul.f32 %v3017_v2, %v3017_v2  ;;  %v666_v55 = vsel %vm238_vm0, %v574_v34, 0.0 }
 0x171   :  { %664 = vadd.xlane.f32.xlu0 %v663_v19  ;;  %v289_v0 = vpop.xlane.xlu0 %288 }
 0x172   :  { %v3029_v48 = vsub.f32 %v2667_v7, %v479_v47  ;;  %v448_v5 = vmul.f32 0.03125, %v289_v0  ;;  %v762_v60 = vsel %vm238_vm0, %v606_v20, 0.0  ;;  %v575_v4 = vmul.f32 %v3022_v61, %v3022_v61 }
 0x173   :  { %763 = vadd.xlane.f32.xlu1 %v762_v60  ;;  %v385_v53 = vpop.xlane.xlu1 %384 }
 0x174   :  { %v3035_v40 = vsub.f32 %v2674_v13, %v448_v5  ;;  %v480_v26 = vmul.f32 0.03125, %v385_v53  ;;  %v607_v11 = vmul.f32 %v3029_v48, %v3029_v48  ;;  %v669_v20 = vsel %vm238_vm0, %v575_v4, 0.0 }
 0x175   :  { %667 = vadd.xlane.f32.xlu0 %v666_v55  ;;  %v292_v7 = vpop.xlane.xlu0 %291 }
 0x176   :  { %v3041_v14 = vsub.f32 %v2677_v15, %v480_v26  ;;  %v449_v30 = vmul.f32 0.03125, %v292_v7  ;;  %v765_v19 = vsel %vm238_vm0, %v607_v11, 0.0  ;;  %v576_v5 = vmul.f32 %v3035_v40, %v3035_v40 }
 0x177   :  { %766 = vadd.xlane.f32.xlu1 %v765_v19  ;;  %v388_v47 = vpop.xlane.xlu1 %387 }
 0x178   :  { %v3046_v13 = vsub.f32 %v2684_v24, %v449_v30  ;;  %v481_v0 = vmul.f32 0.03125, %v388_v47  ;;  %v608_v34 = vmul.f32 %v3041_v14, %v3041_v14  ;;  %v672_v7 = vsel %vm238_vm0, %v576_v5, 0.0 }
 0x179   :  { %670 = vadd.xlane.f32.xlu0 %v669_v20  ;;  %v295_v15 = vpop.xlane.xlu0 %294 }
 0x17a   :  { %v3053_v60 = vsub.f32 %v2687_v21, %v481_v0  ;;  %v450_v53 = vmul.f32 0.03125, %v295_v15  ;;  %v768_v26 = vsel %vm238_vm0, %v608_v34, 0.0  ;;  %v577_v24 = vmul.f32 %v3046_v13, %v3046_v13 }
 0x17b   :  { %769 = vadd.xlane.f32.xlu1 %v768_v26  ;;  %v391_v4 = vpop.xlane.xlu1 %390 }
 0x17c   :  { %v3059_v55 = vsub.f32 %v2694_v33, %v450_v53  ;;  %v482_v11 = vmul.f32 0.03125, %v391_v4  ;;  %v609_v30 = vmul.f32 %v3053_v60, %v3053_v60  ;;  %v675_v34 = vsel %vm238_vm0, %v577_v24, 0.0 }
 0x17d   :  { %673 = vadd.xlane.f32.xlu0 %v672_v7  ;;  %v298_v21 = vpop.xlane.xlu0 %297 }
 0x17e   :  { %v3065_v19 = vsub.f32 %v2697_v27, %v482_v11  ;;  %v451_v47 = vmul.f32 0.03125, %v298_v21  ;;  %v771_v20 = vsel %vm238_vm0, %v609_v30, 0.0  ;;  %v578_v53 = vmul.f32 %v3059_v55, %v3059_v55 }
 0x17f   :  { %772 = vadd.xlane.f32.xlu1 %v771_v20  ;;  %v394_v0 = vpop.xlane.xlu1 %393 }
 0x180   :  { %v3070_v33 = vsub.f32 %v2704_v52, %v451_v47  ;;  %v483_v15 = vmul.f32 0.03125, %v394_v0  ;;  %v610_v5 = vmul.f32 %v3065_v19, %v3065_v19  ;;  %v678_v21 = vsel %vm238_vm0, %v578_v53, 0.0 }
 0x181   :  { %676 = vadd.xlane.f32.xlu0 %v675_v34  ;;  %v301_v27 = vpop.xlane.xlu0 %300 }
 0x182   :  { %v3077_v26 = vsub.f32 %v2707_v36, %v483_v15  ;;  %v452_v4 = vmul.f32 0.03125, %v301_v27  ;;  %v774_v11 = vsel %vm238_vm0, %v610_v5, 0.0  ;;  %v579_v52 = vmul.f32 %v3070_v33, %v3070_v33 }
 0x183   :  { %775 = vadd.xlane.f32.xlu1 %v774_v11  ;;  %v397_v24 = vpop.xlane.xlu1 %396 }
 0x184   :  { %v3083_v7 = vsub.f32 %v2714_v1, %v452_v4  ;;  %v484_v30 = vmul.f32 0.03125, %v397_v24  ;;  %v611_v47 = vmul.f32 %v3077_v26, %v3077_v26  ;;  %v681_v5 = vsel %vm238_vm0, %v579_v52, 0.0 }
 0x185   :  { %679 = vadd.xlane.f32.xlu0 %v678_v21  ;;  %v304_v36 = vpop.xlane.xlu0 %303 }
 0x186   :  { %v3089_v20 = vsub.f32 %v2717_v46, %v484_v30  ;;  %v453_v0 = vmul.f32 0.03125, %v304_v36  ;;  %v777_v34 = vsel %vm238_vm0, %v611_v47, 0.0  ;;  %v580_v4 = vmul.f32 %v3083_v7, %v3083_v7 }
 0x187   :  { %778 = vadd.xlane.f32.xlu1 %v777_v34  ;;  %v400_v15 = vpop.xlane.xlu1 %399 }
 0x188   :  { %v3094_v1 = vsub.f32 %v2724_v12, %v453_v0  ;;  %v485_v27 = vmul.f32 0.03125, %v400_v15  ;;  %v612_v53 = vmul.f32 %v3089_v20, %v3089_v20  ;;  %v684_v36 = vsel %vm238_vm0, %v580_v4, 0.0 }
 0x189   :  { %682 = vadd.xlane.f32.xlu0 %v681_v5  ;;  %v307_v46 = vpop.xlane.xlu0 %306 }
 0x18a   :  { %v3101_v11 = vsub.f32 %v2727_v58, %v485_v27  ;;  %v454_v24 = vmul.f32 0.03125, %v307_v46  ;;  %v780_v30 = vsel %vm238_vm0, %v612_v53, 0.0  ;;  %v581_v12 = vmul.f32 %v3094_v1, %v3094_v1 }
 0x18b   :  { %781 = vadd.xlane.f32.xlu1 %v780_v30  ;;  %v403_v52 = vpop.xlane.xlu1 %402  ;;  %v3880_v30 = vld [vmem:[#allocation6_spill] sm:$0xff] }
 0x18c   :  { %v3107_v21 = vsub.f32 %v2734_v32, %v454_v24  ;;  %v486_v47 = vmul.f32 0.03125, %v403_v52  ;;  %v613_v0 = vmul.f32 %v3101_v11, %v3101_v11  ;;  %v687_v53 = vsel %vm238_vm0, %v581_v12, 0.0 }
 0x18d   :  { %685 = vadd.xlane.f32.xlu0 %v684_v36  ;;  %v310_v58 = vpop.xlane.xlu0 %309 }
 0x18e   :  { %v3113_v34 = vsub.f32 %v2737_v6, %v486_v47  ;;  %v455_v15 = vmul.f32 0.03125, %v310_v58  ;;  %v783_v5 = vsel %vm238_vm0, %v613_v0, 0.0  ;;  %v582_v24 = vmul.f32 %v3107_v21, %v3107_v21  ;;  %v3881_v0 = vld [vmem:[#allocation7_spill] sm:$0xff] }
 0x18f   :  { %784 = vadd.xlane.f32.xlu1 %v783_v5  ;;  %v406_v27 = vpop.xlane.xlu1 %405 }
 0x190   :  { %v3118_v32 = vsub.f32 %v2744_v56, %v455_v15  ;;  %v487_v46 = vmul.f32 0.03125, %v406_v27  ;;  %v614_v4 = vmul.f32 %v3113_v34, %v3113_v34  ;;  %v690_v5 = vsel %vm238_vm0, %v582_v24, 0.0 }
 0x191   :  { %688 = vadd.xlane.f32.xlu0 %v687_v53  ;;  %v313_v6 = vpop.xlane.xlu0 %312 }
 0x192   :  { %v3125_v52 = vsub.f32 %v3880_v30, %v487_v46  ;;  %v456_v47 = vmul.f32 0.03125, %v313_v6  ;;  %v786_v36 = vsel %vm238_vm0, %v614_v4, 0.0  ;;  %v583_v56 = vmul.f32 %v3118_v32, %v3118_v32 }
 0x193   :  { %787 = vadd.xlane.f32.xlu1 %v786_v36  ;;  %v409_v12 = vpop.xlane.xlu1 %408 }
 0x194   :  { %v3131_v58 = vsub.f32 %v3881_v0, %v456_v47  ;;  %v488_v15 = vmul.f32 0.03125, %v409_v12  ;;  %v615_v27 = vmul.f32 %v3125_v52, %v3125_v52  ;;  %v693_v36 = vsel %vm238_vm0, %v583_v56, 0.0  ;;  %v3884_v47 = vld [vmem:[#allocation8_spill] sm:$0xff] }
 0x195   :  { %691 = vadd.xlane.f32.xlu0 %v690_v5  ;;  %v316_v53 = vpop.xlane.xlu0 %315 }
 0x196   :  { %3882 = vst [vmem:[#allocation6_spill] sm:$0xff] %v3131_v58  ;;  %v3137_v46 = vsub.f32 %v2757_v42, %v488_v15  ;;  %v457_v4 = vmul.f32 0.03125, %v316_v53  ;;  %v789_v6 = vsel %vm238_vm0, %v615_v27, 0.0  ;;  %v584_v5 = vmul.f32 %v3131_v58, %v3131_v58  ;;  %v3886_v15 = vld [vmem:[#allocation9_spill] sm:$0xff] }
 0x197   :  { %790 = vadd.xlane.f32.xlu1 %v789_v6  ;;  %v412_v30 = vpop.xlane.xlu1 %411 }
 0x198   :  { %3883 = vst [vmem:[#allocation7_spill] sm:$0xff] %v3137_v46  ;;  %v3142_v0 = vsub.f32 %v3884_v47, %v457_v4  ;;  %v489_v12 = vmul.f32 0.03125, %v412_v30  ;;  %v616_v24 = vmul.f32 %v3137_v46, %v3137_v46  ;;  %v696_v46 = vsel %vm238_vm0, %v584_v5, 0.0 }
 0x199   :  { %694 = vadd.xlane.f32.xlu0 %v693_v36  ;;  %v319_v42 = vpop.xlane.xlu0 %318 }
 0x19a   :  { %3885 = vst [vmem:[#allocation8_spill] sm:$0xff] %v3142_v0  ;;  %v3149_v53 = vsub.f32 %v3886_v15, %v489_v12  ;;  %v458_v27 = vmul.f32 0.03125, %v319_v42  ;;  %v792_v6 = vsel %vm238_vm0, %v616_v24, 0.0  ;;  %v585_v4 = vmul.f32 %v3142_v0, %v3142_v0  ;;  %v3889_v15 = vld [vmem:[#allocation10_spill] sm:$0xff] }
 0x19b   :  { %793 = vadd.xlane.f32.xlu1 %v792_v6  ;;  %v415_v56 = vpop.xlane.xlu1 %414 }
 0x19c   :  { %3887 = vst [vmem:[#allocation9_spill] sm:$0xff] %v3149_v53  ;;  %v3155_v30 = vsub.f32 %v2774_v50, %v458_v27  ;;  %v490_v47 = vmul.f32 0.03125, %v415_v56  ;;  %v617_v36 = vmul.f32 %v3149_v53, %v3149_v53  ;;  %v699_v0 = vsel %vm238_vm0, %v585_v4, 0.0  ;;  %v3891_v50 = vld [vmem:[#allocation11_spill] sm:$0xff] }
 0x19d   :  { %697 = vadd.xlane.f32.xlu0 %v696_v46  ;;  %v322_v12 = vpop.xlane.xlu0 %321  ;;  %v3909_v53 = vld [vmem:[#allocation19_spill] sm:$0xff] }
 0x19e   :  { %3888 = vst [vmem:[#allocation22_spill] sm:$0xff] %v3155_v30  ;;  %v3161_v42 = vsub.f32 %v3889_v15, %v490_v47  ;;  %v459_v24 = vmul.f32 0.03125, %v322_v12  ;;  %v795_v6 = vsel %vm238_vm0, %v617_v36, 0.0  ;;  %v586_v46 = vmul.f32 %v3155_v30, %v3155_v30 }
 0x19f   :  { %796 = vadd.xlane.f32.xlu1 %v795_v6  ;;  %v418_v58 = vpop.xlane.xlu1 %417 }
 0x1a0   :  { %3890 = vst [vmem:[#allocation10_spill] sm:$0xff] %v3161_v42  ;;  %v3166_v27 = vsub.f32 %v3891_v50, %v459_v24  ;;  %v491_v56 = vmul.f32 0.03125, %v418_v58  ;;  %v618_v5 = vmul.f32 %v3161_v42, %v3161_v42  ;;  %v3894_v58 = vld [vmem:[#allocation12_spill] sm:$0xff]  ;;  %v702_v42 = vsel %vm238_vm0, %v586_v46, 0.0 }
 0x1a1   :  { %700 = vadd.xlane.f32.xlu0 %v699_v0  ;;  %v325_v47 = vpop.xlane.xlu0 %324 }
 0x1a2   :  { %3892 = vst [vmem:[#allocation11_spill] sm:$0xff] %v3166_v27  ;;  %v3173_v12 = vsub.f32 %v2787_v10, %v491_v56  ;;  %v460_v36 = vmul.f32 0.03125, %v325_v47  ;;  %v798_v15 = vsel %vm238_vm0, %v618_v5, 0.0  ;;  %v587_v24 = vmul.f32 %v3166_v27, %v3166_v27  ;;  %v3896_v56 = vld [vmem:[#allocation13_spill] sm:$0xff] }
 0x1a3   :  { %799 = vadd.xlane.f32.xlu1 %v798_v15  ;;  %v421_v4 = vpop.xlane.xlu1 %420 }
 0x1a4   :  { %3893 = vst [vmem:[#allocation23_spill] sm:$0xff] %v3173_v12  ;;  %v3179_v6 = vsub.f32 %v3894_v58, %v460_v36  ;;  %v492_v50 = vmul.f32 0.03125, %v421_v4  ;;  %v619_v0 = vmul.f32 %v3173_v12, %v3173_v12  ;;  %v705_v27 = vsel %vm238_vm0, %v587_v24, 0.0 }
 0x1a5   :  { %703 = vadd.xlane.f32.xlu0 %v702_v42  ;;  %v328_v10 = vpop.xlane.xlu0 %327 }
 0x1a6   :  { %3895 = vst [vmem:[#allocation12_spill] sm:$0xff] %v3179_v6  ;;  %v3185_v47 = vsub.f32 %v3896_v56, %v492_v50  ;;  %v461_v5 = vmul.f32 0.03125, %v328_v10  ;;  %v801_v15 = vsel %vm238_vm0, %v619_v0, 0.0  ;;  %v588_v42 = vmul.f32 %v3179_v6, %v3179_v6  ;;  %v3899_v50 = vld [vmem:[#allocation14_spill] sm:$0xff] }
 0x1a7   :  { %802 = vadd.xlane.f32.xlu1 %v801_v15  ;;  %v424_v30 = vpop.xlane.xlu1 %423 }
 0x1a8   :  { %3897 = vst [vmem:[#allocation13_spill] sm:$0xff] %v3185_v47  ;;  %v3190_v36 = vsub.f32 %v2804_v22, %v461_v5  ;;  %v493_v4 = vmul.f32 0.03125, %v424_v30  ;;  %v620_v46 = vmul.f32 %v3185_v47, %v3185_v47  ;;  %v3901_v30 = vld [vmem:[#allocation15_spill] sm:$0xff]  ;;  %v708_v47 = vsel %vm238_vm0, %v588_v42, 0.0 }
 0x1a9   :  { %706 = vadd.xlane.f32.xlu0 %v705_v27  ;;  %v331_v58 = vpop.xlane.xlu0 %330 }
 0x1aa   :  { %3898 = vst [vmem:[#allocation24_spill] sm:$0xff] %v3190_v36  ;;  %v3197_v10 = vsub.f32 %v3899_v50, %v493_v4  ;;  %v462_v0 = vmul.f32 0.03125, %v331_v58  ;;  %v804_v56 = vsel %vm238_vm0, %v620_v46, 0.0  ;;  %v589_v22 = vmul.f32 %v3190_v36, %v3190_v36  ;;  %v3903_v50 = vld [vmem:[#allocation16_spill] sm:$0xff] }
 0x1ab   :  { %805 = vadd.xlane.f32.xlu1 %v804_v56  ;;  %v427_v24 = vpop.xlane.xlu1 %426 }
 0x1ac   :  { %3900 = vst [vmem:[#allocation14_spill] sm:$0xff] %v3197_v10  ;;  %v3203_v5 = vsub.f32 %v3901_v30, %v462_v0  ;;  %v494_v15 = vmul.f32 0.03125, %v427_v24  ;;  %v621_v27 = vmul.f32 %v3197_v10, %v3197_v10  ;;  %v711_v36 = vsel %vm238_vm0, %v589_v22, 0.0  ;;  %v3905_v0 = vld [vmem:[#allocation17_spill] sm:$0xff] }
 0x1ad   :  { %709 = vadd.xlane.f32.xlu0 %v708_v47  ;;  %v334_v4 = vpop.xlane.xlu0 %333 }
 0x1ae   :  { %3902 = vst [vmem:[#allocation15_spill] sm:$0xff] %v3203_v5  ;;  %v3209_v58 = vsub.f32 %v3903_v50, %v494_v15  ;;  %v463_v46 = vmul.f32 0.03125, %v334_v4  ;;  %v807_v56 = vsel %vm238_vm0, %v621_v27, 0.0  ;;  %v590_v47 = vmul.f32 %v3203_v5, %v3203_v5 }
 0x1af   :  { %808 = vadd.xlane.f32.xlu1 %v807_v56  ;;  %v430_v6 = vpop.xlane.xlu1 %429 }
 0x1b0   :  { %3904 = vst [vmem:[#allocation16_spill] sm:$0xff] %v3209_v58  ;;  %v3214_v30 = vsub.f32 %v3905_v0, %v463_v46  ;;  %v495_v24 = vmul.f32 0.03125, %v430_v6  ;;  %v622_v42 = vmul.f32 %v3209_v58, %v3209_v58  ;;  %v714_v4 = vsel %vm238_vm0, %v590_v47, 0.0 }
 0x1b1   :  { %712 = vadd.xlane.f32.xlu0 %v711_v36 }
 0x1b2   :  { %3906 = vst [vmem:[#allocation17_spill] sm:$0xff] %v3214_v30  ;;  %v3221_v15 = vsub.f32 %v2827_v29, %v495_v24  ;;  %v810_v27 = vsel %vm238_vm0, %v622_v42, 0.0  ;;  %v591_v6 = vmul.f32 %v3214_v30, %v3214_v30 }
 0x1b3   :  { %811 = vadd.xlane.f32.xlu1 %v810_v27 }
 0x1b4   :  { %3907 = vst [vmem:[#allocation25_spill] sm:$0xff] %v3221_v15  ;;  %v623_v22 = vmul.f32 %v3221_v15, %v3221_v15  ;;  %v717_v36 = vsel %vm238_vm0, %v591_v6, 0.0 }
 0x1b5   :  { %715 = vadd.xlane.f32.xlu0 %v714_v4 }
 0x1b6   :  { %v813_v50 = vsel %vm238_vm0, %v623_v22, 0.0 }
 0x1b7   :  { %814 = vadd.xlane.f32.xlu1 %v813_v50 }
 0x1b9   :  { %718 = vadd.xlane.f32.xlu0 %v717_v36 }
 0x1c4   :  { %v722_v29 = vpop.xlane.xlu1 %721 }
 0x1c5   :  { %v848_v46 = vmul.f32 0.03125, %v722_v29 }
 0x1c7   :  { %v912_v56 = vadd.f32 1e-05, %v848_v46  ;;  %v3234_v46 = vld [vmem:[%s3827_s3] ss:$0 sm:$0xff] }
 0x1c9   :  { %2265 = vrsqrt.f32 %v912_v56 }
 0x1ca   :  { %v626_v0 = vpop.xlane.xlu0 %625 }
 0x1cb   :  { %v816_v24 = vmul.f32 0.03125, %v626_v0  ;;  %v3908_v0 = vld [vmem:[#allocation18_spill] sm:$0xff] }
 0x1cc   :  { %v725_v42 = vpop.xlane.xlu1 %724 }
 0x1cd   :  { %v880_v47 = vadd.f32 1e-05, %v816_v24  ;;  %v849_v27 = vmul.f32 0.03125, %v725_v42 }
 0x1ce   :  { %v629_v15 = vpop.xlane.xlu0 %628 }
 0x1cf   :  { %2267 = vrsqrt.f32 %v880_v47  ;;  %v913_v5 = vadd.f32 1e-05, %v849_v27  ;;  %v817_v30 = vmul.f32 0.03125, %v629_v15 }
 0x1d0   :  { %v728_v4 = vpop.xlane.xlu1 %727 }
 0x1d1   :  { %2269 = vrsqrt.f32 %v913_v5  ;;  %v881_v22 = vadd.f32 1e-05, %v817_v30  ;;  %v850_v50 = vmul.f32 0.03125, %v728_v4  ;;  %v3240_v5 = vld [vmem:[%s3828_s4] ss:$0 sm:$0xff] }
 0x1d2   :  { %v632_v58 = vpop.xlane.xlu0 %631 }
 0x1d3   :  { %v2266_v6 = vpop.eup %2265  ;;  %2271 = vrsqrt.f32 %v881_v22  ;;  %v914_v36 = vadd.f32 1e-05, %v850_v50  ;;  %v818_v29 = vmul.f32 0.03125, %v632_v58 }
 0x1d4   :  { %v731_v56 = vpop.xlane.xlu1 %730  ;;  %v1040_v24 = vmul.f32 %v2266_v6, %v3908_v0 }
 0x1d5   :  { %2273 = vrsqrt.f32 %v914_v36  ;;  %v882_v42 = vadd.f32 1e-05, %v818_v29  ;;  %v851_v15 = vmul.f32 0.03125, %v731_v56 }
 0x1d6   :  { %v635_v30 = vpop.xlane.xlu0 %634  ;;  %v1111_v47 = vmul.f32 %v3234_v46, %v1040_v24 }
 0x1d7   :  { %2275 = vrsqrt.f32 %v882_v42  ;;  %v915_v58 = vadd.f32 1e-05, %v851_v15  ;;  %v819_v27 = vmul.f32 0.03125, %v635_v30 }
 0x1d8   :  { %v734_v4 = vpop.xlane.xlu1 %733  ;;  %v1182_v22 = vadd.f32 %v3240_v5, %v1111_v47 }
 0x1d9   :  { %v2268_v50 = vpop.eup %2267  ;;  %2277 = vrsqrt.f32 %v915_v58  ;;  %v883_v6 = vadd.f32 1e-05, %v819_v27  ;;  %v852_v36 = vmul.f32 0.03125, %v734_v4 }
 0x1da   :  { %2201 = vmatprep.mubr.msk.f32.mxu1 %vm238_vm0, %v1182_v22  ;;  %v638_v29 = vpop.xlane.xlu0 %637  ;;  %v1008_v56 = vmul.f32 %v2268_v50, %v2845_v25 }
 0x1db   :  { %v2270_v0 = vpop.eup %2269  ;;  %2279 = vrsqrt.f32 %v883_v6  ;;  %v916_v10 = vadd.f32 1e-05, %v852_v36  ;;  %v820_v12 = vmul.f32 0.03125, %v638_v29 }
 0x1dc   :  { %v737_v24 = vpop.xlane.xlu1 %736  ;;  %v1079_v42 = vmul.f32 %v3234_v46, %v1008_v56  ;;  %v1041_v15 = vmul.f32 %v2270_v0, %v2848_v16 }
 0x1dd   :  { %v2272_v30 = vpop.eup %2271  ;;  %2281 = vrsqrt.f32 %v916_v10  ;;  %v884_v47 = vadd.f32 1e-05, %v820_v12  ;;  %v853_v58 = vmul.f32 0.03125, %v737_v24 }
 0x1de   :  { %v641_v27 = vpop.xlane.xlu0 %640  ;;  %v1150_v4 = vadd.f32 %v3240_v5, %v1079_v42  ;;  %v1112_v22 = vmul.f32 %v3234_v46, %v1041_v15  ;;  %v1009_v25 = vmul.f32 %v2272_v30, %v3909_v53 }
 0x1df   :  { %v2274_v50 = vpop.eup %2273  ;;  %2283 = vrsqrt.f32 %v884_v47  ;;  %v917_v6 = vadd.f32 1e-05, %v853_v58  ;;  %v821_v36 = vmul.f32 0.03125, %v641_v27 }
 0x1e0   :  { %v740_v29 = vpop.xlane.xlu1 %739  ;;  %2153 = vmatprep.mubr.msk.f32.mxu0 %vm238_vm0, %v1150_v4  ;;  %v1183_v16 = vadd.f32 %v3240_v5, %v1112_v22  ;;  %v1080_v10 = vmul.f32 %v3234_v46, %v1009_v25  ;;  %v1042_v12 = vmul.f32 %v2274_v50, %v2861_v59 }
 0x1e1   :  { %v2276_v56 = vpop.eup %2275  ;;  %2285 = vrsqrt.f32 %v917_v6  ;;  %v885_v0 = vadd.f32 1e-05, %v821_v36  ;;  %v854_v24 = vmul.f32 0.03125, %v740_v29 }
 0x1e2   :  { %2202 = vmatmul.mubr.msk.f32.vlgmr.msra.gmra.mrb[0].mxu1 %vm238_vm0, %v1183_v16  ;;  %v644_v53 = vpop.xlane.xlu0 %643  ;;  %v1151_v42 = vadd.f32 %v3240_v5, %v1080_v10  ;;  %v1113_v15 = vmul.f32 %v3234_v46, %v1042_v12  ;;  %v1010_v30 = vmul.f32 %v2276_v56, %v2855_v35 }
 0x1e3   :  { %v2278_v47 = vpop.eup %2277  ;;  %2287 = vrsqrt.f32 %v885_v0  ;;  %v918_v58 = vadd.f32 1e-05, %v854_v24  ;;  %v822_v27 = vmul.f32 0.03125, %v644_v53 }
 0x1e4   :  { %v743_v4 = vpop.xlane.xlu1 %742  ;;  %2154 = vmatmul.mubr.msk.f32.vlgmr.msra.gmra.mrb[0].mxu0 %vm238_vm0, %v1151_v42  ;;  %v1184_v59 = vadd.f32 %v3240_v5, %v1113_v15  ;;  %v1081_v22 = vmul.f32 %v3234_v46, %v1010_v30  ;;  %v1043_v25 = vmul.f32 %v2278_v47, %v2873_v18 }
 0x1e5   :  { %v2280_v50 = vpop.eup %2279  ;;  %2289 = vrsqrt.f32 %v918_v58  ;;  %v886_v6 = vadd.f32 1e-05, %v822_v27  ;;  %v855_v36 = vmul.f32 0.03125, %v743_v4 }
 0x1e6   :  { %2204 = vmatprep.mubr.msk.f32.mxu1 %vm238_vm0, %v1184_v59  ;;  %v647_v35 = vpop.xlane.xlu0 %646  ;;  %v1152_v29 = vadd.f32 %v3240_v5, %v1081_v22  ;;  %v1114_v16 = vmul.f32 %v3234_v46, %v1043_v25  ;;  %v1011_v10 = vmul.f32 %v2280_v50, %v2866_v41 }
 0x1e7   :  { %v2282_v12 = vpop.eup %2281  ;;  %2291 = vrsqrt.f32 %v886_v6  ;;  %v919_v56 = vadd.f32 1e-05, %v855_v36  ;;  %v823_v0 = vmul.f32 0.03125, %v647_v35 }
 0x1e8   :  { %v746_v24 = vpop.xlane.xlu1 %745  ;;  %2156 = vmatprep.mubr.msk.f32.mxu0 %vm238_vm0, %v1152_v29  ;;  %v1185_v18 = vadd.f32 %v3240_v5, %v1114_v16  ;;  %v1082_v53 = vmul.f32 %v3234_v46, %v1011_v10  ;;  %v1044_v42 = vmul.f32 %v2282_v12, %v2885_v31 }
 0x1e9   :  { %v2284_v15 = vpop.eup %2283  ;;  %2293 = vrsqrt.f32 %v919_v56  ;;  %v887_v30 = vadd.f32 1e-05, %v823_v0  ;;  %v856_v47 = vmul.f32 0.03125, %v746_v24 }
 0x1ea   :  { %2205 = vmatmul.mubr.msk.f32.gmra.mrb[2].mxu1 %vm238_vm0, %v1185_v18  ;;  %v650_v41 = vpop.xlane.xlu0 %649  ;;  %v1153_v58 = vadd.f32 %v3240_v5, %v1082_v53  ;;  %v1115_v27 = vmul.f32 %v3234_v46, %v1044_v42  ;;  %v1012_v4 = vmul.f32 %v2284_v15, %v2879_v39 }
 0x1eb   :  { %v2286_v59 = vpop.eup %2285  ;;  %2295 = vrsqrt.f32 %v887_v30  ;;  %v920_v22 = vadd.f32 1e-05, %v856_v47  ;;  %v824_v25 = vmul.f32 0.03125, %v650_v41 }
 0x1ec   :  { %v749_v50 = vpop.xlane.xlu1 %748  ;;  %2157 = vmatmul.mubr.msk.f32.gmra.mrb[2].mxu0 %vm238_vm0, %v1153_v58  ;;  %v1186_v31 = vadd.f32 %v3240_v5, %v1115_v27  ;;  %v1083_v6 = vmul.f32 %v3234_v46, %v1012_v4  ;;  %v1045_v36 = vmul.f32 %v2286_v59, %v2897_v43 }
 0x1ed   :  { %v2288_v35 = vpop.eup %2287  ;;  %2297 = vrsqrt.f32 %v920_v22  ;;  %v888_v29 = vadd.f32 1e-05, %v824_v25  ;;  %v857_v16 = vmul.f32 0.03125, %v749_v50 }
 0x1ee   :  { %2207 = vmatprep.mubr.msk.f32.mxu1 %vm238_vm0, %v1186_v31  ;;  %v653_v39 = vpop.xlane.xlu0 %652  ;;  %v1154_v10 = vadd.f32 %v3240_v5, %v1083_v6  ;;  %v1116_v12 = vmul.f32 %v3234_v46, %v1045_v36  ;;  %v1013_v56 = vmul.f32 %v2288_v35, %v2890_v54 }
 0x1ef   :  { %v2290_v0 = vpop.eup %2289  ;;  %2299 = vrsqrt.f32 %v888_v29  ;;  %v921_v24 = vadd.f32 1e-05, %v857_v16  ;;  %v825_v18 = vmul.f32 0.03125, %v653_v39 }
 0x1f0   :  { %v752_v53 = vpop.xlane.xlu1 %751  ;;  %2159 = vmatprep.mubr.msk.f32.mxu0 %vm238_vm0, %v1154_v10  ;;  %v1187_v43 = vadd.f32 %v3240_v5, %v1116_v12  ;;  %v1084_v42 = vmul.f32 %v3234_v46, %v1013_v56  ;;  %v1046_v15 = vmul.f32 %v2290_v0, %v2909_v3  ;;  %v3910_v10 = vld [vmem:[#allocation20_spill] sm:$0xff] }
 0x1f1   :  { %v2292_v30 = vpop.eup %2291  ;;  %2301 = vrsqrt.f32 %v921_v24  ;;  %v889_v47 = vadd.f32 1e-05, %v825_v18  ;;  %v858_v41 = vmul.f32 0.03125, %v752_v53 }
 0x1f2   :  { %2208 = vmatmul.mubr.msk.f32.gmra.mrb[4].mxu1 %vm238_vm0, %v1187_v43  ;;  %v656_v54 = vpop.xlane.xlu0 %655  ;;  %v1155_v58 = vadd.f32 %v3240_v5, %v1084_v42  ;;  %v1117_v27 = vmul.f32 %v3234_v46, %v1046_v15  ;;  %v1014_v4 = vmul.f32 %v2292_v30, %v2903_v51 }
 0x1f3   :  { %v2294_v59 = vpop.eup %2293  ;;  %2303 = vrsqrt.f32 %v889_v47  ;;  %v922_v22 = vadd.f32 1e-05, %v858_v41  ;;  %v826_v25 = vmul.f32 0.03125, %v656_v54 }
 0x1f4   :  { %v755_v50 = vpop.xlane.xlu1 %754  ;;  %2160 = vmatmul.mubr.msk.f32.gmra.mrb[4].mxu0 %vm238_vm0, %v1155_v58  ;;  %v1188_v3 = vadd.f32 %v3240_v5, %v1117_v27  ;;  %v1085_v31 = vmul.f32 %v3234_v46, %v1014_v4  ;;  %v1047_v6 = vmul.f32 %v2294_v59, %v2921_v28 }
 0x1f5   :  { %v2296_v36 = vpop.eup %2295  ;;  %2305 = vrsqrt.f32 %v922_v22  ;;  %v890_v35 = vadd.f32 1e-05, %v826_v25  ;;  %v859_v29 = vmul.f32 0.03125, %v755_v50 }
 0x1f6   :  { %2210 = vmatprep.mubr.msk.f32.mxu1 %vm238_vm0, %v1188_v3  ;;  %v659_v51 = vpop.xlane.xlu0 %658  ;;  %v1156_v16 = vadd.f32 %v3240_v5, %v1085_v31  ;;  %v1118_v39 = vmul.f32 %v3234_v46, %v1047_v6  ;;  %v1015_v12 = vmul.f32 %v2296_v36, %v3910_v10 }
 0x1f7   :  { %v2298_v56 = vpop.eup %2297  ;;  %2307 = vrsqrt.f32 %v890_v35  ;;  %v923_v0 = vadd.f32 1e-05, %v859_v29  ;;  %v827_v24 = vmul.f32 0.03125, %v659_v51  ;;  %v3911_v29 = vld [vmem:[#allocation21_spill] sm:$0xff] }
 0x1f8   :  { %v758_v18 = vpop.xlane.xlu1 %757  ;;  %2162 = vmatprep.mubr.msk.f32.mxu0 %vm238_vm0, %v1156_v16  ;;  %v1189_v28 = vadd.f32 %v3240_v5, %v1118_v39  ;;  %v1086_v53 = vmul.f32 %v3234_v46, %v1015_v12  ;;  %v1048_v43 = vmul.f32 %v2298_v56, %v2933_v9 }
 0x1f9   :  { %v2300_v42 = vpop.eup %2299  ;;  %2309 = vrsqrt.f32 %v923_v0  ;;  %v891_v15 = vadd.f32 1e-05, %v827_v24  ;;  %v860_v30 = vmul.f32 0.03125, %v758_v18 }
 0x1fa   :  { %2211 = vmatmul.mubr.msk.f32.gmra.mrb[6].mxu1 %vm238_vm0, %v1189_v28  ;;  %v662_v47 = vpop.xlane.xlu0 %661  ;;  %v1157_v41 = vadd.f32 %v3240_v5, %v1086_v53  ;;  %v1119_v54 = vmul.f32 %v3234_v46, %v1048_v43  ;;  %v1016_v58 = vmul.f32 %v2300_v42, %v2927_v63 }
 0x1fb   :  { %v2302_v27 = vpop.eup %2301  ;;  %2311 = vrsqrt.f32 %v891_v15  ;;  %v924_v4 = vadd.f32 1e-05, %v860_v30  ;;  %v828_v59 = vmul.f32 0.03125, %v662_v47 }
 0x1fc   :  { %v761_v22 = vpop.xlane.xlu1 %760  ;;  %2163 = vmatmul.mubr.msk.f32.gmra.mrb[6].mxu0 %vm238_vm0, %v1157_v41  ;;  %v1190_v9 = vadd.f32 %v3240_v5, %v1119_v54  ;;  %v1087_v25 = vmul.f32 %v3234_v46, %v1016_v58  ;;  %v1049_v50 = vmul.f32 %v2302_v27, %v2951_v57 }
 0x1fd   :  { %v2304_v3 = vpop.eup %2303  ;;  %2313 = vrsqrt.f32 %v924_v4  ;;  %v892_v31 = vadd.f32 1e-05, %v828_v59  ;;  %v861_v6 = vmul.f32 0.03125, %v761_v22 }
 0x1fe   :  { %2213 = vmatprep.mubr.msk.f32.mxu1 %vm238_vm0, %v1190_v9  ;;  %v665_v63 = vpop.xlane.xlu0 %664  ;;  %v1158_v36 = vadd.f32 %v3240_v5, %v1087_v25  ;;  %v1120_v35 = vmul.f32 %v3234_v46, %v1049_v50  ;;  %v1017_v51 = vmul.f32 %v2304_v3, %v3911_v29 }
 0x1ff   :  { %v2306_v16 = vpop.eup %2305  ;;  %2315 = vrsqrt.f32 %v892_v31  ;;  %v925_v39 = vadd.f32 1e-05, %v861_v6  ;;  %v829_v10 = vmul.f32 0.03125, %v665_v63 }
 0x200   :  { %v764_v12 = vpop.xlane.xlu1 %763  ;;  %2165 = vmatprep.mubr.msk.f32.mxu0 %vm238_vm0, %v1158_v36  ;;  %v1191_v57 = vadd.f32 %v3240_v5, %v1120_v35  ;;  %v1088_v56 = vmul.f32 %v3234_v46, %v1017_v51  ;;  %v1050_v0 = vmul.f32 %v2306_v16, %v2969_v8 }
 0x201   :  { %v2308_v24 = vpop.eup %2307  ;;  %2317 = vrsqrt.f32 %v925_v39  ;;  %v893_v18 = vadd.f32 1e-05, %v829_v10  ;;  %v862_v28 = vmul.f32 0.03125, %v764_v12 }
 0x202   :  { %2214 = vmatmul.mubr.msk.f32.gmra.mrb[8].mxu1 %vm238_vm0, %v1191_v57  ;;  %v668_v53 = vpop.xlane.xlu0 %667  ;;  %v1159_v43 = vadd.f32 %v3240_v5, %v1088_v56  ;;  %v1121_v42 = vmul.f32 %v3234_v46, %v1050_v0  ;;  %v1018_v15 = vmul.f32 %v2308_v24, %v2963_v23 }
 0x203   :  { %v2310_v30 = vpop.eup %2309  ;;  %2319 = vrsqrt.f32 %v893_v18  ;;  %v926_v47 = vadd.f32 1e-05, %v862_v28  ;;  %v830_v41 = vmul.f32 0.03125, %v668_v53 }
 0x204   :  { %v767_v54 = vpop.xlane.xlu1 %766  ;;  %2166 = vmatmul.mubr.msk.f32.gmra.mrb[8].mxu0 %vm238_vm0, %v1159_v43  ;;  %v1192_v8 = vadd.f32 %v3240_v5, %v1121_v42  ;;  %v1089_v58 = vmul.f32 %v3234_v46, %v1018_v15  ;;  %v1051_v27 = vmul.f32 %v2310_v30, %v2981_v62 }
 0x205   :  { %v2312_v4 = vpop.eup %2311  ;;  %2321 = vrsqrt.f32 %v926_v47  ;;  %v894_v59 = vadd.f32 1e-05, %v830_v41  ;;  %v863_v22 = vmul.f32 0.03125, %v767_v54 }
 0x206   :  { %2216 = vmatprep.mubr.msk.f32.mxu1 %vm238_vm0, %v1192_v8  ;;  %v671_v23 = vpop.xlane.xlu0 %670  ;;  %v1160_v9 = vadd.f32 %v3240_v5, %v1089_v58  ;;  %v1122_v25 = vmul.f32 %v3234_v46, %v1051_v27  ;;  %v1019_v50 = vmul.f32 %v2312_v4, %v2974_v38 }
 0x207   :  { %v2314_v3 = vpop.eup %2313  ;;  %2323 = vrsqrt.f32 %v894_v59  ;;  %v927_v31 = vadd.f32 1e-05, %v863_v22  ;;  %v831_v6 = vmul.f32 0.03125, %v671_v23 }
 0x208   :  { %v770_v63 = vpop.xlane.xlu1 %769  ;;  %2168 = vmatprep.mubr.msk.f32.mxu0 %vm238_vm0, %v1160_v9  ;;  %v1193_v62 = vadd.f32 %v3240_v5, %v1122_v25  ;;  %v1090_v36 = vmul.f32 %v3234_v46, %v1019_v50  ;;  %v1052_v35 = vmul.f32 %v2314_v3, %v2993_v49 }
 0x209   :  { %v2316_v29 = vpop.eup %2315  ;;  %2325 = vrsqrt.f32 %v927_v31  ;;  %v895_v51 = vadd.f32 1e-05, %v831_v6  ;;  %v864_v16 = vmul.f32 0.03125, %v770_v63 }
 0x20a   :  { %2217 = vmatmul.mubr.msk.f32.gmra.mrb[10].mxu1 %vm238_vm0, %v1193_v62  ;;  %v674_v38 = vpop.xlane.xlu0 %673  ;;  %v1161_v39 = vadd.f32 %v3240_v5, %v1090_v36  ;;  %v1123_v10 = vmul.f32 %v3234_v46, %v1052_v35  ;;  %v1020_v12 = vmul.f32 %v2316_v29, %v2987_v45 }
 0x20b   :  { %v2318_v57 = vpop.eup %2317  ;;  %2327 = vrsqrt.f32 %v895_v51  ;;  %v928_v56 = vadd.f32 1e-05, %v864_v16  ;;  %v832_v0 = vmul.f32 0.03125, %v674_v38 }
 0x20c   :  { %v773_v24 = vpop.xlane.xlu1 %772  ;;  %2169 = vmatmul.mubr.msk.f32.gmra.mrb[10].mxu0 %vm238_vm0, %v1161_v39  ;;  %v1194_v49 = vadd.f32 %v3240_v5, %v1123_v10  ;;  %v1091_v18 = vmul.f32 %v3234_v46, %v1020_v12  ;;  %v1053_v28 = vmul.f32 %v2318_v57, %v3005_v37 }
 0x20d   :  { %v2320_v53 = vpop.eup %2319  ;;  %2329 = vrsqrt.f32 %v928_v56  ;;  %v896_v43 = vadd.f32 1e-05, %v832_v0  ;;  %v865_v42 = vmul.f32 0.03125, %v773_v24 }
 0x20e   :  { %2219 = vmatprep.mubr.msk.f32.mxu1 %vm238_vm0, %v1194_v49  ;;  %v677_v45 = vpop.xlane.xlu0 %676  ;;  %v1162_v15 = vadd.f32 %v3240_v5, %v1091_v18  ;;  %v1124_v30 = vmul.f32 %v3234_v46, %v1053_v28  ;;  %v1021_v47 = vmul.f32 %v2320_v53, %v2998_v44 }
 0x20f   :  { %v2322_v41 = vpop.eup %2321  ;;  %2331 = vrsqrt.f32 %v896_v43  ;;  %v929_v54 = vadd.f32 1e-05, %v865_v42  ;;  %v833_v8 = vmul.f32 0.03125, %v677_v45 }
 0x210   :  { %v776_v58 = vpop.xlane.xlu1 %775  ;;  %2171 = vmatprep.mubr.msk.f32.mxu0 %vm238_vm0, %v1162_v15  ;;  %v1195_v37 = vadd.f32 %v3240_v5, %v1124_v30  ;;  %v1092_v27 = vmul.f32 %v3234_v46, %v1021_v47  ;;  %v1054_v4 = vmul.f32 %v2322_v41, %v3017_v2 }
 0x211   :  { %v2324_v59 = vpop.eup %2323  ;;  %2333 = vrsqrt.f32 %v929_v54  ;;  %v897_v22 = vadd.f32 1e-05, %v833_v8  ;;  %v866_v23 = vmul.f32 0.03125, %v776_v58 }
 0x212   :  { %2220 = vmatmul.mubr.msk.f32.gmra.mrb[12].mxu1 %vm238_vm0, %v1195_v37  ;;  %v680_v44 = vpop.xlane.xlu0 %679  ;;  %v1163_v9 = vadd.f32 %v3240_v5, %v1092_v27  ;;  %v1125_v25 = vmul.f32 %v3234_v46, %v1054_v4  ;;  %v1022_v50 = vmul.f32 %v2324_v59, %v3011_v17 }
 0x213   :  { %v2326_v3 = vpop.eup %2325  ;;  %2335 = vrsqrt.f32 %v897_v22  ;;  %v930_v31 = vadd.f32 1e-05, %v866_v23  ;;  %v834_v6 = vmul.f32 0.03125, %v680_v44 }
 0x214   :  { %v779_v63 = vpop.xlane.xlu1 %778  ;;  %2172 = vmatmul.mubr.msk.f32.gmra.mrb[12].mxu0 %vm238_vm0, %v1163_v9  ;;  %v1196_v2 = vadd.f32 %v3240_v5, %v1125_v25  ;;  %v1093_v62 = vmul.f32 %v3234_v46, %v1022_v50  ;;  %v1055_v36 = vmul.f32 %v2326_v3, %v3029_v48 }
 0x215   :  { %v2328_v35 = vpop.eup %2327  ;;  %2337 = vrsqrt.f32 %v930_v31  ;;  %v898_v29 = vadd.f32 1e-05, %v834_v6  ;;  %v867_v51 = vmul.f32 0.03125, %v779_v63 }
 0x216   :  { %2222 = vmatprep.mubr.msk.f32.mxu1 %vm238_vm0, %v1196_v2  ;;  %v683_v17 = vpop.xlane.xlu0 %682  ;;  %v1164_v16 = vadd.f32 %v3240_v5, %v1093_v62  ;;  %v1126_v38 = vmul.f32 %v3234_v46, %v1055_v36  ;;  %v1023_v39 = vmul.f32 %v2328_v35, %v3022_v61 }
 0x217   :  { %v2330_v10 = vpop.eup %2329  ;;  %2339 = vrsqrt.f32 %v898_v29  ;;  %v931_v12 = vadd.f32 1e-05, %v867_v51  ;;  %v835_v57 = vmul.f32 0.03125, %v683_v17 }
 0x218   :  { %v782_v56 = vpop.xlane.xlu1 %781  ;;  %2174 = vmatprep.mubr.msk.f32.mxu0 %vm238_vm0, %v1164_v16  ;;  %v1197_v48 = vadd.f32 %v3240_v5, %v1126_v38  ;;  %v1094_v0 = vmul.f32 %v3234_v46, %v1023_v39  ;;  %v1056_v24 = vmul.f32 %v2330_v10, %v3041_v14 }
 0x219   :  { %v2332_v49 = vpop.eup %2331  ;;  %2341 = vrsqrt.f32 %v931_v12  ;;  %v899_v18 = vadd.f32 1e-05, %v835_v57  ;;  %v868_v28 = vmul.f32 0.03125, %v782_v56 }
 0x21a   :  { %2223 = vmatmul.mubr.msk.f32.gmra.mrb[14].mxu1 %vm238_vm0, %v1197_v48  ;;  %v686_v61 = vpop.xlane.xlu0 %685  ;;  %v1165_v53 = vadd.f32 %v3240_v5, %v1094_v0  ;;  %v1127_v43 = vmul.f32 %v3234_v46, %v1056_v24  ;;  %v1024_v42 = vmul.f32 %v2332_v49, %v3035_v40 }
 0x21b   :  { %v2334_v45 = vpop.eup %2333  ;;  %2343 = vrsqrt.f32 %v899_v18  ;;  %v932_v15 = vadd.f32 1e-05, %v868_v28  ;;  %v836_v30 = vmul.f32 0.03125, %v686_v61 }
 0x21c   :  { %v785_v47 = vpop.xlane.xlu1 %784  ;;  %2175 = vmatmul.mubr.msk.f32.gmra.mrb[14].mxu0 %vm238_vm0, %v1165_v53  ;;  %v1198_v14 = vadd.f32 %v3240_v5, %v1127_v43  ;;  %v1095_v41 = vmul.f32 %v3234_v46, %v1024_v42  ;;  %v1057_v54 = vmul.f32 %v2334_v45, %v3053_v60 }
 0x21d   :  { %v2336_v8 = vpop.eup %2335  ;;  %2345 = vrsqrt.f32 %v932_v15  ;;  %v900_v58 = vadd.f32 1e-05, %v836_v30  ;;  %v869_v37 = vmul.f32 0.03125, %v785_v47 }
 0x21e   :  { %2225 = vmatprep.mubr.msk.f32.mxu1 %vm238_vm0, %v1198_v14  ;;  %v689_v40 = vpop.xlane.xlu0 %688  ;;  %v1166_v27 = vadd.f32 %v3240_v5, %v1095_v41  ;;  %v1128_v4 = vmul.f32 %v3234_v46, %v1057_v54  ;;  %v1025_v59 = vmul.f32 %v2336_v8, %v3046_v13 }
 0x21f   :  { %v2338_v22 = vpop.eup %2337  ;;  %2347 = vrsqrt.f32 %v900_v58  ;;  %v933_v23 = vadd.f32 1e-05, %v869_v37  ;;  %v837_v44 = vmul.f32 0.03125, %v689_v40 }
 0x220   :  { %v788_v9 = vpop.xlane.xlu1 %787  ;;  %2177 = vmatprep.mubr.msk.f32.mxu0 %vm238_vm0, %v1166_v27  ;;  %v1199_v60 = vadd.f32 %v3240_v5, %v1128_v4  ;;  %v1096_v25 = vmul.f32 %v3234_v46, %v1025_v59  ;;  %v1058_v50 = vmul.f32 %v2338_v22, %v3065_v19 }
 0x221   :  { %v2340_v3 = vpop.eup %2339  ;;  %2349 = vrsqrt.f32 %v933_v23  ;;  %v901_v31 = vadd.f32 1e-05, %v837_v44  ;;  %v870_v6 = vmul.f32 0.03125, %v788_v9 }
 0x222   :  { %2226 = vmatmul.mubr.msk.f32.gmra.mrb[16].mxu1 %vm238_vm0, %v1199_v60  ;;  %v692_v13 = vpop.xlane.xlu0 %691  ;;  %v1167_v63 = vadd.f32 %v3240_v5, %v1096_v25  ;;  %v1129_v2 = vmul.f32 %v3234_v46, %v1058_v50  ;;  %v1026_v62 = vmul.f32 %v2340_v3, %v3059_v55 }
 0x223   :  { %v2342_v36 = vpop.eup %2341  ;;  %2351 = vrsqrt.f32 %v901_v31  ;;  %v934_v35 = vadd.f32 1e-05, %v870_v6  ;;  %v838_v29 = vmul.f32 0.03125, %v692_v13 }
 0x224   :  { %v791_v51 = vpop.xlane.xlu1 %790  ;;  %2178 = vmatmul.mubr.msk.f32.gmra.mrb[16].mxu0 %vm238_vm0, %v1167_v63  ;;  %v1200_v19 = vadd.f32 %v3240_v5, %v1129_v2  ;;  %v1097_v17 = vmul.f32 %v3234_v46, %v1026_v62  ;;  %v1059_v16 = vmul.f32 %v2342_v36, %v3077_v26 }
 0x225   :  { %v2344_v38 = vpop.eup %2343  ;;  %2353 = vrsqrt.f32 %v934_v35  ;;  %v902_v39 = vadd.f32 1e-05, %v838_v29  ;;  %v871_v10 = vmul.f32 0.03125, %v791_v51 }
 0x226   :  { %2228 = vmatprep.mubr.msk.f32.mxu1 %vm238_vm0, %v1200_v19  ;;  %v695_v55 = vpop.xlane.xlu0 %694  ;;  %v1168_v12 = vadd.f32 %v3240_v5, %v1097_v17  ;;  %v1130_v57 = vmul.f32 %v3234_v46, %v1059_v16  ;;  %v1027_v56 = vmul.f32 %v2344_v38, %v3070_v33 }
 0x227   :  { %v2346_v48 = vpop.eup %2345  ;;  %2355 = vrsqrt.f32 %v902_v39  ;;  %v935_v0 = vadd.f32 1e-05, %v871_v10  ;;  %v839_v24 = vmul.f32 0.03125, %v695_v55 }
 0x228   :  { %v794_v49 = vpop.xlane.xlu1 %793  ;;  %2180 = vmatprep.mubr.msk.f32.mxu0 %vm238_vm0, %v1168_v12  ;;  %v1201_v26 = vadd.f32 %v3240_v5, %v1130_v57  ;;  %v1098_v18 = vmul.f32 %v3234_v46, %v1027_v56  ;;  %v1060_v28 = vmul.f32 %v2346_v48, %v3089_v20 }
 0x229   :  { %v2348_v61 = vpop.eup %2347  ;;  %2357 = vrsqrt.f32 %v935_v0  ;;  %v903_v53 = vadd.f32 1e-05, %v839_v24  ;;  %v872_v43 = vmul.f32 0.03125, %v794_v49  ;;  %v3912_v0 = vld [vmem:[#allocation7_spill] sm:$0xff] }
 0x22a   :  { %2229 = vmatmul.mubr.msk.f32.gmra.mrb[18].mxu1 %vm238_vm0, %v1201_v26  ;;  %v698_v33 = vpop.xlane.xlu0 %697  ;;  %v1169_v42 = vadd.f32 %v3240_v5, %v1098_v18  ;;  %v1131_v45 = vmul.f32 %v3234_v46, %v1060_v28  ;;  %v1028_v15 = vmul.f32 %v2348_v61, %v3083_v7 }
 0x22b   :  { %v2350_v30 = vpop.eup %2349  ;;  %2359 = vrsqrt.f32 %v903_v53  ;;  %v936_v47 = vadd.f32 1e-05, %v872_v43  ;;  %v840_v14 = vmul.f32 0.03125, %v698_v33  ;;  %v3913_v53 = vld [vmem:[#allocation6_spill] sm:$0xff] }
 0x22c   :  { %v797_v41 = vpop.xlane.xlu1 %796  ;;  %2181 = vmatmul.mubr.msk.f32.gmra.mrb[18].mxu0 %vm238_vm0, %v1169_v42  ;;  %v1202_v20 = vadd.f32 %v3240_v5, %v1131_v45  ;;  %v1099_v54 = vmul.f32 %v3234_v46, %v1028_v15  ;;  %v1061_v8 = vmul.f32 %v2350_v30, %v3101_v11 }
 0x22d   :  { %v2352_v58 = vpop.eup %2351  ;;  %2361 = vrsqrt.f32 %v936_v47  ;;  %v904_v37 = vadd.f32 1e-05, %v840_v14  ;;  %v873_v40 = vmul.f32 0.03125, %v797_v41  ;;  %v3914_v14 = vld [vmem:[#allocation9_spill] sm:$0xff] }
 0x22e   :  { %2231 = vmatprep.mubr.msk.f32.mxu1 %vm238_vm0, %v1202_v20  ;;  %v701_v7 = vpop.xlane.xlu0 %700  ;;  %v1170_v27 = vadd.f32 %v3240_v5, %v1099_v54  ;;  %v1132_v4 = vmul.f32 %v3234_v46, %v1061_v8  ;;  %v1029_v59 = vmul.f32 %v2352_v58, %v3094_v1 }
 0x22f   :  { %v2354_v22 = vpop.eup %2353  ;;  %2363 = vrsqrt.f32 %v904_v37  ;;  %v937_v23 = vadd.f32 1e-05, %v873_v40  ;;  %v841_v44 = vmul.f32 0.03125, %v701_v7  ;;  %v3915_v7 = vld [vmem:[#allocation8_spill] sm:$0xff] }
 0x230   :  { %v800_v9 = vpop.xlane.xlu1 %799  ;;  %2183 = vmatprep.mubr.msk.f32.mxu0 %vm238_vm0, %v1170_v27  ;;  %v1203_v11 = vadd.f32 %v3240_v5, %v1132_v4  ;;  %v1100_v60 = vmul.f32 %v3234_v46, %v1029_v59  ;;  %v1062_v25 = vmul.f32 %v2354_v22, %v3113_v34 }
 0x231   :  { %v2356_v50 = vpop.eup %2355  ;;  %2365 = vrsqrt.f32 %v937_v23  ;;  %v905_v3 = vadd.f32 1e-05, %v841_v44  ;;  %v874_v31 = vmul.f32 0.03125, %v800_v9 }
 0x232   :  { %2232 = vmatmul.mubr.msk.f32.gmra.mrb[20].mxu1 %vm238_vm0, %v1203_v11  ;;  %v704_v1 = vpop.xlane.xlu0 %703  ;;  %v1171_v6 = vadd.f32 %v3240_v5, %v1100_v60  ;;  %v1133_v13 = vmul.f32 %v3234_v46, %v1062_v25  ;;  %v1030_v63 = vmul.f32 %v2356_v50, %v3107_v21  ;;  %v3916_v11 = vld [vmem:[#allocation10_spill] sm:$0xff] }
 0x233   :  { %v2358_v2 = vpop.eup %2357  ;;  %2367 = vrsqrt.f32 %v905_v3  ;;  %v938_v62 = vadd.f32 1e-05, %v874_v31  ;;  %v842_v36 = vmul.f32 0.03125, %v704_v1 }
 0x234   :  { %v803_v35 = vpop.xlane.xlu1 %802  ;;  %2184 = vmatmul.mubr.msk.f32.gmra.mrb[20].mxu0 %vm238_vm0, %v1171_v6  ;;  %v1204_v34 = vadd.f32 %v3240_v5, %v1133_v13  ;;  %v1101_v29 = vmul.f32 %v3234_v46, %v1030_v63  ;;  %v1063_v51 = vmul.f32 %v2358_v2, %v3125_v52  ;;  %v3917_v13 = vld [vmem:[#allocation22_spill] sm:$0xff] }
 0x235   :  { %v2360_v19 = vpop.eup %2359  ;;  %2369 = vrsqrt.f32 %v938_v62  ;;  %v906_v17 = vadd.f32 1e-05, %v842_v36  ;;  %v875_v16 = vmul.f32 0.03125, %v803_v35 }
 0x236   :  { %2234 = vmatprep.mubr.msk.f32.mxu1 %vm238_vm0, %v1204_v34  ;;  %v707_v21 = vpop.xlane.xlu0 %706  ;;  %v1172_v38 = vadd.f32 %v3240_v5, %v1101_v29  ;;  %v1134_v39 = vmul.f32 %v3234_v46, %v1063_v51  ;;  %v1031_v10 = vmul.f32 %v2360_v19, %v3118_v32  ;;  %v3918_v51 = vld [vmem:[#allocation23_spill] sm:$0xff] }
 0x237   :  { %v2362_v55 = vpop.eup %2361  ;;  %2371 = vrsqrt.f32 %v906_v17  ;;  %v939_v12 = vadd.f32 1e-05, %v875_v16  ;;  %v843_v57 = vmul.f32 0.03125, %v707_v21 }
 0x238   :  { %v806_v56 = vpop.xlane.xlu1 %805  ;;  %2186 = vmatprep.mubr.msk.f32.mxu0 %vm238_vm0, %v1172_v38  ;;  %v1205_v52 = vadd.f32 %v3240_v5, %v1134_v39  ;;  %v1102_v48 = vmul.f32 %v3234_v46, %v1031_v10  ;;  %v1064_v24 = vmul.f32 %v2362_v55, %v3912_v0  ;;  %v3919_v55 = vld [vmem:[#allocation11_spill] sm:$0xff] }
 0x239   :  { %v2364_v49 = vpop.eup %2363  ;;  %2373 = vrsqrt.f32 %v939_v12  ;;  %v907_v26 = vadd.f32 1e-05, %v843_v57  ;;  %v876_v18 = vmul.f32 0.03125, %v806_v56 }
 0x23a   :  { %2235 = vmatmul.mubr.msk.f32.gmra.mrb[22].mxu1 %vm238_vm0, %v1205_v52  ;;  %v710_v32 = vpop.xlane.xlu0 %709  ;;  %v1173_v28 = vadd.f32 %v3240_v5, %v1102_v48  ;;  %v1135_v61 = vmul.f32 %v3234_v46, %v1064_v24  ;;  %v1032_v43 = vmul.f32 %v2364_v49, %v3913_v53  ;;  %v3920_v24 = vld [vmem:[#allocation13_spill] sm:$0xff]  ;;  %v3921_v53 = vld [vmem:[#allocation12_spill] sm:$0xff] }
 0x23b   :  { %v2366_v33 = vpop.eup %2365  ;;  %2375 = vrsqrt.f32 %v907_v26  ;;  %v940_v42 = vadd.f32 1e-05, %v876_v18  ;;  %v844_v45 = vmul.f32 0.03125, %v710_v32 }
 0x23c   :  { %v809_v15 = vpop.xlane.xlu1 %808  ;;  %2187 = vmatmul.mubr.msk.f32.gmra.mrb[22].mxu0 %vm238_vm0, %v1173_v28  ;;  %v1206_v30 = vadd.f32 %v3240_v5, %v1135_v61  ;;  %v1103_v47 = vmul.f32 %v3234_v46, %v1032_v43  ;;  %v1065_v41 = vmul.f32 %v2366_v33, %v3914_v14  ;;  %v2393_v28 = vld [vmem:[%s3827_s3] ss:$0 sm:$0xff] }
 0x23d   :  { %v2368_v20 = vpop.eup %2367  ;;  %2377 = vrsqrt.f32 %v940_v42  ;;  %v908_v54 = vadd.f32 1e-05, %v844_v45  ;;  %v877_v8 = vmul.f32 0.03125, %v809_v15  ;;  %v3922_v15 = vld [vmem:[#allocation14_spill] sm:$0xff] }
 0x23e   :  { %2237 = vmatprep.mubr.msk.f32.mxu1 %vm238_vm0, %v1206_v30  ;;  %v713_v58 = vpop.xlane.xlu0 %712  ;;  %v1174_v37 = vadd.f32 %v3240_v5, %v1103_v47  ;;  %v1136_v40 = vmul.f32 %v3234_v46, %v1065_v41  ;;  %v1033_v27 = vmul.f32 %v2368_v20, %v3915_v7  ;;  %v3923_v41 = vld [vmem:[#allocation24_spill] sm:$0xff] }
 0x23f   :  { %v2370_v4 = vpop.eup %2369  ;;  %2379 = vrsqrt.f32 %v908_v54  ;;  %v941_v59 = vadd.f32 1e-05, %v877_v8  ;;  %v845_v22 = vmul.f32 0.03125, %v713_v58 }
 0x240   :  { %v812_v23 = vpop.xlane.xlu1 %811  ;;  %2189 = vmatprep.mubr.msk.f32.mxu0 %vm238_vm0, %v1174_v37  ;;  %v1207_v44 = vadd.f32 %v3240_v5, %v1136_v40  ;;  %v1104_v9 = vmul.f32 %v3234_v46, %v1033_v27  ;;  %v1066_v60 = vmul.f32 %v2370_v4, %v3916_v11  ;;  %v3924_v37 = vld [vmem:[#allocation16_spill] sm:$0xff]  ;;  %v3926_v11 = vld [vmem:[#allocation25_spill] sm:$0xff] }
 0x241   :  { %v2372_v25 = vpop.eup %2371  ;;  %2381 = vrsqrt.f32 %v941_v59  ;;  %v909_v50 = vadd.f32 1e-05, %v845_v22  ;;  %v878_v3 = vmul.f32 0.03125, %v812_v23  ;;  %v3925_v59 = vld [vmem:[#allocation15_spill] sm:$0xff] }
 0x242   :  { %2238 = vmatmul.mubr.msk.f32.gmra.mrb[24].mxu1 %vm238_vm0, %v1207_v44  ;;  %v716_v31 = vpop.xlane.xlu0 %715  ;;  %v1175_v1 = vadd.f32 %v3240_v5, %v1104_v9  ;;  %v1137_v6 = vmul.f32 %v3234_v46, %v1066_v60  ;;  %v1034_v63 = vmul.f32 %v2372_v25, %v3917_v13 }
 0x243   :  { %v2374_v2 = vpop.eup %2373  ;;  %2383 = vrsqrt.f32 %v909_v50  ;;  %v942_v62 = vadd.f32 1e-05, %v878_v3  ;;  %v846_v36 = vmul.f32 0.03125, %v716_v31  ;;  %v3927_v31 = vld [vmem:[#allocation17_spill] sm:$0xff] }
 0x244   :  { %v815_v35 = vpop.xlane.xlu1 %814  ;;  %2190 = vmatmul.mubr.msk.f32.gmra.mrb[24].mxu0 %vm238_vm0, %v1175_v1  ;;  %v1208_v34 = vadd.f32 %v3240_v5, %v1137_v6  ;;  %v1105_v29 = vmul.f32 %v3234_v46, %v1034_v63  ;;  %v1067_v19 = vmul.f32 %v2374_v2, %v3918_v51  ;;  %v3490_v2 = vld [vmem:[%s3830_s6] ss:$0 sm:$0xff] }
 0x245   :  { %v2376_v17 = vpop.eup %2375  ;;  %2385 = vrsqrt.f32 %v942_v62  ;;  %v910_v16 = vadd.f32 1e-05, %v846_v36  ;;  %v879_v21 = vmul.f32 0.03125, %v815_v35  ;;  %v1835_v36 = vld [vmem:[%s3826_s2 + $0x108] sm:$0xff] }
 0x246   :  { %2240 = vmatprep.mubr.msk.f32.mxu1 %vm238_vm0, %v1208_v34  ;;  %v719_v38 = vpop.xlane.xlu0 %718  ;;  %v1176_v39 = vadd.f32 %v3240_v5, %v1105_v29  ;;  %v1138_v10 = vmul.f32 %v3234_v46, %v1067_v19  ;;  %v1035_v12 = vmul.f32 %v2376_v17, %v3919_v55  ;;  %v1834_v29 = vld [vmem:[%s3826_s2 + $0x100] sm:$0xff]  ;;  %v1803_v17 = vld [vmem:[%s3826_s2 + $0x8] sm:$0xff] }
 0x247   :  { %v2378_v57 = vpop.eup %2377  ;;  %2387 = vrsqrt.f32 %v910_v16  ;;  %v943_v56 = vadd.f32 1e-05, %v879_v21  ;;  %v847_v52 = vmul.f32 0.03125, %v719_v38 }
 0x248   :  { %2192 = vmatprep.mubr.msk.f32.mxu0 %vm238_vm0, %v1176_v39  ;;  %v1209_v48 = vadd.f32 %v3240_v5, %v1138_v10  ;;  %v1106_v0 = vmul.f32 %v3234_v46, %v1035_v12  ;;  %v1068_v49 = vmul.f32 %v2378_v57, %v3920_v24  ;;  %v2394_v46 = vld [vmem:[%s3828_s4] ss:$0 sm:$0xff]  ;;  %v1836_v24 = vld [vmem:[%s3826_s2 + $0x110] sm:$0xff] }
 0x249   :  { %v2380_v26 = vpop.eup %2379  ;;  %2389 = vrsqrt.f32 %v943_v56  ;;  %v911_v18 = vadd.f32 1e-05, %v847_v52  ;;  %v1802_v39 = vld [vmem:[%s3826_s2] sm:$0xff]  ;;  %v1837_v52 = vld [vmem:[%s3826_s2 + $0x118] sm:$0xff] }
 0x24a   :  { %2241 = vmatmul.mubr.msk.f32.gmra.mrb[26].mxu1 %vm238_vm0, %v1209_v48  ;;  %v1177_v32 = vadd.f32 %v3240_v5, %v1106_v0  ;;  %v1139_v61 = vmul.f32 %v2393_v28, %v1068_v49  ;;  %v1036_v43 = vmul.f32 %v2380_v26, %v3921_v53  ;;  %v1804_v53 = vld [vmem:[%s3826_s2 + $0x10] sm:$0xff] }
 0x24b   :  { %v2382_v33 = vpop.eup %2381  ;;  %2391 = vrsqrt.f32 %v911_v18  ;;  %v1805_v18 = vld [vmem:[%s3826_s2 + $0x18] sm:$0xff] }
 0x24c   :  { %2193 = vmatmul.mubr.msk.f32.gmra.mrb[26].mxu0 %vm238_vm0, %v1177_v32  ;;  %v1210_v42 = vadd.f32 %v2394_v46, %v1139_v61  ;;  %v1107_v45 = vmul.f32 %v2393_v28, %v1036_v43  ;;  %v1069_v30 = vmul.f32 %v2382_v33, %v3922_v15  ;;  %v1839_v15 = vld [vmem:[%s3826_s2 + $0x128] sm:$0xff] }
 0x24d   :  { %v2384_v5 = vpop.eup %2383 }
 0x24e   :  { %2243 = vmatprep.mubr.msk.f32.mxu1 %vm238_vm0, %v1210_v42  ;;  %v1178_v47 = vadd.f32 %v2394_v46, %v1107_v45  ;;  %v1140_v14 = vmul.f32 %v2393_v28, %v1069_v30  ;;  %v1037_v20 = vmul.f32 %v2384_v5, %v3923_v41 }
 0x24f   :  { %v2386_v54 = vpop.eup %2385 }
 0x250   :  { %2195 = vmatprep.mubr.msk.f32.mxu0 %vm238_vm0, %v1178_v47  ;;  %v1211_v8 = vadd.f32 %v2394_v46, %v1140_v14  ;;  %v1108_v58 = vmul.f32 %v2393_v28, %v1037_v20  ;;  %v1070_v40 = vmul.f32 %v2386_v54, %v3924_v37  ;;  %v1838_v47 = vld [vmem:[%s3826_s2 + $0x120] sm:$0xff]  ;;  %v1807_v20 = vld [vmem:[%s3826_s2 + $0x28] sm:$0xff] }
 0x251   :  { %v2388_v7 = vpop.eup %2387  ;;  %v1806_v37 = vld [vmem:[%s3826_s2 + $0x20] sm:$0xff] }
 0x252   :  { %2244 = vmatmul.mubr.msk.f32.gmra.mrb[28].mxu1 %vm238_vm0, %v1211_v8  ;;  %v1179_v27 = vadd.f32 %v2394_v46, %v1108_v58  ;;  %v1141_v4 = vmul.f32 %v2393_v28, %v1070_v40  ;;  %v1038_v22 = vmul.f32 %v2388_v7, %v3925_v59 }
 0x253   :  { %v2390_v23 = vpop.eup %2389 }
 0x254   :  { %2196 = vmatmul.mubr.msk.f32.gmra.mrb[28].mxu0 %vm238_vm0, %v1179_v27  ;;  %v1212_v44 = vadd.f32 %v2394_v46, %v1141_v4  ;;  %v1109_v9 = vmul.f32 %v2393_v28, %v1038_v22  ;;  %v1071_v60 = vmul.f32 %v2390_v23, %v3926_v11  ;;  %v1841_v22 = vld [vmem:[%s3826_s2 + $0x138] sm:$0xff] }
 0x255   :  { %v2392_v25 = vpop.eup %2391 }
 0x256   :  { %2246 = vmatprep.mubr.msk.f32.mxu1 %vm238_vm0, %v1212_v44  ;;  %v1180_v50 = vadd.f32 %v2394_v46, %v1109_v9  ;;  %v1142_v3 = vmul.f32 %v2393_v28, %v1071_v60  ;;  %v1039_v1 = vmul.f32 %v2392_v25, %v3927_v31  ;;  %v1840_v9 = vld [vmem:[%s3826_s2 + $0x130] sm:$0xff]  ;;  %v1809_v25 = vld [vmem:[%s3826_s2 + $0x38] sm:$0xff] }
 0x258   :  { %2198 = vmatprep.mubr.msk.f32.mxu0 %vm238_vm0, %v1180_v50  ;;  %v1213_v6 = vadd.f32 %v2394_v46, %v1142_v3  ;;  %v1110_v13 = vmul.f32 %v2393_v28, %v1039_v1  ;;  %v1808_v1 = vld [vmem:[%s3826_s2 + $0x30] sm:$0xff] }
 0x25a   :  { %2247 = vmatmul.mubr.msk.f32.gmra.mrb[30].mxu1 %vm238_vm0, %v1213_v6  ;;  %v1181_v63 = vadd.f32 %v2394_v46, %v1110_v13 }
 0x25c   :  { %2199 = vmatmul.mubr.msk.f32.gmra.mrb[30].mxu0 %vm238_vm0, %v1181_v63 }
 0x2b5   :  { %v2203_v62 = vpop.f32.mrb[0].mxu1 }
 0x2b6   :  { %v1649_v35 = vadd.f32 %v2203_v62, %v3490_v2  ;;  %v1643_v34 = vpop.f32.mrb[1].mxu1 }
 0x2b7   :  { %v1644_v51 = vadd.f32 %v3490_v2, %v1643_v34  ;;  %v2155_v19 = vpop.f32.mrb[0].mxu0 }
 0x2b8   :  { %v1899_v16 = vmul.f32 %v1835_v36, %v1649_v35  ;;  %v1489_v21 = vadd.f32 %v2155_v19, %v3490_v2  ;;  %v1483_v38 = vpop.f32.mrb[1].mxu0  ;;  %v1843_v35 = vld [vmem:[%s3826_s2 + $0x148] sm:$0xff] }
 0x2b9   :  { %v1898_v10 = vmul.f32 %v1834_v29, %v1644_v51  ;;  %v1484_v55 = vadd.f32 %v3490_v2, %v1483_v38  ;;  %v1842_v51 = vld [vmem:[%s3826_s2 + $0x140] sm:$0xff] }
 0x2ba   :  { %1963 = vst.msk [vmem:[#allocation3 + $0x108] sm:$0xff] %vm238_vm0, %v1899_v16  ;;  %v1867_v12 = vmul.f32 %v1803_v17, %v1489_v21  ;;  %v1811_v16 = vld [vmem:[%s3826_s2 + $0x48] sm:$0xff] }
 0x2bb   :  { %1962 = vst.msk [vmem:[#allocation3 + $0x100] sm:$0xff] %vm238_vm0, %v1898_v10  ;;  %v1866_v57 = vmul.f32 %v1802_v39, %v1484_v55  ;;  %v1810_v10 = vld [vmem:[%s3826_s2 + $0x40] sm:$0xff] }
 0x2bc   :  { %1931 = vst.msk [vmem:[#allocation3 + $0x8] sm:$0xff] %vm238_vm0, %v1867_v12 }
 0x2bd   :  { %1930 = vst.msk [vmem:[#allocation3] sm:$0xff] %vm238_vm0, %v1866_v57  ;;  %v2206_v56 = vpop.f32.mrb[2].mxu1 }
 0x2be   :  { %v1659_v48 = vadd.f32 %v2206_v56, %v3490_v2  ;;  %v1653_v0 = vpop.f32.mrb[3].mxu1 }
 0x2bf   :  { %v1654_v49 = vadd.f32 %v3490_v2, %v1653_v0  ;;  %v2158_v26 = vpop.f32.mrb[2].mxu0 }
 0x2c0   :  { %v1901_v32 = vmul.f32 %v1837_v52, %v1659_v48  ;;  %v1499_v28 = vadd.f32 %v2158_v26, %v3490_v2  ;;  %v1493_v61 = vpop.f32.mrb[3].mxu0  ;;  %v1845_v48 = vld [vmem:[%s3826_s2 + $0x158] sm:$0xff] }
 0x2c1   :  { %v1900_v43 = vmul.f32 %v1836_v24, %v1654_v49  ;;  %v1494_v33 = vadd.f32 %v3490_v2, %v1493_v61  ;;  %v1844_v49 = vld [vmem:[%s3826_s2 + $0x150] sm:$0xff] }
 0x2c2   :  { %1965 = vst.msk [vmem:[#allocation3 + $0x118] sm:$0xff] %vm238_vm0, %v1901_v32  ;;  %v1869_v46 = vmul.f32 %v1805_v18, %v1499_v28  ;;  %v1813_v32 = vld [vmem:[%s3826_s2 + $0x58] sm:$0xff] }
 0x2c3   :  { %1964 = vst.msk [vmem:[#allocation3 + $0x110] sm:$0xff] %vm238_vm0, %v1900_v43  ;;  %v1868_v42 = vmul.f32 %v1804_v53, %v1494_v33  ;;  %v1812_v43 = vld [vmem:[%s3826_s2 + $0x50] sm:$0xff] }
 0x2c4   :  { %1933 = vst.msk [vmem:[#allocation3 + $0x18] sm:$0xff] %vm238_vm0, %v1869_v46 }
 0x2c5   :  { %1932 = vst.msk [vmem:[#allocation3 + $0x10] sm:$0xff] %vm238_vm0, %v1868_v42  ;;  %v2209_v45 = vpop.f32.mrb[4].mxu1 }
 0x2c6   :  { %v1669_v30 = vadd.f32 %v2209_v45, %v3490_v2  ;;  %v1663_v5 = vpop.f32.mrb[5].mxu1 }
 0x2c7   :  { %v1664_v14 = vadd.f32 %v3490_v2, %v1663_v5  ;;  %v2161_v41 = vpop.f32.mrb[4].mxu0 }
 0x2c8   :  { %v1903_v54 = vmul.f32 %v1839_v15, %v1669_v30  ;;  %v1509_v8 = vadd.f32 %v2161_v41, %v3490_v2  ;;  %v1503_v58 = vpop.f32.mrb[5].mxu0  ;;  %v1847_v30 = vld [vmem:[%s3826_s2 + $0x168] sm:$0xff] }
 0x2c9   :  { %v1902_v40 = vmul.f32 %v1838_v47, %v1664_v14  ;;  %v1504_v7 = vadd.f32 %v3490_v2, %v1503_v58  ;;  %v1846_v14 = vld [vmem:[%s3826_s2 + $0x160] sm:$0xff] }
 0x2ca   :  { %1967 = vst.msk [vmem:[#allocation3 + $0x128] sm:$0xff] %vm238_vm0, %v1903_v54  ;;  %v1871_v27 = vmul.f32 %v1807_v20, %v1509_v8  ;;  %v1815_v54 = vld [vmem:[%s3826_s2 + $0x68] sm:$0xff] }
 0x2cb   :  { %1966 = vst.msk [vmem:[#allocation3 + $0x120] sm:$0xff] %vm238_vm0, %v1902_v40  ;;  %v1870_v4 = vmul.f32 %v1806_v37, %v1504_v7  ;;  %v1814_v40 = vld [vmem:[%s3826_s2 + $0x60] sm:$0xff] }
 0x2cc   :  { %1935 = vst.msk [vmem:[#allocation3 + $0x28] sm:$0xff] %vm238_vm0, %v1871_v27 }
 0x2cd   :  { %1934 = vst.msk [vmem:[#allocation3 + $0x20] sm:$0xff] %vm238_vm0, %v1870_v4  ;;  %v2212_v59 = vpop.f32.mrb[6].mxu1 }
 0x2ce   :  { %v1679_v23 = vadd.f32 %v2212_v59, %v3490_v2  ;;  %v1673_v44 = vpop.f32.mrb[7].mxu1 }
 0x2cf   :  { %v1674_v11 = vadd.f32 %v3490_v2, %v1673_v44  ;;  %v2164_v60 = vpop.f32.mrb[6].mxu0 }
 0x2d0   :  { %v1905_v50 = vmul.f32 %v1841_v22, %v1679_v23  ;;  %v1519_v3 = vadd.f32 %v2164_v60, %v3490_v2  ;;  %v1513_v31 = vpop.f32.mrb[7].mxu0  ;;  %v1849_v23 = vld [vmem:[%s3826_s2 + $0x178] sm:$0xff] }
 0x2d1   :  { %v1904_v6 = vmul.f32 %v1840_v9, %v1674_v11  ;;  %v1514_v13 = vadd.f32 %v3490_v2, %v1513_v31  ;;  %v1848_v11 = vld [vmem:[%s3826_s2 + $0x170] sm:$0xff] }
 0x2d2   :  { %1969 = vst.msk [vmem:[#allocation3 + $0x138] sm:$0xff] %vm238_vm0, %v1905_v50  ;;  %v1873_v63 = vmul.f32 %v1809_v25, %v1519_v3  ;;  %v1817_v50 = vld [vmem:[%s3826_s2 + $0x78] sm:$0xff] }
 0x2d3   :  { %1968 = vst.msk [vmem:[#allocation3 + $0x130] sm:$0xff] %vm238_vm0, %v1904_v6  ;;  %v1872_v62 = vmul.f32 %v1808_v1, %v1514_v13  ;;  %v1816_v6 = vld [vmem:[%s3826_s2 + $0x70] sm:$0xff] }
 0x2d4   :  { %1937 = vst.msk [vmem:[#allocation3 + $0x38] sm:$0xff] %vm238_vm0, %v1873_v63 }
 0x2d5   :  { %1936 = vst.msk [vmem:[#allocation3 + $0x30] sm:$0xff] %vm238_vm0, %v1872_v62  ;;  %v2215_v36 = vpop.f32.mrb[8].mxu1 }
 0x2d6   :  { %v1689_v34 = vadd.f32 %v2215_v36, %v3490_v2  ;;  %v1683_v29 = vpop.f32.mrb[9].mxu1 }
 0x2d7   :  { %v1684_v19 = vadd.f32 %v3490_v2, %v1683_v29  ;;  %v2167_v17 = vpop.f32.mrb[8].mxu0 }
 0x2d8   :  { %v1907_v21 = vmul.f32 %v1843_v35, %v1689_v34  ;;  %v1529_v38 = vadd.f32 %v2167_v17, %v3490_v2  ;;  %v1523_v39 = vpop.f32.mrb[9].mxu0  ;;  %v1851_v34 = vld [vmem:[%s3826_s2 + $0x188] sm:$0xff] }
 0x2d9   :  { %v1906_v55 = vmul.f32 %v1842_v51, %v1684_v19  ;;  %v1524_v12 = vadd.f32 %v3490_v2, %v1523_v39  ;;  %v1850_v19 = vld [vmem:[%s3826_s2 + $0x180] sm:$0xff] }
 0x2da   :  { %1971 = vst.msk [vmem:[#allocation3 + $0x148] sm:$0xff] %vm238_vm0, %v1907_v21  ;;  %v1875_v57 = vmul.f32 %v1811_v16, %v1529_v38  ;;  %v1819_v21 = vld [vmem:[%s3826_s2 + $0x88] sm:$0xff] }
 0x2db   :  { %1970 = vst.msk [vmem:[#allocation3 + $0x140] sm:$0xff] %vm238_vm0, %v1906_v55  ;;  %v1874_v56 = vmul.f32 %v1810_v10, %v1524_v12  ;;  %v1818_v55 = vld [vmem:[%s3826_s2 + $0x80] sm:$0xff] }
 0x2dc   :  { %1939 = vst.msk [vmem:[#allocation3 + $0x48] sm:$0xff] %vm238_vm0, %v1875_v57 }
 0x2dd   :  { %1938 = vst.msk [vmem:[#allocation3 + $0x40] sm:$0xff] %vm238_vm0, %v1874_v56  ;;  %v2218_v52 = vpop.f32.mrb[10].mxu1 }
 0x2de   :  { %v1699_v0 = vadd.f32 %v2218_v52, %v3490_v2  ;;  %v1693_v24 = vpop.f32.mrb[11].mxu1 }
 0x2df   :  { %v1694_v26 = vadd.f32 %v3490_v2, %v1693_v24  ;;  %v2170_v18 = vpop.f32.mrb[10].mxu0 }
 0x2e0   :  { %v1909_v28 = vmul.f32 %v1845_v48, %v1699_v0  ;;  %v1539_v61 = vadd.f32 %v2170_v18, %v3490_v2  ;;  %v1533_v53 = vpop.f32.mrb[11].mxu0  ;;  %v1853_v0 = vld [vmem:[%s3826_s2 + $0x198] sm:$0xff] }
 0x2e1   :  { %v1908_v33 = vmul.f32 %v1844_v49, %v1694_v26  ;;  %v1534_v46 = vadd.f32 %v3490_v2, %v1533_v53  ;;  %v1852_v26 = vld [vmem:[%s3826_s2 + $0x190] sm:$0xff] }
 0x2e2   :  { %1973 = vst.msk [vmem:[#allocation3 + $0x158] sm:$0xff] %vm238_vm0, %v1909_v28  ;;  %v1877_v42 = vmul.f32 %v1813_v32, %v1539_v61  ;;  %v1821_v28 = vld [vmem:[%s3826_s2 + $0x98] sm:$0xff] }
 0x2e3   :  { %1972 = vst.msk [vmem:[#allocation3 + $0x150] sm:$0xff] %vm238_vm0, %v1908_v33  ;;  %v1876_v45 = vmul.f32 %v1812_v43, %v1534_v46  ;;  %v1820_v33 = vld [vmem:[%s3826_s2 + $0x90] sm:$0xff] }
 0x2e4   :  { %1941 = vst.msk [vmem:[#allocation3 + $0x58] sm:$0xff] %vm238_vm0, %v1877_v42 }
 0x2e5   :  { %1940 = vst.msk [vmem:[#allocation3 + $0x50] sm:$0xff] %vm238_vm0, %v1876_v45  ;;  %v2221_v15 = vpop.f32.mrb[12].mxu1 }
 0x2e6   :  { %v1709_v5 = vadd.f32 %v2221_v15, %v3490_v2  ;;  %v1703_v47 = vpop.f32.mrb[13].mxu1 }
 0x2e7   :  { %v1704_v41 = vadd.f32 %v3490_v2, %v1703_v47  ;;  %v2173_v20 = vpop.f32.mrb[12].mxu0 }
 0x2e8   :  { %v1911_v8 = vmul.f32 %v1847_v30, %v1709_v5  ;;  %v1549_v58 = vadd.f32 %v2173_v20, %v3490_v2  ;;  %v1543_v37 = vpop.f32.mrb[13].mxu0  ;;  %v1855_v5 = vld [vmem:[%s3826_s2 + $0x1a8] sm:$0xff] }
 0x2e9   :  { %v1910_v7 = vmul.f32 %v1846_v14, %v1704_v41  ;;  %v1544_v27 = vadd.f32 %v3490_v2, %v1543_v37  ;;  %v1854_v41 = vld [vmem:[%s3826_s2 + $0x1a0] sm:$0xff] }
 0x2ea   :  { %1975 = vst.msk [vmem:[#allocation3 + $0x168] sm:$0xff] %vm238_vm0, %v1911_v8  ;;  %v1879_v4 = vmul.f32 %v1815_v54, %v1549_v58  ;;  %v1823_v8 = vld [vmem:[%s3826_s2 + $0xa8] sm:$0xff] }
 0x2eb   :  { %1974 = vst.msk [vmem:[#allocation3 + $0x160] sm:$0xff] %vm238_vm0, %v1910_v7  ;;  %v1878_v59 = vmul.f32 %v1814_v40, %v1544_v27  ;;  %v1822_v7 = vld [vmem:[%s3826_s2 + $0xa0] sm:$0xff] }
 0x2ec   :  { %1943 = vst.msk [vmem:[#allocation3 + $0x68] sm:$0xff] %vm238_vm0, %v1879_v4 }
 0x2ed   :  { %1942 = vst.msk [vmem:[#allocation3 + $0x60] sm:$0xff] %vm238_vm0, %v1878_v59  ;;  %v2224_v22 = vpop.f32.mrb[14].mxu1 }
 0x2ee   :  { %v1719_v44 = vadd.f32 %v2224_v22, %v3490_v2  ;;  %v1713_v9 = vpop.f32.mrb[15].mxu1 }
 0x2ef   :  { %v1714_v60 = vadd.f32 %v3490_v2, %v1713_v9  ;;  %v2176_v25 = vpop.f32.mrb[14].mxu0 }
 0x2f0   :  { %v1913_v3 = vmul.f32 %v1849_v23, %v1719_v44  ;;  %v1559_v31 = vadd.f32 %v2176_v25, %v3490_v2  ;;  %v1553_v1 = vpop.f32.mrb[15].mxu0  ;;  %v1857_v44 = vld [vmem:[%s3826_s2 + $0x1b8] sm:$0xff] }
 0x2f1   :  { %v1912_v13 = vmul.f32 %v1848_v11, %v1714_v60  ;;  %v1554_v63 = vadd.f32 %v3490_v2, %v1553_v1  ;;  %v1856_v60 = vld [vmem:[%s3826_s2 + $0x1b0] sm:$0xff] }
 0x2f2   :  { %1977 = vst.msk [vmem:[#allocation3 + $0x178] sm:$0xff] %vm238_vm0, %v1913_v3  ;;  %v1881_v62 = vmul.f32 %v1817_v50, %v1559_v31  ;;  %v1825_v3 = vld [vmem:[%s3826_s2 + $0xb8] sm:$0xff] }
 0x2f3   :  { %1976 = vst.msk [vmem:[#allocation3 + $0x170] sm:$0xff] %vm238_vm0, %v1912_v13  ;;  %v1880_v36 = vmul.f32 %v1816_v6, %v1554_v63  ;;  %v1824_v13 = vld [vmem:[%s3826_s2 + $0xb0] sm:$0xff] }
 0x2f4   :  { %1945 = vst.msk [vmem:[#allocation3 + $0x78] sm:$0xff] %vm238_vm0, %v1881_v62 }
 0x2f5   :  { %1944 = vst.msk [vmem:[#allocation3 + $0x70] sm:$0xff] %vm238_vm0, %v1880_v36  ;;  %v2227_v35 = vpop.f32.mrb[16].mxu1 }
 0x2f6   :  { %v1729_v29 = vadd.f32 %v2227_v35, %v3490_v2  ;;  %v1723_v51 = vpop.f32.mrb[17].mxu1 }
 0x2f7   :  { %v1724_v17 = vadd.f32 %v3490_v2, %v1723_v51  ;;  %v2179_v16 = vpop.f32.mrb[16].mxu0 }
 0x2f8   :  { %v1915_v38 = vmul.f32 %v1851_v34, %v1729_v29  ;;  %v1569_v39 = vadd.f32 %v2179_v16, %v3490_v2  ;;  %v1563_v10 = vpop.f32.mrb[17].mxu0  ;;  %v1859_v29 = vld [vmem:[%s3826_s2 + $0x1c8] sm:$0xff] }
 0x2f9   :  { %v1914_v12 = vmul.f32 %v1850_v19, %v1724_v17  ;;  %v1564_v57 = vadd.f32 %v3490_v2, %v1563_v10  ;;  %v1858_v17 = vld [vmem:[%s3826_s2 + $0x1c0] sm:$0xff] }
 0x2fa   :  { %1979 = vst.msk [vmem:[#allocation3 + $0x188] sm:$0xff] %vm238_vm0, %v1915_v38  ;;  %v1883_v56 = vmul.f32 %v1819_v21, %v1569_v39  ;;  %v1827_v38 = vld [vmem:[%s3826_s2 + $0xc8] sm:$0xff] }
 0x2fb   :  { %1978 = vst.msk [vmem:[#allocation3 + $0x180] sm:$0xff] %vm238_vm0, %v1914_v12  ;;  %v1882_v52 = vmul.f32 %v1818_v55, %v1564_v57  ;;  %v1826_v12 = vld [vmem:[%s3826_s2 + $0xc0] sm:$0xff] }
 0x2fc   :  { %1947 = vst.msk [vmem:[#allocation3 + $0x88] sm:$0xff] %vm238_vm0, %v1883_v56 }
 0x2fd   :  { %1946 = vst.msk [vmem:[#allocation3 + $0x80] sm:$0xff] %vm238_vm0, %v1882_v52  ;;  %v2230_v48 = vpop.f32.mrb[18].mxu1 }
 0x2fe   :  { %v1739_v24 = vadd.f32 %v2230_v48, %v3490_v2  ;;  %v1733_v49 = vpop.f32.mrb[19].mxu1 }
 0x2ff   :  { %v1734_v18 = vadd.f32 %v3490_v2, %v1733_v49  ;;  %v2182_v32 = vpop.f32.mrb[18].mxu0 }
 0x300   :  { %v1917_v61 = vmul.f32 %v1853_v0, %v1739_v24  ;;  %v1579_v53 = vadd.f32 %v2182_v32, %v3490_v2  ;;  %v1573_v43 = vpop.f32.mrb[19].mxu0  ;;  %v1861_v24 = vld [vmem:[%s3826_s2 + $0x1d8] sm:$0xff] }
 0x301   :  { %v1916_v46 = vmul.f32 %v1852_v26, %v1734_v18  ;;  %v1574_v42 = vadd.f32 %v3490_v2, %v1573_v43  ;;  %v1860_v18 = vld [vmem:[%s3826_s2 + $0x1d0] sm:$0xff] }
 0x302   :  { %1981 = vst.msk [vmem:[#allocation3 + $0x198] sm:$0xff] %vm238_vm0, %v1917_v61  ;;  %v1885_v45 = vmul.f32 %v1821_v28, %v1579_v53  ;;  %v1829_v61 = vld [vmem:[%s3826_s2 + $0xd8] sm:$0xff] }
 0x303   :  { %1980 = vst.msk [vmem:[#allocation3 + $0x190] sm:$0xff] %vm238_vm0, %v1916_v46  ;;  %v1884_v15 = vmul.f32 %v1820_v33, %v1574_v42  ;;  %v1828_v46 = vld [vmem:[%s3826_s2 + $0xd0] sm:$0xff] }
 0x304   :  { %1949 = vst.msk [vmem:[#allocation3 + $0x98] sm:$0xff] %vm238_vm0, %v1885_v45 }
 0x305   :  { %1948 = vst.msk [vmem:[#allocation3 + $0x90] sm:$0xff] %vm238_vm0, %v1884_v15  ;;  %v2233_v30 = vpop.f32.mrb[20].mxu1 }
 0x306   :  { %v1749_v47 = vadd.f32 %v2233_v30, %v3490_v2  ;;  %v1743_v14 = vpop.f32.mrb[21].mxu1 }
 0x307   :  { %v1744_v20 = vadd.f32 %v3490_v2, %v1743_v14  ;;  %v2185_v54 = vpop.f32.mrb[20].mxu0 }
 0x308   :  { %v1919_v58 = vmul.f32 %v1855_v5, %v1749_v47  ;;  %v1589_v37 = vadd.f32 %v2185_v54, %v3490_v2  ;;  %v1583_v40 = vpop.f32.mrb[21].mxu0  ;;  %v1863_v47 = vld [vmem:[%s3826_s2 + $0x1e8] sm:$0xff] }
 0x309   :  { %v1918_v27 = vmul.f32 %v1854_v41, %v1744_v20  ;;  %v1584_v4 = vadd.f32 %v3490_v2, %v1583_v40  ;;  %v1862_v20 = vld [vmem:[%s3826_s2 + $0x1e0] sm:$0xff] }
 0x30a   :  { %1983 = vst.msk [vmem:[#allocation3 + $0x1a8] sm:$0xff] %vm238_vm0, %v1919_v58  ;;  %v1887_v59 = vmul.f32 %v1823_v8, %v1589_v37  ;;  %v1831_v58 = vld [vmem:[%s3826_s2 + $0xe8] sm:$0xff] }
 0x30b   :  { %1982 = vst.msk [vmem:[#allocation3 + $0x1a0] sm:$0xff] %vm238_vm0, %v1918_v27  ;;  %v1886_v22 = vmul.f32 %v1822_v7, %v1584_v4  ;;  %v1830_v27 = vld [vmem:[%s3826_s2 + $0xe0] sm:$0xff] }
 0x30c   :  { %1951 = vst.msk [vmem:[#allocation3 + $0xa8] sm:$0xff] %vm238_vm0, %v1887_v59 }
 0x30d   :  { %1950 = vst.msk [vmem:[#allocation3 + $0xa0] sm:$0xff] %vm238_vm0, %v1886_v22  ;;  %v2236_v23 = vpop.f32.mrb[22].mxu1 }
 0x30e   :  { %v1759_v9 = vadd.f32 %v2236_v23, %v3490_v2  ;;  %v1753_v11 = vpop.f32.mrb[23].mxu1 }
 0x30f   :  { %v1754_v25 = vadd.f32 %v3490_v2, %v1753_v11  ;;  %v2188_v50 = vpop.f32.mrb[22].mxu0 }
 0x310   :  { %v1921_v31 = vmul.f32 %v1857_v44, %v1759_v9  ;;  %v1599_v1 = vadd.f32 %v2188_v50, %v3490_v2  ;;  %v1593_v6 = vpop.f32.mrb[23].mxu0  ;;  %v1865_v9 = vld [vmem:[%s3826_s2 + $0x1f8] sm:$0xff] }
 0x311   :  { %v1920_v63 = vmul.f32 %v1856_v60, %v1754_v25  ;;  %v1594_v62 = vadd.f32 %v3490_v2, %v1593_v6  ;;  %v1864_v25 = vld [vmem:[%s3826_s2 + $0x1f0] sm:$0xff] }
 0x312   :  { %1985 = vst.msk [vmem:[#allocation3 + $0x1b8] sm:$0xff] %vm238_vm0, %v1921_v31  ;;  %v1889_v36 = vmul.f32 %v1825_v3, %v1599_v1  ;;  %v1833_v31 = vld [vmem:[%s3826_s2 + $0xf8] sm:$0xff] }
 0x313   :  { %1984 = vst.msk [vmem:[#allocation3 + $0x1b0] sm:$0xff] %vm238_vm0, %v1920_v63  ;;  %v1888_v35 = vmul.f32 %v1824_v13, %v1594_v62  ;;  %v1832_v63 = vld [vmem:[%s3826_s2 + $0xf0] sm:$0xff] }
 0x314   :  { %1953 = vst.msk [vmem:[#allocation3 + $0xb8] sm:$0xff] %vm238_vm0, %v1889_v36 }
 0x315   :  { %1952 = vst.msk [vmem:[#allocation3 + $0xb0] sm:$0xff] %vm238_vm0, %v1888_v35  ;;  %v2239_v34 = vpop.f32.mrb[24].mxu1 }
 0x316   :  { %v1769_v51 = vadd.f32 %v2239_v34, %v3490_v2  ;;  %v1763_v19 = vpop.f32.mrb[25].mxu1 }
 0x317   :  { %v1764_v16 = vadd.f32 %v3490_v2, %v1763_v19  ;;  %v2191_v21 = vpop.f32.mrb[24].mxu0 }
 0x318   :  { %v1923_v39 = vmul.f32 %v1859_v29, %v1769_v51  ;;  %v1609_v10 = vadd.f32 %v2191_v21, %v3490_v2  ;;  %v1603_v55 = vpop.f32.mrb[25].mxu0 }
 0x319   :  { %v1922_v57 = vmul.f32 %v1858_v17, %v1764_v16  ;;  %v1604_v56 = vadd.f32 %v3490_v2, %v1603_v55 }
 0x31a   :  { %1987 = vst.msk [vmem:[#allocation3 + $0x1c8] sm:$0xff] %vm238_vm0, %v1923_v39  ;;  %v1891_v52 = vmul.f32 %v1827_v38, %v1609_v10 }
 0x31b   :  { %1986 = vst.msk [vmem:[#allocation3 + $0x1c0] sm:$0xff] %vm238_vm0, %v1922_v57  ;;  %v1890_v48 = vmul.f32 %v1826_v12, %v1604_v56 }
 0x31c   :  { %1955 = vst.msk [vmem:[#allocation3 + $0xc8] sm:$0xff] %vm238_vm0, %v1891_v52 }
 0x31d   :  { %1954 = vst.msk [vmem:[#allocation3 + $0xc0] sm:$0xff] %vm238_vm0, %v1890_v48  ;;  %v2242_v0 = vpop.f32.mrb[26].mxu1 }
 0x31e   :  { %v1779_v49 = vadd.f32 %v2242_v0, %v3490_v2  ;;  %v1773_v26 = vpop.f32.mrb[27].mxu1 }
 0x31f   :  { %v1774_v32 = vadd.f32 %v3490_v2, %v1773_v26  ;;  %v2194_v28 = vpop.f32.mrb[26].mxu0 }
 0x320   :  { %v1925_v53 = vmul.f32 %v1861_v24, %v1779_v49  ;;  %v1619_v43 = vadd.f32 %v2194_v28, %v3490_v2  ;;  %v1613_v33 = vpop.f32.mrb[27].mxu0 }
 0x321   :  { %v1924_v42 = vmul.f32 %v1860_v18, %v1774_v32  ;;  %v1614_v45 = vadd.f32 %v3490_v2, %v1613_v33 }
 0x322   :  { %1989 = vst.msk [vmem:[#allocation3 + $0x1d8] sm:$0xff] %vm238_vm0, %v1925_v53  ;;  %v1893_v15 = vmul.f32 %v1829_v61, %v1619_v43 }
 0x323   :  { %1988 = vst.msk [vmem:[#allocation3 + $0x1d0] sm:$0xff] %vm238_vm0, %v1924_v42  ;;  %v1892_v30 = vmul.f32 %v1828_v46, %v1614_v45 }
 0x324   :  { %1957 = vst.msk [vmem:[#allocation3 + $0xd8] sm:$0xff] %vm238_vm0, %v1893_v15 }
 0x325   :  { %1956 = vst.msk [vmem:[#allocation3 + $0xd0] sm:$0xff] %vm238_vm0, %v1892_v30  ;;  %v2245_v5 = vpop.f32.mrb[28].mxu1 }
 0x326   :  { %v1789_v14 = vadd.f32 %v2245_v5, %v3490_v2  ;;  %v1783_v41 = vpop.f32.mrb[29].mxu1 }
 0x327   :  { %v1784_v54 = vadd.f32 %v3490_v2, %v1783_v41  ;;  %v2197_v8 = vpop.f32.mrb[28].mxu0 }
 0x328   :  { %v1927_v37 = vmul.f32 %v1863_v47, %v1789_v14  ;;  %v1629_v40 = vadd.f32 %v2197_v8, %v3490_v2  ;;  %v1623_v7 = vpop.f32.mrb[29].mxu0 }
 0x329   :  { %v1926_v4 = vmul.f32 %v1862_v20, %v1784_v54  ;;  %v1624_v59 = vadd.f32 %v3490_v2, %v1623_v7 }
 0x32a   :  { %1991 = vst.msk [vmem:[#allocation3 + $0x1e8] sm:$0xff] %vm238_vm0, %v1927_v37  ;;  %v1895_v22 = vmul.f32 %v1831_v58, %v1629_v40 }
 0x32b   :  { %1990 = vst.msk [vmem:[#allocation3 + $0x1e0] sm:$0xff] %vm238_vm0, %v1926_v4  ;;  %v1894_v23 = vmul.f32 %v1830_v27, %v1624_v59 }
 0x32c   :  { %1959 = vst.msk [vmem:[#allocation3 + $0xe8] sm:$0xff] %vm238_vm0, %v1895_v22 }
 0x32d   :  { %1958 = vst.msk [vmem:[#allocation3 + $0xe0] sm:$0xff] %vm238_vm0, %v1894_v23  ;;  %v2248_v44 = vpop.f32.mrb[30].mxu1 }
 0x32e   :  { %v1799_v11 = vadd.f32 %v2248_v44, %v3490_v2  ;;  %v1793_v60 = vpop.f32.mrb[31].mxu1 }
 0x32f   :  { %v1794_v50 = vadd.f32 %v3490_v2, %v1793_v60  ;;  %v2200_v3 = vpop.f32.mrb[30].mxu0 }
 0x330   :  { %v1929_v1 = vmul.f32 %v1865_v9, %v1799_v11  ;;  %v1639_v6 = vadd.f32 %v2200_v3, %v3490_v2  ;;  %v1633_v13 = vpop.f32.mrb[31].mxu0 }
 0x331   :  { %v1928_v62 = vmul.f32 %v1864_v25, %v1794_v50  ;;  %v1634_v36 = vadd.f32 %v3490_v2, %v1633_v13 }
 0x332   :  { %1993 = vst.msk [vmem:[#allocation3 + $0x1f8] sm:$0xff] %vm238_vm0, %v1929_v1  ;;  %v1897_v35 = vmul.f32 %v1833_v31, %v1639_v6 }
 0x333   :  { %1992 = vst.msk [vmem:[#allocation3 + $0x1f0] sm:$0xff] %vm238_vm0, %v1928_v62  ;;  %v1896_v34 = vmul.f32 %v1832_v63, %v1634_v36 }
 0x334   :  { %1961 = vst.msk [vmem:[#allocation3 + $0xf8] sm:$0xff] %vm238_vm0, %v1897_v35 }
 0x335   :  { %1960 = vst.msk [vmem:[#allocation3 + $0xf0] sm:$0xff] %vm238_vm0, %v1896_v34 }
 0x336   :  { %2406 = shalt.err (!%p2403_p4)
}
 0x337   :  { %s2407_s15 = scalar_lea.hbm %s3831_s7, 8192 }
 0x338   :  { %p2408_p5 = scmp.ne.s32.totalorder %s3831_s7, %s2407_s15  ;;  %p2411_p6 = scmp.lt.u32.totalorder %s2407_s15, %s3831_s7 }
 0x33a   :  { %p2413_p7 = pnand %p2411_p6, %p2408_p5 }
 0x33c   :  { %2416 = shalt.err (!%p2413_p7)
}
 0x33d   :  { %s2420_s19 = smov 128   ;;  %s2421_s20 = smov 8  }
 0x33e   :  { %2005 = dma.vmem_to_hbm [thread:$0]  %s2000_s0, 8192, %s3831_s7, [#allocation4], %s2420_s19, %s2420_s19, %s2421_s20  }
 0x33f   :  { %2417 = dma.done.wait [#allocation4], 8192  }
 0x340   :  { %2418 = vsyncadd [#allocation4], 4294959104 }
 0x341   :  { %2009 = vsyncpa [#allocation4], 1 }

</bundles_post_ra>
